<compile_context>
chip_gen: v6e
topology: v6e:2x2x1
jax: 0.10.0
libtpu: 0.0.40
codegen_flags: <defaults>
</compile_context>

<pallas_src>
import functools

import jax
import jax.numpy as jnp
from jax.experimental import pallas as pl
from jax.experimental.pallas import tpu as pltpu


def _round_up(n, m):
    return ((n + m - 1) // m) * m


def _pick_vmem_limit(wanted_bytes):
    """Clamp the requested scoped-VMEM budget to this chip's capacity."""
    try:
        cap = int(getattr(pltpu.get_tpu_info(), "vmem_capacity_bytes",
                          64 * 1024 * 1024))
    except Exception:
        cap = 64 * 1024 * 1024  # conservative (v7x-sized) fallback
    ceiling = max(16 * 1024 * 1024, int(cap * 0.85))
    return int(min(max(wanted_bytes, 16 * 1024 * 1024), ceiling))


# ----------------------------- fused forward kernel --------------------------

def _fused_rnn_kernel(*refs, T, Bb, H, num_layers):
    """3-layer LSTM + MLP head for one batch block; intermediates live in VMEM.

    Ref layout (per batch block, padded sizes):
      refs[0]                      g0      (T, Bb, 4H)  layer-0 gates (x-proj + bias)
      refs[1]                      w_hh0^T (H, 4H)
      refs[2 .. 2+3*(L-1))         (w_ih^T, w_hh^T, bias) for layers 1..L-1
      next 4                       fc1_w^T (H,H), fc1_b (1,H), fc2_w^T (H,O), fc2_b (1,O)
      next                         out     (Bb, O)
      scratch                      gbuf (T*Bb, 4H) f32, hseq (T*Bb, H) f32
    """
    g0_ref = refs[0]
    whh0_ref = refs[1]
    rest = refs[2:2 + 3 * (num_layers - 1)]
    idx = 2 + 3 * (num_layers - 1)
    fc1w_ref, fc1b_ref, fc2w_ref, fc2b_ref = refs[idx:idx + 4]
    o_ref = refs[idx + 4]
    gbuf_ref, hseq_ref = refs[idx + 5], refs[idx + 6]

    def lstm_scan(gate_at, whh_ref, write_seq):
        """Serial recurrence over T steps; precomputed gates come from gate_at(t)."""

        def step(t, carry):
            h_prev, c_prev = carry
            # NOTE: W_hh is deliberately NOT hoisted out of the loop; reading it
            # here keeps its live range inside one matmul (no vreg spills on the
            # serial critical path).
            gates = gate_at(t).astype(jnp.float32) + jnp.dot(
                h_prev.astype(whh_ref.dtype), whh_ref[...],
                preferred_element_type=jnp.float32)
            # H is a multiple of 128 => every gate slice is lane-aligned.
            i_g = jax.nn.sigmoid(gates[:, 0 * H:1 * H])
            f_g = jax.nn.sigmoid(gates[:, 1 * H:2 * H])
            g_g = jnp.tanh(gates[:, 2 * H:3 * H])
            o_g = jax.nn.sigmoid(gates[:, 3 * H:4 * H])
            c_new = f_g * c_prev + i_g * g_g
            h_new = o_g * jnp.tanh(c_new)
            if write_seq:  # the last layer only needs its final-step h
                row = pl.multiple_of(t * Bb, Bb)
                hseq_ref[pl.ds(row, Bb), :] = h_new.astype(hseq_ref.dtype)
            return h_new, c_new

        zeros = jnp.zeros((Bb, H), jnp.float32)
        h_last, _ = jax.lax.fori_loop(0, T, step, (zeros, zeros),
                                      unroll=int(min(T, 8)))
        return h_last

    # ---- layer 0: gates precomputed outside the kernel (XLA GEMM). ----
    h_last = lstm_scan(lambda t: g0_ref[t], whh0_ref,
                       write_seq=(num_layers > 1))

    # ---- layers 1..L-1: hoisted input projection + serial recurrence. ----
    for l in range(1, num_layers):
        wih_ref, whh_ref, b_ref = rest[3 * (l - 1):3 * (l - 1) + 3]
        # One (T*Bb, H) x (H, 4H) MXU matmul for all timesteps of this layer.
        # NOTE: for very long T on v7x (64 MiB VMEM) this should be chunked
        # over time so gbuf is (Tc*Bb, 4H); not needed at these sizes.
        proj = jnp.dot(hseq_ref[...].astype(wih_ref.dtype), wih_ref[...],
                       preferred_element_type=jnp.float32) + b_ref[...]
        gbuf_ref[...] = proj.astype(gbuf_ref.dtype)

        def gate_at(t):
            row = pl.multiple_of(t * Bb, Bb)
            return gbuf_ref[pl.ds(row, Bb), :]

        h_last = lstm_scan(gate_at, whh_ref,
                           write_seq=(l != num_layers - 1))

    # ---- head: fc1 (Linear + SELU [+ Dropout = identity]) then fc2. ----
    w_dt = fc1w_ref.dtype
    z1 = jnp.dot(h_last.astype(w_dt), fc1w_ref[...],
                 preferred_element_type=jnp.float32) + fc1b_ref[...]
    alpha = 1.6732632423543772
    scale = 1.0507009873554805
    a1 = scale * jnp.where(z1 > 0, z1, alpha * (jnp.exp(z1) - 1.0))
    out = jnp.dot(a1.astype(w_dt), fc2w_ref[...],
                  preferred_element_type=jnp.float32) + fc2b_ref[...]
    o_ref[...] = out.astype(o_ref.dtype)


# ------------------------------ parameter handling ----------------------------

def init_params(key, num_variables, hidden_size, output_length, num_layers=3):
    """PyTorch-convention shapes, uniform(-1/sqrt(H), 1/sqrt(H)) init."""
    H = hidden_size
    k = 1.0 / jnp.sqrt(jnp.float32(H))
    params = {"lstm": []}
    for layer in range(num_layers):
        d_in = num_variables if layer == 0 else H
        key, k1, k2, k3, k4 = jax.random.split(key, 5)
        params["lstm"].append({
            "w_ih": jax.random.uniform(k1, (4 * H, d_in), jnp.float32, -k, k),
            "w_hh": jax.random.uniform(k2, (4 * H, H), jnp.float32, -k, k),
            "b_ih": jax.random.uniform(k3, (4 * H,), jnp.float32, -k, k),
            "b_hh": jax.random.uniform(k4, (4 * H,), jnp.float32, -k, k),
        })
    out_dim = output_length * num_variables
    key, k1, k2, k3, k4 = jax.random.split(key, 5)
    params["fc1_w"] = jax.random.uniform(k1, (H, H), jnp.float32, -k, k)
    params["fc1_b"] = jax.random.uniform(k2, (H,), jnp.float32, -k, k)
    params["fc2_w"] = jax.random.uniform(k3, (out_dim, H), jnp.float32, -k, k)
    params["fc2_b"] = jax.random.uniform(k4, (out_dim,), jnp.float32, -k, k)
    return params


def _pack_gate_weight_t(w, d_in_pad, h_pad):
    """(4H, d_in) gate-stacked PyTorch weight -> (d_in_pad, 4*h_pad), transposed,
    each gate block zero-padded to h_pad lanes."""
    four_h, d_in = w.shape
    h = four_h // 4
    w4 = w.reshape(4, h, d_in)
    w4 = jnp.pad(w4, ((0, 0), (0, h_pad - h), (0, d_in_pad - d_in)))
    return jnp.transpose(w4, (2, 0, 1)).reshape(d_in_pad, 4 * h_pad)


def _pack_gate_bias(b_ih, b_hh, h_pad):
    h = b_ih.shape[0] // 4
    b = (b_ih + b_hh).reshape(4, h)
    b = jnp.pad(b, ((0, 0), (0, h_pad - h)))
    return b.reshape(1, 4 * h_pad)


def _pad2d(a, rows, cols):
    return jnp.pad(a, ((0, rows - a.shape[0]), (0, cols - a.shape[1])))


def pack_params(params, dtype=jnp.float32):
    """Transpose + zero-pad PyTorch-layout params into the kernel layout.

    `dtype` controls storage of the large weight matrices (and, downstream, the
    streamed layer-0 gate tensor).  Matmuls accumulate in f32 and all gate/cell
    elementwise math stays f32, so bf16 here is the v6e/v7x memory/bandwidth
    lever without a v5e VPU/EUP penalty.  Biases stay f32.
    """
    H = params["lstm"][0]["w_hh"].shape[1]
    Hp = _round_up(H, 128)
    out_dim = params["fc2_w"].shape[0]
    Op = _round_up(out_dim, 128)
    packed = {"lstm": []}
    for i, lp in enumerate(params["lstm"]):
        d_in = lp["w_ih"].shape[1]
        if i == 0:
            # Layer-0 x-projection runs OUTSIDE the kernel (XLA GEMM) in f32.
            w_ih_t = _pack_gate_weight_t(lp["w_ih"], d_in, Hp)
        else:
            w_ih_t = _pack_gate_weight_t(lp["w_ih"], Hp, Hp).astype(dtype)
        packed["lstm"].append({
            "w_ih_t": w_ih_t,
            "w_hh_t": _pack_gate_weight_t(lp["w_hh"], Hp, Hp).astype(dtype),
            "bias": _pack_gate_bias(lp["b_ih"], lp["b_hh"], Hp),   # f32
        })
    packed["fc1_w_t"] = _pad2d(params["fc1_w"].T, Hp, Hp).astype(dtype)
    packed["fc1_b"] = _pad2d(params["fc1_b"][None, :], 1, Hp)
    packed["fc2_w_t"] = _pad2d(params["fc2_w"].T, Hp, Op).astype(dtype)
    packed["fc2_b"] = _pad2d(params["fc2_b"][None, :], 1, Op)
    return packed


# ------------------------------- model wrapper --------------------------------

@functools.partial(jax.jit,
                   static_argnames=("output_length", "num_variables",
                                    "batch_block"))
def rnn_model_forward(packed, x, *, output_length, num_variables,
                      batch_block=128):
    """x: (B, T, num_variables) -> (B, output_length, num_variables)."""
    B, T, V = x.shape
    num_layers = len(packed["lstm"])
    Hp = packed["lstm"][0]["w_hh_t"].shape[0]
    Op = packed["fc2_w_t"].shape[1]
    store_dtype = packed["lstm"][0]["w_hh_t"].dtype
    s_bytes = jnp.dtype(store_dtype).itemsize

    # Batch block: multiple of 8 (f32 sublanes).  The grid over blocks lets
    # v7x megacore split independent batch rows across its two TensorCores.
    Bb = _round_up(min(max(B, 8), batch_block), 8)
    Bp = _round_up(max(B, 8), Bb)
    num_blocks = Bp // Bb

    # Layer-0 input projection as a plain XLA GEMM (outside the kernel): avoids
    # keeping the lane-inflated (last dim = V) x in VMEM and removes a K=V
    # MXU-hostile matmul from the kernel.
    lstm0 = packed["lstm"][0]
    xt = jnp.transpose(x.astype(jnp.float32), (1, 0, 2))           # (T, B, V)
    xt = jnp.pad(xt, ((0, 0), (0, Bp - B), (0, 0)))                # (T, Bp, V)
    g0 = jnp.einsum("tbv,vg->tbg", xt, lstm0["w_ih_t"],
                    preferred_element_type=jnp.float32) + lstm0["bias"]
    g0 = g0.astype(store_dtype)                                    # (T, Bp, 4Hp)
    # NOTE: padded batch rows pick up the broadcast bias and carry nonzero
    # values through the recurrence; harmless because every op in the kernel is
    # row-independent and those rows are sliced off below.

    weight_args = [lstm0["w_hh_t"]]
    for lp in packed["lstm"][1:]:
        weight_args += [lp["w_ih_t"], lp["w_hh_t"], lp["bias"]]
    weight_args += [packed["fc1_w_t"], packed["fc1_b"],
                    packed["fc2_w_t"], packed["fc2_b"]]

    def _full(a):
        nd = a.ndim
        return pl.BlockSpec(a.shape, lambda b: (0,) * nd)

    in_specs = ([pl.BlockSpec((T, Bb, 4 * Hp), lambda b: (0, b, 0))]
                + [_full(a) for a in weight_args])
    out_spec = pl.BlockSpec((Bb, Op), lambda b: (b, 0))

    # Scratch stays f32 so the per-step 8-row dynamic stores are always
    # (8,128)-tile aligned regardless of the weight storage dtype.
    scratch_shapes = [
        pltpu.VMEM((T * Bb, 4 * Hp), jnp.float32),   # per-layer gate buffer
        pltpu.VMEM((T * Bb, Hp), jnp.float32),       # previous layer hidden seq
    ]

    # Explicit VMEM budget: double-buffered input block + weights + output
    # block + scratch, clamped to this generation's per-core capacity.
    weight_bytes = sum(int(a.size) * a.dtype.itemsize for a in weight_args)
    wanted = (2 * T * Bb * 4 * Hp * s_bytes          # g0 block (pipeline bufs)
              + 2 * weight_bytes
              + 2 * Bb * Op * 4                      # output block
              + T * Bb * 4 * Hp * 4                  # gbuf scratch
              + T * Bb * Hp * 4                      # hseq scratch
              + (2 << 20))                           # headroom
    vmem_limit = _pick_vmem_limit(wanted)

    kernel = functools.partial(_fused_rnn_kernel, T=T, Bb=Bb, H=Hp,
                               num_layers=num_layers)
    out_padded = pl.pallas_call(
        kernel,
        out_shape=jax.ShapeDtypeStruct((Bp, Op), jnp.float32),
        grid=(num_blocks,),
        in_specs=in_specs,
        out_specs=out_spec,
        scratch_shapes=scratch_shapes,
        compiler_params=pltpu.CompilerParams(
            dimension_semantics=("parallel",),
            vmem_limit_bytes=vmem_limit),
    )(g0, *weight_args)

    out_dim = output_length * num_variables
    return out_padded[:B, :out_dim].reshape(B, output_length, num_variables)


# ------------------------------ pure-JAX reference -----------------------------

def _reference_forward(params, x, output_length, num_variables):
    B = x.shape[0]
    h_seq = x
    for lp in params["lstm"]:
        H = lp["w_hh"].shape[1]

        def step(carry, x_t, lp=lp):
            h, c = carry
            gates = (x_t @ lp["w_ih"].T + h @ lp["w_hh"].T
                     + lp["b_ih"] + lp["b_hh"])
            i, f, g, o = jnp.split(gates, 4, axis=-1)
            i = jax.nn.sigmoid(i); f = jax.nn.sigmoid(f)
            g = jnp.tanh(g); o = jax.nn.sigmoid(o)
            c = f * c + i * g
            h = o * jnp.tanh(c)
            return (h, c), h

        h0 = jnp.zeros((B, H), jnp.float32)
        (_, _), hs = jax.lax.scan(step, (h0, h0), jnp.transpose(h_seq, (1, 0, 2)))
        h_seq = jnp.transpose(hs, (1, 0, 2))
    h_last = h_seq[:, -1, :]
    z1 = h_last @ params["fc1_w"].T + params["fc1_b"]
    a1 = 1.0507009873554805 * jnp.where(
        z1 > 0, z1, 1.6732632423543772 * (jnp.exp(z1) - 1.0))
    out = a1 @ params["fc2_w"].T + params["fc2_b"]
    return out.reshape(B, output_length, num_variables)


if __name__ == "__main__":
    # Small shapes consistent with the module's forward.
    B, T = 2, 8                 # batch, input_length (sequence length)
    NV, H, OL = 4, 32, 5        # num_variables, hidden_size, output_length

    key = jax.random.PRNGKey(0)
    pkey, xkey = jax.random.split(key)
    raw_params = init_params(pkey, NV, H, OL, num_layers=3)
    x = jax.random.normal(xkey, (B, T, NV), jnp.float32)

    ref = _reference_forward(raw_params, x, OL, NV)

    # f32 storage path: tight check against the pure-JAX reference.
    packed_f32 = pack_params(raw_params, dtype=jnp.float32)
    out = rnn_model_forward(packed_f32, x, output_length=OL, num_variables=NV)
    out = jax.block_until_ready(out)
    assert out.shape == (B, OL, NV), out.shape
    err = float(jnp.max(jnp.abs(out - ref)))
    assert err < 1e-4, ("f32 max abs err", err)

    # bf16 weight/gate storage path (v6e/v7x memory lever): loose check.
    packed_bf16 = pack_params(raw_params, dtype=jnp.bfloat16)
    out_bf16 = jax.block_until_ready(
        rnn_model_forward(packed_bf16, x, output_length=OL, num_variables=NV))
    assert out_bf16.shape == (B, OL, NV), out_bf16.shape
    err_bf16 = float(jnp.max(jnp.abs(out_bf16 - ref)))
    assert err_bf16 < 0.15, ("bf16 max abs err", err_bf16)

    print("KERNEL_OK")
</pallas_src>

<mosaic_0001>
module attributes {stable_mosaic.version = 11 : i64} {
  func.func @_fused_rnn_kernel(%arg0: i32, %arg1: memref<8x8x512xf32, #tpu.memory_space<vmem>>, %arg2: memref<128x512xf32, #tpu.memory_space<vmem>>, %arg3: memref<128x512xf32, #tpu.memory_space<vmem>>, %arg4: memref<128x512xf32, #tpu.memory_space<vmem>>, %arg5: memref<1x512xf32, #tpu.memory_space<vmem>>, %arg6: memref<128x512xf32, #tpu.memory_space<vmem>>, %arg7: memref<128x512xf32, #tpu.memory_space<vmem>>, %arg8: memref<1x512xf32, #tpu.memory_space<vmem>>, %arg9: memref<128x128xf32, #tpu.memory_space<vmem>>, %arg10: memref<1x128xf32, #tpu.memory_space<vmem>>, %arg11: memref<128x128xf32, #tpu.memory_space<vmem>>, %arg12: memref<1x128xf32, #tpu.memory_space<vmem>>, %arg13: memref<8x128xf32, #tpu.memory_space<vmem>>, %arg14: memref<64x512xf32, #tpu.memory_space<vmem>>, %arg15: memref<64x128xf32, #tpu.memory_space<vmem>>) attributes {dimension_semantics = [#tpu.dimension_semantics<parallel>], iteration_bounds = array<i64: 1>, scalar_prefetch = 0 : i64, scratch_operands = 2 : i64, tpu.core_type = #tpu.core_type<tc>, window_params = [{transform_indices = @transform_0, window_bounds = array<i64: 8, 8, 512>}, {pipeline_mode = #tpu.pipeline_mode<synchronous>, transform_indices = @transform_1, window_bounds = array<i64: 128, 512>}, {pipeline_mode = #tpu.pipeline_mode<synchronous>, transform_indices = @transform_2, window_bounds = array<i64: 128, 512>}, {pipeline_mode = #tpu.pipeline_mode<synchronous>, transform_indices = @transform_3, window_bounds = array<i64: 128, 512>}, {pipeline_mode = #tpu.pipeline_mode<synchronous>, transform_indices = @transform_4, window_bounds = array<i64: 1, 512>}, {pipeline_mode = #tpu.pipeline_mode<synchronous>, transform_indices = @transform_5, window_bounds = array<i64: 128, 512>}, {pipeline_mode = #tpu.pipeline_mode<synchronous>, transform_indices = @transform_6, window_bounds = array<i64: 128, 512>}, {pipeline_mode = #tpu.pipeline_mode<synchronous>, transform_indices = @transform_7, window_bounds = array<i64: 1, 512>}, {pipeline_mode = #tpu.pipeline_mode<synchronous>, transform_indices = @transform_8, window_bounds = array<i64: 128, 128>}, {pipeline_mode = #tpu.pipeline_mode<synchronous>, transform_indices = @transform_9, window_bounds = array<i64: 1, 128>}, {pipeline_mode = #tpu.pipeline_mode<synchronous>, transform_indices = @transform_10, window_bounds = array<i64: 128, 128>}, {pipeline_mode = #tpu.pipeline_mode<synchronous>, transform_indices = @transform_11, window_bounds = array<i64: 1, 128>}, {transform_indices = @transform_12, window_bounds = array<i64: 8, 128>}]} {
    %cst = arith.constant 0.000000e+00 : f32
    %0 = vector.broadcast %cst : f32 to vector<8x128xf32>
    %c0_i32 = arith.constant 0 : i32
    %1 = arith.index_cast %c0_i32 : i32 to index
    %c0 = arith.constant 0 : index
    %c0_0 = arith.constant 0 : index
    %2 = vector.load %arg1[%1, %c0, %c0_0] : memref<8x8x512xf32, #tpu.memory_space<vmem>>, vector<1x8x512xf32>
    %3 = vector.shape_cast %2 : vector<1x8x512xf32> to vector<8x512xf32>
    %c0_1 = arith.constant 0 : index
    %c0_2 = arith.constant 0 : index
    %4 = vector.load %arg2[%c0_1, %c0_2] : memref<128x512xf32, #tpu.memory_space<vmem>>, vector<128x512xf32>
    %cst_3 = arith.constant dense<0.000000e+00> : vector<8x512xf32>
    %5 = tpu.matmul %0, %4, %cst_3 {dimension_numbers = #tpu.dot_dimension_numbers<[1], [0], [0], [1], [0, 0, 1, 1], [], []>} : vector<8x128xf32>, vector<128x512xf32>, vector<8x512xf32> -> vector<8x512xf32>
    %6 = arith.addf %3, %5 : vector<8x512xf32>
    %7 = vector.extract_strided_slice %6 {offsets = [0, 0], sizes = [8, 128], strides = [1, 1]} : vector<8x512xf32> to vector<8x128xf32>
    %8 = arith.negf %7 : vector<8x128xf32>
    %9 = math.exp %8 : vector<8x128xf32>
    %cst_4 = arith.constant 1.000000e+00 : f32
    %10 = vector.broadcast %cst_4 : f32 to vector<8x128xf32>
    %11 = arith.addf %10, %9 : vector<8x128xf32>
    %12 = arith.divf %10, %11 : vector<8x128xf32>
    %13 = vector.extract_strided_slice %6 {offsets = [0, 128], sizes = [8, 128], strides = [1, 1]} : vector<8x512xf32> to vector<8x128xf32>
    %14 = arith.negf %13 : vector<8x128xf32>
    %15 = math.exp %14 : vector<8x128xf32>
    %cst_5 = arith.constant 1.000000e+00 : f32
    %16 = vector.broadcast %cst_5 : f32 to vector<8x128xf32>
    %17 = arith.addf %16, %15 : vector<8x128xf32>
    %18 = arith.divf %16, %17 : vector<8x128xf32>
    %19 = vector.extract_strided_slice %6 {offsets = [0, 256], sizes = [8, 128], strides = [1, 1]} : vector<8x512xf32> to vector<8x128xf32>
    %20 = math.tanh %19 : vector<8x128xf32>
    %21 = vector.extract_strided_slice %6 {offsets = [0, 384], sizes = [8, 128], strides = [1, 1]} : vector<8x512xf32> to vector<8x128xf32>
    %22 = arith.negf %21 : vector<8x128xf32>
    %23 = math.exp %22 : vector<8x128xf32>
    %cst_6 = arith.constant 1.000000e+00 : f32
    %24 = vector.broadcast %cst_6 : f32 to vector<8x128xf32>
    %25 = arith.addf %24, %23 : vector<8x128xf32>
    %26 = arith.divf %24, %25 : vector<8x128xf32>
    %27 = arith.mulf %18, %0 : vector<8x128xf32>
    %28 = arith.mulf %12, %20 : vector<8x128xf32>
    %29 = arith.addf %27, %28 : vector<8x128xf32>
    %30 = math.tanh %29 : vector<8x128xf32>
    %31 = arith.mulf %26, %30 : vector<8x128xf32>
    %c8_i32 = arith.constant 8 : i32
    %32 = arith.muli %c0_i32, %c8_i32 : i32
    %33 = tpu.assume_multiple %32, 8 : i32
    %34 = arith.index_cast %33 : i32 to index
    %c0_7 = arith.constant 0 : index
    %35 = vector.load %arg15[%34, %c0_7] : memref<64x128xf32, #tpu.memory_space<vmem>>, vector<8x128xf32>
    tpu.vector_store %arg15[%34, %c0_7], %31 {strides = array<i32>} : memref<64x128xf32, #tpu.memory_space<vmem>>, vector<8x128xf32>,
    %c1_i32 = arith.constant 1 : i32
    %36 = arith.index_cast %c1_i32 : i32 to index
    %c0_8 = arith.constant 0 : index
    %c0_9 = arith.constant 0 : index
    %37 = vector.load %arg1[%36, %c0_8, %c0_9] : memref<8x8x512xf32, #tpu.memory_space<vmem>>, vector<1x8x512xf32>
    %38 = vector.shape_cast %37 : vector<1x8x512xf32> to vector<8x512xf32>
    %c0_10 = arith.constant 0 : index
    %c0_11 = arith.constant 0 : index
    %39 = vector.load %arg2[%c0_10, %c0_11] : memref<128x512xf32, #tpu.memory_space<vmem>>, vector<128x512xf32>
    %cst_12 = arith.constant dense<0.000000e+00> : vector<8x512xf32>
    %40 = tpu.matmul %31, %39, %cst_12 {dimension_numbers = #tpu.dot_dimension_numbers<[1], [0], [0], [1], [0, 0, 1, 1], [], []>} : vector<8x128xf32>, vector<128x512xf32>, vector<8x512xf32> -> vector<8x512xf32>
    %41 = arith.addf %38, %40 : vector<8x512xf32>
    %42 = vector.extract_strided_slice %41 {offsets = [0, 0], sizes = [8, 128], strides = [1, 1]} : vector<8x512xf32> to vector<8x128xf32>
    %43 = arith.negf %42 : vector<8x128xf32>
    %44 = math.exp %43 : vector<8x128xf32>
    %cst_13 = arith.constant 1.000000e+00 : f32
    %45 = vector.broadcast %cst_13 : f32 to vector<8x128xf32>
    %46 = arith.addf %45, %44 : vector<8x128xf32>
    %47 = arith.divf %45, %46 : vector<8x128xf32>
    %48 = vector.extract_strided_slice %41 {offsets = [0, 128], sizes = [8, 128], strides = [1, 1]} : vector<8x512xf32> to vector<8x128xf32>
    %49 = arith.negf %48 : vector<8x128xf32>
    %50 = math.exp %49 : vector<8x128xf32>
    %cst_14 = arith.constant 1.000000e+00 : f32
    %51 = vector.broadcast %cst_14 : f32 to vector<8x128xf32>
    %52 = arith.addf %51, %50 : vector<8x128xf32>
    %53 = arith.divf %51, %52 : vector<8x128xf32>
    %54 = vector.extract_strided_slice %41 {offsets = [0, 256], sizes = [8, 128], strides = [1, 1]} : vector<8x512xf32> to vector<8x128xf32>
    %55 = math.tanh %54 : vector<8x128xf32>
    %56 = vector.extract_strided_slice %41 {offsets = [0, 384], sizes = [8, 128], strides = [1, 1]} : vector<8x512xf32> to vector<8x128xf32>
    %57 = arith.negf %56 : vector<8x128xf32>
    %58 = math.exp %57 : vector<8x128xf32>
    %cst_15 = arith.constant 1.000000e+00 : f32
    %59 = vector.broadcast %cst_15 : f32 to vector<8x128xf32>
    %60 = arith.addf %59, %58 : vector<8x128xf32>
    %61 = arith.divf %59, %60 : vector<8x128xf32>
    %62 = arith.mulf %53, %29 : vector<8x128xf32>
    %63 = arith.mulf %47, %55 : vector<8x128xf32>
    %64 = arith.addf %62, %63 : vector<8x128xf32>
    %65 = math.tanh %64 : vector<8x128xf32>
    %66 = arith.mulf %61, %65 : vector<8x128xf32>
    %c8_i32_16 = arith.constant 8 : i32
    %67 = arith.muli %c1_i32, %c8_i32_16 : i32
    %68 = tpu.assume_multiple %67, 8 : i32
    %69 = arith.index_cast %68 : i32 to index
    %c0_17 = arith.constant 0 : index
    %70 = vector.load %arg15[%69, %c0_17] : memref<64x128xf32, #tpu.memory_space<vmem>>, vector<8x128xf32>
    tpu.vector_store %arg15[%69, %c0_17], %66 {strides = array<i32>} : memref<64x128xf32, #tpu.memory_space<vmem>>, vector<8x128xf32>,
    %c2_i32 = arith.constant 2 : i32
    %71 = arith.index_cast %c2_i32 : i32 to index
    %c0_18 = arith.constant 0 : index
    %c0_19 = arith.constant 0 : index
    %72 = vector.load %arg1[%71, %c0_18, %c0_19] : memref<8x8x512xf32, #tpu.memory_space<vmem>>, vector<1x8x512xf32>
    %73 = vector.shape_cast %72 : vector<1x8x512xf32> to vector<8x512xf32>
    %c0_20 = arith.constant 0 : index
    %c0_21 = arith.constant 0 : index
    %74 = vector.load %arg2[%c0_20, %c0_21] : memref<128x512xf32, #tpu.memory_space<vmem>>, vector<128x512xf32>
    %cst_22 = arith.constant dense<0.000000e+00> : vector<8x512xf32>
    %75 = tpu.matmul %66, %74, %cst_22 {dimension_numbers = #tpu.dot_dimension_numbers<[1], [0], [0], [1], [0, 0, 1, 1], [], []>} : vector<8x128xf32>, vector<128x512xf32>, vector<8x512xf32> -> vector<8x512xf32>
    %76 = arith.addf %73, %75 : vector<8x512xf32>
    %77 = vector.extract_strided_slice %76 {offsets = [0, 0], sizes = [8, 128], strides = [1, 1]} : vector<8x512xf32> to vector<8x128xf32>
    %78 = arith.negf %77 : vector<8x128xf32>
    %79 = math.exp %78 : vector<8x128xf32>
    %cst_23 = arith.constant 1.000000e+00 : f32
    %80 = vector.broadcast %cst_23 : f32 to vector<8x128xf32>
    %81 = arith.addf %80, %79 : vector<8x128xf32>
    %82 = arith.divf %80, %81 : vector<8x128xf32>
    %83 = vector.extract_strided_slice %76 {offsets = [0, 128], sizes = [8, 128], strides = [1, 1]} : vector<8x512xf32> to vector<8x128xf32>
    %84 = arith.negf %83 : vector<8x128xf32>
    %85 = math.exp %84 : vector<8x128xf32>
    %cst_24 = arith.constant 1.000000e+00 : f32
    %86 = vector.broadcast %cst_24 : f32 to vector<8x128xf32>
    %87 = arith.addf %86, %85 : vector<8x128xf32>
    %88 = arith.divf %86, %87 : vector<8x128xf32>
    %89 = vector.extract_strided_slice %76 {offsets = [0, 256], sizes = [8, 128], strides = [1, 1]} : vector<8x512xf32> to vector<8x128xf32>
    %90 = math.tanh %89 : vector<8x128xf32>
    %91 = vector.extract_strided_slice %76 {offsets = [0, 384], sizes = [8, 128], strides = [1, 1]} : vector<8x512xf32> to vector<8x128xf32>
    %92 = arith.negf %91 : vector<8x128xf32>
    %93 = math.exp %92 : vector<8x128xf32>
    %cst_25 = arith.constant 1.000000e+00 : f32
    %94 = vector.broadcast %cst_25 : f32 to vector<8x128xf32>
    %95 = arith.addf %94, %93 : vector<8x128xf32>
    %96 = arith.divf %94, %95 : vector<8x128xf32>
    %97 = arith.mulf %88, %64 : vector<8x128xf32>
    %98 = arith.mulf %82, %90 : vector<8x128xf32>
    %99 = arith.addf %97, %98 : vector<8x128xf32>
    %100 = math.tanh %99 : vector<8x128xf32>
    %101 = arith.mulf %96, %100 : vector<8x128xf32>
    %c8_i32_26 = arith.constant 8 : i32
    %102 = arith.muli %c2_i32, %c8_i32_26 : i32
    %103 = tpu.assume_multiple %102, 8 : i32
    %104 = arith.index_cast %103 : i32 to index
    %c0_27 = arith.constant 0 : index
    %105 = vector.load %arg15[%104, %c0_27] : memref<64x128xf32, #tpu.memory_space<vmem>>, vector<8x128xf32>
    tpu.vector_store %arg15[%104, %c0_27], %101 {strides = array<i32>} : memref<64x128xf32, #tpu.memory_space<vmem>>, vector<8x128xf32>,
    %c3_i32 = arith.constant 3 : i32
    %106 = arith.index_cast %c3_i32 : i32 to index
    %c0_28 = arith.constant 0 : index
    %c0_29 = arith.constant 0 : index
    %107 = vector.load %arg1[%106, %c0_28, %c0_29] : memref<8x8x512xf32, #tpu.memory_space<vmem>>, vector<1x8x512xf32>
    %108 = vector.shape_cast %107 : vector<1x8x512xf32> to vector<8x512xf32>
    %c0_30 = arith.constant 0 : index
    %c0_31 = arith.constant 0 : index
    %109 = vector.load %arg2[%c0_30, %c0_31] : memref<128x512xf32, #tpu.memory_space<vmem>>, vector<128x512xf32>
    %cst_32 = arith.constant dense<0.000000e+00> : vector<8x512xf32>
    %110 = tpu.matmul %101, %109, %cst_32 {dimension_numbers = #tpu.dot_dimension_numbers<[1], [0], [0], [1], [0, 0, 1, 1], [], []>} : vector<8x128xf32>, vector<128x512xf32>, vector<8x512xf32> -> vector<8x512xf32>
    %111 = arith.addf %108, %110 : vector<8x512xf32>
    %112 = vector.extract_strided_slice %111 {offsets = [0, 0], sizes = [8, 128], strides = [1, 1]} : vector<8x512xf32> to vector<8x128xf32>
    %113 = arith.negf %112 : vector<8x128xf32>
    %114 = math.exp %113 : vector<8x128xf32>
    %cst_33 = arith.constant 1.000000e+00 : f32
    %115 = vector.broadcast %cst_33 : f32 to vector<8x128xf32>
    %116 = arith.addf %115, %114 : vector<8x128xf32>
    %117 = arith.divf %115, %116 : vector<8x128xf32>
    %118 = vector.extract_strided_slice %111 {offsets = [0, 128], sizes = [8, 128], strides = [1, 1]} : vector<8x512xf32> to vector<8x128xf32>
    %119 = arith.negf %118 : vector<8x128xf32>
    %120 = math.exp %119 : vector<8x128xf32>
    %cst_34 = arith.constant 1.000000e+00 : f32
    %121 = vector.broadcast %cst_34 : f32 to vector<8x128xf32>
    %122 = arith.addf %121, %120 : vector<8x128xf32>
    %123 = arith.divf %121, %122 : vector<8x128xf32>
    %124 = vector.extract_strided_slice %111 {offsets = [0, 256], sizes = [8, 128], strides = [1, 1]} : vector<8x512xf32> to vector<8x128xf32>
    %125 = math.tanh %124 : vector<8x128xf32>
    %126 = vector.extract_strided_slice %111 {offsets = [0, 384], sizes = [8, 128], strides = [1, 1]} : vector<8x512xf32> to vector<8x128xf32>
    %127 = arith.negf %126 : vector<8x128xf32>
    %128 = math.exp %127 : vector<8x128xf32>
    %cst_35 = arith.constant 1.000000e+00 : f32
    %129 = vector.broadcast %cst_35 : f32 to vector<8x128xf32>
    %130 = arith.addf %129, %128 : vector<8x128xf32>
    %131 = arith.divf %129, %130 : vector<8x128xf32>
    %132 = arith.mulf %123, %99 : vector<8x128xf32>
    %133 = arith.mulf %117, %125 : vector<8x128xf32>
    %134 = arith.addf %132, %133 : vector<8x128xf32>
    %135 = math.tanh %134 : vector<8x128xf32>
    %136 = arith.mulf %131, %135 : vector<8x128xf32>
    %c8_i32_36 = arith.constant 8 : i32
    %137 = arith.muli %c3_i32, %c8_i32_36 : i32
    %138 = tpu.assume_multiple %137, 8 : i32
    %139 = arith.index_cast %138 : i32 to index
    %c0_37 = arith.constant 0 : index
    %140 = vector.load %arg15[%139, %c0_37] : memref<64x128xf32, #tpu.memory_space<vmem>>, vector<8x128xf32>
    tpu.vector_store %arg15[%139, %c0_37], %136 {strides = array<i32>} : memref<64x128xf32, #tpu.memory_space<vmem>>, vector<8x128xf32>,
    %c4_i32 = arith.constant 4 : i32
    %141 = arith.index_cast %c4_i32 : i32 to index
    %c0_38 = arith.constant 0 : index
    %c0_39 = arith.constant 0 : index
    %142 = vector.load %arg1[%141, %c0_38, %c0_39] : memref<8x8x512xf32, #tpu.memory_space<vmem>>, vector<1x8x512xf32>
    %143 = vector.shape_cast %142 : vector<1x8x512xf32> to vector<8x512xf32>
    %c0_40 = arith.constant 0 : index
    %c0_41 = arith.constant 0 : index
    %144 = vector.load %arg2[%c0_40, %c0_41] : memref<128x512xf32, #tpu.memory_space<vmem>>, vector<128x512xf32>
    %cst_42 = arith.constant dense<0.000000e+00> : vector<8x512xf32>
    %145 = tpu.matmul %136, %144, %cst_42 {dimension_numbers = #tpu.dot_dimension_numbers<[1], [0], [0], [1], [0, 0, 1, 1], [], []>} : vector<8x128xf32>, vector<128x512xf32>, vector<8x512xf32> -> vector<8x512xf32>
    %146 = arith.addf %143, %145 : vector<8x512xf32>
    %147 = vector.extract_strided_slice %146 {offsets = [0, 0], sizes = [8, 128], strides = [1, 1]} : vector<8x512xf32> to vector<8x128xf32>
    %148 = arith.negf %147 : vector<8x128xf32>
    %149 = math.exp %148 : vector<8x128xf32>
    %cst_43 = arith.constant 1.000000e+00 : f32
    %150 = vector.broadcast %cst_43 : f32 to vector<8x128xf32>
    %151 = arith.addf %150, %149 : vector<8x128xf32>
    %152 = arith.divf %150, %151 : vector<8x128xf32>
    %153 = vector.extract_strided_slice %146 {offsets = [0, 128], sizes = [8, 128], strides = [1, 1]} : vector<8x512xf32> to vector<8x128xf32>
    %154 = arith.negf %153 : vector<8x128xf32>
    %155 = math.exp %154 : vector<8x128xf32>
    %cst_44 = arith.constant 1.000000e+00 : f32
    %156 = vector.broadcast %cst_44 : f32 to vector<8x128xf32>
    %157 = arith.addf %156, %155 : vector<8x128xf32>
    %158 = arith.divf %156, %157 : vector<8x128xf32>
    %159 = vector.extract_strided_slice %146 {offsets = [0, 256], sizes = [8, 128], strides = [1, 1]} : vector<8x512xf32> to vector<8x128xf32>
    %160 = math.tanh %159 : vector<8x128xf32>
    %161 = vector.extract_strided_slice %146 {offsets = [0, 384], sizes = [8, 128], strides = [1, 1]} : vector<8x512xf32> to vector<8x128xf32>
    %162 = arith.negf %161 : vector<8x128xf32>
    %163 = math.exp %162 : vector<8x128xf32>
    %cst_45 = arith.constant 1.000000e+00 : f32
    %164 = vector.broadcast %cst_45 : f32 to vector<8x128xf32>
    %165 = arith.addf %164, %163 : vector<8x128xf32>
    %166 = arith.divf %164, %165 : vector<8x128xf32>
    %167 = arith.mulf %158, %134 : vector<8x128xf32>
    %168 = arith.mulf %152, %160 : vector<8x128xf32>
    %169 = arith.addf %167, %168 : vector<8x128xf32>
    %170 = math.tanh %169 : vector<8x128xf32>
    %171 = arith.mulf %166, %170 : vector<8x128xf32>
    %c8_i32_46 = arith.constant 8 : i32
    %172 = arith.muli %c4_i32, %c8_i32_46 : i32
    %173 = tpu.assume_multiple %172, 8 : i32
    %174 = arith.index_cast %173 : i32 to index
    %c0_47 = arith.constant 0 : index
    %175 = vector.load %arg15[%174, %c0_47] : memref<64x128xf32, #tpu.memory_space<vmem>>, vector<8x128xf32>
    tpu.vector_store %arg15[%174, %c0_47], %171 {strides = array<i32>} : memref<64x128xf32, #tpu.memory_space<vmem>>, vector<8x128xf32>,
    %c5_i32 = arith.constant 5 : i32
    %176 = arith.index_cast %c5_i32 : i32 to index
    %c0_48 = arith.constant 0 : index
    %c0_49 = arith.constant 0 : index
    %177 = vector.load %arg1[%176, %c0_48, %c0_49] : memref<8x8x512xf32, #tpu.memory_space<vmem>>, vector<1x8x512xf32>
    %178 = vector.shape_cast %177 : vector<1x8x512xf32> to vector<8x512xf32>
    %c0_50 = arith.constant 0 : index
    %c0_51 = arith.constant 0 : index
    %179 = vector.load %arg2[%c0_50, %c0_51] : memref<128x512xf32, #tpu.memory_space<vmem>>, vector<128x512xf32>
    %cst_52 = arith.constant dense<0.000000e+00> : vector<8x512xf32>
    %180 = tpu.matmul %171, %179, %cst_52 {dimension_numbers = #tpu.dot_dimension_numbers<[1], [0], [0], [1], [0, 0, 1, 1], [], []>} : vector<8x128xf32>, vector<128x512xf32>, vector<8x512xf32> -> vector<8x512xf32>
    %181 = arith.addf %178, %180 : vector<8x512xf32>
    %182 = vector.extract_strided_slice %181 {offsets = [0, 0], sizes = [8, 128], strides = [1, 1]} : vector<8x512xf32> to vector<8x128xf32>
    %183 = arith.negf %182 : vector<8x128xf32>
    %184 = math.exp %183 : vector<8x128xf32>
    %cst_53 = arith.constant 1.000000e+00 : f32
    %185 = vector.broadcast %cst_53 : f32 to vector<8x128xf32>
    %186 = arith.addf %185, %184 : vector<8x128xf32>
    %187 = arith.divf %185, %186 : vector<8x128xf32>
    %188 = vector.extract_strided_slice %181 {offsets = [0, 128], sizes = [8, 128], strides = [1, 1]} : vector<8x512xf32> to vector<8x128xf32>
    %189 = arith.negf %188 : vector<8x128xf32>
    %190 = math.exp %189 : vector<8x128xf32>
    %cst_54 = arith.constant 1.000000e+00 : f32
    %191 = vector.broadcast %cst_54 : f32 to vector<8x128xf32>
    %192 = arith.addf %191, %190 : vector<8x128xf32>
    %193 = arith.divf %191, %192 : vector<8x128xf32>
    %194 = vector.extract_strided_slice %181 {offsets = [0, 256], sizes = [8, 128], strides = [1, 1]} : vector<8x512xf32> to vector<8x128xf32>
    %195 = math.tanh %194 : vector<8x128xf32>
    %196 = vector.extract_strided_slice %181 {offsets = [0, 384], sizes = [8, 128], strides = [1, 1]} : vector<8x512xf32> to vector<8x128xf32>
    %197 = arith.negf %196 : vector<8x128xf32>
    %198 = math.exp %197 : vector<8x128xf32>
    %cst_55 = arith.constant 1.000000e+00 : f32
    %199 = vector.broadcast %cst_55 : f32 to vector<8x128xf32>
    %200 = arith.addf %199, %198 : vector<8x128xf32>
    %201 = arith.divf %199, %200 : vector<8x128xf32>
    %202 = arith.mulf %193, %169 : vector<8x128xf32>
    %203 = arith.mulf %187, %195 : vector<8x128xf32>
    %204 = arith.addf %202, %203 : vector<8x128xf32>
    %205 = math.tanh %204 : vector<8x128xf32>
    %206 = arith.mulf %201, %205 : vector<8x128xf32>
    %c8_i32_56 = arith.constant 8 : i32
    %207 = arith.muli %c5_i32, %c8_i32_56 : i32
    %208 = tpu.assume_multiple %207, 8 : i32
    %209 = arith.index_cast %208 : i32 to index
    %c0_57 = arith.constant 0 : index
    %210 = vector.load %arg15[%209, %c0_57] : memref<64x128xf32, #tpu.memory_space<vmem>>, vector<8x128xf32>
    tpu.vector_store %arg15[%209, %c0_57], %206 {strides = array<i32>} : memref<64x128xf32, #tpu.memory_space<vmem>>, vector<8x128xf32>,
    %c6_i32 = arith.constant 6 : i32
    %211 = arith.index_cast %c6_i32 : i32 to index
    %c0_58 = arith.constant 0 : index
    %c0_59 = arith.constant 0 : index
    %212 = vector.load %arg1[%211, %c0_58, %c0_59] : memref<8x8x512xf32, #tpu.memory_space<vmem>>, vector<1x8x512xf32>
    %213 = vector.shape_cast %212 : vector<1x8x512xf32> to vector<8x512xf32>
    %c0_60 = arith.constant 0 : index
    %c0_61 = arith.constant 0 : index
    %214 = vector.load %arg2[%c0_60, %c0_61] : memref<128x512xf32, #tpu.memory_space<vmem>>, vector<128x512xf32>
    %cst_62 = arith.constant dense<0.000000e+00> : vector<8x512xf32>
    %215 = tpu.matmul %206, %214, %cst_62 {dimension_numbers = #tpu.dot_dimension_numbers<[1], [0], [0], [1], [0, 0, 1, 1], [], []>} : vector<8x128xf32>, vector<128x512xf32>, vector<8x512xf32> -> vector<8x512xf32>
    %216 = arith.addf %213, %215 : vector<8x512xf32>
    %217 = vector.extract_strided_slice %216 {offsets = [0, 0], sizes = [8, 128], strides = [1, 1]} : vector<8x512xf32> to vector<8x128xf32>
    %218 = arith.negf %217 : vector<8x128xf32>
    %219 = math.exp %218 : vector<8x128xf32>
    %cst_63 = arith.constant 1.000000e+00 : f32
    %220 = vector.broadcast %cst_63 : f32 to vector<8x128xf32>
    %221 = arith.addf %220, %219 : vector<8x128xf32>
    %222 = arith.divf %220, %221 : vector<8x128xf32>
    %223 = vector.extract_strided_slice %216 {offsets = [0, 128], sizes = [8, 128], strides = [1, 1]} : vector<8x512xf32> to vector<8x128xf32>
    %224 = arith.negf %223 : vector<8x128xf32>
    %225 = math.exp %224 : vector<8x128xf32>
    %cst_64 = arith.constant 1.000000e+00 : f32
    %226 = vector.broadcast %cst_64 : f32 to vector<8x128xf32>
    %227 = arith.addf %226, %225 : vector<8x128xf32>
    %228 = arith.divf %226, %227 : vector<8x128xf32>
    %229 = vector.extract_strided_slice %216 {offsets = [0, 256], sizes = [8, 128], strides = [1, 1]} : vector<8x512xf32> to vector<8x128xf32>
    %230 = math.tanh %229 : vector<8x128xf32>
    %231 = vector.extract_strided_slice %216 {offsets = [0, 384], sizes = [8, 128], strides = [1, 1]} : vector<8x512xf32> to vector<8x128xf32>
    %232 = arith.negf %231 : vector<8x128xf32>
    %233 = math.exp %232 : vector<8x128xf32>
    %cst_65 = arith.constant 1.000000e+00 : f32
    %234 = vector.broadcast %cst_65 : f32 to vector<8x128xf32>
    %235 = arith.addf %234, %233 : vector<8x128xf32>
    %236 = arith.divf %234, %235 : vector<8x128xf32>
    %237 = arith.mulf %228, %204 : vector<8x128xf32>
    %238 = arith.mulf %222, %230 : vector<8x128xf32>
    %239 = arith.addf %237, %238 : vector<8x128xf32>
    %240 = math.tanh %239 : vector<8x128xf32>
    %241 = arith.mulf %236, %240 : vector<8x128xf32>
    %c8_i32_66 = arith.constant 8 : i32
    %242 = arith.muli %c6_i32, %c8_i32_66 : i32
    %243 = tpu.assume_multiple %242, 8 : i32
    %244 = arith.index_cast %243 : i32 to index
    %c0_67 = arith.constant 0 : index
    %245 = vector.load %arg15[%244, %c0_67] : memref<64x128xf32, #tpu.memory_space<vmem>>, vector<8x128xf32>
    tpu.vector_store %arg15[%244, %c0_67], %241 {strides = array<i32>} : memref<64x128xf32, #tpu.memory_space<vmem>>, vector<8x128xf32>,
    %c7_i32 = arith.constant 7 : i32
    %246 = arith.index_cast %c7_i32 : i32 to index
    %c0_68 = arith.constant 0 : index
    %c0_69 = arith.constant 0 : index
    %247 = vector.load %arg1[%246, %c0_68, %c0_69] : memref<8x8x512xf32, #tpu.memory_space<vmem>>, vector<1x8x512xf32>
    %248 = vector.shape_cast %247 : vector<1x8x512xf32> to vector<8x512xf32>
    %c0_70 = arith.constant 0 : index
    %c0_71 = arith.constant 0 : index
    %249 = vector.load %arg2[%c0_70, %c0_71] : memref<128x512xf32, #tpu.memory_space<vmem>>, vector<128x512xf32>
    %cst_72 = arith.constant dense<0.000000e+00> : vector<8x512xf32>
    %250 = tpu.matmul %241, %249, %cst_72 {dimension_numbers = #tpu.dot_dimension_numbers<[1], [0], [0], [1], [0, 0, 1, 1], [], []>} : vector<8x128xf32>, vector<128x512xf32>, vector<8x512xf32> -> vector<8x512xf32>
    %251 = arith.addf %248, %250 : vector<8x512xf32>
    %252 = vector.extract_strided_slice %251 {offsets = [0, 0], sizes = [8, 128], strides = [1, 1]} : vector<8x512xf32> to vector<8x128xf32>
    %253 = arith.negf %252 : vector<8x128xf32>
    %254 = math.exp %253 : vector<8x128xf32>
    %cst_73 = arith.constant 1.000000e+00 : f32
    %255 = vector.broadcast %cst_73 : f32 to vector<8x128xf32>
    %256 = arith.addf %255, %254 : vector<8x128xf32>
    %257 = arith.divf %255, %256 : vector<8x128xf32>
    %258 = vector.extract_strided_slice %251 {offsets = [0, 128], sizes = [8, 128], strides = [1, 1]} : vector<8x512xf32> to vector<8x128xf32>
    %259 = arith.negf %258 : vector<8x128xf32>
    %260 = math.exp %259 : vector<8x128xf32>
    %cst_74 = arith.constant 1.000000e+00 : f32
    %261 = vector.broadcast %cst_74 : f32 to vector<8x128xf32>
    %262 = arith.addf %261, %260 : vector<8x128xf32>
    %263 = arith.divf %261, %262 : vector<8x128xf32>
    %264 = vector.extract_strided_slice %251 {offsets = [0, 256], sizes = [8, 128], strides = [1, 1]} : vector<8x512xf32> to vector<8x128xf32>
    %265 = math.tanh %264 : vector<8x128xf32>
    %266 = vector.extract_strided_slice %251 {offsets = [0, 384], sizes = [8, 128], strides = [1, 1]} : vector<8x512xf32> to vector<8x128xf32>
    %267 = arith.negf %266 : vector<8x128xf32>
    %268 = math.exp %267 : vector<8x128xf32>
    %cst_75 = arith.constant 1.000000e+00 : f32
    %269 = vector.broadcast %cst_75 : f32 to vector<8x128xf32>
    %270 = arith.addf %269, %268 : vector<8x128xf32>
    %271 = arith.divf %269, %270 : vector<8x128xf32>
    %272 = arith.mulf %263, %239 : vector<8x128xf32>
    %273 = arith.mulf %257, %265 : vector<8x128xf32>
    %274 = arith.addf %272, %273 : vector<8x128xf32>
    %275 = math.tanh %274 : vector<8x128xf32>
    %276 = arith.mulf %271, %275 : vector<8x128xf32>
    %c8_i32_76 = arith.constant 8 : i32
    %277 = arith.muli %c7_i32, %c8_i32_76 : i32
    %278 = tpu.assume_multiple %277, 8 : i32
    %279 = arith.index_cast %278 : i32 to index
    %c0_77 = arith.constant 0 : index
    %280 = vector.load %arg15[%279, %c0_77] : memref<64x128xf32, #tpu.memory_space<vmem>>, vector<8x128xf32>
    tpu.vector_store %arg15[%279, %c0_77], %276 {strides = array<i32>} : memref<64x128xf32, #tpu.memory_space<vmem>>, vector<8x128xf32>,
    %c8_i32_78 = arith.constant 8 : i32
    %c0_79 = arith.constant 0 : index
    %c0_80 = arith.constant 0 : index
    %281 = vector.load %arg15[%c0_79, %c0_80] : memref<64x128xf32, #tpu.memory_space<vmem>>, vector<64x128xf32>
    %c0_81 = arith.constant 0 : index
    %c0_82 = arith.constant 0 : index
    %282 = vector.load %arg3[%c0_81, %c0_82] : memref<128x512xf32, #tpu.memory_space<vmem>>, vector<128x512xf32>
    %cst_83 = arith.constant dense<0.000000e+00> : vector<64x512xf32>
    %283 = tpu.matmul %281, %282, %cst_83 {dimension_numbers = #tpu.dot_dimension_numbers<[1], [0], [0], [1], [0, 0, 1, 1], [], []>} : vector<64x128xf32>, vector<128x512xf32>, vector<64x512xf32> -> vector<64x512xf32>
    %c0_84 = arith.constant 0 : index
    %c0_85 = arith.constant 0 : index
    %284 = vector.load %arg5[%c0_84, %c0_85] : memref<1x512xf32, #tpu.memory_space<vmem>>, vector<1x512xf32>
    %285 = vector.broadcast %284 : vector<1x512xf32> to vector<64x512xf32>
    %286 = arith.addf %283, %285 : vector<64x512xf32>
    %c0_86 = arith.constant 0 : index
    %c0_87 = arith.constant 0 : index
    %287 = vector.load %arg14[%c0_86, %c0_87] : memref<64x512xf32, #tpu.memory_space<vmem>>, vector<64x512xf32>
    tpu.vector_store %arg14[%c0_86, %c0_87], %286 {strides = array<i32>} : memref<64x512xf32, #tpu.memory_space<vmem>>, vector<64x512xf32>,
    %cst_88 = arith.constant 0.000000e+00 : f32
    %288 = vector.broadcast %cst_88 : f32 to vector<8x128xf32>
    %c0_i32_89 = arith.constant 0 : i32
    %c8_i32_90 = arith.constant 8 : i32
    %289 = arith.muli %c0_i32_89, %c8_i32_90 : i32
    %290 = tpu.assume_multiple %289, 8 : i32
    %291 = arith.index_cast %290 : i32 to index
    %c0_91 = arith.constant 0 : index
    %292 = vector.load %arg14[%291, %c0_91] : memref<64x512xf32, #tpu.memory_space<vmem>>, vector<8x512xf32>
    %c0_92 = arith.constant 0 : index
    %c0_93 = arith.constant 0 : index
    %293 = vector.load %arg4[%c0_92, %c0_93] : memref<128x512xf32, #tpu.memory_space<vmem>>, vector<128x512xf32>
    %cst_94 = arith.constant dense<0.000000e+00> : vector<8x512xf32>
    %294 = tpu.matmul %288, %293, %cst_94 {dimension_numbers = #tpu.dot_dimension_numbers<[1], [0], [0], [1], [0, 0, 1, 1], [], []>} : vector<8x128xf32>, vector<128x512xf32>, vector<8x512xf32> -> vector<8x512xf32>
    %295 = arith.addf %292, %294 : vector<8x512xf32>
    %296 = vector.extract_strided_slice %295 {offsets = [0, 0], sizes = [8, 128], strides = [1, 1]} : vector<8x512xf32> to vector<8x128xf32>
    %297 = arith.negf %296 : vector<8x128xf32>
    %298 = math.exp %297 : vector<8x128xf32>
    %cst_95 = arith.constant 1.000000e+00 : f32
    %299 = vector.broadcast %cst_95 : f32 to vector<8x128xf32>
    %300 = arith.addf %299, %298 : vector<8x128xf32>
    %301 = arith.divf %299, %300 : vector<8x128xf32>
    %302 = vector.extract_strided_slice %295 {offsets = [0, 128], sizes = [8, 128], strides = [1, 1]} : vector<8x512xf32> to vector<8x128xf32>
    %303 = arith.negf %302 : vector<8x128xf32>
    %304 = math.exp %303 : vector<8x128xf32>
    %cst_96 = arith.constant 1.000000e+00 : f32
    %305 = vector.broadcast %cst_96 : f32 to vector<8x128xf32>
    %306 = arith.addf %305, %304 : vector<8x128xf32>
    %307 = arith.divf %305, %306 : vector<8x128xf32>
    %308 = vector.extract_strided_slice %295 {offsets = [0, 256], sizes = [8, 128], strides = [1, 1]} : vector<8x512xf32> to vector<8x128xf32>
    %309 = math.tanh %308 : vector<8x128xf32>
    %310 = vector.extract_strided_slice %295 {offsets = [0, 384], sizes = [8, 128], strides = [1, 1]} : vector<8x512xf32> to vector<8x128xf32>
    %311 = arith.negf %310 : vector<8x128xf32>
    %312 = math.exp %311 : vector<8x128xf32>
    %cst_97 = arith.constant 1.000000e+00 : f32
    %313 = vector.broadcast %cst_97 : f32 to vector<8x128xf32>
    %314 = arith.addf %313, %312 : vector<8x128xf32>
    %315 = arith.divf %313, %314 : vector<8x128xf32>
    %316 = arith.mulf %307, %288 : vector<8x128xf32>
    %317 = arith.mulf %301, %309 : vector<8x128xf32>
    %318 = arith.addf %316, %317 : vector<8x128xf32>
    %319 = math.tanh %318 : vector<8x128xf32>
    %320 = arith.mulf %315, %319 : vector<8x128xf32>
    %c8_i32_98 = arith.constant 8 : i32
    %321 = arith.muli %c0_i32_89, %c8_i32_98 : i32
    %322 = tpu.assume_multiple %321, 8 : i32
    %323 = arith.index_cast %322 : i32 to index
    %c0_99 = arith.constant 0 : index
    %324 = vector.load %arg15[%323, %c0_99] : memref<64x128xf32, #tpu.memory_space<vmem>>, vector<8x128xf32>
    tpu.vector_store %arg15[%323, %c0_99], %320 {strides = array<i32>} : memref<64x128xf32, #tpu.memory_space<vmem>>, vector<8x128xf32>,
    %c1_i32_100 = arith.constant 1 : i32
    %c8_i32_101 = arith.constant 8 : i32
    %325 = arith.muli %c1_i32_100, %c8_i32_101 : i32
    %326 = tpu.assume_multiple %325, 8 : i32
    %327 = arith.index_cast %326 : i32 to index
    %c0_102 = arith.constant 0 : index
    %328 = vector.load %arg14[%327, %c0_102] : memref<64x512xf32, #tpu.memory_space<vmem>>, vector<8x512xf32>
    %c0_103 = arith.constant 0 : index
    %c0_104 = arith.constant 0 : index
    %329 = vector.load %arg4[%c0_103, %c0_104] : memref<128x512xf32, #tpu.memory_space<vmem>>, vector<128x512xf32>
    %cst_105 = arith.constant dense<0.000000e+00> : vector<8x512xf32>
    %330 = tpu.matmul %320, %329, %cst_105 {dimension_numbers = #tpu.dot_dimension_numbers<[1], [0], [0], [1], [0, 0, 1, 1], [], []>} : vector<8x128xf32>, vector<128x512xf32>, vector<8x512xf32> -> vector<8x512xf32>
    %331 = arith.addf %328, %330 : vector<8x512xf32>
    %332 = vector.extract_strided_slice %331 {offsets = [0, 0], sizes = [8, 128], strides = [1, 1]} : vector<8x512xf32> to vector<8x128xf32>
    %333 = arith.negf %332 : vector<8x128xf32>
    %334 = math.exp %333 : vector<8x128xf32>
    %cst_106 = arith.constant 1.000000e+00 : f32
    %335 = vector.broadcast %cst_106 : f32 to vector<8x128xf32>
    %336 = arith.addf %335, %334 : vector<8x128xf32>
    %337 = arith.divf %335, %336 : vector<8x128xf32>
    %338 = vector.extract_strided_slice %331 {offsets = [0, 128], sizes = [8, 128], strides = [1, 1]} : vector<8x512xf32> to vector<8x128xf32>
    %339 = arith.negf %338 : vector<8x128xf32>
    %340 = math.exp %339 : vector<8x128xf32>
    %cst_107 = arith.constant 1.000000e+00 : f32
    %341 = vector.broadcast %cst_107 : f32 to vector<8x128xf32>
    %342 = arith.addf %341, %340 : vector<8x128xf32>
    %343 = arith.divf %341, %342 : vector<8x128xf32>
    %344 = vector.extract_strided_slice %331 {offsets = [0, 256], sizes = [8, 128], strides = [1, 1]} : vector<8x512xf32> to vector<8x128xf32>
    %345 = math.tanh %344 : vector<8x128xf32>
    %346 = vector.extract_strided_slice %331 {offsets = [0, 384], sizes = [8, 128], strides = [1, 1]} : vector<8x512xf32> to vector<8x128xf32>
    %347 = arith.negf %346 : vector<8x128xf32>
    %348 = math.exp %347 : vector<8x128xf32>
    %cst_108 = arith.constant 1.000000e+00 : f32
    %349 = vector.broadcast %cst_108 : f32 to vector<8x128xf32>
    %350 = arith.addf %349, %348 : vector<8x128xf32>
    %351 = arith.divf %349, %350 : vector<8x128xf32>
    %352 = arith.mulf %343, %318 : vector<8x128xf32>
    %353 = arith.mulf %337, %345 : vector<8x128xf32>
    %354 = arith.addf %352, %353 : vector<8x128xf32>
    %355 = math.tanh %354 : vector<8x128xf32>
    %356 = arith.mulf %351, %355 : vector<8x128xf32>
    %c8_i32_109 = arith.constant 8 : i32
    %357 = arith.muli %c1_i32_100, %c8_i32_109 : i32
    %358 = tpu.assume_multiple %357, 8 : i32
    %359 = arith.index_cast %358 : i32 to index
    %c0_110 = arith.constant 0 : index
    %360 = vector.load %arg15[%359, %c0_110] : memref<64x128xf32, #tpu.memory_space<vmem>>, vector<8x128xf32>
    tpu.vector_store %arg15[%359, %c0_110], %356 {strides = array<i32>} : memref<64x128xf32, #tpu.memory_space<vmem>>, vector<8x128xf32>,
    %c2_i32_111 = arith.constant 2 : i32
    %c8_i32_112 = arith.constant 8 : i32
    %361 = arith.muli %c2_i32_111, %c8_i32_112 : i32
    %362 = tpu.assume_multiple %361, 8 : i32
    %363 = arith.index_cast %362 : i32 to index
    %c0_113 = arith.constant 0 : index
    %364 = vector.load %arg14[%363, %c0_113] : memref<64x512xf32, #tpu.memory_space<vmem>>, vector<8x512xf32>
    %c0_114 = arith.constant 0 : index
    %c0_115 = arith.constant 0 : index
    %365 = vector.load %arg4[%c0_114, %c0_115] : memref<128x512xf32, #tpu.memory_space<vmem>>, vector<128x512xf32>
    %cst_116 = arith.constant dense<0.000000e+00> : vector<8x512xf32>
    %366 = tpu.matmul %356, %365, %cst_116 {dimension_numbers = #tpu.dot_dimension_numbers<[1], [0], [0], [1], [0, 0, 1, 1], [], []>} : vector<8x128xf32>, vector<128x512xf32>, vector<8x512xf32> -> vector<8x512xf32>
    %367 = arith.addf %364, %366 : vector<8x512xf32>
    %368 = vector.extract_strided_slice %367 {offsets = [0, 0], sizes = [8, 128], strides = [1, 1]} : vector<8x512xf32> to vector<8x128xf32>
    %369 = arith.negf %368 : vector<8x128xf32>
    %370 = math.exp %369 : vector<8x128xf32>
    %cst_117 = arith.constant 1.000000e+00 : f32
    %371 = vector.broadcast %cst_117 : f32 to vector<8x128xf32>
    %372 = arith.addf %371, %370 : vector<8x128xf32>
    %373 = arith.divf %371, %372 : vector<8x128xf32>
    %374 = vector.extract_strided_slice %367 {offsets = [0, 128], sizes = [8, 128], strides = [1, 1]} : vector<8x512xf32> to vector<8x128xf32>
    %375 = arith.negf %374 : vector<8x128xf32>
    %376 = math.exp %375 : vector<8x128xf32>
    %cst_118 = arith.constant 1.000000e+00 : f32
    %377 = vector.broadcast %cst_118 : f32 to vector<8x128xf32>
    %378 = arith.addf %377, %376 : vector<8x128xf32>
    %379 = arith.divf %377, %378 : vector<8x128xf32>
    %380 = vector.extract_strided_slice %367 {offsets = [0, 256], sizes = [8, 128], strides = [1, 1]} : vector<8x512xf32> to vector<8x128xf32>
    %381 = math.tanh %380 : vector<8x128xf32>
    %382 = vector.extract_strided_slice %367 {offsets = [0, 384], sizes = [8, 128], strides = [1, 1]} : vector<8x512xf32> to vector<8x128xf32>
    %383 = arith.negf %382 : vector<8x128xf32>
    %384 = math.exp %383 : vector<8x128xf32>
    %cst_119 = arith.constant 1.000000e+00 : f32
    %385 = vector.broadcast %cst_119 : f32 to vector<8x128xf32>
    %386 = arith.addf %385, %384 : vector<8x128xf32>
    %387 = arith.divf %385, %386 : vector<8x128xf32>
    %388 = arith.mulf %379, %354 : vector<8x128xf32>
    %389 = arith.mulf %373, %381 : vector<8x128xf32>
    %390 = arith.addf %388, %389 : vector<8x128xf32>
    %391 = math.tanh %390 : vector<8x128xf32>
    %392 = arith.mulf %387, %391 : vector<8x128xf32>
    %c8_i32_120 = arith.constant 8 : i32
    %393 = arith.muli %c2_i32_111, %c8_i32_120 : i32
    %394 = tpu.assume_multiple %393, 8 : i32
    %395 = arith.index_cast %394 : i32 to index
    %c0_121 = arith.constant 0 : index
    %396 = vector.load %arg15[%395, %c0_121] : memref<64x128xf32, #tpu.memory_space<vmem>>, vector<8x128xf32>
    tpu.vector_store %arg15[%395, %c0_121], %392 {strides = array<i32>} : memref<64x128xf32, #tpu.memory_space<vmem>>, vector<8x128xf32>,
    %c3_i32_122 = arith.constant 3 : i32
    %c8_i32_123 = arith.constant 8 : i32
    %397 = arith.muli %c3_i32_122, %c8_i32_123 : i32
    %398 = tpu.assume_multiple %397, 8 : i32
    %399 = arith.index_cast %398 : i32 to index
    %c0_124 = arith.constant 0 : index
    %400 = vector.load %arg14[%399, %c0_124] : memref<64x512xf32, #tpu.memory_space<vmem>>, vector<8x512xf32>
    %c0_125 = arith.constant 0 : index
    %c0_126 = arith.constant 0 : index
    %401 = vector.load %arg4[%c0_125, %c0_126] : memref<128x512xf32, #tpu.memory_space<vmem>>, vector<128x512xf32>
    %cst_127 = arith.constant dense<0.000000e+00> : vector<8x512xf32>
    %402 = tpu.matmul %392, %401, %cst_127 {dimension_numbers = #tpu.dot_dimension_numbers<[1], [0], [0], [1], [0, 0, 1, 1], [], []>} : vector<8x128xf32>, vector<128x512xf32>, vector<8x512xf32> -> vector<8x512xf32>
    %403 = arith.addf %400, %402 : vector<8x512xf32>
    %404 = vector.extract_strided_slice %403 {offsets = [0, 0], sizes = [8, 128], strides = [1, 1]} : vector<8x512xf32> to vector<8x128xf32>
    %405 = arith.negf %404 : vector<8x128xf32>
    %406 = math.exp %405 : vector<8x128xf32>
    %cst_128 = arith.constant 1.000000e+00 : f32
    %407 = vector.broadcast %cst_128 : f32 to vector<8x128xf32>
    %408 = arith.addf %407, %406 : vector<8x128xf32>
    %409 = arith.divf %407, %408 : vector<8x128xf32>
    %410 = vector.extract_strided_slice %403 {offsets = [0, 128], sizes = [8, 128], strides = [1, 1]} : vector<8x512xf32> to vector<8x128xf32>
    %411 = arith.negf %410 : vector<8x128xf32>
    %412 = math.exp %411 : vector<8x128xf32>
    %cst_129 = arith.constant 1.000000e+00 : f32
    %413 = vector.broadcast %cst_129 : f32 to vector<8x128xf32>
    %414 = arith.addf %413, %412 : vector<8x128xf32>
    %415 = arith.divf %413, %414 : vector<8x128xf32>
    %416 = vector.extract_strided_slice %403 {offsets = [0, 256], sizes = [8, 128], strides = [1, 1]} : vector<8x512xf32> to vector<8x128xf32>
    %417 = math.tanh %416 : vector<8x128xf32>
    %418 = vector.extract_strided_slice %403 {offsets = [0, 384], sizes = [8, 128], strides = [1, 1]} : vector<8x512xf32> to vector<8x128xf32>
    %419 = arith.negf %418 : vector<8x128xf32>
    %420 = math.exp %419 : vector<8x128xf32>
    %cst_130 = arith.constant 1.000000e+00 : f32
    %421 = vector.broadcast %cst_130 : f32 to vector<8x128xf32>
    %422 = arith.addf %421, %420 : vector<8x128xf32>
    %423 = arith.divf %421, %422 : vector<8x128xf32>
    %424 = arith.mulf %415, %390 : vector<8x128xf32>
    %425 = arith.mulf %409, %417 : vector<8x128xf32>
    %426 = arith.addf %424, %425 : vector<8x128xf32>
    %427 = math.tanh %426 : vector<8x128xf32>
    %428 = arith.mulf %423, %427 : vector<8x128xf32>
    %c8_i32_131 = arith.constant 8 : i32
    %429 = arith.muli %c3_i32_122, %c8_i32_131 : i32
    %430 = tpu.assume_multiple %429, 8 : i32
    %431 = arith.index_cast %430 : i32 to index
    %c0_132 = arith.constant 0 : index
    %432 = vector.load %arg15[%431, %c0_132] : memref<64x128xf32, #tpu.memory_space<vmem>>, vector<8x128xf32>
    tpu.vector_store %arg15[%431, %c0_132], %428 {strides = array<i32>} : memref<64x128xf32, #tpu.memory_space<vmem>>, vector<8x128xf32>,
    %c4_i32_133 = arith.constant 4 : i32
    %c8_i32_134 = arith.constant 8 : i32
    %433 = arith.muli %c4_i32_133, %c8_i32_134 : i32
    %434 = tpu.assume_multiple %433, 8 : i32
    %435 = arith.index_cast %434 : i32 to index
    %c0_135 = arith.constant 0 : index
    %436 = vector.load %arg14[%435, %c0_135] : memref<64x512xf32, #tpu.memory_space<vmem>>, vector<8x512xf32>
    %c0_136 = arith.constant 0 : index
    %c0_137 = arith.constant 0 : index
    %437 = vector.load %arg4[%c0_136, %c0_137] : memref<128x512xf32, #tpu.memory_space<vmem>>, vector<128x512xf32>
    %cst_138 = arith.constant dense<0.000000e+00> : vector<8x512xf32>
    %438 = tpu.matmul %428, %437, %cst_138 {dimension_numbers = #tpu.dot_dimension_numbers<[1], [0], [0], [1], [0, 0, 1, 1], [], []>} : vector<8x128xf32>, vector<128x512xf32>, vector<8x512xf32> -> vector<8x512xf32>
    %439 = arith.addf %436, %438 : vector<8x512xf32>
    %440 = vector.extract_strided_slice %439 {offsets = [0, 0], sizes = [8, 128], strides = [1, 1]} : vector<8x512xf32> to vector<8x128xf32>
    %441 = arith.negf %440 : vector<8x128xf32>
    %442 = math.exp %441 : vector<8x128xf32>
    %cst_139 = arith.constant 1.000000e+00 : f32
    %443 = vector.broadcast %cst_139 : f32 to vector<8x128xf32>
    %444 = arith.addf %443, %442 : vector<8x128xf32>
    %445 = arith.divf %443, %444 : vector<8x128xf32>
    %446 = vector.extract_strided_slice %439 {offsets = [0, 128], sizes = [8, 128], strides = [1, 1]} : vector<8x512xf32> to vector<8x128xf32>
    %447 = arith.negf %446 : vector<8x128xf32>
    %448 = math.exp %447 : vector<8x128xf32>
    %cst_140 = arith.constant 1.000000e+00 : f32
    %449 = vector.broadcast %cst_140 : f32 to vector<8x128xf32>
    %450 = arith.addf %449, %448 : vector<8x128xf32>
    %451 = arith.divf %449, %450 : vector<8x128xf32>
    %452 = vector.extract_strided_slice %439 {offsets = [0, 256], sizes = [8, 128], strides = [1, 1]} : vector<8x512xf32> to vector<8x128xf32>
    %453 = math.tanh %452 : vector<8x128xf32>
    %454 = vector.extract_strided_slice %439 {offsets = [0, 384], sizes = [8, 128], strides = [1, 1]} : vector<8x512xf32> to vector<8x128xf32>
    %455 = arith.negf %454 : vector<8x128xf32>
    %456 = math.exp %455 : vector<8x128xf32>
    %cst_141 = arith.constant 1.000000e+00 : f32
    %457 = vector.broadcast %cst_141 : f32 to vector<8x128xf32>
    %458 = arith.addf %457, %456 : vector<8x128xf32>
    %459 = arith.divf %457, %458 : vector<8x128xf32>
    %460 = arith.mulf %451, %426 : vector<8x128xf32>
    %461 = arith.mulf %445, %453 : vector<8x128xf32>
    %462 = arith.addf %460, %461 : vector<8x128xf32>
    %463 = math.tanh %462 : vector<8x128xf32>
    %464 = arith.mulf %459, %463 : vector<8x128xf32>
    %c8_i32_142 = arith.constant 8 : i32
    %465 = arith.muli %c4_i32_133, %c8_i32_142 : i32
    %466 = tpu.assume_multiple %465, 8 : i32
    %467 = arith.index_cast %466 : i32 to index
    %c0_143 = arith.constant 0 : index
    %468 = vector.load %arg15[%467, %c0_143] : memref<64x128xf32, #tpu.memory_space<vmem>>, vector<8x128xf32>
    tpu.vector_store %arg15[%467, %c0_143], %464 {strides = array<i32>} : memref<64x128xf32, #tpu.memory_space<vmem>>, vector<8x128xf32>,
    %c5_i32_144 = arith.constant 5 : i32
    %c8_i32_145 = arith.constant 8 : i32
    %469 = arith.muli %c5_i32_144, %c8_i32_145 : i32
    %470 = tpu.assume_multiple %469, 8 : i32
    %471 = arith.index_cast %470 : i32 to index
    %c0_146 = arith.constant 0 : index
    %472 = vector.load %arg14[%471, %c0_146] : memref<64x512xf32, #tpu.memory_space<vmem>>, vector<8x512xf32>
    %c0_147 = arith.constant 0 : index
    %c0_148 = arith.constant 0 : index
    %473 = vector.load %arg4[%c0_147, %c0_148] : memref<128x512xf32, #tpu.memory_space<vmem>>, vector<128x512xf32>
    %cst_149 = arith.constant dense<0.000000e+00> : vector<8x512xf32>
    %474 = tpu.matmul %464, %473, %cst_149 {dimension_numbers = #tpu.dot_dimension_numbers<[1], [0], [0], [1], [0, 0, 1, 1], [], []>} : vector<8x128xf32>, vector<128x512xf32>, vector<8x512xf32> -> vector<8x512xf32>
    %475 = arith.addf %472, %474 : vector<8x512xf32>
    %476 = vector.extract_strided_slice %475 {offsets = [0, 0], sizes = [8, 128], strides = [1, 1]} : vector<8x512xf32> to vector<8x128xf32>
    %477 = arith.negf %476 : vector<8x128xf32>
    %478 = math.exp %477 : vector<8x128xf32>
    %cst_150 = arith.constant 1.000000e+00 : f32
    %479 = vector.broadcast %cst_150 : f32 to vector<8x128xf32>
    %480 = arith.addf %479, %478 : vector<8x128xf32>
    %481 = arith.divf %479, %480 : vector<8x128xf32>
    %482 = vector.extract_strided_slice %475 {offsets = [0, 128], sizes = [8, 128], strides = [1, 1]} : vector<8x512xf32> to vector<8x128xf32>
    %483 = arith.negf %482 : vector<8x128xf32>
    %484 = math.exp %483 : vector<8x128xf32>
    %cst_151 = arith.constant 1.000000e+00 : f32
    %485 = vector.broadcast %cst_151 : f32 to vector<8x128xf32>
    %486 = arith.addf %485, %484 : vector<8x128xf32>
    %487 = arith.divf %485, %486 : vector<8x128xf32>
    %488 = vector.extract_strided_slice %475 {offsets = [0, 256], sizes = [8, 128], strides = [1, 1]} : vector<8x512xf32> to vector<8x128xf32>
    %489 = math.tanh %488 : vector<8x128xf32>
    %490 = vector.extract_strided_slice %475 {offsets = [0, 384], sizes = [8, 128], strides = [1, 1]} : vector<8x512xf32> to vector<8x128xf32>
    %491 = arith.negf %490 : vector<8x128xf32>
    %492 = math.exp %491 : vector<8x128xf32>
    %cst_152 = arith.constant 1.000000e+00 : f32
    %493 = vector.broadcast %cst_152 : f32 to vector<8x128xf32>
    %494 = arith.addf %493, %492 : vector<8x128xf32>
    %495 = arith.divf %493, %494 : vector<8x128xf32>
    %496 = arith.mulf %487, %462 : vector<8x128xf32>
    %497 = arith.mulf %481, %489 : vector<8x128xf32>
    %498 = arith.addf %496, %497 : vector<8x128xf32>
    %499 = math.tanh %498 : vector<8x128xf32>
    %500 = arith.mulf %495, %499 : vector<8x128xf32>
    %c8_i32_153 = arith.constant 8 : i32
    %501 = arith.muli %c5_i32_144, %c8_i32_153 : i32
    %502 = tpu.assume_multiple %501, 8 : i32
    %503 = arith.index_cast %502 : i32 to index
    %c0_154 = arith.constant 0 : index
    %504 = vector.load %arg15[%503, %c0_154] : memref<64x128xf32, #tpu.memory_space<vmem>>, vector<8x128xf32>
    tpu.vector_store %arg15[%503, %c0_154], %500 {strides = array<i32>} : memref<64x128xf32, #tpu.memory_space<vmem>>, vector<8x128xf32>,
    %c6_i32_155 = arith.constant 6 : i32
    %c8_i32_156 = arith.constant 8 : i32
    %505 = arith.muli %c6_i32_155, %c8_i32_156 : i32
    %506 = tpu.assume_multiple %505, 8 : i32
    %507 = arith.index_cast %506 : i32 to index
    %c0_157 = arith.constant 0 : index
    %508 = vector.load %arg14[%507, %c0_157] : memref<64x512xf32, #tpu.memory_space<vmem>>, vector<8x512xf32>
    %c0_158 = arith.constant 0 : index
    %c0_159 = arith.constant 0 : index
    %509 = vector.load %arg4[%c0_158, %c0_159] : memref<128x512xf32, #tpu.memory_space<vmem>>, vector<128x512xf32>
    %cst_160 = arith.constant dense<0.000000e+00> : vector<8x512xf32>
    %510 = tpu.matmul %500, %509, %cst_160 {dimension_numbers = #tpu.dot_dimension_numbers<[1], [0], [0], [1], [0, 0, 1, 1], [], []>} : vector<8x128xf32>, vector<128x512xf32>, vector<8x512xf32> -> vector<8x512xf32>
    %511 = arith.addf %508, %510 : vector<8x512xf32>
    %512 = vector.extract_strided_slice %511 {offsets = [0, 0], sizes = [8, 128], strides = [1, 1]} : vector<8x512xf32> to vector<8x128xf32>
    %513 = arith.negf %512 : vector<8x128xf32>
    %514 = math.exp %513 : vector<8x128xf32>
    %cst_161 = arith.constant 1.000000e+00 : f32
    %515 = vector.broadcast %cst_161 : f32 to vector<8x128xf32>
    %516 = arith.addf %515, %514 : vector<8x128xf32>
    %517 = arith.divf %515, %516 : vector<8x128xf32>
    %518 = vector.extract_strided_slice %511 {offsets = [0, 128], sizes = [8, 128], strides = [1, 1]} : vector<8x512xf32> to vector<8x128xf32>
    %519 = arith.negf %518 : vector<8x128xf32>
    %520 = math.exp %519 : vector<8x128xf32>
    %cst_162 = arith.constant 1.000000e+00 : f32
    %521 = vector.broadcast %cst_162 : f32 to vector<8x128xf32>
    %522 = arith.addf %521, %520 : vector<8x128xf32>
    %523 = arith.divf %521, %522 : vector<8x128xf32>
    %524 = vector.extract_strided_slice %511 {offsets = [0, 256], sizes = [8, 128], strides = [1, 1]} : vector<8x512xf32> to vector<8x128xf32>
    %525 = math.tanh %524 : vector<8x128xf32>
    %526 = vector.extract_strided_slice %511 {offsets = [0, 384], sizes = [8, 128], strides = [1, 1]} : vector<8x512xf32> to vector<8x128xf32>
    %527 = arith.negf %526 : vector<8x128xf32>
    %528 = math.exp %527 : vector<8x128xf32>
    %cst_163 = arith.constant 1.000000e+00 : f32
    %529 = vector.broadcast %cst_163 : f32 to vector<8x128xf32>
    %530 = arith.addf %529, %528 : vector<8x128xf32>
    %531 = arith.divf %529, %530 : vector<8x128xf32>
    %532 = arith.mulf %523, %498 : vector<8x128xf32>
    %533 = arith.mulf %517, %525 : vector<8x128xf32>
    %534 = arith.addf %532, %533 : vector<8x128xf32>
    %535 = math.tanh %534 : vector<8x128xf32>
    %536 = arith.mulf %531, %535 : vector<8x128xf32>
    %c8_i32_164 = arith.constant 8 : i32
    %537 = arith.muli %c6_i32_155, %c8_i32_164 : i32
    %538 = tpu.assume_multiple %537, 8 : i32
    %539 = arith.index_cast %538 : i32 to index
    %c0_165 = arith.constant 0 : index
    %540 = vector.load %arg15[%539, %c0_165] : memref<64x128xf32, #tpu.memory_space<vmem>>, vector<8x128xf32>
    tpu.vector_store %arg15[%539, %c0_165], %536 {strides = array<i32>} : memref<64x128xf32, #tpu.memory_space<vmem>>, vector<8x128xf32>,
    %c7_i32_166 = arith.constant 7 : i32
    %c8_i32_167 = arith.constant 8 : i32
    %541 = arith.muli %c7_i32_166, %c8_i32_167 : i32
    %542 = tpu.assume_multiple %541, 8 : i32
    %543 = arith.index_cast %542 : i32 to index
    %c0_168 = arith.constant 0 : index
    %544 = vector.load %arg14[%543, %c0_168] : memref<64x512xf32, #tpu.memory_space<vmem>>, vector<8x512xf32>
    %c0_169 = arith.constant 0 : index
    %c0_170 = arith.constant 0 : index
    %545 = vector.load %arg4[%c0_169, %c0_170] : memref<128x512xf32, #tpu.memory_space<vmem>>, vector<128x512xf32>
    %cst_171 = arith.constant dense<0.000000e+00> : vector<8x512xf32>
    %546 = tpu.matmul %536, %545, %cst_171 {dimension_numbers = #tpu.dot_dimension_numbers<[1], [0], [0], [1], [0, 0, 1, 1], [], []>} : vector<8x128xf32>, vector<128x512xf32>, vector<8x512xf32> -> vector<8x512xf32>
    %547 = arith.addf %544, %546 : vector<8x512xf32>
    %548 = vector.extract_strided_slice %547 {offsets = [0, 0], sizes = [8, 128], strides = [1, 1]} : vector<8x512xf32> to vector<8x128xf32>
    %549 = arith.negf %548 : vector<8x128xf32>
    %550 = math.exp %549 : vector<8x128xf32>
    %cst_172 = arith.constant 1.000000e+00 : f32
    %551 = vector.broadcast %cst_172 : f32 to vector<8x128xf32>
    %552 = arith.addf %551, %550 : vector<8x128xf32>
    %553 = arith.divf %551, %552 : vector<8x128xf32>
    %554 = vector.extract_strided_slice %547 {offsets = [0, 128], sizes = [8, 128], strides = [1, 1]} : vector<8x512xf32> to vector<8x128xf32>
    %555 = arith.negf %554 : vector<8x128xf32>
    %556 = math.exp %555 : vector<8x128xf32>
    %cst_173 = arith.constant 1.000000e+00 : f32
    %557 = vector.broadcast %cst_173 : f32 to vector<8x128xf32>
    %558 = arith.addf %557, %556 : vector<8x128xf32>
    %559 = arith.divf %557, %558 : vector<8x128xf32>
    %560 = vector.extract_strided_slice %547 {offsets = [0, 256], sizes = [8, 128], strides = [1, 1]} : vector<8x512xf32> to vector<8x128xf32>
    %561 = math.tanh %560 : vector<8x128xf32>
    %562 = vector.extract_strided_slice %547 {offsets = [0, 384], sizes = [8, 128], strides = [1, 1]} : vector<8x512xf32> to vector<8x128xf32>
    %563 = arith.negf %562 : vector<8x128xf32>
    %564 = math.exp %563 : vector<8x128xf32>
    %cst_174 = arith.constant 1.000000e+00 : f32
    %565 = vector.broadcast %cst_174 : f32 to vector<8x128xf32>
    %566 = arith.addf %565, %564 : vector<8x128xf32>
    %567 = arith.divf %565, %566 : vector<8x128xf32>
    %568 = arith.mulf %559, %534 : vector<8x128xf32>
    %569 = arith.mulf %553, %561 : vector<8x128xf32>
    %570 = arith.addf %568, %569 : vector<8x128xf32>
    %571 = math.tanh %570 : vector<8x128xf32>
    %572 = arith.mulf %567, %571 : vector<8x128xf32>
    %c8_i32_175 = arith.constant 8 : i32
    %573 = arith.muli %c7_i32_166, %c8_i32_175 : i32
    %574 = tpu.assume_multiple %573, 8 : i32
    %575 = arith.index_cast %574 : i32 to index
    %c0_176 = arith.constant 0 : index
    %576 = vector.load %arg15[%575, %c0_176] : memref<64x128xf32, #tpu.memory_space<vmem>>, vector<8x128xf32>
    tpu.vector_store %arg15[%575, %c0_176], %572 {strides = array<i32>} : memref<64x128xf32, #tpu.memory_space<vmem>>, vector<8x128xf32>,
    %c8_i32_177 = arith.constant 8 : i32
    %c0_178 = arith.constant 0 : index
    %c0_179 = arith.constant 0 : index
    %577 = vector.load %arg15[%c0_178, %c0_179] : memref<64x128xf32, #tpu.memory_space<vmem>>, vector<64x128xf32>
    %c0_180 = arith.constant 0 : index
    %c0_181 = arith.constant 0 : index
    %578 = vector.load %arg6[%c0_180, %c0_181] : memref<128x512xf32, #tpu.memory_space<vmem>>, vector<128x512xf32>
    %cst_182 = arith.constant dense<0.000000e+00> : vector<64x512xf32>
    %579 = tpu.matmul %577, %578, %cst_182 {dimension_numbers = #tpu.dot_dimension_numbers<[1], [0], [0], [1], [0, 0, 1, 1], [], []>} : vector<64x128xf32>, vector<128x512xf32>, vector<64x512xf32> -> vector<64x512xf32>
    %c0_183 = arith.constant 0 : index
    %c0_184 = arith.constant 0 : index
    %580 = vector.load %arg8[%c0_183, %c0_184] : memref<1x512xf32, #tpu.memory_space<vmem>>, vector<1x512xf32>
    %581 = vector.broadcast %580 : vector<1x512xf32> to vector<64x512xf32>
    %582 = arith.addf %579, %581 : vector<64x512xf32>
    %c0_185 = arith.constant 0 : index
    %c0_186 = arith.constant 0 : index
    %583 = vector.load %arg14[%c0_185, %c0_186] : memref<64x512xf32, #tpu.memory_space<vmem>>, vector<64x512xf32>
    tpu.vector_store %arg14[%c0_185, %c0_186], %582 {strides = array<i32>} : memref<64x512xf32, #tpu.memory_space<vmem>>, vector<64x512xf32>,
    %cst_187 = arith.constant 0.000000e+00 : f32
    %584 = vector.broadcast %cst_187 : f32 to vector<8x128xf32>
    %c0_i32_188 = arith.constant 0 : i32
    %c8_i32_189 = arith.constant 8 : i32
    %585 = arith.muli %c0_i32_188, %c8_i32_189 : i32
    %586 = tpu.assume_multiple %585, 8 : i32
    %587 = arith.index_cast %586 : i32 to index
    %c0_190 = arith.constant 0 : index
    %588 = vector.load %arg14[%587, %c0_190] : memref<64x512xf32, #tpu.memory_space<vmem>>, vector<8x512xf32>
    %c0_191 = arith.constant 0 : index
    %c0_192 = arith.constant 0 : index
    %589 = vector.load %arg7[%c0_191, %c0_192] : memref<128x512xf32, #tpu.memory_space<vmem>>, vector<128x512xf32>
    %cst_193 = arith.constant dense<0.000000e+00> : vector<8x512xf32>
    %590 = tpu.matmul %584, %589, %cst_193 {dimension_numbers = #tpu.dot_dimension_numbers<[1], [0], [0], [1], [0, 0, 1, 1], [], []>} : vector<8x128xf32>, vector<128x512xf32>, vector<8x512xf32> -> vector<8x512xf32>
    %591 = arith.addf %588, %590 : vector<8x512xf32>
    %592 = vector.extract_strided_slice %591 {offsets = [0, 0], sizes = [8, 128], strides = [1, 1]} : vector<8x512xf32> to vector<8x128xf32>
    %593 = arith.negf %592 : vector<8x128xf32>
    %594 = math.exp %593 : vector<8x128xf32>
    %cst_194 = arith.constant 1.000000e+00 : f32
    %595 = vector.broadcast %cst_194 : f32 to vector<8x128xf32>
    %596 = arith.addf %595, %594 : vector<8x128xf32>
    %597 = arith.divf %595, %596 : vector<8x128xf32>
    %598 = vector.extract_strided_slice %591 {offsets = [0, 128], sizes = [8, 128], strides = [1, 1]} : vector<8x512xf32> to vector<8x128xf32>
    %599 = arith.negf %598 : vector<8x128xf32>
    %600 = math.exp %599 : vector<8x128xf32>
    %cst_195 = arith.constant 1.000000e+00 : f32
    %601 = vector.broadcast %cst_195 : f32 to vector<8x128xf32>
    %602 = arith.addf %601, %600 : vector<8x128xf32>
    %603 = arith.divf %601, %602 : vector<8x128xf32>
    %604 = vector.extract_strided_slice %591 {offsets = [0, 256], sizes = [8, 128], strides = [1, 1]} : vector<8x512xf32> to vector<8x128xf32>
    %605 = math.tanh %604 : vector<8x128xf32>
    %606 = vector.extract_strided_slice %591 {offsets = [0, 384], sizes = [8, 128], strides = [1, 1]} : vector<8x512xf32> to vector<8x128xf32>
    %607 = arith.negf %606 : vector<8x128xf32>
    %608 = math.exp %607 : vector<8x128xf32>
    %cst_196 = arith.constant 1.000000e+00 : f32
    %609 = vector.broadcast %cst_196 : f32 to vector<8x128xf32>
    %610 = arith.addf %609, %608 : vector<8x128xf32>
    %611 = arith.divf %609, %610 : vector<8x128xf32>
    %612 = arith.mulf %603, %584 : vector<8x128xf32>
    %613 = arith.mulf %597, %605 : vector<8x128xf32>
    %614 = arith.addf %612, %613 : vector<8x128xf32>
    %615 = math.tanh %614 : vector<8x128xf32>
    %616 = arith.mulf %611, %615 : vector<8x128xf32>
    %c1_i32_197 = arith.constant 1 : i32
    %c8_i32_198 = arith.constant 8 : i32
    %617 = arith.muli %c1_i32_197, %c8_i32_198 : i32
    %618 = tpu.assume_multiple %617, 8 : i32
    %619 = arith.index_cast %618 : i32 to index
    %c0_199 = arith.constant 0 : index
    %620 = vector.load %arg14[%619, %c0_199] : memref<64x512xf32, #tpu.memory_space<vmem>>, vector<8x512xf32>
    %c0_200 = arith.constant 0 : index
    %c0_201 = arith.constant 0 : index
    %621 = vector.load %arg7[%c0_200, %c0_201] : memref<128x512xf32, #tpu.memory_space<vmem>>, vector<128x512xf32>
    %cst_202 = arith.constant dense<0.000000e+00> : vector<8x512xf32>
    %622 = tpu.matmul %616, %621, %cst_202 {dimension_numbers = #tpu.dot_dimension_numbers<[1], [0], [0], [1], [0, 0, 1, 1], [], []>} : vector<8x128xf32>, vector<128x512xf32>, vector<8x512xf32> -> vector<8x512xf32>
    %623 = arith.addf %620, %622 : vector<8x512xf32>
    %624 = vector.extract_strided_slice %623 {offsets = [0, 0], sizes = [8, 128], strides = [1, 1]} : vector<8x512xf32> to vector<8x128xf32>
    %625 = arith.negf %624 : vector<8x128xf32>
    %626 = math.exp %625 : vector<8x128xf32>
    %cst_203 = arith.constant 1.000000e+00 : f32
    %627 = vector.broadcast %cst_203 : f32 to vector<8x128xf32>
    %628 = arith.addf %627, %626 : vector<8x128xf32>
    %629 = arith.divf %627, %628 : vector<8x128xf32>
    %630 = vector.extract_strided_slice %623 {offsets = [0, 128], sizes = [8, 128], strides = [1, 1]} : vector<8x512xf32> to vector<8x128xf32>
    %631 = arith.negf %630 : vector<8x128xf32>
    %632 = math.exp %631 : vector<8x128xf32>
    %cst_204 = arith.constant 1.000000e+00 : f32
    %633 = vector.broadcast %cst_204 : f32 to vector<8x128xf32>
    %634 = arith.addf %633, %632 : vector<8x128xf32>
    %635 = arith.divf %633, %634 : vector<8x128xf32>
    %636 = vector.extract_strided_slice %623 {offsets = [0, 256], sizes = [8, 128], strides = [1, 1]} : vector<8x512xf32> to vector<8x128xf32>
    %637 = math.tanh %636 : vector<8x128xf32>
    %638 = vector.extract_strided_slice %623 {offsets = [0, 384], sizes = [8, 128], strides = [1, 1]} : vector<8x512xf32> to vector<8x128xf32>
    %639 = arith.negf %638 : vector<8x128xf32>
    %640 = math.exp %639 : vector<8x128xf32>
    %cst_205 = arith.constant 1.000000e+00 : f32
    %641 = vector.broadcast %cst_205 : f32 to vector<8x128xf32>
    %642 = arith.addf %641, %640 : vector<8x128xf32>
    %643 = arith.divf %641, %642 : vector<8x128xf32>
    %644 = arith.mulf %635, %614 : vector<8x128xf32>
    %645 = arith.mulf %629, %637 : vector<8x128xf32>
    %646 = arith.addf %644, %645 : vector<8x128xf32>
    %647 = math.tanh %646 : vector<8x128xf32>
    %648 = arith.mulf %643, %647 : vector<8x128xf32>
    %c2_i32_206 = arith.constant 2 : i32
    %c8_i32_207 = arith.constant 8 : i32
    %649 = arith.muli %c2_i32_206, %c8_i32_207 : i32
    %650 = tpu.assume_multiple %649, 8 : i32
    %651 = arith.index_cast %650 : i32 to index
    %c0_208 = arith.constant 0 : index
    %652 = vector.load %arg14[%651, %c0_208] : memref<64x512xf32, #tpu.memory_space<vmem>>, vector<8x512xf32>
    %c0_209 = arith.constant 0 : index
    %c0_210 = arith.constant 0 : index
    %653 = vector.load %arg7[%c0_209, %c0_210] : memref<128x512xf32, #tpu.memory_space<vmem>>, vector<128x512xf32>
    %cst_211 = arith.constant dense<0.000000e+00> : vector<8x512xf32>
    %654 = tpu.matmul %648, %653, %cst_211 {dimension_numbers = #tpu.dot_dimension_numbers<[1], [0], [0], [1], [0, 0, 1, 1], [], []>} : vector<8x128xf32>, vector<128x512xf32>, vector<8x512xf32> -> vector<8x512xf32>
    %655 = arith.addf %652, %654 : vector<8x512xf32>
    %656 = vector.extract_strided_slice %655 {offsets = [0, 0], sizes = [8, 128], strides = [1, 1]} : vector<8x512xf32> to vector<8x128xf32>
    %657 = arith.negf %656 : vector<8x128xf32>
    %658 = math.exp %657 : vector<8x128xf32>
    %cst_212 = arith.constant 1.000000e+00 : f32
    %659 = vector.broadcast %cst_212 : f32 to vector<8x128xf32>
    %660 = arith.addf %659, %658 : vector<8x128xf32>
    %661 = arith.divf %659, %660 : vector<8x128xf32>
    %662 = vector.extract_strided_slice %655 {offsets = [0, 128], sizes = [8, 128], strides = [1, 1]} : vector<8x512xf32> to vector<8x128xf32>
    %663 = arith.negf %662 : vector<8x128xf32>
    %664 = math.exp %663 : vector<8x128xf32>
    %cst_213 = arith.constant 1.000000e+00 : f32
    %665 = vector.broadcast %cst_213 : f32 to vector<8x128xf32>
    %666 = arith.addf %665, %664 : vector<8x128xf32>
    %667 = arith.divf %665, %666 : vector<8x128xf32>
    %668 = vector.extract_strided_slice %655 {offsets = [0, 256], sizes = [8, 128], strides = [1, 1]} : vector<8x512xf32> to vector<8x128xf32>
    %669 = math.tanh %668 : vector<8x128xf32>
    %670 = vector.extract_strided_slice %655 {offsets = [0, 384], sizes = [8, 128], strides = [1, 1]} : vector<8x512xf32> to vector<8x128xf32>
    %671 = arith.negf %670 : vector<8x128xf32>
    %672 = math.exp %671 : vector<8x128xf32>
    %cst_214 = arith.constant 1.000000e+00 : f32
    %673 = vector.broadcast %cst_214 : f32 to vector<8x128xf32>
    %674 = arith.addf %673, %672 : vector<8x128xf32>
    %675 = arith.divf %673, %674 : vector<8x128xf32>
    %676 = arith.mulf %667, %646 : vector<8x128xf32>
    %677 = arith.mulf %661, %669 : vector<8x128xf32>
    %678 = arith.addf %676, %677 : vector<8x128xf32>
    %679 = math.tanh %678 : vector<8x128xf32>
    %680 = arith.mulf %675, %679 : vector<8x128xf32>
    %c3_i32_215 = arith.constant 3 : i32
    %c8_i32_216 = arith.constant 8 : i32
    %681 = arith.muli %c3_i32_215, %c8_i32_216 : i32
    %682 = tpu.assume_multiple %681, 8 : i32
    %683 = arith.index_cast %682 : i32 to index
    %c0_217 = arith.constant 0 : index
    %684 = vector.load %arg14[%683, %c0_217] : memref<64x512xf32, #tpu.memory_space<vmem>>, vector<8x512xf32>
    %c0_218 = arith.constant 0 : index
    %c0_219 = arith.constant 0 : index
    %685 = vector.load %arg7[%c0_218, %c0_219] : memref<128x512xf32, #tpu.memory_space<vmem>>, vector<128x512xf32>
    %cst_220 = arith.constant dense<0.000000e+00> : vector<8x512xf32>
    %686 = tpu.matmul %680, %685, %cst_220 {dimension_numbers = #tpu.dot_dimension_numbers<[1], [0], [0], [1], [0, 0, 1, 1], [], []>} : vector<8x128xf32>, vector<128x512xf32>, vector<8x512xf32> -> vector<8x512xf32>
    %687 = arith.addf %684, %686 : vector<8x512xf32>
    %688 = vector.extract_strided_slice %687 {offsets = [0, 0], sizes = [8, 128], strides = [1, 1]} : vector<8x512xf32> to vector<8x128xf32>
    %689 = arith.negf %688 : vector<8x128xf32>
    %690 = math.exp %689 : vector<8x128xf32>
    %cst_221 = arith.constant 1.000000e+00 : f32
    %691 = vector.broadcast %cst_221 : f32 to vector<8x128xf32>
    %692 = arith.addf %691, %690 : vector<8x128xf32>
    %693 = arith.divf %691, %692 : vector<8x128xf32>
    %694 = vector.extract_strided_slice %687 {offsets = [0, 128], sizes = [8, 128], strides = [1, 1]} : vector<8x512xf32> to vector<8x128xf32>
    %695 = arith.negf %694 : vector<8x128xf32>
    %696 = math.exp %695 : vector<8x128xf32>
    %cst_222 = arith.constant 1.000000e+00 : f32
    %697 = vector.broadcast %cst_222 : f32 to vector<8x128xf32>
    %698 = arith.addf %697, %696 : vector<8x128xf32>
    %699 = arith.divf %697, %698 : vector<8x128xf32>
    %700 = vector.extract_strided_slice %687 {offsets = [0, 256], sizes = [8, 128], strides = [1, 1]} : vector<8x512xf32> to vector<8x128xf32>
    %701 = math.tanh %700 : vector<8x128xf32>
    %702 = vector.extract_strided_slice %687 {offsets = [0, 384], sizes = [8, 128], strides = [1, 1]} : vector<8x512xf32> to vector<8x128xf32>
    %703 = arith.negf %702 : vector<8x128xf32>
    %704 = math.exp %703 : vector<8x128xf32>
    %cst_223 = arith.constant 1.000000e+00 : f32
    %705 = vector.broadcast %cst_223 : f32 to vector<8x128xf32>
    %706 = arith.addf %705, %704 : vector<8x128xf32>
    %707 = arith.divf %705, %706 : vector<8x128xf32>
    %708 = arith.mulf %699, %678 : vector<8x128xf32>
    %709 = arith.mulf %693, %701 : vector<8x128xf32>
    %710 = arith.addf %708, %709 : vector<8x128xf32>
    %711 = math.tanh %710 : vector<8x128xf32>
    %712 = arith.mulf %707, %711 : vector<8x128xf32>
    %c4_i32_224 = arith.constant 4 : i32
    %c8_i32_225 = arith.constant 8 : i32
    %713 = arith.muli %c4_i32_224, %c8_i32_225 : i32
    %714 = tpu.assume_multiple %713, 8 : i32
    %715 = arith.index_cast %714 : i32 to index
    %c0_226 = arith.constant 0 : index
    %716 = vector.load %arg14[%715, %c0_226] : memref<64x512xf32, #tpu.memory_space<vmem>>, vector<8x512xf32>
    %c0_227 = arith.constant 0 : index
    %c0_228 = arith.constant 0 : index
    %717 = vector.load %arg7[%c0_227, %c0_228] : memref<128x512xf32, #tpu.memory_space<vmem>>, vector<128x512xf32>
    %cst_229 = arith.constant dense<0.000000e+00> : vector<8x512xf32>
    %718 = tpu.matmul %712, %717, %cst_229 {dimension_numbers = #tpu.dot_dimension_numbers<[1], [0], [0], [1], [0, 0, 1, 1], [], []>} : vector<8x128xf32>, vector<128x512xf32>, vector<8x512xf32> -> vector<8x512xf32>
    %719 = arith.addf %716, %718 : vector<8x512xf32>
    %720 = vector.extract_strided_slice %719 {offsets = [0, 0], sizes = [8, 128], strides = [1, 1]} : vector<8x512xf32> to vector<8x128xf32>
    %721 = arith.negf %720 : vector<8x128xf32>
    %722 = math.exp %721 : vector<8x128xf32>
    %cst_230 = arith.constant 1.000000e+00 : f32
    %723 = vector.broadcast %cst_230 : f32 to vector<8x128xf32>
    %724 = arith.addf %723, %722 : vector<8x128xf32>
    %725 = arith.divf %723, %724 : vector<8x128xf32>
    %726 = vector.extract_strided_slice %719 {offsets = [0, 128], sizes = [8, 128], strides = [1, 1]} : vector<8x512xf32> to vector<8x128xf32>
    %727 = arith.negf %726 : vector<8x128xf32>
    %728 = math.exp %727 : vector<8x128xf32>
    %cst_231 = arith.constant 1.000000e+00 : f32
    %729 = vector.broadcast %cst_231 : f32 to vector<8x128xf32>
    %730 = arith.addf %729, %728 : vector<8x128xf32>
    %731 = arith.divf %729, %730 : vector<8x128xf32>
    %732 = vector.extract_strided_slice %719 {offsets = [0, 256], sizes = [8, 128], strides = [1, 1]} : vector<8x512xf32> to vector<8x128xf32>
    %733 = math.tanh %732 : vector<8x128xf32>
    %734 = vector.extract_strided_slice %719 {offsets = [0, 384], sizes = [8, 128], strides = [1, 1]} : vector<8x512xf32> to vector<8x128xf32>
    %735 = arith.negf %734 : vector<8x128xf32>
    %736 = math.exp %735 : vector<8x128xf32>
    %cst_232 = arith.constant 1.000000e+00 : f32
    %737 = vector.broadcast %cst_232 : f32 to vector<8x128xf32>
    %738 = arith.addf %737, %736 : vector<8x128xf32>
    %739 = arith.divf %737, %738 : vector<8x128xf32>
    %740 = arith.mulf %731, %710 : vector<8x128xf32>
    %741 = arith.mulf %725, %733 : vector<8x128xf32>
    %742 = arith.addf %740, %741 : vector<8x128xf32>
    %743 = math.tanh %742 : vector<8x128xf32>
    %744 = arith.mulf %739, %743 : vector<8x128xf32>
    %c5_i32_233 = arith.constant 5 : i32
    %c8_i32_234 = arith.constant 8 : i32
    %745 = arith.muli %c5_i32_233, %c8_i32_234 : i32
    %746 = tpu.assume_multiple %745, 8 : i32
    %747 = arith.index_cast %746 : i32 to index
    %c0_235 = arith.constant 0 : index
    %748 = vector.load %arg14[%747, %c0_235] : memref<64x512xf32, #tpu.memory_space<vmem>>, vector<8x512xf32>
    %c0_236 = arith.constant 0 : index
    %c0_237 = arith.constant 0 : index
    %749 = vector.load %arg7[%c0_236, %c0_237] : memref<128x512xf32, #tpu.memory_space<vmem>>, vector<128x512xf32>
    %cst_238 = arith.constant dense<0.000000e+00> : vector<8x512xf32>
    %750 = tpu.matmul %744, %749, %cst_238 {dimension_numbers = #tpu.dot_dimension_numbers<[1], [0], [0], [1], [0, 0, 1, 1], [], []>} : vector<8x128xf32>, vector<128x512xf32>, vector<8x512xf32> -> vector<8x512xf32>
    %751 = arith.addf %748, %750 : vector<8x512xf32>
    %752 = vector.extract_strided_slice %751 {offsets = [0, 0], sizes = [8, 128], strides = [1, 1]} : vector<8x512xf32> to vector<8x128xf32>
    %753 = arith.negf %752 : vector<8x128xf32>
    %754 = math.exp %753 : vector<8x128xf32>
    %cst_239 = arith.constant 1.000000e+00 : f32
    %755 = vector.broadcast %cst_239 : f32 to vector<8x128xf32>
    %756 = arith.addf %755, %754 : vector<8x128xf32>
    %757 = arith.divf %755, %756 : vector<8x128xf32>
    %758 = vector.extract_strided_slice %751 {offsets = [0, 128], sizes = [8, 128], strides = [1, 1]} : vector<8x512xf32> to vector<8x128xf32>
    %759 = arith.negf %758 : vector<8x128xf32>
    %760 = math.exp %759 : vector<8x128xf32>
    %cst_240 = arith.constant 1.000000e+00 : f32
    %761 = vector.broadcast %cst_240 : f32 to vector<8x128xf32>
    %762 = arith.addf %761, %760 : vector<8x128xf32>
    %763 = arith.divf %761, %762 : vector<8x128xf32>
    %764 = vector.extract_strided_slice %751 {offsets = [0, 256], sizes = [8, 128], strides = [1, 1]} : vector<8x512xf32> to vector<8x128xf32>
    %765 = math.tanh %764 : vector<8x128xf32>
    %766 = vector.extract_strided_slice %751 {offsets = [0, 384], sizes = [8, 128], strides = [1, 1]} : vector<8x512xf32> to vector<8x128xf32>
    %767 = arith.negf %766 : vector<8x128xf32>
    %768 = math.exp %767 : vector<8x128xf32>
    %cst_241 = arith.constant 1.000000e+00 : f32
    %769 = vector.broadcast %cst_241 : f32 to vector<8x128xf32>
    %770 = arith.addf %769, %768 : vector<8x128xf32>
    %771 = arith.divf %769, %770 : vector<8x128xf32>
    %772 = arith.mulf %763, %742 : vector<8x128xf32>
    %773 = arith.mulf %757, %765 : vector<8x128xf32>
    %774 = arith.addf %772, %773 : vector<8x128xf32>
    %775 = math.tanh %774 : vector<8x128xf32>
    %776 = arith.mulf %771, %775 : vector<8x128xf32>
    %c6_i32_242 = arith.constant 6 : i32
    %c8_i32_243 = arith.constant 8 : i32
    %777 = arith.muli %c6_i32_242, %c8_i32_243 : i32
    %778 = tpu.assume_multiple %777, 8 : i32
    %779 = arith.index_cast %778 : i32 to index
    %c0_244 = arith.constant 0 : index
    %780 = vector.load %arg14[%779, %c0_244] : memref<64x512xf32, #tpu.memory_space<vmem>>, vector<8x512xf32>
    %c0_245 = arith.constant 0 : index
    %c0_246 = arith.constant 0 : index
    %781 = vector.load %arg7[%c0_245, %c0_246] : memref<128x512xf32, #tpu.memory_space<vmem>>, vector<128x512xf32>
    %cst_247 = arith.constant dense<0.000000e+00> : vector<8x512xf32>
    %782 = tpu.matmul %776, %781, %cst_247 {dimension_numbers = #tpu.dot_dimension_numbers<[1], [0], [0], [1], [0, 0, 1, 1], [], []>} : vector<8x128xf32>, vector<128x512xf32>, vector<8x512xf32> -> vector<8x512xf32>
    %783 = arith.addf %780, %782 : vector<8x512xf32>
    %784 = vector.extract_strided_slice %783 {offsets = [0, 0], sizes = [8, 128], strides = [1, 1]} : vector<8x512xf32> to vector<8x128xf32>
    %785 = arith.negf %784 : vector<8x128xf32>
    %786 = math.exp %785 : vector<8x128xf32>
    %cst_248 = arith.constant 1.000000e+00 : f32
    %787 = vector.broadcast %cst_248 : f32 to vector<8x128xf32>
    %788 = arith.addf %787, %786 : vector<8x128xf32>
    %789 = arith.divf %787, %788 : vector<8x128xf32>
    %790 = vector.extract_strided_slice %783 {offsets = [0, 128], sizes = [8, 128], strides = [1, 1]} : vector<8x512xf32> to vector<8x128xf32>
    %791 = arith.negf %790 : vector<8x128xf32>
    %792 = math.exp %791 : vector<8x128xf32>
    %cst_249 = arith.constant 1.000000e+00 : f32
    %793 = vector.broadcast %cst_249 : f32 to vector<8x128xf32>
    %794 = arith.addf %793, %792 : vector<8x128xf32>
    %795 = arith.divf %793, %794 : vector<8x128xf32>
    %796 = vector.extract_strided_slice %783 {offsets = [0, 256], sizes = [8, 128], strides = [1, 1]} : vector<8x512xf32> to vector<8x128xf32>
    %797 = math.tanh %796 : vector<8x128xf32>
    %798 = vector.extract_strided_slice %783 {offsets = [0, 384], sizes = [8, 128], strides = [1, 1]} : vector<8x512xf32> to vector<8x128xf32>
    %799 = arith.negf %798 : vector<8x128xf32>
    %800 = math.exp %799 : vector<8x128xf32>
    %cst_250 = arith.constant 1.000000e+00 : f32
    %801 = vector.broadcast %cst_250 : f32 to vector<8x128xf32>
    %802 = arith.addf %801, %800 : vector<8x128xf32>
    %803 = arith.divf %801, %802 : vector<8x128xf32>
    %804 = arith.mulf %795, %774 : vector<8x128xf32>
    %805 = arith.mulf %789, %797 : vector<8x128xf32>
    %806 = arith.addf %804, %805 : vector<8x128xf32>
    %807 = math.tanh %806 : vector<8x128xf32>
    %808 = arith.mulf %803, %807 : vector<8x128xf32>
    %c7_i32_251 = arith.constant 7 : i32
    %c8_i32_252 = arith.constant 8 : i32
    %809 = arith.muli %c7_i32_251, %c8_i32_252 : i32
    %810 = tpu.assume_multiple %809, 8 : i32
    %811 = arith.index_cast %810 : i32 to index
    %c0_253 = arith.constant 0 : index
    %812 = vector.load %arg14[%811, %c0_253] : memref<64x512xf32, #tpu.memory_space<vmem>>, vector<8x512xf32>
    %c0_254 = arith.constant 0 : index
    %c0_255 = arith.constant 0 : index
    %813 = vector.load %arg7[%c0_254, %c0_255] : memref<128x512xf32, #tpu.memory_space<vmem>>, vector<128x512xf32>
    %cst_256 = arith.constant dense<0.000000e+00> : vector<8x512xf32>
    %814 = tpu.matmul %808, %813, %cst_256 {dimension_numbers = #tpu.dot_dimension_numbers<[1], [0], [0], [1], [0, 0, 1, 1], [], []>} : vector<8x128xf32>, vector<128x512xf32>, vector<8x512xf32> -> vector<8x512xf32>
    %815 = arith.addf %812, %814 : vector<8x512xf32>
    %816 = vector.extract_strided_slice %815 {offsets = [0, 0], sizes = [8, 128], strides = [1, 1]} : vector<8x512xf32> to vector<8x128xf32>
    %817 = arith.negf %816 : vector<8x128xf32>
    %818 = math.exp %817 : vector<8x128xf32>
    %cst_257 = arith.constant 1.000000e+00 : f32
    %819 = vector.broadcast %cst_257 : f32 to vector<8x128xf32>
    %820 = arith.addf %819, %818 : vector<8x128xf32>
    %821 = arith.divf %819, %820 : vector<8x128xf32>
    %822 = vector.extract_strided_slice %815 {offsets = [0, 128], sizes = [8, 128], strides = [1, 1]} : vector<8x512xf32> to vector<8x128xf32>
    %823 = arith.negf %822 : vector<8x128xf32>
    %824 = math.exp %823 : vector<8x128xf32>
    %cst_258 = arith.constant 1.000000e+00 : f32
    %825 = vector.broadcast %cst_258 : f32 to vector<8x128xf32>
    %826 = arith.addf %825, %824 : vector<8x128xf32>
    %827 = arith.divf %825, %826 : vector<8x128xf32>
    %828 = vector.extract_strided_slice %815 {offsets = [0, 256], sizes = [8, 128], strides = [1, 1]} : vector<8x512xf32> to vector<8x128xf32>
    %829 = math.tanh %828 : vector<8x128xf32>
    %830 = vector.extract_strided_slice %815 {offsets = [0, 384], sizes = [8, 128], strides = [1, 1]} : vector<8x512xf32> to vector<8x128xf32>
    %831 = arith.negf %830 : vector<8x128xf32>
    %832 = math.exp %831 : vector<8x128xf32>
    %cst_259 = arith.constant 1.000000e+00 : f32
    %833 = vector.broadcast %cst_259 : f32 to vector<8x128xf32>
    %834 = arith.addf %833, %832 : vector<8x128xf32>
    %835 = arith.divf %833, %834 : vector<8x128xf32>
    %836 = arith.mulf %827, %806 : vector<8x128xf32>
    %837 = arith.mulf %821, %829 : vector<8x128xf32>
    %838 = arith.addf %836, %837 : vector<8x128xf32>
    %839 = math.tanh %838 : vector<8x128xf32>
    %840 = arith.mulf %835, %839 : vector<8x128xf32>
    %c8_i32_260 = arith.constant 8 : i32
    %c0_261 = arith.constant 0 : index
    %c0_262 = arith.constant 0 : index
    %841 = vector.load %arg9[%c0_261, %c0_262] : memref<128x128xf32, #tpu.memory_space<vmem>>, vector<128x128xf32>
    %cst_263 = arith.constant dense<0.000000e+00> : vector<8x128xf32>
    %842 = tpu.matmul %840, %841, %cst_263 {dimension_numbers = #tpu.dot_dimension_numbers<[1], [0], [0], [1], [0, 0, 1, 1], [], []>} : vector<8x128xf32>, vector<128x128xf32>, vector<8x128xf32> -> vector<8x128xf32>
    %c0_264 = arith.constant 0 : index
    %c0_265 = arith.constant 0 : index
    %843 = vector.load %arg10[%c0_264, %c0_265] : memref<1x128xf32, #tpu.memory_space<vmem>>, vector<1x128xf32>
    %844 = vector.broadcast %843 : vector<1x128xf32> to vector<8x128xf32>
    %845 = arith.addf %842, %844 : vector<8x128xf32>
    %cst_266 = arith.constant 0.000000e+00 : f32
    %846 = vector.broadcast %cst_266 : f32 to vector<8x128xf32>
    %847 = arith.cmpf ogt, %845, %846 : vector<8x128xf32>
    %848 = math.exp %845 : vector<8x128xf32>
    %cst_267 = arith.constant 1.000000e+00 : f32
    %849 = vector.broadcast %cst_267 : f32 to vector<8x128xf32>
    %850 = arith.subf %848, %849 : vector<8x128xf32>
    %cst_268 = arith.constant 1.67326319 : f32
    %851 = vector.broadcast %cst_268 : f32 to vector<8x128xf32>
    %852 = arith.mulf %851, %850 : vector<8x128xf32>
    %853 = arith.select %847, %845, %852 : vector<8x128xi1>, vector<8x128xf32>
    %cst_269 = arith.constant 1.05070102 : f32
    %854 = vector.broadcast %cst_269 : f32 to vector<8x128xf32>
    %855 = arith.mulf %854, %853 : vector<8x128xf32>
    %c0_270 = arith.constant 0 : index
    %c0_271 = arith.constant 0 : index
    %856 = vector.load %arg11[%c0_270, %c0_271] : memref<128x128xf32, #tpu.memory_space<vmem>>, vector<128x128xf32>
    %cst_272 = arith.constant dense<0.000000e+00> : vector<8x128xf32>
    %857 = tpu.matmul %855, %856, %cst_272 {dimension_numbers = #tpu.dot_dimension_numbers<[1], [0], [0], [1], [0, 0, 1, 1], [], []>} : vector<8x128xf32>, vector<128x128xf32>, vector<8x128xf32> -> vector<8x128xf32>
    %c0_273 = arith.constant 0 : index
    %c0_274 = arith.constant 0 : index
    %858 = vector.load %arg12[%c0_273, %c0_274] : memref<1x128xf32, #tpu.memory_space<vmem>>, vector<1x128xf32>
    %859 = vector.broadcast %858 : vector<1x128xf32> to vector<8x128xf32>
    %860 = arith.addf %857, %859 : vector<8x128xf32>
    %c0_275 = arith.constant 0 : index
    %c0_276 = arith.constant 0 : index
    %861 = vector.load %arg13[%c0_275, %c0_276] : memref<8x128xf32, #tpu.memory_space<vmem>>, vector<8x128xf32>
    tpu.vector_store %arg13[%c0_275, %c0_276], %860 {strides = array<i32>} : memref<8x128xf32, #tpu.memory_space<vmem>>, vector<8x128xf32>,
    return
  }
  func.func @transform_0(%arg0: i32) -> (i32, i32, i32) {
    %c0_i32 = arith.constant 0 : i32
    %c0_i32_0 = arith.constant 0 : i32
    %c0_i32_1 = arith.constant 0 : i32
    return %c0_i32, %arg0, %c0_i32_0 : i32, i32, i32
  }
  func.func @transform_1(%arg0: i32) -> (i32, i32) {
    %c0_i32 = arith.constant 0 : i32
    %c0_i32_0 = arith.constant 0 : i32
    %c0_i32_1 = arith.constant 0 : i32
    return %c0_i32, %c0_i32_0 : i32, i32
  }
  func.func @transform_2(%arg0: i32) -> (i32, i32) {
    %c0_i32 = arith.constant 0 : i32
    %c0_i32_0 = arith.constant 0 : i32
    %c0_i32_1 = arith.constant 0 : i32
    return %c0_i32, %c0_i32_0 : i32, i32
  }
  func.func @transform_3(%arg0: i32) -> (i32, i32) {
    %c0_i32 = arith.constant 0 : i32
    %c0_i32_0 = arith.constant 0 : i32
    %c0_i32_1 = arith.constant 0 : i32
    return %c0_i32, %c0_i32_0 : i32, i32
  }
  func.func @transform_4(%arg0: i32) -> (i32, i32) {
    %c0_i32 = arith.constant 0 : i32
    %c0_i32_0 = arith.constant 0 : i32
    %c0_i32_1 = arith.constant 0 : i32
    return %c0_i32, %c0_i32_0 : i32, i32
  }
  func.func @transform_5(%arg0: i32) -> (i32, i32) {
    %c0_i32 = arith.constant 0 : i32
    %c0_i32_0 = arith.constant 0 : i32
    %c0_i32_1 = arith.constant 0 : i32
    return %c0_i32, %c0_i32_0 : i32, i32
  }
  func.func @transform_6(%arg0: i32) -> (i32, i32) {
    %c0_i32 = arith.constant 0 : i32
    %c0_i32_0 = arith.constant 0 : i32
    %c0_i32_1 = arith.constant 0 : i32
    return %c0_i32, %c0_i32_0 : i32, i32
  }
  func.func @transform_7(%arg0: i32) -> (i32, i32) {
    %c0_i32 = arith.constant 0 : i32
    %c0_i32_0 = arith.constant 0 : i32
    %c0_i32_1 = arith.constant 0 : i32
    return %c0_i32, %c0_i32_0 : i32, i32
  }
  func.func @transform_8(%arg0: i32) -> (i32, i32) {
    %c0_i32 = arith.constant 0 : i32
    %c0_i32_0 = arith.constant 0 : i32
    %c0_i32_1 = arith.constant 0 : i32
    return %c0_i32, %c0_i32_0 : i32, i32
  }
  func.func @transform_9(%arg0: i32) -> (i32, i32) {
    %c0_i32 = arith.constant 0 : i32
    %c0_i32_0 = arith.constant 0 : i32
    %c0_i32_1 = arith.constant 0 : i32
    return %c0_i32, %c0_i32_0 : i32, i32
  }
  func.func @transform_10(%arg0: i32) -> (i32, i32) {
    %c0_i32 = arith.constant 0 : i32
    %c0_i32_0 = arith.constant 0 : i32
    %c0_i32_1 = arith.constant 0 : i32
    return %c0_i32, %c0_i32_0 : i32, i32
  }
  func.func @transform_11(%arg0: i32) -> (i32, i32) {
    %c0_i32 = arith.constant 0 : i32
    %c0_i32_0 = arith.constant 0 : i32
    %c0_i32_1 = arith.constant 0 : i32
    return %c0_i32, %c0_i32_0 : i32, i32
  }
  func.func @transform_12(%arg0: i32) -> (i32, i32) {
    %c0_i32 = arith.constant 0 : i32
    %c0_i32_0 = arith.constant 0 : i32
    return %arg0, %c0_i32 : i32, i32
  }
}

</mosaic_0001>

<bundles_post_ra>
// kernel: rnn_model_forward.1
= control target key start
LH: loop header
LB: loop body
LE: loop exit
PB: predicated region body
PF: predicated region fallthrough
CT: control target
= control target key end

     0   :  { %17 = vsyncpa [#allocation5], 0  ;;  %s10231_s0 = inlined_call_operand.vmem [shape: f32[8,8,512], index: 0, kind: input, shape index: {}]   ;;  %s10232_s1 = inlined_call_operand.hbm [shape: f32[128,512], index: 1, kind: input, shape index: {}]   ;;  %s10233_s2 = inlined_call_operand.hbm [shape: f32[128,512], index: 2, kind: input, shape index: {}]   ;;  %s10234_s3 = inlined_call_operand.hbm [shape: f32[128,512], index: 3, kind: input, shape index: {}]   ;;  %s10235_s4 = inlined_call_operand.vmem [shape: f32[1,512], index: 4, kind: input, shape index: {}]   ;;  %s10236_s5 = inlined_call_operand.hbm [shape: f32[128,512], index: 5, kind: input, shape index: {}]   ;;  %s10237_s6 = inlined_call_operand.hbm [shape: f32[128,512], index: 6, kind: input, shape index: {}]   ;;  %s10238_s7 = inlined_call_operand.vmem [shape: f32[1,512], index: 7, kind: input, shape index: {}]   ;;  %s10239_s8 = inlined_call_operand.vmem [shape: f32[128,128], index: 8, kind: input, shape index: {}]   ;;  %s10240_s9 = inlined_call_operand.vmem [shape: f32[1,128], index: 9, kind: input, shape index: {}]   ;;  %s10241_s10 = inlined_call_operand.vmem [shape: f32[128,128], index: 10, kind: input, shape index: {}]   ;;  %s10242_s11 = inlined_call_operand.vmem [shape: f32[1,128], index: 11, kind: input, shape index: {}]   ;;  %s10243_s12 = inlined_call_operand.vmem [shape: f32[8,128], index: 12, kind: output, shape index: {}]  }
   0x1   :  { %18 = vsyncpa [#allocation7], 0 }
   0x2   :  { %19 = vsyncpa [#allocation10], 0  ;;  %s7111_s21 = smov [#allocation6]   ;;  %s7112_s23 = smov [#allocation9]  }
   0x3   :  { %s39_s22 = sshll.u32 %s7111_s21, 4  ;;  %s65_s24 = sshll.u32 %s7112_s23, 4  ;;  %s40_s22 = int_to_ptr.vmem [resolvable:$true] %s39_s22  ;;  %s66_s24 = int_to_ptr.vmem [resolvable:$true] %s65_s24 }
   0x4   :  { %s7013_s25 = scalar_lea.vmem %s40_s22, 8192  ;;  %p7018_p1 = scmp.lt.s32.totalorder %s40_s22, %s40_s22 }
   0x5   :  { %p7014_p0 = scmp.ne.s32.totalorder %s40_s22, %s7013_s25  ;;  %p7019_p2 = scmp.lt.s32.totalorder %s7013_s25, %s7013_s25 }
   0x7   :  { %p7020_p3 = por %p7019_p2, %p7018_p1 }
   0x9   :  { %p7021_p4 = pnand %p7020_p3, %p7014_p0 }
   0xb   :  { %7024 = shalt.err (!%p7021_p4)
}
   0xc   :  { %s7113_s26 = smov 512   ;;  %s7114_s27 = smov 32  }
   0xd   :  { %45 = dma.hbm_to_vmem [thread:$0]  %s10233_s2, 8192, %s40_s22, [#allocation7], %s7113_s26, %s7113_s26, %s7114_s27  }
   0xe   :  { %s7033_s30 = scalar_lea.vmem %s66_s24, 8192  ;;  %p7038_p6 = scmp.lt.s32.totalorder %s66_s24, %s66_s24 }
   0xf   :  { %p7034_p5 = scmp.ne.s32.totalorder %s66_s24, %s7033_s30  ;;  %p7039_p7 = scmp.lt.s32.totalorder %s7033_s30, %s7033_s30 }
  0x11   :  { %p7040_p8 = por %p7039_p7, %p7038_p6 }
  0x13   :  { %p7041_p9 = pnand %p7040_p8, %p7034_p5 }
  0x15   :  { %7044 = shalt.err (!%p7041_p9)
}
  0x16   :  { %71 = dma.hbm_to_vmem [thread:$0]  %s10236_s5, 8192, %s66_s24, [#allocation10], %s7113_s26, %s7113_s26, %s7114_s27  }
  0x17   :  { %s7115_s15 = smov [#allocation4]   ;;  %s7116_s17 = smov [#allocation8]  }
  0x18   :  { %s27_s16 = sshll.u32 %s7115_s15, 4  ;;  %s51_s18 = sshll.u32 %s7116_s17, 4  ;;  %s28_s16 = int_to_ptr.vmem [resolvable:$true] %s27_s16  ;;  %s52_s18 = int_to_ptr.vmem [resolvable:$true] %s51_s18 }
  0x19   :  { %s7053_s2 = scalar_lea.vmem %s28_s16, 8192  ;;  %p7058_p11 = scmp.lt.s32.totalorder %s28_s16, %s28_s16 }
  0x1a   :  { %p7054_p10 = scmp.ne.s32.totalorder %s28_s16, %s7053_s2  ;;  %p7059_p12 = scmp.lt.s32.totalorder %s7053_s2, %s7053_s2 }
  0x1c   :  { %p7060_p13 = por %p7059_p12, %p7058_p11 }
  0x1e   :  { %p7061_p0 = pnand %p7060_p13, %p7054_p10 }
  0x20   :  { %7064 = shalt.err (!%p7061_p0)
}
  0x21   :  { %33 = dma.hbm_to_vmem [thread:$0]  %s10232_s1, 8192, %s28_s16, [#allocation5], %s7113_s26, %s7113_s26, %s7114_s27  }
  0x22   :  { %s7073_s5 = scalar_lea.vmem %s52_s18, 8192  ;;  %p7078_p2 = scmp.lt.s32.totalorder %s52_s18, %s52_s18 }
  0x23   :  { %p7074_p1 = scmp.ne.s32.totalorder %s52_s18, %s7073_s5  ;;  %p7079_p3 = scmp.lt.s32.totalorder %s7073_s5, %s7073_s5 }
  0x25   :  { %p7080_p4 = por %p7079_p3, %p7078_p2 }
  0x27   :  { %p7081_p5 = pnand %p7080_p4, %p7074_p1 }
  0x29   :  { %7084 = shalt.err (!%p7081_p5)
}
  0x2a   :  { %57 = dma.hbm_to_vmem [thread:$0]  %s10234_s3, 8192, %s52_s18, [#allocation7], %s7113_s26, %s7113_s26, %s7114_s27  }
  0x2b   :  { %s7117_s23 = smov [#allocation11]  }
  0x2c   :  { %s77_s24 = sshll.u32 %s7117_s23, 4  ;;  %s78_s24 = int_to_ptr.vmem [resolvable:$true] %s77_s24 }
  0x2d   :  { %s7093_s25 = scalar_lea.vmem %s78_s24, 8192  ;;  %p7098_p7 = scmp.lt.s32.totalorder %s78_s24, %s78_s24 }
  0x2e   :  { %p7094_p6 = scmp.ne.s32.totalorder %s78_s24, %s7093_s25  ;;  %p7099_p8 = scmp.lt.s32.totalorder %s7093_s25, %s7093_s25 }
  0x30   :  { %p7100_p9 = por %p7099_p8, %p7098_p7 }
  0x32   :  { %p7101_p10 = pnand %p7100_p9, %p7094_p6 }
  0x34   :  { %7104 = shalt.err (!%p7101_p10)
}
  0x35   :  { %83 = dma.hbm_to_vmem [thread:$0]  %s10237_s6, 8192, %s78_s24, [#allocation10], %s7113_s26, %s7113_s26, %s7114_s27  }
  0x36   :  { %7105 = dma.done.wait [#allocation5], 8192  }
  0x37   :  { %7106 = vsyncadd [#allocation5], 4294959104 }
  0x38   :  { %7107 = dma.done.wait [#allocation7], 16384  }
  0x39   :  { %7108 = vsyncadd [#allocation7], 4294950912 }
  0x3a   :  { %7109 = dma.done.wait [#allocation10], 16384  }
  0x3b   :  { %7110 = vsyncadd [#allocation10], 4294950912  ;;  %v10246_v0 = vmov 0.0   ;;  %v7217_v1 = vld [vmem:[#allocation4 + $0x1e8] sm:$0xff]  ;;  %v7219_v2 = vld [vmem:[#allocation4 + $0x1e0] sm:$0xff]  ;;  %vm7119_vm0 = vmmov 0  }
  0x3c   :  { %241 = vmatprep.mubr.f32.mxu0 %v10246_v0  ;;  %312 = vmatprep.mubr.f32.mxu1 %v10246_v0  ;;  %10543 = vst [vmem:[#allocation15_spill] sm:$0xff] %v7217_v1  ;;  %v7221_v3 = vld [vmem:[#allocation4 + $0x1c8] sm:$0xff]  ;;  %v7224_v4 = vld [vmem:[#allocation4 + $0x1c0] sm:$0xff]  ;;  %v7238_v9 = vld [vmem:[#allocation4 + $0x1f8] sm:$0xff] }
  0x3d   :  { %177 = vmatprep.subr.mxu0 %v7217_v1  ;;  %v7227_v5 = vld [vmem:[#allocation4 + $0x1a8] sm:$0xff]  ;;  %v7230_v6 = vld [vmem:[#allocation4 + $0x1a0] sm:$0xff]  ;;  %10544 = vst [vmem:[#allocation16_spill] sm:$0xff] %v7238_v9  ;;  %248 = vmatprep.subr.mxu1 %v7238_v9  ;;  %v7244_v11 = vld [vmem:[#allocation4 + $0x1f0] sm:$0xff] }
  0x3e   :  { %178 = vmatpush1.msra.mxu0 %v7219_v2  ;;  %v7233_v7 = vld [vmem:[#allocation4 + $0x188] sm:$0xff]  ;;  %v7236_v8 = vld [vmem:[#allocation4 + $0x180] sm:$0xff]  ;;  %249 = vmatpush1.msra.mxu1 %v7244_v11  ;;  %v7250_v13 = vld [vmem:[#allocation4 + $0x1d8] sm:$0xff] }
  0x3f   :  { %179 = vmatprep.subr.mxu0 %v7221_v3  ;;  %v7241_v10 = vld [vmem:[#allocation4 + $0x168] sm:$0xff]  ;;  %v7247_v12 = vld [vmem:[#allocation4 + $0x160] sm:$0xff]  ;;  %v7252_v14 = vld [vmem:[#allocation4 + $0x1d0] sm:$0xff]  ;;  %250 = vmatprep.subr.mxu1 %v7250_v13 }
  0x40   :  { %180 = vmatpush1.msra.mxu0 %v7224_v4  ;;  %v7255_v15 = vld [vmem:[#allocation4 + $0x148] sm:$0xff]  ;;  %v7258_v16 = vld [vmem:[#allocation4 + $0x1b8] sm:$0xff]  ;;  %v7261_v17 = vld [vmem:[#allocation4 + $0x140] sm:$0xff]  ;;  %251 = vmatpush1.msra.mxu1 %v7252_v14 }
  0x41   :  { %181 = vmatprep.subr.mxu0 %v7227_v5  ;;  %v7264_v18 = vld [vmem:[#allocation4 + $0x1b0] sm:$0xff]  ;;  %v7266_v19 = vld [vmem:[#allocation4 + $0x198] sm:$0xff]  ;;  %v7269_v20 = vld [vmem:[#allocation4 + $0x128] sm:$0xff]  ;;  %252 = vmatprep.subr.mxu1 %v7258_v16 }
  0x42   :  { %182 = vmatpush1.msra.mxu0 %v7230_v6  ;;  %v7272_v21 = vld [vmem:[#allocation4 + $0x190] sm:$0xff]  ;;  %v7275_v22 = vld [vmem:[#allocation4 + $0x120] sm:$0xff]  ;;  %253 = vmatpush1.msra.mxu1 %v7264_v18  ;;  %v7278_v23 = vld [vmem:[#allocation4 + $0x178] sm:$0xff] }
  0x43   :  { %183 = vmatprep.subr.mxu0 %v7233_v7  ;;  %v7281_v24 = vld [vmem:[#allocation4 + $0x108] sm:$0xff]  ;;  %254 = vmatprep.subr.mxu1 %v7266_v19  ;;  %v7284_v25 = vld [vmem:[#allocation4 + $0x170] sm:$0xff]  ;;  %v7287_v26 = vld [vmem:[#allocation4 + $0x100] sm:$0xff] }
  0x44   :  { %184 = vmatpush1.msra.mxu0 %v7236_v8  ;;  %255 = vmatpush1.msra.mxu1 %v7272_v21  ;;  %v7290_v27 = vld [vmem:[#allocation4 + $0x158] sm:$0xff]  ;;  %v7293_v28 = vld [vmem:[#allocation4 + $0xe8] sm:$0xff]  ;;  %v7296_v29 = vld [vmem:[#allocation4 + $0x150] sm:$0xff] }
  0x45   :  { %185 = vmatprep.subr.mxu0 %v7241_v10  ;;  %256 = vmatprep.subr.mxu1 %v7278_v23  ;;  %v7299_v30 = vld [vmem:[#allocation4 + $0xe0] sm:$0xff]  ;;  %v7302_v31 = vld [vmem:[#allocation4 + $0x138] sm:$0xff]  ;;  %v7305_v32 = vld [vmem:[#allocation4 + $0xc8] sm:$0xff] }
  0x46   :  { %186 = vmatpush1.msra.mxu0 %v7247_v12  ;;  %257 = vmatpush1.msra.mxu1 %v7284_v25  ;;  %v7308_v33 = vld [vmem:[#allocation4 + $0x130] sm:$0xff]  ;;  %v7311_v34 = vld [vmem:[#allocation4 + $0xc0] sm:$0xff]  ;;  %v7314_v35 = vld [vmem:[#allocation4 + $0x118] sm:$0xff] }
  0x47   :  { %187 = vmatprep.subr.mxu0 %v7255_v15  ;;  %258 = vmatprep.subr.mxu1 %v7290_v27  ;;  %v7317_v36 = vld [vmem:[#allocation4 + $0xa8] sm:$0xff]  ;;  %v7320_v37 = vld [vmem:[#allocation4 + $0x110] sm:$0xff]  ;;  %v7323_v38 = vld [vmem:[#allocation4 + $0xa0] sm:$0xff] }
  0x48   :  { %188 = vmatpush1.msra.mxu0 %v7261_v17  ;;  %259 = vmatpush1.msra.mxu1 %v7296_v29  ;;  %v7326_v39 = vld [vmem:[#allocation4 + $0xf8] sm:$0xff]  ;;  %v7329_v40 = vld [vmem:[#allocation4 + $0x88] sm:$0xff]  ;;  %v7332_v41 = vld [vmem:[#allocation4 + $0xf0] sm:$0xff] }
  0x49   :  { %189 = vmatprep.subr.mxu0 %v7269_v20  ;;  %260 = vmatprep.subr.mxu1 %v7302_v31  ;;  %v7335_v42 = vld [vmem:[#allocation4 + $0x80] sm:$0xff]  ;;  %v7338_v43 = vld [vmem:[#allocation4 + $0xd8] sm:$0xff]  ;;  %v7341_v44 = vld [vmem:[#allocation4 + $0x68] sm:$0xff] }
  0x4a   :  { %190 = vmatpush1.msra.mxu0 %v7275_v22  ;;  %261 = vmatpush1.msra.mxu1 %v7308_v33  ;;  %10545 = vst [vmem:[#allocation17_spill] sm:$0xff] %v7341_v44  ;;  %v7344_v45 = vld [vmem:[#allocation4 + $0xd0] sm:$0xff]  ;;  %v7347_v46 = vld [vmem:[#allocation4 + $0x60] sm:$0xff]  ;;  %v7350_v47 = vld [vmem:[#allocation4 + $0xb8] sm:$0xff] }
  0x4b   :  { %191 = vmatprep.subr.mxu0 %v7281_v24  ;;  %262 = vmatprep.subr.mxu1 %v7314_v35  ;;  %10546 = vst [vmem:[#allocation18_spill] sm:$0xff] %v7347_v46  ;;  %v7353_v48 = vld [vmem:[#allocation4 + $0x48] sm:$0xff]  ;;  %v7356_v49 = vld [vmem:[#allocation4 + $0xb0] sm:$0xff]  ;;  %v7359_v50 = vld [vmem:[#allocation4 + $0x40] sm:$0xff] }
  0x4c   :  { %192 = vmatpush1.msra.mxu0 %v7287_v26  ;;  %263 = vmatpush1.msra.mxu1 %v7320_v37  ;;  %10547 = vst [vmem:[#allocation19_spill] sm:$0xff] %v7353_v48  ;;  %10548 = vst [vmem:[#allocation20_spill] sm:$0xff] %v7359_v50  ;;  %v7362_v51 = vld [vmem:[#allocation4 + $0x98] sm:$0xff]  ;;  %v7365_v52 = vld [vmem:[#allocation4 + $0x28] sm:$0xff] }
  0x4d   :  { %193 = vmatprep.subr.mxu0 %v7293_v28  ;;  %264 = vmatprep.subr.mxu1 %v7326_v39  ;;  %10549 = vst [vmem:[#allocation21_spill] sm:$0xff] %v7365_v52  ;;  %v7368_v53 = vld [vmem:[#allocation4 + $0x90] sm:$0xff]  ;;  %v7371_v54 = vld [vmem:[#allocation4 + $0x20] sm:$0xff]  ;;  %v7374_v55 = vld [vmem:[#allocation4 + $0x78] sm:$0xff] }
  0x4e   :  { %194 = vmatpush1.msra.mxu0 %v7299_v30  ;;  %265 = vmatpush1.msra.mxu1 %v7332_v41  ;;  %10550 = vst [vmem:[#allocation22_spill] sm:$0xff] %v7368_v53  ;;  %10551 = vst [vmem:[#allocation23_spill] sm:$0xff] %v7371_v54  ;;  %v7377_v56 = vld [vmem:[#allocation4 + $0x8] sm:$0xff]  ;;  %v7380_v57 = vld [vmem:[#allocation4 + $0x70] sm:$0xff] }
  0x4f   :  { %195 = vmatprep.subr.mxu0 %v7305_v32  ;;  %266 = vmatprep.subr.mxu1 %v7338_v43  ;;  %10552 = vst [vmem:[#allocation24_spill] sm:$0xff] %v7374_v55  ;;  %10553 = vst [vmem:[#allocation25_spill] sm:$0xff] %v7377_v56  ;;  %v7383_v58 = vld [vmem:[#allocation4] sm:$0xff]  ;;  %v7386_v59 = vld [vmem:[#allocation4 + $0x58] sm:$0xff] }
  0x50   :  { %196 = vmatpush1.msra.mxu0 %v7311_v34  ;;  %267 = vmatpush1.msra.mxu1 %v7344_v45  ;;  %10554 = vst [vmem:[#allocation26_spill] sm:$0xff] %v7380_v57  ;;  %10555 = vst [vmem:[#allocation27_spill] sm:$0xff] %v7383_v58  ;;  %v7390_v60 = vld [vmem:[#allocation4 + $0x50] sm:$0xff]  ;;  %v7394_v61 = vld [vmem:[#allocation4 + $0x38] sm:$0xff] }
  0x51   :  { %197 = vmatprep.subr.mxu0 %v7317_v36  ;;  %268 = vmatprep.subr.mxu1 %v7350_v47  ;;  %10556 = vst [vmem:[#allocation28_spill] sm:$0xff] %v7386_v59  ;;  %10557 = vst [vmem:[#allocation29_spill] sm:$0xff] %v7390_v60  ;;  %v7398_v62 = vld [vmem:[#allocation4 + $0x30] sm:$0xff]  ;;  %v7402_v63 = vld [vmem:[#allocation4 + $0x18] sm:$0xff] }
  0x52   :  { %198 = vmatpush1.msra.mxu0 %v7323_v38  ;;  %269 = vmatpush1.msra.mxu1 %v7356_v49  ;;  %10558 = vst [vmem:[#allocation30_spill] sm:$0xff] %v7394_v61  ;;  %10559 = vst [vmem:[#allocation31_spill] sm:$0xff] %v7398_v62 }
  0x53   :  { %199 = vmatprep.subr.mxu0 %v7329_v40  ;;  %270 = vmatprep.subr.mxu1 %v7362_v51  ;;  %10560 = vst [vmem:[#allocation32_spill] sm:$0xff] %v7402_v63 }
  0x54   :  { %200 = vmatpush1.msra.mxu0 %v7335_v42  ;;  %271 = vmatpush1.msra.mxu1 %v7368_v53 }
  0x55   :  { %201 = vmatprep.subr.mxu0 %v7341_v44  ;;  %272 = vmatprep.subr.mxu1 %v7374_v55 }
  0x56   :  { %202 = vmatpush1.msra.mxu0 %v7347_v46  ;;  %273 = vmatpush1.msra.mxu1 %v7380_v57 }
  0x57   :  { %203 = vmatprep.subr.mxu0 %v7353_v48  ;;  %274 = vmatprep.subr.mxu1 %v7386_v59 }
  0x58   :  { %204 = vmatpush1.msra.mxu0 %v7359_v50  ;;  %275 = vmatpush1.msra.mxu1 %v7390_v60 }
  0x59   :  { %205 = vmatprep.subr.mxu0 %v7365_v52  ;;  %276 = vmatprep.subr.mxu1 %v7394_v61 }
  0x5a   :  { %206 = vmatpush1.msra.mxu0 %v7371_v54  ;;  %v7405_v54 = vld [vmem:[#allocation4 + $0x10] sm:$0xff]  ;;  %277 = vmatpush1.msra.mxu1 %v7398_v62 }
  0x5b   :  { %207 = vmatprep.subr.mxu0 %v7377_v56  ;;  %10561 = vst [vmem:[#allocation33_spill] sm:$0xff] %v7405_v54  ;;  %278 = vmatprep.subr.mxu1 %v7402_v63 }
  0x5c   :  { %208 = vmatpush1.msra.mxu0 %v7383_v58  ;;  %279 = vmatpush1.msra.mxu1 %v7405_v54 }
  0x5d   :  { %242 = vmatmul.mubr.f32.vlgmr.msra.gmra.mxu0 %v10246_v0  ;;  %417 = vmatprep.subr.mxu0 %v7217_v1 }
  0x5e   :  { %418 = vmatpush1.msra.mxu0 %v7219_v2  ;;  %313 = vmatmul.mubr.f32.vlgmr.msra.gmra.mxu1 %v10246_v0  ;;  %v10562_v0 = vld [vmem:[#allocation23_spill] sm:$0xff] }
  0x5f   :  { %419 = vmatprep.subr.mxu0 %v7221_v3  ;;  %488 = vmatprep.subr.mxu1 %v7238_v9 }
  0x60   :  { %420 = vmatpush1.msra.mxu0 %v7224_v4  ;;  %489 = vmatpush1.msra.mxu1 %v7244_v11 }
  0x61   :  { %421 = vmatprep.subr.mxu0 %v7227_v5  ;;  %490 = vmatprep.subr.mxu1 %v7250_v13 }
  0x62   :  { %422 = vmatpush1.msra.mxu0 %v7230_v6  ;;  %491 = vmatpush1.msra.mxu1 %v7252_v14 }
  0x63   :  { %423 = vmatprep.subr.mxu0 %v7233_v7  ;;  %492 = vmatprep.subr.mxu1 %v7258_v16 }
  0x64   :  { %424 = vmatpush1.msra.mxu0 %v7236_v8  ;;  %493 = vmatpush1.msra.mxu1 %v7264_v18 }
  0x65   :  { %425 = vmatprep.subr.mxu0 %v7241_v10  ;;  %494 = vmatprep.subr.mxu1 %v7266_v19 }
  0x66   :  { %426 = vmatpush1.msra.mxu0 %v7247_v12  ;;  %495 = vmatpush1.msra.mxu1 %v7272_v21 }
  0x67   :  { %427 = vmatprep.subr.mxu0 %v7255_v15  ;;  %496 = vmatprep.subr.mxu1 %v7278_v23 }
  0x68   :  { %428 = vmatpush1.msra.mxu0 %v7261_v17  ;;  %497 = vmatpush1.msra.mxu1 %v7284_v25 }
  0x69   :  { %429 = vmatprep.subr.mxu0 %v7269_v20  ;;  %498 = vmatprep.subr.mxu1 %v7290_v27 }
  0x6a   :  { %430 = vmatpush1.msra.mxu0 %v7275_v22  ;;  %499 = vmatpush1.msra.mxu1 %v7296_v29 }
  0x6b   :  { %431 = vmatprep.subr.mxu0 %v7281_v24  ;;  %500 = vmatprep.subr.mxu1 %v7302_v31 }
  0x6c   :  { %432 = vmatpush1.msra.mxu0 %v7287_v26  ;;  %501 = vmatpush1.msra.mxu1 %v7308_v33 }
  0x6d   :  { %433 = vmatprep.subr.mxu0 %v7293_v28  ;;  %502 = vmatprep.subr.mxu1 %v7314_v35 }
  0x6e   :  { %434 = vmatpush1.msra.mxu0 %v7299_v30  ;;  %503 = vmatpush1.msra.mxu1 %v7320_v37 }
  0x6f   :  { %435 = vmatprep.subr.mxu0 %v7305_v32  ;;  %504 = vmatprep.subr.mxu1 %v7326_v39 }
  0x70   :  { %436 = vmatpush1.msra.mxu0 %v7311_v34  ;;  %505 = vmatpush1.msra.mxu1 %v7332_v41 }
  0x71   :  { %437 = vmatprep.subr.mxu0 %v7317_v36  ;;  %506 = vmatprep.subr.mxu1 %v7338_v43 }
  0x72   :  { %438 = vmatpush1.msra.mxu0 %v7323_v38  ;;  %507 = vmatpush1.msra.mxu1 %v7344_v45 }
  0x73   :  { %439 = vmatprep.subr.mxu0 %v7329_v40  ;;  %508 = vmatprep.subr.mxu1 %v7350_v47 }
  0x74   :  { %440 = vmatpush1.msra.mxu0 %v7335_v42  ;;  %509 = vmatpush1.msra.mxu1 %v7356_v49 }
  0x75   :  { %441 = vmatprep.subr.mxu0 %v7341_v44  ;;  %510 = vmatprep.subr.mxu1 %v7362_v51 }
  0x76   :  { %442 = vmatpush1.msra.mxu0 %v7347_v46  ;;  %511 = vmatpush1.msra.mxu1 %v7368_v53 }
  0x77   :  { %443 = vmatprep.subr.mxu0 %v7353_v48  ;;  %512 = vmatprep.subr.mxu1 %v7374_v55  ;;  %v10563_v48 = vmov 0.0  }
  0x78   :  { %444 = vmatpush1.msra.mxu0 %v7359_v50  ;;  %513 = vmatpush1.msra.mxu1 %v7380_v57 }
  0x79   :  { %445 = vmatprep.subr.mxu0 %v7365_v52  ;;  %514 = vmatprep.subr.mxu1 %v7386_v59 }
  0x7a   :  { %446 = vmatpush1.msra.mxu0 %v10562_v0  ;;  %515 = vmatpush1.msra.mxu1 %v7390_v60  ;;  %v111_v60 = vld [vmem:[%s10231_s0 + $0x10] sm:$0xff] }
  0x7b   :  { %447 = vmatprep.subr.mxu0 %v7377_v56  ;;  %516 = vmatprep.subr.mxu1 %v7394_v61  ;;  %v109_v56 = vld [vmem:[%s10231_s0] sm:$0xff] }
  0x7c   :  { %448 = vmatpush1.msra.mxu0 %v7383_v58  ;;  %517 = vmatpush1.msra.mxu1 %v7398_v62  ;;  %v110_v58 = vld [vmem:[%s10231_s0 + $0x8] sm:$0xff] }
  0x7d   :  { %481 = vmatprep.mubr.f32.mxu0 %v10563_v48  ;;  %518 = vmatprep.subr.mxu1 %v7402_v63 }
  0x7e   :  { %552 = vmatprep.mubr.f32.mxu1 %v10563_v48  ;;  %519 = vmatpush1.msra.mxu1 %v7405_v54 }
  0x7f   :  { %658 = vmatprep.subr.mxu0 %v7217_v1  ;;  %729 = vmatprep.subr.mxu1 %v7238_v9  ;;  %v112_v9 = vld [vmem:[%s10231_s0 + $0x18] sm:$0xff] }
 0x11d   :  { %v243_v0 = vpop.f32.mrf.mxu0 }
 0x11e   :  { %v319_v62 = vadd.f32 %v243_v0, %v109_v56  ;;  %v314_v54 = vpop.f32.mrf.mxu1 }
 0x11f   :  { %v245_v61 = vpop.f32.mrf.mxu0  ;;  %v321_v59 = vadd.f32 %v314_v54, %v111_v60  ;;  %v10577_v54 = vld [vmem:[#allocation31_spill] sm:$0xff]  ;;  %v10581_v60 = vmov 0.0  }
 0x120   :  { %v6339_v63 = vmul.f32 -1.442695, %v319_v62  ;;  %v320_v52 = vadd.f32 %v245_v61, %v110_v58  ;;  %v316_v1 = vpop.f32.mrf.mxu1 }
 0x121   :  { %v322_v50 = vadd.f32 %v316_v1, %v112_v9 }
 0x122   :  { %6555 = vpow2.f32 %v6339_v63  ;;  %v6340_v48 = vmul.f32 -1.442695, %v320_v52 }
 0x123   :  { %v6341_v57 = vmul.f32 -1.442695, %v322_v50 }
 0x124   :  { %6557 = vpow2.f32 %v6340_v48 }
 0x125   :  { %6559 = vtanh.f32 %v321_v59  ;;  %v10580_v59 = vld [vmem:[#allocation27_spill] sm:$0xff] }
 0x126   :  { %6561 = vpow2.f32 %v6341_v57  ;;  %v10579_v57 = vld [vmem:[#allocation32_spill] sm:$0xff] }
 0x12f   :  { %v6556_v0 = vpop.eup %6555 }
 0x130   :  { %v326_v56 = vadd.f32 1.0, %v6556_v0  ;;  %v10582_v0 = vld [vmem:[#allocation33_spill] sm:$0xff] }
 0x131   :  { %v6558_v58 = vpop.eup %6557 }
 0x132   :  { %6563 = vrcp.f32 %v326_v56  ;;  %v332_v52 = vadd.f32 1.0, %v6558_v58  ;;  %v6560_v48 = vpop.eup %6559  ;;  %v10583_v56 = vld [vmem:[#allocation15_spill] sm:$0xff]  ;;  %v10584_v58 = vld [vmem:[#allocation16_spill] sm:$0xff] }
 0x133   :  { %v6562_v61 = vpop.eup %6561 }
 0x134   :  { %6565 = vrcp.f32 %v332_v52  ;;  %v339_v46 = vadd.f32 1.0, %v6562_v61  ;;  %v6342_v52 = vld [vmem:[%s10231_s0 + $0x20] sm:$0xff]  ;;  %v6343_v61 = vld [vmem:[%s10231_s0 + $0x28] sm:$0xff] }
 0x136   :  { %6567 = vrcp.f32 %v339_v46  ;;  %v10576_v46 = vld [vmem:[#allocation23_spill] sm:$0xff] }
 0x13f   :  { %v6564_v62 = vpop.eup %6563 }
 0x140   :  { %v343_v44 = vmul.f32 %v6564_v62, %v6560_v48 }
 0x141   :  { %v6566_v63 = vpop.eup %6565 }
 0x142   :  { %v342_v55 = vmul.f32 0.0, %v6566_v63 }
 0x143   :  { %v6568_v1 = vpop.eup %6567 }
 0x144   :  { %v7491_v53 = vadd.f32 %v343_v44, %v342_v55  ;;  %v10574_v44 = vld [vmem:[#allocation21_spill] sm:$0xff] }
 0x145   :  { %v10578_v55 = vld [vmem:[#allocation25_spill] sm:$0xff] }
 0x146   :  { %6569 = vtanh.f32 %v7491_v53 }
 0x153   :  { %v6570_v9 = vpop.eup %6569 }
 0x154   :  { %v7494_v50 = vmul.f32 %v6570_v9, %v6568_v1 }
 0x156   :  { %10564 = vst [vmem:[#allocation34_spill] sm:$0xff] %v7494_v50  ;;  %482 = vmatmul.mubr.f32.vlgmr.msra.gmra.mxu0 %v7494_v50  ;;  %553 = vmatmul.mubr.f32.vlgmr.msra.gmra.mxu1 %v7494_v50  ;;  %v7846_v50 = vld [vmem:[#allocation4 + $0x30] sm:$0xff] }
 0x157   :  { %659 = vmatpush1.msra.mxu0 %v7219_v2  ;;  %730 = vmatpush1.msra.mxu1 %v7244_v11  ;;  %10602 = vst [vmem:[#allocation15_spill] sm:$0xff] %v7846_v50 }
 0x158   :  { %660 = vmatprep.subr.mxu0 %v7221_v3  ;;  %731 = vmatprep.subr.mxu1 %v7250_v13 }
 0x159   :  { %661 = vmatpush1.msra.mxu0 %v7224_v4  ;;  %732 = vmatpush1.msra.mxu1 %v7252_v14 }
 0x15a   :  { %662 = vmatprep.subr.mxu0 %v7227_v5  ;;  %733 = vmatprep.subr.mxu1 %v7258_v16 }
 0x15b   :  { %663 = vmatpush1.msra.mxu0 %v7230_v6  ;;  %734 = vmatpush1.msra.mxu1 %v7264_v18 }
 0x15c   :  { %664 = vmatprep.subr.mxu0 %v7233_v7  ;;  %735 = vmatprep.subr.mxu1 %v7266_v19 }
 0x15d   :  { %665 = vmatpush1.msra.mxu0 %v7236_v8  ;;  %736 = vmatpush1.msra.mxu1 %v7272_v21 }
 0x15e   :  { %666 = vmatprep.subr.mxu0 %v7241_v10  ;;  %737 = vmatprep.subr.mxu1 %v7278_v23 }
 0x15f   :  { %667 = vmatpush1.msra.mxu0 %v7247_v12  ;;  %738 = vmatpush1.msra.mxu1 %v7284_v25 }
 0x160   :  { %668 = vmatprep.subr.mxu0 %v7255_v15  ;;  %739 = vmatprep.subr.mxu1 %v7290_v27 }
 0x161   :  { %669 = vmatpush1.msra.mxu0 %v7261_v17  ;;  %740 = vmatpush1.msra.mxu1 %v7296_v29 }
 0x162   :  { %670 = vmatprep.subr.mxu0 %v7269_v20  ;;  %741 = vmatprep.subr.mxu1 %v7302_v31 }
 0x163   :  { %671 = vmatpush1.msra.mxu0 %v7275_v22  ;;  %742 = vmatpush1.msra.mxu1 %v7308_v33 }
 0x164   :  { %672 = vmatprep.subr.mxu0 %v7281_v24  ;;  %743 = vmatprep.subr.mxu1 %v7314_v35  ;;  %v10565_v24 = vld [vmem:[#allocation22_spill] sm:$0xff] }
 0x165   :  { %673 = vmatpush1.msra.mxu0 %v7287_v26  ;;  %744 = vmatpush1.msra.mxu1 %v7320_v37  ;;  %v10566_v26 = vld [vmem:[#allocation17_spill] sm:$0xff] }
 0x166   :  { %674 = vmatprep.subr.mxu0 %v7293_v28  ;;  %745 = vmatprep.subr.mxu1 %v7326_v39  ;;  %v10567_v28 = vld [vmem:[#allocation24_spill] sm:$0xff] }
 0x167   :  { %675 = vmatpush1.msra.mxu0 %v7299_v30  ;;  %746 = vmatpush1.msra.mxu1 %v7332_v41  ;;  %v10568_v30 = vld [vmem:[#allocation18_spill] sm:$0xff] }
 0x168   :  { %676 = vmatprep.subr.mxu0 %v7305_v32  ;;  %747 = vmatprep.subr.mxu1 %v7338_v43  ;;  %v10569_v32 = vld [vmem:[#allocation26_spill] sm:$0xff] }
 0x169   :  { %677 = vmatpush1.msra.mxu0 %v7311_v34  ;;  %748 = vmatpush1.msra.mxu1 %v7344_v45  ;;  %v10570_v34 = vld [vmem:[#allocation19_spill] sm:$0xff] }
 0x16a   :  { %678 = vmatprep.subr.mxu0 %v7317_v36  ;;  %749 = vmatprep.subr.mxu1 %v7350_v47  ;;  %v10571_v36 = vld [vmem:[#allocation28_spill] sm:$0xff] }
 0x16b   :  { %679 = vmatpush1.msra.mxu0 %v7323_v38  ;;  %750 = vmatpush1.msra.mxu1 %v7356_v49  ;;  %v10572_v38 = vld [vmem:[#allocation20_spill] sm:$0xff] }
 0x16c   :  { %680 = vmatprep.subr.mxu0 %v7329_v40  ;;  %751 = vmatprep.subr.mxu1 %v7362_v51  ;;  %v10573_v40 = vld [vmem:[#allocation29_spill] sm:$0xff] }
 0x16d   :  { %681 = vmatpush1.msra.mxu0 %v7335_v42  ;;  %752 = vmatpush1.msra.mxu1 %v10565_v24  ;;  %v10575_v42 = vld [vmem:[#allocation30_spill] sm:$0xff] }
 0x16e   :  { %682 = vmatprep.subr.mxu0 %v10566_v26  ;;  %753 = vmatprep.subr.mxu1 %v10567_v28 }
 0x16f   :  { %683 = vmatpush1.msra.mxu0 %v10568_v30  ;;  %754 = vmatpush1.msra.mxu1 %v10569_v32 }
 0x170   :  { %684 = vmatprep.subr.mxu0 %v10570_v34  ;;  %755 = vmatprep.subr.mxu1 %v10571_v36  ;;  %v6345_v34 = vld [vmem:[%s10231_s0 + $0x38] sm:$0xff] }
 0x171   :  { %685 = vmatpush1.msra.mxu0 %v10572_v38  ;;  %756 = vmatpush1.msra.mxu1 %v10573_v40 }
 0x172   :  { %686 = vmatprep.subr.mxu0 %v10574_v44  ;;  %757 = vmatprep.subr.mxu1 %v10575_v42 }
 0x173   :  { %687 = vmatpush1.msra.mxu0 %v10576_v46  ;;  %758 = vmatpush1.msra.mxu1 %v10577_v54  ;;  %v6344_v46 = vld [vmem:[%s10231_s0 + $0x30] sm:$0xff] }
 0x174   :  { %688 = vmatprep.subr.mxu0 %v10578_v55  ;;  %759 = vmatprep.subr.mxu1 %v10579_v57 }
 0x175   :  { %689 = vmatpush1.msra.mxu0 %v10580_v59  ;;  %722 = vmatprep.mubr.f32.mxu0 %v10581_v60 }
 0x176   :  { %760 = vmatpush1.msra.mxu1 %v10582_v0  ;;  %793 = vmatprep.mubr.f32.mxu1 %v10581_v60 }
 0x177   :  { %899 = vmatprep.subr.mxu0 %v10583_v56  ;;  %970 = vmatprep.subr.mxu1 %v10584_v58 }
 0x216   :  { %v483_v48 = vpop.f32.mrf.mxu0  ;;  %v554_v26 = vpop.f32.mrf.mxu1 }
 0x217   :  { %v559_v62 = vadd.f32 %v6342_v52, %v483_v48  ;;  %v561_v56 = vadd.f32 %v6344_v46, %v554_v26 }
 0x218   :  { %v485_v63 = vpop.f32.mrf.mxu0  ;;  %v556_v38 = vpop.f32.mrf.mxu1 }
 0x219   :  { %v6346_v1 = vmul.f32 -1.442695, %v559_v62  ;;  %v560_v9 = vadd.f32 %v6343_v61, %v485_v63  ;;  %v562_v44 = vadd.f32 %v6345_v34, %v556_v38 }
 0x21b   :  { %6571 = vpow2.f32 %v6346_v1  ;;  %v6347_v30 = vmul.f32 -1.442695, %v560_v9  ;;  %v6348_v55 = vmul.f32 -1.442695, %v562_v44 }
 0x21d   :  { %6573 = vpow2.f32 %v6347_v30 }
 0x21e   :  { %6575 = vpow2.f32 %v6348_v55 }
 0x228   :  { %v6572_v59 = vpop.eup %6571 }
 0x229   :  { %v566_v58 = vadd.f32 1.0, %v6572_v59 }
 0x22a   :  { %v6574_v52 = vpop.eup %6573 }
 0x22b   :  { %6577 = vrcp.f32 %v566_v58  ;;  %v572_v48 = vadd.f32 1.0, %v6574_v52  ;;  %v6576_v61 = vpop.eup %6575  ;;  %v7706_v58 = vld [vmem:[#allocation4 + $0x1e8] sm:$0xff]  ;;  %v7708_v52 = vld [vmem:[#allocation4 + $0x1f8] sm:$0xff] }
 0x22c   :  { %6579 = vtanh.f32 %v561_v56  ;;  %v579_v9 = vadd.f32 1.0, %v6576_v61  ;;  %10595 = vst [vmem:[#allocation30_spill] sm:$0xff] %v7706_v58  ;;  %10596 = vst [vmem:[#allocation23_spill] sm:$0xff] %v7708_v52  ;;  %v7714_v61 = vld [vmem:[#allocation4 + $0x1f0] sm:$0xff] }
 0x22d   :  { %6581 = vrcp.f32 %v572_v48  ;;  %v7712_v48 = vld [vmem:[#allocation4 + $0x1e0] sm:$0xff] }
 0x22e   :  { %6583 = vrcp.f32 %v579_v9  ;;  %v7726_v9 = vld [vmem:[#allocation4 + $0x1d0] sm:$0xff] }
 0x238   :  { %v6578_v62 = vpop.eup %6577 }
 0x239   :  { %v6580_v63 = vpop.eup %6579 }
 0x23a   :  { %v6582_v1 = vpop.eup %6581  ;;  %v583_v30 = vmul.f32 %v6580_v63, %v6578_v62  ;;  %v7718_v62 = vld [vmem:[#allocation4 + $0x1c8] sm:$0xff]  ;;  %v7720_v63 = vld [vmem:[#allocation4 + $0x1d8] sm:$0xff] }
 0x23b   :  { %v582_v34 = vmul.f32 %v6582_v1, %v7491_v53  ;;  %v6584_v26 = vpop.eup %6583  ;;  %v7724_v1 = vld [vmem:[#allocation4 + $0x1c0] sm:$0xff] }
 0x23d   :  { %v7577_v38 = vadd.f32 %v583_v30, %v582_v34  ;;  %v7730_v30 = vld [vmem:[#allocation4 + $0x1a8] sm:$0xff]  ;;  %v7732_v34 = vld [vmem:[#allocation4 + $0x1b8] sm:$0xff] }
 0x23f   :  { %6585 = vtanh.f32 %v7577_v38 }
 0x24c   :  { %v6586_v44 = vpop.eup %6585 }
 0x24d   :  { %v7580_v46 = vmul.f32 %v6586_v44, %v6584_v26  ;;  %v7738_v26 = vld [vmem:[#allocation4 + $0x1b0] sm:$0xff]  ;;  %v7742_v44 = vld [vmem:[#allocation4 + $0x188] sm:$0xff] }
 0x24f   :  { %10585 = vst [vmem:[#allocation22_spill] sm:$0xff] %v7580_v46  ;;  %723 = vmatmul.mubr.f32.vlgmr.msra.gmra.mxu0 %v7580_v46  ;;  %794 = vmatmul.mubr.f32.vlgmr.msra.gmra.mxu1 %v7580_v46  ;;  %v7842_v46 = vld [vmem:[#allocation4 + $0x38] sm:$0xff] }
 0x250   :  { %900 = vmatpush1.msra.mxu0 %v7219_v2  ;;  %971 = vmatpush1.msra.mxu1 %v7244_v11  ;;  %v7630_v2 = vld [vmem:[#allocation4 + $0x108] sm:$0xff]  ;;  %10601 = vst [vmem:[#allocation33_spill] sm:$0xff] %v7842_v46 }
 0x251   :  { %901 = vmatprep.subr.mxu0 %v7221_v3  ;;  %972 = vmatprep.subr.mxu1 %v7250_v13  ;;  %v7632_v3 = vld [vmem:[#allocation4 + $0x100] sm:$0xff]  ;;  %v7652_v11 = vld [vmem:[#allocation4 + $0x88] sm:$0xff] }
 0x252   :  { %902 = vmatpush1.msra.mxu0 %v7224_v4  ;;  %973 = vmatpush1.msra.mxu1 %v7252_v14  ;;  %v7634_v4 = vld [vmem:[#allocation4 + $0xe8] sm:$0xff]  ;;  %v7661_v14 = vld [vmem:[#allocation4 + $0x60] sm:$0xff] }
 0x253   :  { %903 = vmatprep.subr.mxu0 %v7227_v5  ;;  %974 = vmatprep.subr.mxu1 %v7258_v16  ;;  %v7637_v5 = vld [vmem:[#allocation4 + $0xe0] sm:$0xff]  ;;  %v7658_v13 = vld [vmem:[#allocation4 + $0x68] sm:$0xff]  ;;  %10587 = vst [vmem:[#allocation24_spill] sm:$0xff] %v7661_v14 }
 0x254   :  { %904 = vmatpush1.msra.mxu0 %v7230_v6  ;;  %975 = vmatpush1.msra.mxu1 %v7264_v18  ;;  %v7640_v6 = vld [vmem:[#allocation4 + $0xc8] sm:$0xff]  ;;  %10586 = vst [vmem:[#allocation17_spill] sm:$0xff] %v7658_v13  ;;  %v7667_v16 = vld [vmem:[#allocation4 + $0x40] sm:$0xff] }
 0x255   :  { %905 = vmatprep.subr.mxu0 %v7233_v7  ;;  %976 = vmatprep.subr.mxu1 %v7266_v19  ;;  %v7643_v7 = vld [vmem:[#allocation4 + $0xc0] sm:$0xff]  ;;  %10589 = vst [vmem:[#allocation26_spill] sm:$0xff] %v7667_v16  ;;  %v7676_v19 = vld [vmem:[#allocation4 + $0x8] sm:$0xff] }
 0x256   :  { %906 = vmatpush1.msra.mxu0 %v7236_v8  ;;  %977 = vmatpush1.msra.mxu1 %v7272_v21  ;;  %v7646_v8 = vld [vmem:[#allocation4 + $0xa8] sm:$0xff]  ;;  %v7673_v18 = vld [vmem:[#allocation4 + $0x20] sm:$0xff]  ;;  %10592 = vst [vmem:[#allocation20_spill] sm:$0xff] %v7676_v19 }
 0x257   :  { %907 = vmatprep.subr.mxu0 %v7241_v10  ;;  %978 = vmatprep.subr.mxu1 %v7278_v23  ;;  %v7649_v10 = vld [vmem:[#allocation4 + $0xa0] sm:$0xff]  ;;  %10591 = vst [vmem:[#allocation28_spill] sm:$0xff] %v7673_v18  ;;  %v6350_v23 = vld [vmem:[%s10231_s0 + $0x48] sm:$0xff] }
 0x258   :  { %908 = vmatpush1.msra.mxu0 %v7247_v12  ;;  %979 = vmatpush1.msra.mxu1 %v7284_v25  ;;  %v7655_v12 = vld [vmem:[#allocation4 + $0x80] sm:$0xff] }
 0x259   :  { %909 = vmatprep.subr.mxu0 %v7255_v15  ;;  %980 = vmatprep.subr.mxu1 %v7290_v27  ;;  %v7664_v15 = vld [vmem:[#allocation4 + $0x48] sm:$0xff]  ;;  %v6349_v21 = vld [vmem:[%s10231_s0 + $0x40] sm:$0xff] }
 0x25a   :  { %910 = vmatpush1.msra.mxu0 %v7261_v17  ;;  %981 = vmatpush1.msra.mxu1 %v7296_v29  ;;  %10588 = vst [vmem:[#allocation18_spill] sm:$0xff] %v7664_v15  ;;  %v7670_v17 = vld [vmem:[#allocation4 + $0x28] sm:$0xff] }
 0x25b   :  { %911 = vmatprep.subr.mxu0 %v7269_v20  ;;  %982 = vmatprep.subr.mxu1 %v7302_v31  ;;  %10590 = vst [vmem:[#allocation19_spill] sm:$0xff] %v7670_v17  ;;  %v7679_v20 = vld [vmem:[#allocation4] sm:$0xff] }
 0x25c   :  { %912 = vmatpush1.msra.mxu0 %v7275_v22  ;;  %983 = vmatpush1.msra.mxu1 %v7308_v33  ;;  %10593 = vst [vmem:[#allocation29_spill] sm:$0xff] %v7679_v20 }
 0x25d   :  { %984 = vmatprep.subr.mxu1 %v7314_v35  ;;  %963 = vmatprep.mubr.f32.mxu0 %v10581_v60 }
 0x25e   :  { %985 = vmatpush1.msra.mxu1 %v7320_v37  ;;  %1034 = vmatprep.mubr.f32.mxu1 %v10581_v60  ;;  %v6352_v37 = vld [vmem:[%s10231_s0 + $0x58] sm:$0xff] }
 0x25f   :  { %986 = vmatprep.subr.mxu1 %v7326_v39  ;;  %913 = vmatprep.subr.mxu0 %v7630_v2 }
 0x260   :  { %987 = vmatpush1.msra.mxu1 %v7332_v41  ;;  %914 = vmatpush1.msra.mxu0 %v7632_v3 }
 0x261   :  { %988 = vmatprep.subr.mxu1 %v7338_v43  ;;  %915 = vmatprep.subr.mxu0 %v7634_v4  ;;  %v6351_v43 = vld [vmem:[%s10231_s0 + $0x50] sm:$0xff] }
 0x262   :  { %989 = vmatpush1.msra.mxu1 %v7344_v45  ;;  %916 = vmatpush1.msra.mxu0 %v7637_v5 }
 0x263   :  { %990 = vmatprep.subr.mxu1 %v7350_v47  ;;  %917 = vmatprep.subr.mxu0 %v7640_v6 }
 0x264   :  { %991 = vmatpush1.msra.mxu1 %v7356_v49  ;;  %918 = vmatpush1.msra.mxu0 %v7643_v7 }
 0x265   :  { %992 = vmatprep.subr.mxu1 %v7362_v51  ;;  %919 = vmatprep.subr.mxu0 %v7646_v8 }
 0x266   :  { %993 = vmatpush1.msra.mxu1 %v10565_v24  ;;  %920 = vmatpush1.msra.mxu0 %v7649_v10 }
 0x267   :  { %994 = vmatprep.subr.mxu1 %v10567_v28  ;;  %921 = vmatprep.subr.mxu0 %v7652_v11 }
 0x268   :  { %995 = vmatpush1.msra.mxu1 %v10569_v32  ;;  %922 = vmatpush1.msra.mxu0 %v7655_v12 }
 0x269   :  { %996 = vmatprep.subr.mxu1 %v10571_v36  ;;  %923 = vmatprep.subr.mxu0 %v7658_v13 }
 0x26a   :  { %997 = vmatpush1.msra.mxu1 %v10573_v40  ;;  %924 = vmatpush1.msra.mxu0 %v7661_v14 }
 0x26b   :  { %998 = vmatprep.subr.mxu1 %v10575_v42  ;;  %925 = vmatprep.subr.mxu0 %v7664_v15 }
 0x26c   :  { %999 = vmatpush1.msra.mxu1 %v10577_v54  ;;  %926 = vmatpush1.msra.mxu0 %v7667_v16 }
 0x26d   :  { %1000 = vmatprep.subr.mxu1 %v10579_v57  ;;  %927 = vmatprep.subr.mxu0 %v7670_v17 }
 0x26e   :  { %1001 = vmatpush1.msra.mxu1 %v10582_v0  ;;  %928 = vmatpush1.msra.mxu0 %v7673_v18 }
 0x26f   :  { %929 = vmatprep.subr.mxu0 %v7676_v19  ;;  %1211 = vmatprep.subr.mxu1 %v7708_v52 }
 0x270   :  { %930 = vmatpush1.msra.mxu0 %v7679_v20 }
 0x271   :  { %1140 = vmatprep.subr.mxu0 %v7706_v58 }
 0x30f   :  { %v724_v22 = vpop.f32.mrf.mxu0  ;;  %v795_v33 = vpop.f32.mrf.mxu1 }
 0x310   :  { %v800_v25 = vadd.f32 %v6349_v21, %v724_v22  ;;  %v802_v49 = vadd.f32 %v6351_v43, %v795_v33  ;;  %v7744_v21 = vld [vmem:[#allocation4 + $0x198] sm:$0xff]  ;;  %v7748_v22 = vld [vmem:[#allocation4 + $0x180] sm:$0xff]  ;;  %v7766_v33 = vld [vmem:[#allocation4 + $0x148] sm:$0xff] }
 0x311   :  { %v726_v27 = vpop.f32.mrf.mxu0  ;;  %v797_v39 = vpop.f32.mrf.mxu1  ;;  %v7780_v43 = vld [vmem:[#allocation4 + $0x138] sm:$0xff] }
 0x312   :  { %v6353_v29 = vmul.f32 -1.442695, %v800_v25  ;;  %v801_v31 = vadd.f32 %v6350_v23, %v726_v27  ;;  %v803_v41 = vadd.f32 %v6352_v37, %v797_v39  ;;  %v7750_v23 = vld [vmem:[#allocation4 + $0x190] sm:$0xff]  ;;  %v7754_v25 = vld [vmem:[#allocation4 + $0x168] sm:$0xff]  ;;  %v7756_v27 = vld [vmem:[#allocation4 + $0x178] sm:$0xff] }
 0x313   :  { %v7772_v37 = vld [vmem:[#allocation4 + $0x140] sm:$0xff]  ;;  %v7774_v39 = vld [vmem:[#allocation4 + $0x150] sm:$0xff] }
 0x314   :  { %6587 = vpow2.f32 %v6353_v29  ;;  %v6354_v35 = vmul.f32 -1.442695, %v801_v31  ;;  %v6355_v45 = vmul.f32 -1.442695, %v803_v41  ;;  %v7760_v29 = vld [vmem:[#allocation4 + $0x160] sm:$0xff]  ;;  %v7762_v31 = vld [vmem:[#allocation4 + $0x170] sm:$0xff] }
 0x315   :  { %v7778_v41 = vld [vmem:[#allocation4 + $0x128] sm:$0xff] }
 0x316   :  { %6589 = vpow2.f32 %v6354_v35  ;;  %v7768_v35 = vld [vmem:[#allocation4 + $0x158] sm:$0xff] }
 0x317   :  { %6591 = vpow2.f32 %v6355_v45  ;;  %v7784_v45 = vld [vmem:[#allocation4 + $0x120] sm:$0xff] }
 0x321   :  { %v6588_v47 = vpop.eup %6587 }
 0x322   :  { %v807_v51 = vadd.f32 1.0, %v6588_v47  ;;  %v7786_v47 = vld [vmem:[#allocation4 + $0x130] sm:$0xff] }
 0x323   :  { %v6590_v53 = vpop.eup %6589 }
 0x324   :  { %6593 = vrcp.f32 %v807_v51  ;;  %v813_v24 = vadd.f32 1.0, %v6590_v53  ;;  %v6592_v28 = vpop.eup %6591  ;;  %v7792_v51 = vld [vmem:[#allocation4 + $0x110] sm:$0xff]  ;;  %v7794_v53 = vld [vmem:[#allocation4 + $0xf8] sm:$0xff] }
 0x325   :  { %6595 = vtanh.f32 %v802_v49  ;;  %v820_v42 = vadd.f32 1.0, %v6592_v28  ;;  %v7790_v49 = vld [vmem:[#allocation4 + $0x118] sm:$0xff] }
 0x326   :  { %6597 = vrcp.f32 %v813_v24  ;;  %v7798_v24 = vld [vmem:[#allocation4 + $0xf0] sm:$0xff]  ;;  %v7802_v28 = vld [vmem:[#allocation4 + $0xd8] sm:$0xff] }
 0x327   :  { %6599 = vrcp.f32 %v820_v42  ;;  %v7818_v42 = vld [vmem:[#allocation4 + $0x98] sm:$0xff] }
 0x331   :  { %v6594_v32 = vpop.eup %6593 }
 0x332   :  { %v6596_v36 = vpop.eup %6595 }
 0x333   :  { %v6598_v40 = vpop.eup %6597  ;;  %v824_v54 = vmul.f32 %v6596_v36, %v6594_v32  ;;  %v7806_v32 = vld [vmem:[#allocation4 + $0xd0] sm:$0xff]  ;;  %v7810_v36 = vld [vmem:[#allocation4 + $0xb8] sm:$0xff] }
 0x334   :  { %v823_v57 = vmul.f32 %v6598_v40, %v7577_v38  ;;  %v6600_v55 = vpop.eup %6599  ;;  %v7736_v38 = vld [vmem:[#allocation4 + $0x1a0] sm:$0xff]  ;;  %v7814_v40 = vld [vmem:[#allocation4 + $0xb0] sm:$0xff] }
 0x336   :  { %v7697_v0 = vadd.f32 %v824_v54, %v823_v57  ;;  %v7822_v54 = vld [vmem:[#allocation4 + $0x90] sm:$0xff]  ;;  %v7826_v57 = vld [vmem:[#allocation4 + $0x78] sm:$0xff] }
 0x337   :  { %10597 = vst [vmem:[#allocation31_spill] sm:$0xff] %v7826_v57 }
 0x338   :  { %6601 = vtanh.f32 %v7697_v0 }
 0x345   :  { %v6602_v59 = vpop.eup %6601 }
 0x346   :  { %v7700_v56 = vmul.f32 %v6602_v59, %v6600_v55  ;;  %v7830_v55 = vld [vmem:[#allocation4 + $0x70] sm:$0xff]  ;;  %v7834_v59 = vld [vmem:[#allocation4 + $0x58] sm:$0xff] }
 0x347   :  { %10598 = vst [vmem:[#allocation25_spill] sm:$0xff] %v7830_v55  ;;  %10599 = vst [vmem:[#allocation32_spill] sm:$0xff] %v7834_v59 }
 0x348   :  { %10594 = vst [vmem:[#allocation21_spill] sm:$0xff] %v7700_v56  ;;  %964 = vmatmul.mubr.f32.vlgmr.msra.gmra.mxu0 %v7700_v56  ;;  %1035 = vmatmul.mubr.f32.vlgmr.msra.gmra.mxu1 %v7700_v56  ;;  %v7838_v56 = vld [vmem:[#allocation4 + $0x50] sm:$0xff] }
 0x349   :  { %1204 = vmatprep.mubr.f32.mxu0 %v10581_v60  ;;  %1275 = vmatprep.mubr.f32.mxu1 %v10581_v60  ;;  %10600 = vst [vmem:[#allocation27_spill] sm:$0xff] %v7838_v56  ;;  %v7850_v60 = vld [vmem:[#allocation4 + $0x18] sm:$0xff] }
 0x34a   :  { %1141 = vmatpush1.msra.mxu0 %v7712_v48  ;;  %1212 = vmatpush1.msra.mxu1 %v7714_v61  ;;  %10603 = vst [vmem:[#allocation16_spill] sm:$0xff] %v7850_v60 }
 0x34b   :  { %1142 = vmatprep.subr.mxu0 %v7718_v62  ;;  %1213 = vmatprep.subr.mxu1 %v7720_v63 }
 0x34c   :  { %1143 = vmatpush1.msra.mxu0 %v7724_v1  ;;  %1214 = vmatpush1.msra.mxu1 %v7726_v9 }
 0x34d   :  { %1144 = vmatprep.subr.mxu0 %v7730_v30  ;;  %1215 = vmatprep.subr.mxu1 %v7732_v34 }
 0x34e   :  { %1145 = vmatpush1.msra.mxu0 %v7736_v38  ;;  %1216 = vmatpush1.msra.mxu1 %v7738_v26 }
 0x34f   :  { %1146 = vmatprep.subr.mxu0 %v7742_v44  ;;  %1217 = vmatprep.subr.mxu1 %v7744_v21 }
 0x350   :  { %1147 = vmatpush1.msra.mxu0 %v7748_v22  ;;  %1218 = vmatpush1.msra.mxu1 %v7750_v23 }
 0x351   :  { %1148 = vmatprep.subr.mxu0 %v7754_v25  ;;  %1219 = vmatprep.subr.mxu1 %v7756_v27 }
 0x352   :  { %1149 = vmatpush1.msra.mxu0 %v7760_v29  ;;  %1220 = vmatpush1.msra.mxu1 %v7762_v31 }
 0x353   :  { %1150 = vmatprep.subr.mxu0 %v7766_v33  ;;  %1221 = vmatprep.subr.mxu1 %v7768_v35 }
 0x354   :  { %1151 = vmatpush1.msra.mxu0 %v7772_v37  ;;  %1222 = vmatpush1.msra.mxu1 %v7774_v39 }
 0x355   :  { %1152 = vmatprep.subr.mxu0 %v7778_v41  ;;  %1223 = vmatprep.subr.mxu1 %v7780_v43 }
 0x356   :  { %1153 = vmatpush1.msra.mxu0 %v7784_v45  ;;  %1224 = vmatpush1.msra.mxu1 %v7786_v47 }
 0x357   :  { %1154 = vmatprep.subr.mxu0 %v7630_v2  ;;  %1225 = vmatprep.subr.mxu1 %v7790_v49 }
 0x358   :  { %1155 = vmatpush1.msra.mxu0 %v7632_v3  ;;  %1226 = vmatpush1.msra.mxu1 %v7792_v51 }
 0x359   :  { %1156 = vmatprep.subr.mxu0 %v7634_v4  ;;  %1227 = vmatprep.subr.mxu1 %v7794_v53 }
 0x35a   :  { %1157 = vmatpush1.msra.mxu0 %v7637_v5  ;;  %1228 = vmatpush1.msra.mxu1 %v7798_v24 }
 0x35b   :  { %1158 = vmatprep.subr.mxu0 %v7640_v6  ;;  %1229 = vmatprep.subr.mxu1 %v7802_v28 }
 0x35c   :  { %1159 = vmatpush1.msra.mxu0 %v7643_v7  ;;  %1230 = vmatpush1.msra.mxu1 %v7806_v32 }
 0x35d   :  { %1160 = vmatprep.subr.mxu0 %v7646_v8  ;;  %1231 = vmatprep.subr.mxu1 %v7810_v36 }
 0x35e   :  { %1161 = vmatpush1.msra.mxu0 %v7649_v10  ;;  %1232 = vmatpush1.msra.mxu1 %v7814_v40 }
 0x35f   :  { %1162 = vmatprep.subr.mxu0 %v7652_v11  ;;  %1233 = vmatprep.subr.mxu1 %v7818_v42 }
 0x360   :  { %1163 = vmatpush1.msra.mxu0 %v7655_v12  ;;  %1234 = vmatpush1.msra.mxu1 %v7822_v54 }
 0x361   :  { %1164 = vmatprep.subr.mxu0 %v7658_v13  ;;  %1235 = vmatprep.subr.mxu1 %v7826_v57 }
 0x362   :  { %1165 = vmatpush1.msra.mxu0 %v7661_v14  ;;  %1236 = vmatpush1.msra.mxu1 %v7830_v55  ;;  %v7854_v14 = vld [vmem:[#allocation4 + $0x10] sm:$0xff] }
 0x363   :  { %1166 = vmatprep.subr.mxu0 %v7664_v15  ;;  %1237 = vmatprep.subr.mxu1 %v7834_v59  ;;  %10604 = vst [vmem:[#allocation35_spill] sm:$0xff] %v7854_v14  ;;  %v6358_v59 = vld [vmem:[%s10231_s0 + $0x70] sm:$0xff] }
 0x364   :  { %1167 = vmatpush1.msra.mxu0 %v7667_v16  ;;  %1238 = vmatpush1.msra.mxu1 %v7838_v56 }
 0x365   :  { %1168 = vmatprep.subr.mxu0 %v7670_v17  ;;  %1239 = vmatprep.subr.mxu1 %v7842_v46  ;;  %v6356_v46 = vld [vmem:[%s10231_s0 + $0x60] sm:$0xff] }
 0x366   :  { %1169 = vmatpush1.msra.mxu0 %v7673_v18  ;;  %1240 = vmatpush1.msra.mxu1 %v7846_v50  ;;  %v6357_v50 = vld [vmem:[%s10231_s0 + $0x68] sm:$0xff] }
 0x367   :  { %1170 = vmatprep.subr.mxu0 %v7676_v19  ;;  %1241 = vmatprep.subr.mxu1 %v7850_v60 }
 0x368   :  { %1171 = vmatpush1.msra.mxu0 %v7679_v20  ;;  %1242 = vmatpush1.msra.mxu1 %v7854_v14 }
 0x369   :  { %1381 = vmatprep.subr.mxu0 %v7706_v58  ;;  %1452 = vmatprep.subr.mxu1 %v7708_v52  ;;  %v6359_v52 = vld [vmem:[%s10231_s0 + $0x78] sm:$0xff] }
 0x408   :  { %v965_v17 = vpop.f32.mrf.mxu0  ;;  %v1036_v20 = vpop.f32.mrf.mxu1 }
 0x409   :  { %v1041_v19 = vadd.f32 %v6356_v46, %v965_v17  ;;  %v1043_v46 = vadd.f32 %v6358_v59, %v1036_v20  ;;  %v10609_v59 = vld [vmem:[#allocation25_spill] sm:$0xff] }
 0x40a   :  { %v967_v18 = vpop.f32.mrf.mxu0  ;;  %v1038_v58 = vpop.f32.mrf.mxu1 }
 0x40b   :  { %v6360_v60 = vmul.f32 -1.442695, %v1041_v19  ;;  %v1042_v56 = vadd.f32 %v6357_v50, %v967_v18  ;;  %v1044_v16 = vadd.f32 %v6359_v52, %v1038_v58 }
 0x40d   :  { %6603 = vpow2.f32 %v6360_v60  ;;  %v6361_v14 = vmul.f32 -1.442695, %v1042_v56  ;;  %v6362_v15 = vmul.f32 -1.442695, %v1044_v16 }
 0x40f   :  { %6605 = vpow2.f32 %v6361_v14 }
 0x410   :  { %6607 = vpow2.f32 %v6362_v15 }
 0x41a   :  { %v6604_v55 = vpop.eup %6603 }
 0x41b   :  { %v1048_v17 = vadd.f32 1.0, %v6604_v55  ;;  %v10608_v55 = vld [vmem:[#allocation24_spill] sm:$0xff] }
 0x41c   :  { %v6606_v19 = vpop.eup %6605 }
 0x41d   :  { %6609 = vrcp.f32 %v1048_v17  ;;  %v1054_v50 = vadd.f32 1.0, %v6606_v19  ;;  %v6608_v60 = vpop.eup %6607  ;;  %v10611_v17 = vld [vmem:[#allocation32_spill] sm:$0xff]  ;;  %v10612_v19 = vld [vmem:[#allocation26_spill] sm:$0xff] }
 0x41e   :  { %6611 = vtanh.f32 %v1043_v46  ;;  %v1061_v57 = vadd.f32 1.0, %v6608_v60  ;;  %v10610_v46 = vld [vmem:[#allocation18_spill] sm:$0xff]  ;;  %v10614_v60 = vld [vmem:[#allocation19_spill] sm:$0xff] }
 0x41f   :  { %6613 = vrcp.f32 %v1054_v50  ;;  %v10613_v50 = vld [vmem:[#allocation27_spill] sm:$0xff] }
 0x420   :  { %6615 = vrcp.f32 %v1061_v57  ;;  %v10607_v57 = vld [vmem:[#allocation31_spill] sm:$0xff] }
 0x42a   :  { %v6610_v14 = vpop.eup %6609 }
 0x42b   :  { %v6612_v18 = vpop.eup %6611 }
 0x42c   :  { %v6614_v56 = vpop.eup %6613  ;;  %v1065_v58 = vmul.f32 %v6612_v18, %v6610_v14  ;;  %v10615_v14 = vld [vmem:[#allocation33_spill] sm:$0xff]  ;;  %v10616_v18 = vld [vmem:[#allocation28_spill] sm:$0xff] }
 0x42d   :  { %v1064_v52 = vmul.f32 %v6614_v56, %v7697_v0  ;;  %v6616_v16 = vpop.eup %6615  ;;  %v10606_v0 = vld [vmem:[#allocation17_spill] sm:$0xff]  ;;  %v10617_v56 = vld [vmem:[#allocation15_spill] sm:$0xff] }
 0x42f   :  { %v7877_v13 = vadd.f32 %v1065_v58, %v1064_v52  ;;  %v10618_v58 = vld [vmem:[#allocation20_spill] sm:$0xff] }
 0x430   :  { %v10619_v52 = vld [vmem:[#allocation16_spill] sm:$0xff] }
 0x431   :  { %6617 = vtanh.f32 %v7877_v13 }
 0x43e   :  { %v6618_v20 = vpop.eup %6617 }
 0x43f   :  { %v7880_v15 = vmul.f32 %v6618_v20, %v6616_v16  ;;  %v10620_v16 = vld [vmem:[#allocation29_spill] sm:$0xff]  ;;  %v10621_v20 = vmov 0.0  }
 0x441   :  { %10605 = vst [vmem:[#allocation36_spill] sm:$0xff] %v7880_v15  ;;  %1205 = vmatmul.mubr.f32.vlgmr.msra.gmra.mxu0 %v7880_v15  ;;  %1276 = vmatmul.mubr.f32.vlgmr.msra.gmra.mxu1 %v7880_v15  ;;  %v10622_v15 = vld [vmem:[#allocation35_spill] sm:$0xff] }
 0x442   :  { %1382 = vmatpush1.msra.mxu0 %v7712_v48  ;;  %1453 = vmatpush1.msra.mxu1 %v7714_v61 }
 0x443   :  { %1383 = vmatprep.subr.mxu0 %v7718_v62  ;;  %1454 = vmatprep.subr.mxu1 %v7720_v63 }
 0x444   :  { %1384 = vmatpush1.msra.mxu0 %v7724_v1  ;;  %1455 = vmatpush1.msra.mxu1 %v7726_v9 }
 0x445   :  { %1385 = vmatprep.subr.mxu0 %v7730_v30  ;;  %1456 = vmatprep.subr.mxu1 %v7732_v34 }
 0x446   :  { %1386 = vmatpush1.msra.mxu0 %v7736_v38  ;;  %1457 = vmatpush1.msra.mxu1 %v7738_v26 }
 0x447   :  { %1387 = vmatprep.subr.mxu0 %v7742_v44  ;;  %1458 = vmatprep.subr.mxu1 %v7744_v21 }
 0x448   :  { %1388 = vmatpush1.msra.mxu0 %v7748_v22  ;;  %1459 = vmatpush1.msra.mxu1 %v7750_v23 }
 0x449   :  { %1389 = vmatprep.subr.mxu0 %v7754_v25  ;;  %1460 = vmatprep.subr.mxu1 %v7756_v27 }
 0x44a   :  { %1390 = vmatpush1.msra.mxu0 %v7760_v29  ;;  %1461 = vmatpush1.msra.mxu1 %v7762_v31 }
 0x44b   :  { %1391 = vmatprep.subr.mxu0 %v7766_v33  ;;  %1462 = vmatprep.subr.mxu1 %v7768_v35 }
 0x44c   :  { %1392 = vmatpush1.msra.mxu0 %v7772_v37  ;;  %1463 = vmatpush1.msra.mxu1 %v7774_v39 }
 0x44d   :  { %1393 = vmatprep.subr.mxu0 %v7778_v41  ;;  %1464 = vmatprep.subr.mxu1 %v7780_v43 }
 0x44e   :  { %1394 = vmatpush1.msra.mxu0 %v7784_v45  ;;  %1465 = vmatpush1.msra.mxu1 %v7786_v47 }
 0x44f   :  { %1395 = vmatprep.subr.mxu0 %v7630_v2  ;;  %1466 = vmatprep.subr.mxu1 %v7790_v49 }
 0x450   :  { %1396 = vmatpush1.msra.mxu0 %v7632_v3  ;;  %1467 = vmatpush1.msra.mxu1 %v7792_v51 }
 0x451   :  { %1397 = vmatprep.subr.mxu0 %v7634_v4  ;;  %1468 = vmatprep.subr.mxu1 %v7794_v53 }
 0x452   :  { %1398 = vmatpush1.msra.mxu0 %v7637_v5  ;;  %1469 = vmatpush1.msra.mxu1 %v7798_v24 }
 0x453   :  { %1399 = vmatprep.subr.mxu0 %v7640_v6  ;;  %1470 = vmatprep.subr.mxu1 %v7802_v28 }
 0x454   :  { %1400 = vmatpush1.msra.mxu0 %v7643_v7  ;;  %1471 = vmatpush1.msra.mxu1 %v7806_v32 }
 0x455   :  { %1401 = vmatprep.subr.mxu0 %v7646_v8  ;;  %1472 = vmatprep.subr.mxu1 %v7810_v36 }
 0x456   :  { %1402 = vmatpush1.msra.mxu0 %v7649_v10  ;;  %1473 = vmatpush1.msra.mxu1 %v7814_v40 }
 0x457   :  { %1403 = vmatprep.subr.mxu0 %v7652_v11  ;;  %1474 = vmatprep.subr.mxu1 %v7818_v42 }
 0x458   :  { %1404 = vmatpush1.msra.mxu0 %v7655_v12  ;;  %1475 = vmatpush1.msra.mxu1 %v7822_v54 }
 0x459   :  { %1405 = vmatprep.subr.mxu0 %v10606_v0  ;;  %1476 = vmatprep.subr.mxu1 %v10607_v57 }
 0x45a   :  { %1406 = vmatpush1.msra.mxu0 %v10608_v55  ;;  %1477 = vmatpush1.msra.mxu1 %v10609_v59 }
 0x45b   :  { %1407 = vmatprep.subr.mxu0 %v10610_v46  ;;  %1478 = vmatprep.subr.mxu1 %v10611_v17  ;;  %v6365_v46 = vld [vmem:[%s10231_s0 + $0x90] sm:$0xff] }
 0x45c   :  { %1408 = vmatpush1.msra.mxu0 %v10612_v19  ;;  %1479 = vmatpush1.msra.mxu1 %v10613_v50  ;;  %v10623_v50 = vld [vmem:[#allocation30_spill] sm:$0xff] }
 0x45d   :  { %1409 = vmatprep.subr.mxu0 %v10614_v60  ;;  %1480 = vmatprep.subr.mxu1 %v10615_v14  ;;  %v10624_v60 = vld [vmem:[#allocation23_spill] sm:$0xff] }
 0x45e   :  { %1410 = vmatpush1.msra.mxu0 %v10616_v18  ;;  %1481 = vmatpush1.msra.mxu1 %v10617_v56  ;;  %v6363_v56 = vld [vmem:[%s10231_s0 + $0x80] sm:$0xff] }
 0x45f   :  { %1411 = vmatprep.subr.mxu0 %v10618_v58  ;;  %1482 = vmatprep.subr.mxu1 %v10619_v52  ;;  %v6364_v52 = vld [vmem:[%s10231_s0 + $0x88] sm:$0xff] }
 0x460   :  { %1412 = vmatpush1.msra.mxu0 %v10620_v16  ;;  %1445 = vmatprep.mubr.f32.mxu0 %v10621_v20 }
 0x461   :  { %1483 = vmatpush1.msra.mxu1 %v10622_v15  ;;  %1516 = vmatprep.mubr.f32.mxu1 %v10621_v20 }
 0x462   :  { %1622 = vmatprep.subr.mxu0 %v10623_v50  ;;  %1693 = vmatprep.subr.mxu1 %v10624_v60  ;;  %v6366_v60 = vld [vmem:[%s10231_s0 + $0x98] sm:$0xff] }
 0x501   :  { %v1206_v18 = vpop.f32.mrf.mxu0  ;;  %v1277_v15 = vpop.f32.mrf.mxu1 }
 0x502   :  { %v1282_v16 = vadd.f32 %v6363_v56, %v1206_v18  ;;  %v1284_v18 = vadd.f32 %v6365_v46, %v1277_v15  ;;  %v10637_v46 = vld [vmem:[#allocation20_spill] sm:$0xff] }
 0x503   :  { %v1208_v58 = vpop.f32.mrf.mxu0  ;;  %v1279_v50 = vpop.f32.mrf.mxu1 }
 0x504   :  { %v6367_v14 = vmul.f32 -1.442695, %v1282_v16  ;;  %v1283_v19 = vadd.f32 %v6364_v52, %v1208_v58  ;;  %v1285_v17 = vadd.f32 %v6366_v60, %v1279_v50 }
 0x506   :  { %6619 = vpow2.f32 %v6367_v14  ;;  %v6368_v20 = vmul.f32 -1.442695, %v1283_v19  ;;  %v6369_v59 = vmul.f32 -1.442695, %v1285_v17  ;;  %v10638_v17 = vld [vmem:[#allocation16_spill] sm:$0xff] }
 0x508   :  { %6621 = vpow2.f32 %v6368_v20 }
 0x509   :  { %6623 = vpow2.f32 %v6369_v59 }
 0x513   :  { %v6620_v55 = vpop.eup %6619 }
 0x514   :  { %v1289_v56 = vadd.f32 1.0, %v6620_v55 }
 0x515   :  { %v6622_v16 = vpop.eup %6621 }
 0x516   :  { %6625 = vrcp.f32 %v1289_v56  ;;  %v1295_v14 = vadd.f32 1.0, %v6622_v16  ;;  %v6624_v19 = vpop.eup %6623  ;;  %v10640_v56 = vmov 0.0   ;;  %v10641_v16 = vld [vmem:[#allocation35_spill] sm:$0xff] }
 0x517   :  { %6627 = vtanh.f32 %v1284_v18  ;;  %v1302_v57 = vadd.f32 1.0, %v6624_v19  ;;  %v10639_v18 = vld [vmem:[#allocation29_spill] sm:$0xff]  ;;  %v10643_v19 = vld [vmem:[#allocation23_spill] sm:$0xff] }
 0x518   :  { %6629 = vrcp.f32 %v1295_v14  ;;  %v10642_v14 = vld [vmem:[#allocation30_spill] sm:$0xff] }
 0x519   :  { %6631 = vrcp.f32 %v1302_v57  ;;  %v10636_v57 = vld [vmem:[#allocation15_spill] sm:$0xff] }
 0x523   :  { %v6626_v58 = vpop.eup %6625 }
 0x524   :  { %v6628_v52 = vpop.eup %6627 }
 0x525   :  { %v6630_v20 = vpop.eup %6629  ;;  %v1306_v50 = vmul.f32 %v6628_v52, %v6626_v58  ;;  %v6370_v58 = vld [vmem:[%s10231_s0 + $0xa0] sm:$0xff] }
 0x526   :  { %v1305_v60 = vmul.f32 %v6630_v20, %v7877_v13  ;;  %v6632_v15 = vpop.eup %6631  ;;  %v10635_v13 = vld [vmem:[#allocation28_spill] sm:$0xff] }
 0x527   :  { %v6371_v20 = vld [vmem:[%s10231_s0 + $0xa8] sm:$0xff] }
 0x528   :  { %v7963_v0 = vadd.f32 %v1306_v50, %v1305_v60 }
 0x52a   :  { %6633 = vtanh.f32 %v7963_v0 }
 0x537   :  { %v6634_v55 = vpop.eup %6633 }
 0x538   :  { %v7966_v59 = vmul.f32 %v6634_v55, %v6632_v15 }
 0x53a   :  { %1446 = vmatmul.mubr.f32.vlgmr.msra.gmra.mxu0 %v7966_v59  ;;  %1517 = vmatmul.mubr.f32.vlgmr.msra.gmra.mxu1 %v7966_v59 }
 0x53b   :  { %1623 = vmatpush1.msra.mxu0 %v7712_v48  ;;  %1694 = vmatpush1.msra.mxu1 %v7714_v61 }
 0x53c   :  { %1624 = vmatprep.subr.mxu0 %v7718_v62  ;;  %1695 = vmatprep.subr.mxu1 %v7720_v63 }
 0x53d   :  { %1625 = vmatpush1.msra.mxu0 %v7724_v1  ;;  %1696 = vmatpush1.msra.mxu1 %v7726_v9 }
 0x53e   :  { %1626 = vmatprep.subr.mxu0 %v7730_v30  ;;  %1697 = vmatprep.subr.mxu1 %v7732_v34 }
 0x53f   :  { %1627 = vmatpush1.msra.mxu0 %v7736_v38  ;;  %1698 = vmatpush1.msra.mxu1 %v7738_v26 }
 0x540   :  { %1628 = vmatprep.subr.mxu0 %v7742_v44  ;;  %1699 = vmatprep.subr.mxu1 %v7744_v21 }
 0x541   :  { %1629 = vmatpush1.msra.mxu0 %v7748_v22  ;;  %1700 = vmatpush1.msra.mxu1 %v7750_v23 }
 0x542   :  { %1630 = vmatprep.subr.mxu0 %v7754_v25  ;;  %1701 = vmatprep.subr.mxu1 %v7756_v27 }
 0x543   :  { %1631 = vmatpush1.msra.mxu0 %v7760_v29  ;;  %1702 = vmatpush1.msra.mxu1 %v7762_v31 }
 0x544   :  { %1632 = vmatprep.subr.mxu0 %v7766_v33  ;;  %1703 = vmatprep.subr.mxu1 %v7768_v35 }
 0x545   :  { %1633 = vmatpush1.msra.mxu0 %v7772_v37  ;;  %1704 = vmatpush1.msra.mxu1 %v7774_v39 }
 0x546   :  { %1634 = vmatprep.subr.mxu0 %v7778_v41  ;;  %1705 = vmatprep.subr.mxu1 %v7780_v43 }
 0x547   :  { %1635 = vmatpush1.msra.mxu0 %v7784_v45  ;;  %1706 = vmatpush1.msra.mxu1 %v7786_v47 }
 0x548   :  { %1636 = vmatprep.subr.mxu0 %v7630_v2  ;;  %1707 = vmatprep.subr.mxu1 %v7790_v49  ;;  %v10625_v2 = vld [vmem:[#allocation17_spill] sm:$0xff] }
 0x549   :  { %1637 = vmatpush1.msra.mxu0 %v7632_v3  ;;  %1708 = vmatpush1.msra.mxu1 %v7792_v51  ;;  %v10626_v3 = vld [vmem:[#allocation31_spill] sm:$0xff] }
 0x54a   :  { %1638 = vmatprep.subr.mxu0 %v7634_v4  ;;  %1709 = vmatprep.subr.mxu1 %v7794_v53  ;;  %v10627_v4 = vld [vmem:[#allocation24_spill] sm:$0xff] }
 0x54b   :  { %1639 = vmatpush1.msra.mxu0 %v7637_v5  ;;  %1710 = vmatpush1.msra.mxu1 %v7798_v24  ;;  %v10628_v5 = vld [vmem:[#allocation25_spill] sm:$0xff] }
 0x54c   :  { %1640 = vmatprep.subr.mxu0 %v7640_v6  ;;  %1711 = vmatprep.subr.mxu1 %v7802_v28  ;;  %v10629_v6 = vld [vmem:[#allocation18_spill] sm:$0xff] }
 0x54d   :  { %1641 = vmatpush1.msra.mxu0 %v7643_v7  ;;  %1712 = vmatpush1.msra.mxu1 %v7806_v32  ;;  %v10630_v7 = vld [vmem:[#allocation32_spill] sm:$0xff] }
 0x54e   :  { %1642 = vmatprep.subr.mxu0 %v7646_v8  ;;  %1713 = vmatprep.subr.mxu1 %v7810_v36  ;;  %v10631_v8 = vld [vmem:[#allocation26_spill] sm:$0xff] }
 0x54f   :  { %1643 = vmatpush1.msra.mxu0 %v7649_v10  ;;  %1714 = vmatpush1.msra.mxu1 %v7814_v40  ;;  %v10632_v10 = vld [vmem:[#allocation27_spill] sm:$0xff] }
 0x550   :  { %1644 = vmatprep.subr.mxu0 %v7652_v11  ;;  %1715 = vmatprep.subr.mxu1 %v7818_v42  ;;  %v10633_v11 = vld [vmem:[#allocation19_spill] sm:$0xff] }
 0x551   :  { %1645 = vmatpush1.msra.mxu0 %v7655_v12  ;;  %1716 = vmatpush1.msra.mxu1 %v7822_v54  ;;  %v10634_v12 = vld [vmem:[#allocation33_spill] sm:$0xff] }
 0x552   :  { %1646 = vmatprep.subr.mxu0 %v10625_v2  ;;  %1717 = vmatprep.subr.mxu1 %v10626_v3 }
 0x553   :  { %1647 = vmatpush1.msra.mxu0 %v10627_v4  ;;  %1718 = vmatpush1.msra.mxu1 %v10628_v5 }
 0x554   :  { %1648 = vmatprep.subr.mxu0 %v10629_v6  ;;  %1719 = vmatprep.subr.mxu1 %v10630_v7  ;;  %v6373_v6 = vld [vmem:[%s10231_s0 + $0xb8] sm:$0xff] }
 0x555   :  { %1649 = vmatpush1.msra.mxu0 %v10631_v8  ;;  %1720 = vmatpush1.msra.mxu1 %v10632_v10 }
 0x556   :  { %1650 = vmatprep.subr.mxu0 %v10633_v11  ;;  %1721 = vmatprep.subr.mxu1 %v10634_v12 }
 0x557   :  { %1651 = vmatpush1.msra.mxu0 %v10635_v13  ;;  %1722 = vmatpush1.msra.mxu1 %v10636_v57  ;;  %v6372_v13 = vld [vmem:[%s10231_s0 + $0xb0] sm:$0xff] }
 0x558   :  { %1652 = vmatprep.subr.mxu0 %v10637_v46  ;;  %1723 = vmatprep.subr.mxu1 %v10638_v17 }
 0x559   :  { %1653 = vmatpush1.msra.mxu0 %v10639_v18  ;;  %1686 = vmatprep.mubr.f32.mxu0 %v10640_v56 }
 0x55a   :  { %1724 = vmatpush1.msra.mxu1 %v10641_v16  ;;  %1757 = vmatprep.mubr.f32.mxu1 %v10640_v56 }
 0x55b   :  { %1863 = vmatprep.subr.mxu0 %v10642_v14  ;;  %1934 = vmatprep.subr.mxu1 %v10643_v19 }
 0x5fa   :  { %v1447_v52 = vpop.f32.mrf.mxu0  ;;  %v1518_v2 = vpop.f32.mrf.mxu1 }
 0x5fb   :  { %v1523_v50 = vadd.f32 %v6370_v58, %v1447_v52  ;;  %v1525_v14 = vadd.f32 %v6372_v13, %v1518_v2 }
 0x5fc   :  { %v1449_v60 = vpop.f32.mrf.mxu0  ;;  %v1520_v8 = vpop.f32.mrf.mxu1 }
 0x5fd   :  { %v6374_v15 = vmul.f32 -1.442695, %v1523_v50  ;;  %v1524_v55 = vadd.f32 %v6371_v20, %v1449_v60  ;;  %v1526_v11 = vadd.f32 %v6373_v6, %v1520_v8 }
 0x5ff   :  { %6635 = vpow2.f32 %v6374_v15  ;;  %v6375_v4 = vmul.f32 -1.442695, %v1524_v55  ;;  %v6376_v46 = vmul.f32 -1.442695, %v1526_v11 }
 0x601   :  { %6637 = vpow2.f32 %v6375_v4 }
 0x602   :  { %6639 = vpow2.f32 %v6376_v46 }
 0x60c   :  { %v6636_v18 = vpop.eup %6635 }
 0x60d   :  { %v1530_v19 = vadd.f32 1.0, %v6636_v18 }
 0x60e   :  { %v6638_v58 = vpop.eup %6637 }
 0x60f   :  { %6641 = vrcp.f32 %v1530_v19  ;;  %v1536_v52 = vadd.f32 1.0, %v6638_v58  ;;  %v6640_v20 = vpop.eup %6639 }
 0x610   :  { %6643 = vtanh.f32 %v1525_v14  ;;  %v1543_v55 = vadd.f32 1.0, %v6640_v20  ;;  %v2105_v20 = vld [vmem:[#allocation6 + $0x1f0] sm:$0xff] }
 0x611   :  { %6645 = vrcp.f32 %v1536_v52  ;;  %v2103_v52 = vld [vmem:[#allocation6 + $0x1e0] sm:$0xff] }
 0x612   :  { %6647 = vrcp.f32 %v1543_v55  ;;  %v2101_v55 = vld [vmem:[#allocation6 + $0x1d0] sm:$0xff] }
 0x61c   :  { %v6642_v50 = vpop.eup %6641 }
 0x61d   :  { %v6644_v60 = vpop.eup %6643 }
 0x61e   :  { %v6646_v15 = vpop.eup %6645  ;;  %v1547_v4 = vmul.f32 %v6644_v60, %v6642_v50  ;;  %v2100_v50 = vld [vmem:[#allocation6 + $0x1c8] sm:$0xff]  ;;  %v2102_v60 = vld [vmem:[#allocation6 + $0x1d8] sm:$0xff] }
 0x61f   :  { %v1546_v6 = vmul.f32 %v6646_v15, %v7963_v0  ;;  %v6648_v2 = vpop.eup %6647  ;;  %v2099_v15 = vld [vmem:[#allocation6 + $0x1c0] sm:$0xff] }
 0x621   :  { %v8049_v8 = vadd.f32 %v1547_v4, %v1546_v6  ;;  %v2096_v4 = vld [vmem:[#allocation6 + $0x1a8] sm:$0xff]  ;;  %v2098_v6 = vld [vmem:[#allocation6 + $0x1b8] sm:$0xff] }
 0x623   :  { %6649 = vtanh.f32 %v8049_v8 }
 0x630   :  { %v6650_v11 = vpop.eup %6649 }
 0x631   :  { %v8052_v13 = vmul.f32 %v6650_v11, %v6648_v2  ;;  %v2097_v2 = vld [vmem:[#allocation6 + $0x1b0] sm:$0xff]  ;;  %v2092_v11 = vld [vmem:[#allocation6 + $0x188] sm:$0xff] }
 0x633   :  { %1687 = vmatmul.mubr.f32.vlgmr.msra.gmra.mxu0 %v8052_v13  ;;  %1758 = vmatmul.mubr.f32.vlgmr.msra.gmra.mxu1 %v8052_v13 }
 0x634   :  { %1864 = vmatpush1.msra.mxu0 %v7712_v48  ;;  %1935 = vmatpush1.msra.mxu1 %v7714_v61  ;;  %v1832_v48 = vld [vmem:[#allocation4 + $0x108] sm:$0xff]  ;;  %v1831_v61 = vld [vmem:[#allocation4 + $0x100] sm:$0xff] }
 0x635   :  { %1865 = vmatprep.subr.mxu0 %v7718_v62  ;;  %1936 = vmatprep.subr.mxu1 %v7720_v63  ;;  %v1828_v62 = vld [vmem:[#allocation4 + $0xe8] sm:$0xff]  ;;  %v1827_v63 = vld [vmem:[#allocation4 + $0xe0] sm:$0xff] }
 0x636   :  { %1866 = vmatpush1.msra.mxu0 %v7724_v1  ;;  %1937 = vmatpush1.msra.mxu1 %v7726_v9  ;;  %v1824_v1 = vld [vmem:[#allocation4 + $0xc8] sm:$0xff]  ;;  %v1823_v9 = vld [vmem:[#allocation4 + $0xc0] sm:$0xff] }
 0x637   :  { %1867 = vmatprep.subr.mxu0 %v7730_v30  ;;  %1938 = vmatprep.subr.mxu1 %v7732_v34  ;;  %v1820_v30 = vld [vmem:[#allocation4 + $0xa8] sm:$0xff]  ;;  %v1819_v34 = vld [vmem:[#allocation4 + $0xa0] sm:$0xff] }
 0x638   :  { %1868 = vmatpush1.msra.mxu0 %v7736_v38  ;;  %1939 = vmatpush1.msra.mxu1 %v7738_v26  ;;  %v1816_v38 = vld [vmem:[#allocation4 + $0x88] sm:$0xff]  ;;  %v1815_v26 = vld [vmem:[#allocation4 + $0x80] sm:$0xff] }
 0x639   :  { %1869 = vmatprep.subr.mxu0 %v7742_v44  ;;  %1940 = vmatprep.subr.mxu1 %v7744_v21  ;;  %v2106_v44 = vld [vmem:[#allocation6 + $0x1f8] sm:$0xff]  ;;  %v1812_v21 = vld [vmem:[#allocation4 + $0x68] sm:$0xff] }
 0x63a   :  { %1870 = vmatpush1.msra.mxu0 %v7748_v22  ;;  %1941 = vmatpush1.msra.mxu1 %v7750_v23  ;;  %v1811_v22 = vld [vmem:[#allocation4 + $0x60] sm:$0xff]  ;;  %v1808_v23 = vld [vmem:[#allocation4 + $0x48] sm:$0xff] }
 0x63b   :  { %1871 = vmatprep.subr.mxu0 %v7754_v25  ;;  %1942 = vmatprep.subr.mxu1 %v7756_v27  ;;  %v1807_v25 = vld [vmem:[#allocation4 + $0x40] sm:$0xff]  ;;  %v1804_v27 = vld [vmem:[#allocation4 + $0x28] sm:$0xff] }
 0x63c   :  { %1872 = vmatpush1.msra.mxu0 %v7760_v29  ;;  %1943 = vmatpush1.msra.mxu1 %v7762_v31  ;;  %v1803_v29 = vld [vmem:[#allocation4 + $0x20] sm:$0xff]  ;;  %v1800_v31 = vld [vmem:[#allocation4 + $0x8] sm:$0xff] }
 0x63d   :  { %1873 = vmatprep.subr.mxu0 %v7766_v33  ;;  %1944 = vmatprep.subr.mxu1 %v7768_v35  ;;  %v1799_v33 = vld [vmem:[#allocation4] sm:$0xff]  ;;  %v2104_v35 = vld [vmem:[#allocation6 + $0x1e8] sm:$0xff] }
 0x63e   :  { %1874 = vmatpush1.msra.mxu0 %v7772_v37  ;;  %1945 = vmatpush1.msra.mxu1 %v7774_v39  ;;  %v6377_v37 = vld [vmem:[%s10231_s0 + $0xc0] sm:$0xff] }
 0x63f   :  { %1875 = vmatprep.subr.mxu0 %v7778_v41  ;;  %1946 = vmatprep.subr.mxu1 %v7780_v43  ;;  %v6378_v41 = vld [vmem:[%s10231_s0 + $0xc8] sm:$0xff] }
 0x640   :  { %1876 = vmatpush1.msra.mxu0 %v7784_v45  ;;  %1947 = vmatpush1.msra.mxu1 %v7786_v47 }
 0x641   :  { %1948 = vmatprep.subr.mxu1 %v7790_v49  ;;  %1927 = vmatprep.mubr.f32.mxu0 %v10640_v56 }
 0x642   :  { %1949 = vmatpush1.msra.mxu1 %v7792_v51  ;;  %1998 = vmatprep.mubr.f32.mxu1 %v10640_v56 }
 0x643   :  { %1950 = vmatprep.subr.mxu1 %v7794_v53  ;;  %1877 = vmatprep.subr.mxu0 %v1832_v48  ;;  %v2094_v48 = vld [vmem:[#allocation6 + $0x198] sm:$0xff] }
 0x644   :  { %1951 = vmatpush1.msra.mxu1 %v7798_v24  ;;  %1878 = vmatpush1.msra.mxu0 %v1831_v61  ;;  %v6380_v24 = vld [vmem:[%s10231_s0 + $0xd8] sm:$0xff]  ;;  %v2091_v61 = vld [vmem:[#allocation6 + $0x180] sm:$0xff] }
 0x645   :  { %1952 = vmatprep.subr.mxu1 %v7802_v28  ;;  %1879 = vmatprep.subr.mxu0 %v1828_v62  ;;  %v2093_v62 = vld [vmem:[#allocation6 + $0x190] sm:$0xff] }
 0x646   :  { %1953 = vmatpush1.msra.mxu1 %v7806_v32  ;;  %1880 = vmatpush1.msra.mxu0 %v1827_v63  ;;  %v2088_v63 = vld [vmem:[#allocation6 + $0x168] sm:$0xff] }
 0x647   :  { %1954 = vmatprep.subr.mxu1 %v7810_v36  ;;  %1881 = vmatprep.subr.mxu0 %v1824_v1  ;;  %v6379_v36 = vld [vmem:[%s10231_s0 + $0xd0] sm:$0xff]  ;;  %v2090_v1 = vld [vmem:[#allocation6 + $0x178] sm:$0xff] }
 0x648   :  { %1955 = vmatpush1.msra.mxu1 %v7814_v40  ;;  %1882 = vmatpush1.msra.mxu0 %v1823_v9  ;;  %v2087_v9 = vld [vmem:[#allocation6 + $0x160] sm:$0xff] }
 0x649   :  { %1956 = vmatprep.subr.mxu1 %v7818_v42  ;;  %1883 = vmatprep.subr.mxu0 %v1820_v30  ;;  %v2089_v30 = vld [vmem:[#allocation6 + $0x170] sm:$0xff] }
 0x64a   :  { %1957 = vmatpush1.msra.mxu1 %v7822_v54  ;;  %1884 = vmatpush1.msra.mxu0 %v1819_v34  ;;  %v2084_v34 = vld [vmem:[#allocation6 + $0x148] sm:$0xff] }
 0x64b   :  { %1958 = vmatprep.subr.mxu1 %v10626_v3  ;;  %1885 = vmatprep.subr.mxu0 %v1816_v38  ;;  %v2086_v38 = vld [vmem:[#allocation6 + $0x158] sm:$0xff] }
 0x64c   :  { %1959 = vmatpush1.msra.mxu1 %v10628_v5  ;;  %1886 = vmatpush1.msra.mxu0 %v1815_v26  ;;  %v2083_v26 = vld [vmem:[#allocation6 + $0x140] sm:$0xff] }
 0x64d   :  { %1960 = vmatprep.subr.mxu1 %v10630_v7  ;;  %1887 = vmatprep.subr.mxu0 %v1812_v21  ;;  %v2080_v21 = vld [vmem:[#allocation6 + $0x128] sm:$0xff] }
 0x64e   :  { %1961 = vmatpush1.msra.mxu1 %v10632_v10  ;;  %1888 = vmatpush1.msra.mxu0 %v1811_v22  ;;  %v2082_v22 = vld [vmem:[#allocation6 + $0x138] sm:$0xff] }
 0x64f   :  { %1962 = vmatprep.subr.mxu1 %v10634_v12  ;;  %1889 = vmatprep.subr.mxu0 %v1808_v23  ;;  %v2079_v23 = vld [vmem:[#allocation6 + $0x120] sm:$0xff] }
 0x650   :  { %1963 = vmatpush1.msra.mxu1 %v10636_v57  ;;  %1890 = vmatpush1.msra.mxu0 %v1807_v25  ;;  %v2081_v25 = vld [vmem:[#allocation6 + $0x130] sm:$0xff] }
 0x651   :  { %1964 = vmatprep.subr.mxu1 %v10638_v17  ;;  %1891 = vmatprep.subr.mxu0 %v1804_v27  ;;  %v2076_v27 = vld [vmem:[#allocation6 + $0x108] sm:$0xff] }
 0x652   :  { %1965 = vmatpush1.msra.mxu1 %v10641_v16  ;;  %1892 = vmatpush1.msra.mxu0 %v1803_v29  ;;  %v2078_v29 = vld [vmem:[#allocation6 + $0x118] sm:$0xff] }
 0x653   :  { %2242 = vmatprep.subr.mxu1 %v2106_v44  ;;  %1893 = vmatprep.subr.mxu0 %v1800_v31  ;;  %v2085_v44 = vld [vmem:[#allocation6 + $0x150] sm:$0xff]  ;;  %v2075_v31 = vld [vmem:[#allocation6 + $0x100] sm:$0xff] }
 0x654   :  { %1894 = vmatpush1.msra.mxu0 %v1799_v33  ;;  %v2077_v33 = vld [vmem:[#allocation6 + $0x110] sm:$0xff] }
 0x655   :  { %2129 = vmatprep.subr.mxu0 %v2104_v35  ;;  %v2072_v35 = vld [vmem:[#allocation6 + $0xe8] sm:$0xff] }
 0x6f3   :  { %v1688_v39 = vpop.f32.mrf.mxu0  ;;  %v1759_v51 = vpop.f32.mrf.mxu1 }
 0x6f4   :  { %v1764_v43 = vadd.f32 %v6377_v37, %v1688_v39  ;;  %v1766_v54 = vadd.f32 %v6379_v36, %v1759_v51  ;;  %v2074_v37 = vld [vmem:[#allocation6 + $0xf8] sm:$0xff]  ;;  %v2071_v39 = vld [vmem:[#allocation6 + $0xe0] sm:$0xff]  ;;  %v2064_v51 = vld [vmem:[#allocation6 + $0xa8] sm:$0xff] }
 0x6f5   :  { %v1690_v45 = vpop.f32.mrf.mxu0  ;;  %v1761_v28 = vpop.f32.mrf.mxu1  ;;  %v2062_v36 = vld [vmem:[#allocation6 + $0x98] sm:$0xff] }
 0x6f6   :  { %v6381_v47 = vmul.f32 -1.442695, %v1764_v43  ;;  %v1765_v49 = vadd.f32 %v6378_v41, %v1690_v45  ;;  %v1767_v32 = vadd.f32 %v6380_v24, %v1761_v28  ;;  %v2073_v41 = vld [vmem:[#allocation6 + $0xf0] sm:$0xff]  ;;  %v2068_v43 = vld [vmem:[#allocation6 + $0xc8] sm:$0xff]  ;;  %v2070_v45 = vld [vmem:[#allocation6 + $0xd8] sm:$0xff] }
 0x6f7   :  { %v2063_v24 = vld [vmem:[#allocation6 + $0xa0] sm:$0xff]  ;;  %v2065_v28 = vld [vmem:[#allocation6 + $0xb0] sm:$0xff] }
 0x6f8   :  { %6651 = vpow2.f32 %v6381_v47  ;;  %v6382_v53 = vmul.f32 -1.442695, %v1765_v49  ;;  %v6383_v40 = vmul.f32 -1.442695, %v1767_v32  ;;  %v2067_v47 = vld [vmem:[#allocation6 + $0xc0] sm:$0xff]  ;;  %v2069_v49 = vld [vmem:[#allocation6 + $0xd0] sm:$0xff] }
 0x6f9   :  { %v2060_v32 = vld [vmem:[#allocation6 + $0x88] sm:$0xff] }
 0x6fa   :  { %6653 = vpow2.f32 %v6382_v53  ;;  %v2066_v53 = vld [vmem:[#allocation6 + $0xb8] sm:$0xff] }
 0x6fb   :  { %6655 = vpow2.f32 %v6383_v40  ;;  %v2059_v40 = vld [vmem:[#allocation6 + $0x80] sm:$0xff] }
 0x705   :  { %v6652_v42 = vpop.eup %6651 }
 0x706   :  { %v1771_v0 = vadd.f32 1.0, %v6652_v42  ;;  %v2061_v42 = vld [vmem:[#allocation6 + $0x90] sm:$0xff] }
 0x707   :  { %v6654_v3 = vpop.eup %6653 }
 0x708   :  { %6657 = vrcp.f32 %v1771_v0  ;;  %v1777_v5 = vadd.f32 1.0, %v6654_v3  ;;  %v6656_v7 = vpop.eup %6655  ;;  %v2058_v0 = vld [vmem:[#allocation6 + $0x78] sm:$0xff]  ;;  %v2055_v3 = vld [vmem:[#allocation6 + $0x60] sm:$0xff] }
 0x709   :  { %6659 = vtanh.f32 %v1766_v54  ;;  %v1784_v17 = vadd.f32 1.0, %v6656_v7  ;;  %v2056_v54 = vld [vmem:[#allocation6 + $0x68] sm:$0xff] }
 0x70a   :  { %6661 = vrcp.f32 %v1777_v5  ;;  %v2057_v5 = vld [vmem:[#allocation6 + $0x70] sm:$0xff]  ;;  %v2052_v7 = vld [vmem:[#allocation6 + $0x48] sm:$0xff] }
 0x70b   :  { %6663 = vrcp.f32 %v1784_v17  ;;  %v2048_v17 = vld [vmem:[#allocation6 + $0x28] sm:$0xff] }
 0x715   :  { %v6658_v10 = vpop.eup %6657 }
 0x716   :  { %v6660_v12 = vpop.eup %6659 }
 0x717   :  { %v6662_v57 = vpop.eup %6661  ;;  %v1788_v16 = vmul.f32 %v6660_v12, %v6658_v10  ;;  %v2054_v10 = vld [vmem:[#allocation6 + $0x58] sm:$0xff]  ;;  %v2051_v12 = vld [vmem:[#allocation6 + $0x40] sm:$0xff] }
 0x718   :  { %v1787_v46 = vmul.f32 %v6662_v57, %v8049_v8  ;;  %v6664_v14 = vpop.eup %6663  ;;  %v2095_v8 = vld [vmem:[#allocation6 + $0x1a0] sm:$0xff]  ;;  %v2053_v57 = vld [vmem:[#allocation6 + $0x50] sm:$0xff] }
 0x71a   :  { %v8115_v18 = vadd.f32 %v1788_v16, %v1787_v46  ;;  %v2050_v16 = vld [vmem:[#allocation6 + $0x38] sm:$0xff]  ;;  %v2047_v46 = vld [vmem:[#allocation6 + $0x20] sm:$0xff] }
 0x71c   :  { %6665 = vtanh.f32 %v8115_v18 }
 0x729   :  { %v6666_v19 = vpop.eup %6665 }
 0x72a   :  { %v8118_v58 = vmul.f32 %v6666_v19, %v6664_v14  ;;  %v2049_v14 = vld [vmem:[#allocation6 + $0x30] sm:$0xff]  ;;  %v2044_v19 = vld [vmem:[#allocation6 + $0x8] sm:$0xff] }
 0x72c   :  { %1928 = vmatmul.mubr.f32.vlgmr.msra.gmra.mxu0 %v8118_v58  ;;  %1999 = vmatmul.mubr.f32.vlgmr.msra.gmra.mxu1 %v8118_v58 }
 0x72d   :  { %2130 = vmatpush1.msra.mxu0 %v2103_v52  ;;  %2243 = vmatpush1.msra.mxu1 %v2105_v20  ;;  %v2046_v52 = vld [vmem:[#allocation6 + $0x18] sm:$0xff]  ;;  %v2043_v20 = vld [vmem:[#allocation6] sm:$0xff] }
 0x72e   :  { %2131 = vmatprep.subr.mxu0 %v2100_v50  ;;  %2244 = vmatprep.subr.mxu1 %v2102_v60  ;;  %v2045_v50 = vld [vmem:[#allocation6 + $0x10] sm:$0xff]  ;;  %v10644_v60 = vld [vmem:[#allocation34_spill] sm:$0xff] }
 0x72f   :  { %2132 = vmatpush1.msra.mxu0 %v2099_v15  ;;  %2245 = vmatpush1.msra.mxu1 %v2101_v55  ;;  %v10645_v15 = vld [vmem:[#allocation22_spill] sm:$0xff]  ;;  %v10646_v55 = vld [vmem:[#allocation21_spill] sm:$0xff] }
 0x730   :  { %2133 = vmatprep.subr.mxu0 %v2096_v4  ;;  %2246 = vmatprep.subr.mxu1 %v2098_v6  ;;  %v10647_v4 = vld [vmem:[#allocation36_spill] sm:$0xff]  ;;  %v8154_v6 = vld [vmem:[#allocation8 + $0x1f8] sm:$0xff] }
 0x731   :  { %2134 = vmatpush1.msra.mxu0 %v2095_v8  ;;  %2247 = vmatpush1.msra.mxu1 %v2097_v2  ;;  %10649 = vst [vmem:[#allocation31_spill] sm:$0xff] %v8154_v6  ;;  %v8157_v8 = vld [vmem:[#allocation8 + $0x1e0] sm:$0xff]  ;;  %v8163_v2 = vld [vmem:[#allocation8 + $0x1c8] sm:$0xff] }
 0x732   :  { %2135 = vmatprep.subr.mxu0 %v2092_v11  ;;  %2248 = vmatprep.subr.mxu1 %v2094_v48  ;;  %v8169_v11 = vld [vmem:[#allocation8 + $0x1c0] sm:$0xff]  ;;  %v8172_v48 = vld [vmem:[#allocation8 + $0x1d0] sm:$0xff] }
 0x733   :  { %2136 = vmatpush1.msra.mxu0 %v2091_v61  ;;  %2249 = vmatpush1.msra.mxu1 %v2093_v62  ;;  %v8175_v61 = vld [vmem:[#allocation8 + $0x1a8] sm:$0xff]  ;;  %v8178_v62 = vld [vmem:[#allocation8 + $0x1b8] sm:$0xff] }
 0x734   :  { %2137 = vmatprep.subr.mxu0 %v2088_v63  ;;  %2250 = vmatprep.subr.mxu1 %v2090_v1  ;;  %v8181_v63 = vld [vmem:[#allocation8 + $0x1a0] sm:$0xff]  ;;  %v8184_v1 = vld [vmem:[#allocation8 + $0x1b0] sm:$0xff] }
 0x735   :  { %2138 = vmatpush1.msra.mxu0 %v2087_v9  ;;  %2251 = vmatpush1.msra.mxu1 %v2089_v30  ;;  %v8187_v9 = vld [vmem:[#allocation8 + $0x188] sm:$0xff]  ;;  %v8190_v30 = vld [vmem:[#allocation8 + $0x198] sm:$0xff] }
 0x736   :  { %2139 = vmatprep.subr.mxu0 %v2084_v34  ;;  %2252 = vmatprep.subr.mxu1 %v2086_v38  ;;  %v8193_v34 = vld [vmem:[#allocation8 + $0x180] sm:$0xff]  ;;  %v8196_v38 = vld [vmem:[#allocation8 + $0x190] sm:$0xff] }
 0x737   :  { %2140 = vmatpush1.msra.mxu0 %v2083_v26  ;;  %2253 = vmatpush1.msra.mxu1 %v2085_v44  ;;  %v8199_v26 = vld [vmem:[#allocation8 + $0x168] sm:$0xff]  ;;  %v8202_v44 = vld [vmem:[#allocation8 + $0x178] sm:$0xff] }
 0x738   :  { %2141 = vmatprep.subr.mxu0 %v2080_v21  ;;  %2254 = vmatprep.subr.mxu1 %v2082_v22  ;;  %v8205_v21 = vld [vmem:[#allocation8 + $0x160] sm:$0xff]  ;;  %v8208_v22 = vld [vmem:[#allocation8 + $0x170] sm:$0xff] }
 0x739   :  { %2142 = vmatpush1.msra.mxu0 %v2079_v23  ;;  %2255 = vmatpush1.msra.mxu1 %v2081_v25  ;;  %v8211_v23 = vld [vmem:[#allocation8 + $0x148] sm:$0xff]  ;;  %v8214_v25 = vld [vmem:[#allocation8 + $0x158] sm:$0xff] }
 0x73a   :  { %2143 = vmatprep.subr.mxu0 %v2076_v27  ;;  %2256 = vmatprep.subr.mxu1 %v2078_v29  ;;  %v8217_v27 = vld [vmem:[#allocation8 + $0x140] sm:$0xff]  ;;  %v8220_v29 = vld [vmem:[#allocation8 + $0x150] sm:$0xff] }
 0x73b   :  { %2144 = vmatpush1.msra.mxu0 %v2075_v31  ;;  %2257 = vmatpush1.msra.mxu1 %v2077_v33  ;;  %v8223_v31 = vld [vmem:[#allocation8 + $0x128] sm:$0xff]  ;;  %v8226_v33 = vld [vmem:[#allocation8 + $0x138] sm:$0xff] }
 0x73c   :  { %2145 = vmatprep.subr.mxu0 %v2072_v35  ;;  %2258 = vmatprep.subr.mxu1 %v2074_v37  ;;  %v8229_v35 = vld [vmem:[#allocation8 + $0x120] sm:$0xff]  ;;  %v8232_v37 = vld [vmem:[#allocation8 + $0x130] sm:$0xff] }
 0x73d   :  { %2146 = vmatpush1.msra.mxu0 %v2071_v39  ;;  %2259 = vmatpush1.msra.mxu1 %v2073_v41  ;;  %v8235_v39 = vld [vmem:[#allocation8 + $0x108] sm:$0xff]  ;;  %v8238_v41 = vld [vmem:[#allocation8 + $0x118] sm:$0xff] }
 0x73e   :  { %2147 = vmatprep.subr.mxu0 %v2068_v43  ;;  %2260 = vmatprep.subr.mxu1 %v2070_v45  ;;  %v8241_v43 = vld [vmem:[#allocation8 + $0x100] sm:$0xff]  ;;  %v8244_v45 = vld [vmem:[#allocation8 + $0x110] sm:$0xff] }
 0x73f   :  { %2148 = vmatpush1.msra.mxu0 %v2067_v47  ;;  %2261 = vmatpush1.msra.mxu1 %v2069_v49  ;;  %v8247_v47 = vld [vmem:[#allocation8 + $0xe8] sm:$0xff]  ;;  %v8250_v49 = vld [vmem:[#allocation8 + $0xf8] sm:$0xff] }
 0x740   :  { %2149 = vmatprep.subr.mxu0 %v2064_v51  ;;  %2262 = vmatprep.subr.mxu1 %v2066_v53  ;;  %v8253_v51 = vld [vmem:[#allocation8 + $0xe0] sm:$0xff]  ;;  %v8256_v53 = vld [vmem:[#allocation8 + $0xf0] sm:$0xff] }
 0x741   :  { %2150 = vmatpush1.msra.mxu0 %v2063_v24  ;;  %2263 = vmatpush1.msra.mxu1 %v2065_v28  ;;  %v8259_v24 = vld [vmem:[#allocation8 + $0xc8] sm:$0xff]  ;;  %v8262_v28 = vld [vmem:[#allocation8 + $0xd8] sm:$0xff] }
 0x742   :  { %2151 = vmatprep.subr.mxu0 %v2060_v32  ;;  %2264 = vmatprep.subr.mxu1 %v2062_v36  ;;  %v8265_v32 = vld [vmem:[#allocation8 + $0xc0] sm:$0xff]  ;;  %v8268_v36 = vld [vmem:[#allocation8 + $0xd0] sm:$0xff] }
 0x743   :  { %2152 = vmatpush1.msra.mxu0 %v2059_v40  ;;  %2265 = vmatpush1.msra.mxu1 %v2061_v42  ;;  %v8271_v40 = vld [vmem:[#allocation8 + $0xa8] sm:$0xff]  ;;  %v8274_v42 = vld [vmem:[#allocation8 + $0xb8] sm:$0xff] }
 0x744   :  { %2153 = vmatprep.subr.mxu0 %v2056_v54  ;;  %2266 = vmatprep.subr.mxu1 %v2058_v0  ;;  %v8277_v54 = vld [vmem:[#allocation8 + $0xa0] sm:$0xff]  ;;  %v8280_v0 = vld [vmem:[#allocation8 + $0xb0] sm:$0xff] }
 0x745   :  { %2154 = vmatpush1.msra.mxu0 %v2055_v3  ;;  %2267 = vmatpush1.msra.mxu1 %v2057_v5  ;;  %v8283_v3 = vld [vmem:[#allocation8 + $0x88] sm:$0xff]  ;;  %v8286_v5 = vld [vmem:[#allocation8 + $0x98] sm:$0xff] }
 0x746   :  { %2155 = vmatprep.subr.mxu0 %v2052_v7  ;;  %2268 = vmatprep.subr.mxu1 %v2054_v10  ;;  %10650 = vst [vmem:[#allocation24_spill] sm:$0xff] %v8286_v5  ;;  %v8289_v7 = vld [vmem:[#allocation8 + $0x80] sm:$0xff]  ;;  %v8292_v10 = vld [vmem:[#allocation8 + $0x90] sm:$0xff] }
 0x747   :  { %2156 = vmatpush1.msra.mxu0 %v2051_v12  ;;  %2269 = vmatpush1.msra.mxu1 %v2053_v57  ;;  %10651 = vst [vmem:[#allocation25_spill] sm:$0xff] %v8289_v7  ;;  %10652 = vst [vmem:[#allocation18_spill] sm:$0xff] %v8292_v10  ;;  %v8295_v12 = vld [vmem:[#allocation8 + $0x68] sm:$0xff]  ;;  %v8298_v57 = vld [vmem:[#allocation8 + $0x78] sm:$0xff] }
 0x748   :  { %2157 = vmatprep.subr.mxu0 %v2048_v17  ;;  %2270 = vmatprep.subr.mxu1 %v2050_v16  ;;  %10653 = vst [vmem:[#allocation32_spill] sm:$0xff] %v8295_v12  ;;  %10654 = vst [vmem:[#allocation26_spill] sm:$0xff] %v8298_v57  ;;  %v8301_v17 = vld [vmem:[#allocation8 + $0x60] sm:$0xff]  ;;  %v8304_v16 = vld [vmem:[#allocation8 + $0x70] sm:$0xff] }
 0x749   :  { %2158 = vmatpush1.msra.mxu0 %v2047_v46  ;;  %2271 = vmatpush1.msra.mxu1 %v2049_v14  ;;  %10655 = vst [vmem:[#allocation27_spill] sm:$0xff] %v8301_v17  ;;  %10656 = vst [vmem:[#allocation19_spill] sm:$0xff] %v8304_v16  ;;  %v8307_v46 = vld [vmem:[#allocation8 + $0x48] sm:$0xff]  ;;  %v8310_v14 = vld [vmem:[#allocation8 + $0x58] sm:$0xff] }
 0x74a   :  { %2159 = vmatprep.subr.mxu0 %v2044_v19  ;;  %2272 = vmatprep.subr.mxu1 %v2046_v52  ;;  %10657 = vst [vmem:[#allocation33_spill] sm:$0xff] %v8307_v46  ;;  %10658 = vst [vmem:[#allocation28_spill] sm:$0xff] %v8310_v14  ;;  %v8313_v19 = vld [vmem:[#allocation8 + $0x40] sm:$0xff]  ;;  %v8316_v52 = vld [vmem:[#allocation8 + $0x50] sm:$0xff] }
 0x74b   :  { %2160 = vmatpush1.msra.mxu0 %v2043_v20  ;;  %2193 = vmatprep.mubr.f32.mxu0 %v10640_v56  ;;  %10659 = vst [vmem:[#allocation15_spill] sm:$0xff] %v8313_v19  ;;  %10660 = vst [vmem:[#allocation20_spill] sm:$0xff] %v8316_v52  ;;  %v8319_v20 = vld [vmem:[#allocation8 + $0x28] sm:$0xff] }
 0x74c   :  { %2273 = vmatpush1.msra.mxu1 %v2045_v50  ;;  %2306 = vmatprep.mubr.f32.mxu1 %v10640_v56  ;;  %10661 = vst [vmem:[#allocation16_spill] sm:$0xff] %v8319_v20  ;;  %v8322_v50 = vld [vmem:[#allocation8 + $0x38] sm:$0xff] }
 0x74d   :  { %2194 = vmatmul.mubr.f32.vlgmr.msra.gmra.mxu0 %v10644_v60  ;;  %2307 = vmatmul.mubr.f32.vlgmr.msra.gmra.mxu1 %v10644_v60  ;;  %10662 = vst [vmem:[#allocation29_spill] sm:$0xff] %v8322_v50  ;;  %v8325_v60 = vld [vmem:[#allocation8 + $0x20] sm:$0xff] }
 0x74e   :  { %2199 = vmatprep.mubr.f32.mxu0 %v10640_v56  ;;  %2312 = vmatprep.mubr.f32.mxu1 %v10640_v56  ;;  %10663 = vst [vmem:[#allocation35_spill] sm:$0xff] %v8325_v60 }
 0x74f   :  { %2529 = vmatprep.subr.mxu1 %v8154_v6 }
 0x751   :  { %2200 = vmatmul.mubr.f32.gmra.mxu0 %v10645_v15  ;;  %2313 = vmatmul.mubr.f32.gmra.mxu1 %v10645_v15  ;;  %v8328_v15 = vld [vmem:[#allocation8 + $0x30] sm:$0xff] }
 0x752   :  { %2205 = vmatprep.mubr.f32.mxu0 %v10640_v56  ;;  %2318 = vmatprep.mubr.f32.mxu1 %v10640_v56  ;;  %10664 = vst [vmem:[#allocation30_spill] sm:$0xff] %v8328_v15 }
 0x755   :  { %2206 = vmatmul.mubr.f32.gmra.mxu0 %v10646_v55  ;;  %2319 = vmatmul.mubr.f32.gmra.mxu1 %v10646_v55  ;;  %v8331_v55 = vld [vmem:[#allocation8 + $0x8] sm:$0xff] }
 0x756   :  { %2211 = vmatprep.mubr.f32.mxu0 %v10640_v56  ;;  %2324 = vmatprep.mubr.f32.mxu1 %v10640_v56  ;;  %10665 = vst [vmem:[#allocation23_spill] sm:$0xff] %v8331_v55 }
 0x759   :  { %2212 = vmatmul.mubr.f32.gmra.mxu0 %v10647_v4  ;;  %2325 = vmatmul.mubr.f32.gmra.mxu1 %v10647_v4  ;;  %v8334_v4 = vld [vmem:[#allocation8] sm:$0xff] }
 0x75a   :  { %2217 = vmatprep.mubr.f32.mxu0 %v10640_v56  ;;  %2330 = vmatprep.mubr.f32.mxu1 %v10640_v56  ;;  %10666 = vst [vmem:[#allocation34_spill] sm:$0xff] %v8334_v4 }
 0x75d   :  { %2218 = vmatmul.mubr.f32.gmra.mxu0 %v7966_v59  ;;  %2331 = vmatmul.mubr.f32.gmra.mxu1 %v7966_v59  ;;  %v8152_v59 = vld [vmem:[#allocation8 + $0x1e8] sm:$0xff] }
 0x75e   :  { %2223 = vmatprep.mubr.f32.mxu0 %v10640_v56  ;;  %2336 = vmatprep.mubr.f32.mxu1 %v10640_v56  ;;  %10648 = vst [vmem:[#allocation17_spill] sm:$0xff] %v8152_v59 }
 0x75f   :  { %2458 = vmatprep.subr.mxu0 %v8152_v59 }
 0x760   :  { %2459 = vmatpush1.msra.mxu0 %v8157_v8 }
 0x761   :  { %2224 = vmatmul.mubr.f32.gmra.mxu0 %v8052_v13  ;;  %2337 = vmatmul.mubr.f32.gmra.mxu1 %v8052_v13  ;;  %v8160_v13 = vld [vmem:[#allocation8 + $0x1f0] sm:$0xff] }
 0x762   :  { %2229 = vmatprep.mubr.f32.mxu0 %v10640_v56  ;;  %2342 = vmatprep.mubr.f32.mxu1 %v10640_v56 }
 0x763   :  { %2530 = vmatpush1.msra.mxu1 %v8160_v13  ;;  %2460 = vmatprep.subr.mxu0 %v8163_v2 }
 0x764   :  { %2461 = vmatpush1.msra.mxu0 %v8169_v11 }
 0x765   :  { %2230 = vmatmul.mubr.f32.gmra.mxu0 %v8118_v58  ;;  %2343 = vmatmul.mubr.f32.gmra.mxu1 %v8118_v58  ;;  %v8166_v58 = vld [vmem:[#allocation8 + $0x1d8] sm:$0xff] }
 0x766   :  { %2235 = vmatprep.mubr.f32.mxu0 %v10640_v56  ;;  %2348 = vmatprep.mubr.f32.mxu1 %v10640_v56 }
 0x767   :  { %2531 = vmatprep.subr.mxu1 %v8166_v58  ;;  %2462 = vmatprep.subr.mxu0 %v8175_v61 }
 0x768   :  { %2532 = vmatpush1.msra.mxu1 %v8172_v48  ;;  %2463 = vmatpush1.msra.mxu0 %v8181_v63 }
 0x769   :  { %2533 = vmatprep.subr.mxu1 %v8178_v62  ;;  %2464 = vmatprep.subr.mxu0 %v8187_v9 }
 0x76a   :  { %2534 = vmatpush1.msra.mxu1 %v8184_v1  ;;  %2465 = vmatpush1.msra.mxu0 %v8193_v34 }
 0x76b   :  { %2535 = vmatprep.subr.mxu1 %v8190_v30  ;;  %2466 = vmatprep.subr.mxu0 %v8199_v26 }
 0x76c   :  { %2536 = vmatpush1.msra.mxu1 %v8196_v38  ;;  %2467 = vmatpush1.msra.mxu0 %v8205_v21 }
 0x76d   :  { %2537 = vmatprep.subr.mxu1 %v8202_v44  ;;  %2468 = vmatprep.subr.mxu0 %v8211_v23 }
 0x76e   :  { %2538 = vmatpush1.msra.mxu1 %v8208_v22  ;;  %2469 = vmatpush1.msra.mxu0 %v8217_v27 }
 0x76f   :  { %2539 = vmatprep.subr.mxu1 %v8214_v25  ;;  %2470 = vmatprep.subr.mxu0 %v8223_v31 }
 0x770   :  { %2540 = vmatpush1.msra.mxu1 %v8220_v29  ;;  %2471 = vmatpush1.msra.mxu0 %v8229_v35 }
 0x771   :  { %2541 = vmatprep.subr.mxu1 %v8226_v33  ;;  %2472 = vmatprep.subr.mxu0 %v8235_v39 }
 0x772   :  { %2542 = vmatpush1.msra.mxu1 %v8232_v37  ;;  %2473 = vmatpush1.msra.mxu0 %v8241_v43 }
 0x773   :  { %2543 = vmatprep.subr.mxu1 %v8238_v41  ;;  %2474 = vmatprep.subr.mxu0 %v8247_v47 }
 0x774   :  { %2544 = vmatpush1.msra.mxu1 %v8244_v45  ;;  %2475 = vmatpush1.msra.mxu0 %v8253_v51 }
 0x775   :  { %2545 = vmatprep.subr.mxu1 %v8250_v49  ;;  %2476 = vmatprep.subr.mxu0 %v8259_v24 }
 0x776   :  { %2546 = vmatpush1.msra.mxu1 %v8256_v53  ;;  %2477 = vmatpush1.msra.mxu0 %v8265_v32 }
 0x777   :  { %2547 = vmatprep.subr.mxu1 %v8262_v28  ;;  %2478 = vmatprep.subr.mxu0 %v8271_v40 }
 0x778   :  { %2548 = vmatpush1.msra.mxu1 %v8268_v36  ;;  %2479 = vmatpush1.msra.mxu0 %v8277_v54 }
 0x779   :  { %2549 = vmatprep.subr.mxu1 %v8274_v42  ;;  %2480 = vmatprep.subr.mxu0 %v8283_v3 }
 0x77a   :  { %2550 = vmatpush1.msra.mxu1 %v8280_v0  ;;  %2481 = vmatpush1.msra.mxu0 %v8289_v7 }
 0x77b   :  { %2551 = vmatprep.subr.mxu1 %v8286_v5  ;;  %2482 = vmatprep.subr.mxu0 %v8295_v12 }
 0x77c   :  { %2552 = vmatpush1.msra.mxu1 %v8292_v10  ;;  %2483 = vmatpush1.msra.mxu0 %v8301_v17 }
 0x77d   :  { %2553 = vmatprep.subr.mxu1 %v8298_v57  ;;  %2484 = vmatprep.subr.mxu0 %v8307_v46 }
 0x77e   :  { %2554 = vmatpush1.msra.mxu1 %v8304_v16  ;;  %2485 = vmatpush1.msra.mxu0 %v8313_v19  ;;  %v8336_v19 = vld [vmem:[#allocation8 + $0x18] sm:$0xff]  ;;  %v6386_v16 = vld [vmem:[%s10231_s0 + $0xf0] sm:$0xff] }
 0x77f   :  { %2555 = vmatprep.subr.mxu1 %v8310_v14  ;;  %2486 = vmatprep.subr.mxu0 %v8319_v20  ;;  %10667 = vst [vmem:[#allocation22_spill] sm:$0xff] %v8336_v19  ;;  %v8340_v20 = vld [vmem:[#allocation8 + $0x10] sm:$0xff] }
 0x780   :  { %2556 = vmatpush1.msra.mxu1 %v8316_v52  ;;  %2487 = vmatpush1.msra.mxu0 %v8325_v60  ;;  %10668 = vst [vmem:[#allocation21_spill] sm:$0xff] %v8340_v20 }
 0x781   :  { %2557 = vmatprep.subr.mxu1 %v8322_v50  ;;  %2488 = vmatprep.subr.mxu0 %v8331_v55  ;;  %v6385_v55 = vld [vmem:[%s10231_s0 + $0xe8] sm:$0xff] }
 0x782   :  { %2558 = vmatpush1.msra.mxu1 %v8328_v15  ;;  %2489 = vmatpush1.msra.mxu0 %v8334_v4  ;;  %v6384_v15 = vld [vmem:[%s10231_s0 + $0xe0] sm:$0xff] }
 0x783   :  { %2559 = vmatprep.subr.mxu1 %v8336_v19  ;;  %2700 = vmatprep.subr.mxu0 %v8152_v59 }
 0x784   :  { %2560 = vmatpush1.msra.mxu1 %v8340_v20 }
 0x785   :  { %2771 = vmatprep.subr.mxu1 %v8154_v6  ;;  %v6387_v6 = vld [vmem:[%s10231_s0 + $0xf8] sm:$0xff] }
 0x7ec   :  { %v1929_v60 = vpop.f32.mrf.mxu0  ;;  %v2000_v4 = vpop.f32.mrf.mxu1 }
 0x7ed   :  { %v2005_v19 = vadd.f32 %v6384_v15, %v1929_v60  ;;  %v2007_v60 = vadd.f32 %v6386_v16, %v2000_v4  ;;  %v10673_v4 = vld [vmem:[#allocation19_spill] sm:$0xff] }
 0x7ee   :  { %v1931_v50 = vpop.f32.mrf.mxu0  ;;  %v2002_v59 = vpop.f32.mrf.mxu1 }
 0x7ef   :  { %v6388_v52 = vmul.f32 -1.442695, %v2005_v19  ;;  %v2006_v14 = vadd.f32 %v6385_v55, %v1931_v50  ;;  %v2008_v46 = vadd.f32 %v6387_v6, %v2002_v59 }
 0x7f1   :  { %6667 = vpow2.f32 %v6388_v52  ;;  %v6389_v20 = vmul.f32 -1.442695, %v2006_v14  ;;  %v6390_v17 = vmul.f32 -1.442695, %v2008_v46 }
 0x7f3   :  { %6669 = vpow2.f32 %v6389_v20 }
 0x7f4   :  { %6671 = vpow2.f32 %v6390_v17  ;;  %v10672_v17 = vld [vmem:[#allocation27_spill] sm:$0xff] }
 0x7fe   :  { %v6668_v57 = vpop.eup %6667 }
 0x7ff   :  { %v2012_v15 = vadd.f32 1.0, %v6668_v57 }
 0x800   :  { %v6670_v19 = vpop.eup %6669 }
 0x801   :  { %6673 = vrcp.f32 %v2012_v15  ;;  %v2018_v52 = vadd.f32 1.0, %v6670_v19  ;;  %v6672_v14 = vpop.eup %6671  ;;  %v10675_v15 = vld [vmem:[#allocation28_spill] sm:$0xff]  ;;  %v10676_v19 = vld [vmem:[#allocation15_spill] sm:$0xff] }
 0x802   :  { %6675 = vtanh.f32 %v2007_v60  ;;  %v2025_v12 = vadd.f32 1.0, %v6672_v14  ;;  %v10674_v60 = vld [vmem:[#allocation33_spill] sm:$0xff]  ;;  %v10678_v14 = vld [vmem:[#allocation16_spill] sm:$0xff] }
 0x803   :  { %6677 = vrcp.f32 %v2018_v52  ;;  %v10677_v52 = vld [vmem:[#allocation20_spill] sm:$0xff] }
 0x804   :  { %6679 = vrcp.f32 %v2025_v12  ;;  %v10671_v12 = vld [vmem:[#allocation26_spill] sm:$0xff] }
 0x80e   :  { %v6674_v20 = vpop.eup %6673 }
 0x80f   :  { %v6676_v50 = vpop.eup %6675 }
 0x810   :  { %v6678_v55 = vpop.eup %6677  ;;  %v2029_v59 = vmul.f32 %v6676_v50, %v6674_v20  ;;  %v10679_v20 = vld [vmem:[#allocation29_spill] sm:$0xff]  ;;  %v10680_v50 = vld [vmem:[#allocation35_spill] sm:$0xff] }
 0x811   :  { %v2028_v6 = vmul.f32 %v6678_v55, %v8115_v18  ;;  %v6680_v46 = vpop.eup %6679  ;;  %v10669_v18 = vld [vmem:[#allocation18_spill] sm:$0xff] }
 0x812   :  { %v10681_v55 = vld [vmem:[#allocation30_spill] sm:$0xff] }
 0x813   :  { %v2030_v10 = vadd.f32 %v2029_v59, %v2028_v6  ;;  %v10682_v59 = vld [vmem:[#allocation23_spill] sm:$0xff]  ;;  %v10683_v6 = vld [vmem:[#allocation22_spill] sm:$0xff] }
 0x815   :  { %6681 = vtanh.f32 %v2030_v10  ;;  %v10670_v10 = vld [vmem:[#allocation32_spill] sm:$0xff] }
 0x822   :  { %v6682_v16 = vpop.eup %6681 }
 0x823   :  { %v2032_v57 = vmul.f32 %v6682_v16, %v6680_v46  ;;  %v10684_v46 = vld [vmem:[#allocation34_spill] sm:$0xff]  ;;  %v10685_v16 = vld [vmem:[#allocation21_spill] sm:$0xff] }
 0x825   :  { %2236 = vmatmul.mubr.f32.gmra.mxu0 %v2032_v57  ;;  %2349 = vmatmul.mubr.f32.gmra.mxu1 %v2032_v57  ;;  %v10686_v57 = vld [vmem:[#allocation17_spill] sm:$0xff] }
 0x826   :  { %2522 = vmatprep.mubr.f32.mxu0 %v10640_v56  ;;  %2593 = vmatprep.mubr.f32.mxu1 %v10640_v56 }
 0x829   :  { %2523 = vmatmul.mubr.f32.vlgmr.msra.gmra.mxu0 %v10640_v56  ;;  %2594 = vmatmul.mubr.f32.vlgmr.msra.gmra.mxu1 %v10640_v56 }
 0x82a   :  { %2701 = vmatpush1.msra.mxu0 %v8157_v8  ;;  %2772 = vmatpush1.msra.mxu1 %v8160_v13 }
 0x82b   :  { %2702 = vmatprep.subr.mxu0 %v8163_v2  ;;  %2773 = vmatprep.subr.mxu1 %v8166_v58 }
 0x82c   :  { %2703 = vmatpush1.msra.mxu0 %v8169_v11  ;;  %2774 = vmatpush1.msra.mxu1 %v8172_v48 }
 0x82d   :  { %2704 = vmatprep.subr.mxu0 %v8175_v61  ;;  %2775 = vmatprep.subr.mxu1 %v8178_v62 }
 0x82e   :  { %2705 = vmatpush1.msra.mxu0 %v8181_v63  ;;  %2776 = vmatpush1.msra.mxu1 %v8184_v1 }
 0x82f   :  { %2706 = vmatprep.subr.mxu0 %v8187_v9  ;;  %2777 = vmatprep.subr.mxu1 %v8190_v30 }
 0x830   :  { %2707 = vmatpush1.msra.mxu0 %v8193_v34  ;;  %2778 = vmatpush1.msra.mxu1 %v8196_v38 }
 0x831   :  { %2708 = vmatprep.subr.mxu0 %v8199_v26  ;;  %2779 = vmatprep.subr.mxu1 %v8202_v44 }
 0x832   :  { %2709 = vmatpush1.msra.mxu0 %v8205_v21  ;;  %2780 = vmatpush1.msra.mxu1 %v8208_v22 }
 0x833   :  { %2710 = vmatprep.subr.mxu0 %v8211_v23  ;;  %2781 = vmatprep.subr.mxu1 %v8214_v25 }
 0x834   :  { %2711 = vmatpush1.msra.mxu0 %v8217_v27  ;;  %2782 = vmatpush1.msra.mxu1 %v8220_v29 }
 0x835   :  { %2712 = vmatprep.subr.mxu0 %v8223_v31  ;;  %2783 = vmatprep.subr.mxu1 %v8226_v33 }
 0x836   :  { %2713 = vmatpush1.msra.mxu0 %v8229_v35  ;;  %2784 = vmatpush1.msra.mxu1 %v8232_v37 }
 0x837   :  { %2714 = vmatprep.subr.mxu0 %v8235_v39  ;;  %2785 = vmatprep.subr.mxu1 %v8238_v41 }
 0x838   :  { %2715 = vmatpush1.msra.mxu0 %v8241_v43  ;;  %2786 = vmatpush1.msra.mxu1 %v8244_v45 }
 0x839   :  { %2716 = vmatprep.subr.mxu0 %v8247_v47  ;;  %2787 = vmatprep.subr.mxu1 %v8250_v49 }
 0x83a   :  { %2717 = vmatpush1.msra.mxu0 %v8253_v51  ;;  %2788 = vmatpush1.msra.mxu1 %v8256_v53 }
 0x83b   :  { %2718 = vmatprep.subr.mxu0 %v8259_v24  ;;  %2789 = vmatprep.subr.mxu1 %v8262_v28 }
 0x83c   :  { %2719 = vmatpush1.msra.mxu0 %v8265_v32  ;;  %2790 = vmatpush1.msra.mxu1 %v8268_v36 }
 0x83d   :  { %2720 = vmatprep.subr.mxu0 %v8271_v40  ;;  %2791 = vmatprep.subr.mxu1 %v8274_v42 }
 0x83e   :  { %2721 = vmatpush1.msra.mxu0 %v8277_v54  ;;  %2792 = vmatpush1.msra.mxu1 %v8280_v0 }
 0x83f   :  { %2722 = vmatprep.subr.mxu0 %v8283_v3  ;;  %2793 = vmatprep.subr.mxu1 %v8286_v5 }
 0x840   :  { %2723 = vmatpush1.msra.mxu0 %v8289_v7  ;;  %2794 = vmatpush1.msra.mxu1 %v10669_v18 }
 0x841   :  { %2724 = vmatprep.subr.mxu0 %v10670_v10  ;;  %2795 = vmatprep.subr.mxu1 %v10671_v12 }
 0x842   :  { %2725 = vmatpush1.msra.mxu0 %v10672_v17  ;;  %2796 = vmatpush1.msra.mxu1 %v10673_v4 }
 0x843   :  { %2726 = vmatprep.subr.mxu0 %v10674_v60  ;;  %2797 = vmatprep.subr.mxu1 %v10675_v15 }
 0x844   :  { %2727 = vmatpush1.msra.mxu0 %v10676_v19  ;;  %2798 = vmatpush1.msra.mxu1 %v10677_v52 }
 0x845   :  { %2728 = vmatprep.subr.mxu0 %v10678_v14  ;;  %2799 = vmatprep.subr.mxu1 %v10679_v20  ;;  %v10687_v14 = vld [vmem:[#allocation31_spill] sm:$0xff]  ;;  %v2195_v20 = vpop.f32.mrf.mxu0 }
 0x846   :  { %2729 = vmatpush1.msra.mxu0 %v10680_v50  ;;  %2800 = vmatpush1.msra.mxu1 %v10681_v55  ;;  %v2308_v50 = vpop.f32.mrf.mxu1 }
 0x847   :  { %2730 = vmatprep.subr.mxu0 %v10682_v59  ;;  %2801 = vmatprep.subr.mxu1 %v10683_v6  ;;  %v2197_v52 = vpop.f32.mrf.mxu0 }
 0x848   :  { %2731 = vmatpush1.msra.mxu0 %v10684_v46  ;;  %2764 = vmatprep.mubr.f32.mxu0 %v10640_v56  ;;  %v2310_v55 = vpop.f32.mrf.mxu1 }
 0x849   :  { %2802 = vmatpush1.msra.mxu1 %v10685_v16  ;;  %2835 = vmatprep.mubr.f32.mxu1 %v10640_v56  ;;  %v8429_v19 = vpop.f32.mrf.mxu0 }
 0x84a   :  { %2942 = vmatprep.subr.mxu0 %v10686_v57  ;;  %3013 = vmatprep.subr.mxu1 %v10687_v14  ;;  %10688 = vst [vmem:[#allocation36_spill] sm:$0xff] %v8429_v19  ;;  %v8431_v59 = vpop.f32.mrf.mxu1 }
 0x84b   :  { %10689 = vst [vmem:[#allocation17_spill] sm:$0xff] %v8431_v59  ;;  %v8433_v6 = vpop.f32.mrf.mxu0 }
 0x84c   :  { %10690 = vst [vmem:[#allocation31_spill] sm:$0xff] %v8433_v6  ;;  %v8435_v46 = vpop.f32.mrf.mxu1 }
 0x84d   :  { %10691 = vst [vmem:[#allocation37_spill] sm:$0xff] %v8435_v46  ;;  %v8437_v15 = vpop.f32.mrf.mxu0 }
 0x84e   :  { %10692 = vst [vmem:[#allocation38_spill] sm:$0xff] %v8437_v15  ;;  %v8439_v16 = vpop.f32.mrf.mxu1 }
 0x84f   :  { %10693 = vst [vmem:[#allocation39_spill] sm:$0xff] %v8439_v16  ;;  %v8441_v56 = vpop.f32.mrf.mxu0 }
 0x850   :  { %10694 = vst [vmem:[#allocation40_spill] sm:$0xff] %v8441_v56  ;;  %v8443_v57 = vpop.f32.mrf.mxu1  ;;  %v2109_v56 = vlaneseq }
 0x851   :  { %10695 = vst [vmem:[#allocation41_spill] sm:$0xff] %v8443_v57  ;;  %v8445_v14 = vpop.f32.mrf.mxu0 }
 0x852   :  { %10696 = vst [vmem:[#allocation42_spill] sm:$0xff] %v8445_v14  ;;  %v8447_v60 = vpop.f32.mrf.mxu1 }
 0x853   :  { %10697 = vst [vmem:[#allocation43_spill] sm:$0xff] %v8447_v60  ;;  %v8449_v4 = vpop.f32.mrf.mxu0  ;;  %v8467_v60 = vshrl.u32 %v2109_v56, 7 }
 0x854   :  { %10698 = vst [vmem:[#allocation44_spill] sm:$0xff] %v8449_v4  ;;  %v8451_v19 = vpop.f32.mrf.mxu1 }
 0x855   :  { %10699 = vst [vmem:[#allocation45_spill] sm:$0xff] %v8451_v19  ;;  %v8453_v59 = vpop.f32.mrf.mxu0  ;;  %10707 = vst [vmem:[#allocation53_spill] sm:$0xff] %v8467_v60 }
 0x856   :  { %10700 = vst [vmem:[#allocation46_spill] sm:$0xff] %v8453_v59  ;;  %v8455_v6 = vpop.f32.mrf.mxu1  ;;  %v10359_v59 = vsub.s32 0, %v8467_v60 }
 0x857   :  { %10701 = vst [vmem:[#allocation47_spill] sm:$0xff] %v8455_v6  ;;  %v8457_v46 = vpop.f32.mrf.mxu0 }
 0x858   :  { %10702 = vst [vmem:[#allocation48_spill] sm:$0xff] %v8457_v46  ;;  %v8459_v15 = vpop.f32.mrf.mxu1 }
 0x859   :  { %10703 = vst [vmem:[#allocation49_spill] sm:$0xff] %v8459_v15  ;;  %v8461_v16 = vpop.f32.mrf.mxu0  ;;  %v2107_v15 = vld [vmem:[%s10235_s4] sm:$0xf] }
 0x85a   :  { %10704 = vst [vmem:[#allocation50_spill] sm:$0xff] %v8461_v16  ;;  %v8463_v57 = vpop.f32.mrf.mxu1  ;;  %v10362_v16 = vsub.s32 1, %v8467_v60  ;;  %v8484_v56 = vrot.slane %v2107_v15, %v10359_v59 }
 0x85b   :  { %10705 = vst [vmem:[#allocation51_spill] sm:$0xff] %v8463_v57  ;;  %v8465_v14 = vpop.f32.mrf.mxu0 }
 0x85c   :  { %10706 = vst [vmem:[#allocation52_spill] sm:$0xff] %v8465_v14  ;;  %v8469_v4 = vpop.f32.mrf.mxu1  ;;  %10712 = vst [vmem:[#allocation58_spill] sm:$0xff] %v8484_v56  ;;  %v2196_v17 = vadd.f32 %v2195_v20, %v8484_v56  ;;  %v10372_v20 = vsub.s32 2, %v8467_v60 }
 0x85d   :  { %10708 = vst [vmem:[#allocation54_spill] sm:$0xff] %v8469_v4  ;;  %v8471_v19 = vpop.f32.mrf.mxu0 }
 0x85e   :  { %10709 = vst [vmem:[#allocation55_spill] sm:$0xff] %v8471_v19  ;;  %v8474_v6 = vpop.f32.mrf.mxu1  ;;  %v8492_v19 = vrot.slane %v2107_v15, %v10362_v16 }
 0x85f   :  { %10710 = vst [vmem:[#allocation56_spill] sm:$0xff] %v8474_v6  ;;  %v8480_v46 = vpop.f32.mrf.mxu0 }
 0x860   :  { %10711 = vst [vmem:[#allocation57_spill] sm:$0xff] %v8480_v46  ;;  %v8486_v57 = vpop.f32.mrf.mxu1  ;;  %10715 = vst [vmem:[#allocation61_spill] sm:$0xff] %v8492_v19  ;;  %v2198_v46 = vadd.f32 %v2197_v52, %v8492_v19 }
 0x861   :  { %10713 = vst [vmem:[#allocation59_spill] sm:$0xff] %v8486_v57  ;;  %v10365_v57 = vsub.s32 3, %v8467_v60 }
 0x8e5   :  { %v8488_v4 = vpop.f32.mrf.mxu0  ;;  %v8494_v6 = vpop.f32.mrf.mxu1 }
 0x8e6   :  { %10714 = vst [vmem:[#allocation60_spill] sm:$0xff] %v8488_v4  ;;  %10716 = vst [vmem:[#allocation62_spill] sm:$0xff] %v8494_v6  ;;  %v8505_v6 = vrot.slane %v2107_v15, %v10365_v57 }
 0x8e7   :  { %v8496_v14 = vpop.f32.mrf.mxu0  ;;  %v8500_v10 = vpop.f32.mrf.mxu1 }
 0x8e8   :  { %10717 = vst [vmem:[#allocation63_spill] sm:$0xff] %v8496_v14  ;;  %10718 = vst [vmem:[#allocation64_spill] sm:$0xff] %v8500_v10  ;;  %v2311_v52 = vadd.f32 %v2310_v55, %v8505_v6 }
 0x8e9   :  { %v2524_v12 = vpop.f32.mrf.mxu0  ;;  %v2595_v16 = vpop.f32.mrf.mxu1  ;;  %10719 = vst [vmem:[#allocation65_spill] sm:$0xff] %v8505_v6 }
 0x8ea   :  { %v2600_v59 = vadd.f32 %v2524_v12, %v2196_v17  ;;  %v8511_v12 = vrot.slane %v2107_v15, %v10372_v20 }
 0x8eb   :  { %v2526_v18 = vpop.f32.mrf.mxu0  ;;  %v2597_v14 = vpop.f32.mrf.mxu1 }
 0x8ec   :  { %v6391_v4 = vmul.f32 -1.442695, %v2600_v59  ;;  %v2601_v7 = vadd.f32 %v2526_v18, %v2198_v46  ;;  %v2603_v17 = vadd.f32 %v2597_v14, %v2311_v52  ;;  %v2309_v18 = vadd.f32 %v2308_v50, %v8511_v12 }
 0x8ee   :  { %6683 = vpow2.f32 %v6391_v4  ;;  %v6392_v5 = vmul.f32 -1.442695, %v2601_v7  ;;  %v6393_v4 = vmul.f32 -1.442695, %v2603_v17  ;;  %v2602_v7 = vadd.f32 %v2595_v16, %v2309_v18 }
 0x8f0   :  { %6685 = vpow2.f32 %v6392_v5 }
 0x8f1   :  { %6687 = vpow2.f32 %v6393_v4 }
 0x8fb   :  { %v6684_v59 = vpop.eup %6683 }
 0x8fc   :  { %v2607_v46 = vadd.f32 1.0, %v6684_v59 }
 0x8fd   :  { %v6686_v10 = vpop.eup %6685 }
 0x8fe   :  { %6689 = vrcp.f32 %v2607_v46  ;;  %v2613_v5 = vadd.f32 1.0, %v6686_v10  ;;  %v6688_v57 = vpop.eup %6687  ;;  %v10744_v10 = vld [vmem:[#allocation65_spill] sm:$0xff] }
 0x8ff   :  { %6691 = vtanh.f32 %v2602_v7  ;;  %v2620_v60 = vadd.f32 1.0, %v6688_v57  ;;  %v10746_v57 = vld [vmem:[#allocation17_spill] sm:$0xff] }
 0x900   :  { %6693 = vrcp.f32 %v2613_v5 }
 0x901   :  { %6695 = vrcp.f32 %v2620_v60  ;;  %v10745_v60 = vld [vmem:[#allocation37_spill] sm:$0xff] }
 0x90b   :  { %v6690_v19 = vpop.eup %6689 }
 0x90c   :  { %v6692_v55 = vpop.eup %6691 }
 0x90d   :  { %v6694_v6 = vpop.eup %6693  ;;  %v2624_v20 = vmul.f32 %v6692_v55, %v6690_v19  ;;  %v2317_v19 = vadd.f32 %v10745_v60, %v10744_v10  ;;  %v8623_v60 = vld [vmem:[#allocation8 + $0x1d0] sm:$0xff] }
 0x90e   :  { %v2623_v15 = vmul.f32 0.0, %v6694_v6  ;;  %v6696_v50 = vpop.eup %6695 }
 0x910   :  { %v8514_v14 = vadd.f32 %v2624_v20, %v2623_v15  ;;  %v2315_v20 = vadd.f32 %v10746_v57, %v8511_v12  ;;  %v8633_v57 = vld [vmem:[#allocation8 + $0x1a0] sm:$0xff] }
 0x912   :  { %6697 = vtanh.f32 %v8514_v14 }
 0x91f   :  { %v6698_v16 = vpop.eup %6697 }
 0x920   :  { %v8517_v52 = vmul.f32 %v6698_v16, %v6696_v50 }
 0x922   :  { %10720 = vst [vmem:[#allocation66_spill] sm:$0xff] %v8517_v52  ;;  %2765 = vmatmul.mubr.f32.vlgmr.msra.gmra.mxu0 %v8517_v52  ;;  %2836 = vmatmul.mubr.f32.vlgmr.msra.gmra.mxu1 %v8517_v52  ;;  %v8685_v52 = vld [vmem:[#allocation8 + $0x108] sm:$0xff] }
 0x923   :  { %2943 = vmatpush1.msra.mxu0 %v8157_v8  ;;  %3014 = vmatpush1.msra.mxu1 %v8160_v13  ;;  %v10721_v8 = vld [vmem:[#allocation24_spill] sm:$0xff]  ;;  %v10722_v13 = vld [vmem:[#allocation25_spill] sm:$0xff] }
 0x924   :  { %2944 = vmatprep.subr.mxu0 %v8163_v2  ;;  %3015 = vmatprep.subr.mxu1 %v8166_v58  ;;  %v10723_v2 = vld [vmem:[#allocation18_spill] sm:$0xff]  ;;  %v10724_v58 = vld [vmem:[#allocation32_spill] sm:$0xff] }
 0x925   :  { %2945 = vmatpush1.msra.mxu0 %v8169_v11  ;;  %3016 = vmatpush1.msra.mxu1 %v8172_v48  ;;  %v10725_v11 = vld [vmem:[#allocation26_spill] sm:$0xff]  ;;  %v10726_v48 = vld [vmem:[#allocation27_spill] sm:$0xff] }
 0x926   :  { %2946 = vmatprep.subr.mxu0 %v8175_v61  ;;  %3017 = vmatprep.subr.mxu1 %v8178_v62  ;;  %v10727_v61 = vld [vmem:[#allocation19_spill] sm:$0xff]  ;;  %v10728_v62 = vld [vmem:[#allocation33_spill] sm:$0xff] }
 0x927   :  { %2947 = vmatpush1.msra.mxu0 %v8181_v63  ;;  %3018 = vmatpush1.msra.mxu1 %v8184_v1  ;;  %v10729_v63 = vld [vmem:[#allocation28_spill] sm:$0xff]  ;;  %v10730_v1 = vld [vmem:[#allocation15_spill] sm:$0xff] }
 0x928   :  { %2948 = vmatprep.subr.mxu0 %v8187_v9  ;;  %3019 = vmatprep.subr.mxu1 %v8190_v30  ;;  %v10731_v9 = vld [vmem:[#allocation20_spill] sm:$0xff] }
 0x929   :  { %2949 = vmatpush1.msra.mxu0 %v8193_v34  ;;  %3020 = vmatpush1.msra.mxu1 %v8196_v38  ;;  %v10732_v30 = vld [vmem:[#allocation16_spill] sm:$0xff]  ;;  %v10733_v34 = vld [vmem:[#allocation29_spill] sm:$0xff]  ;;  %v10734_v38 = vld [vmem:[#allocation35_spill] sm:$0xff] }
 0x92a   :  { %2950 = vmatprep.subr.mxu0 %v8199_v26  ;;  %3021 = vmatprep.subr.mxu1 %v8202_v44  ;;  %v10735_v26 = vld [vmem:[#allocation30_spill] sm:$0xff]  ;;  %v10736_v44 = vld [vmem:[#allocation23_spill] sm:$0xff] }
 0x92b   :  { %2951 = vmatpush1.msra.mxu0 %v8205_v21  ;;  %3022 = vmatpush1.msra.mxu1 %v8208_v22  ;;  %v10737_v21 = vld [vmem:[#allocation22_spill] sm:$0xff] }
 0x92c   :  { %2952 = vmatprep.subr.mxu0 %v8211_v23  ;;  %3023 = vmatprep.subr.mxu1 %v8214_v25  ;;  %v10738_v22 = vld [vmem:[#allocation34_spill] sm:$0xff]  ;;  %v10739_v23 = vmov 0.0   ;;  %v10740_v25 = vld [vmem:[#allocation21_spill] sm:$0xff] }
 0x92d   :  { %2953 = vmatpush1.msra.mxu0 %v8217_v27  ;;  %3024 = vmatpush1.msra.mxu1 %v8220_v29  ;;  %v10741_v27 = vld [vmem:[#allocation36_spill] sm:$0xff] }
 0x92e   :  { %2954 = vmatprep.subr.mxu0 %v8223_v31  ;;  %3025 = vmatprep.subr.mxu1 %v8226_v33  ;;  %v2202_v29 = vadd.f32 %v10741_v27, %v8484_v56  ;;  %v10742_v33 = vld [vmem:[#allocation61_spill] sm:$0xff] }
 0x92f   :  { %2955 = vmatpush1.msra.mxu0 %v8229_v35  ;;  %3026 = vmatpush1.msra.mxu1 %v8232_v37  ;;  %v10743_v35 = vld [vmem:[#allocation31_spill] sm:$0xff] }
 0x930   :  { %2956 = vmatprep.subr.mxu0 %v8235_v39  ;;  %3027 = vmatprep.subr.mxu1 %v8238_v41  ;;  %v2204_v37 = vadd.f32 %v10743_v35, %v10742_v33 }
 0x931   :  { %2957 = vmatpush1.msra.mxu0 %v8241_v43  ;;  %3028 = vmatpush1.msra.mxu1 %v8244_v45 }
 0x932   :  { %2958 = vmatprep.subr.mxu0 %v8247_v47  ;;  %3029 = vmatprep.subr.mxu1 %v8250_v49 }
 0x933   :  { %2959 = vmatpush1.msra.mxu0 %v8253_v51  ;;  %3030 = vmatpush1.msra.mxu1 %v8256_v53 }
 0x934   :  { %2960 = vmatprep.subr.mxu0 %v8259_v24  ;;  %3031 = vmatprep.subr.mxu1 %v8262_v28 }
 0x935   :  { %2961 = vmatpush1.msra.mxu0 %v8265_v32  ;;  %3032 = vmatpush1.msra.mxu1 %v8268_v36 }
 0x936   :  { %2962 = vmatprep.subr.mxu0 %v8271_v40  ;;  %3033 = vmatprep.subr.mxu1 %v8274_v42 }
 0x937   :  { %2963 = vmatpush1.msra.mxu0 %v8277_v54  ;;  %3034 = vmatpush1.msra.mxu1 %v8280_v0 }
 0x938   :  { %2964 = vmatprep.subr.mxu0 %v8283_v3  ;;  %3035 = vmatprep.subr.mxu1 %v10721_v8 }
 0x939   :  { %2965 = vmatpush1.msra.mxu0 %v10722_v13  ;;  %3036 = vmatpush1.msra.mxu1 %v10723_v2 }
 0x93a   :  { %2966 = vmatprep.subr.mxu0 %v10724_v58  ;;  %3037 = vmatprep.subr.mxu1 %v10725_v11 }
 0x93b   :  { %2967 = vmatpush1.msra.mxu0 %v10726_v48  ;;  %3038 = vmatpush1.msra.mxu1 %v10727_v61 }
 0x93c   :  { %2968 = vmatprep.subr.mxu0 %v10728_v62  ;;  %3039 = vmatprep.subr.mxu1 %v10729_v63 }
 0x93d   :  { %2969 = vmatpush1.msra.mxu0 %v10730_v1  ;;  %3040 = vmatpush1.msra.mxu1 %v10731_v9 }
 0x93e   :  { %2970 = vmatprep.subr.mxu0 %v10732_v30  ;;  %3041 = vmatprep.subr.mxu1 %v10733_v34 }
 0x93f   :  { %2971 = vmatpush1.msra.mxu0 %v10734_v38  ;;  %3042 = vmatpush1.msra.mxu1 %v10735_v26 }
 0x940   :  { %2972 = vmatprep.subr.mxu0 %v10736_v44  ;;  %3043 = vmatprep.subr.mxu1 %v10737_v21 }
 0x941   :  { %2973 = vmatpush1.msra.mxu0 %v10738_v22  ;;  %3006 = vmatprep.mubr.f32.mxu0 %v10739_v23 }
 0x942   :  { %3044 = vmatpush1.msra.mxu1 %v10740_v25  ;;  %3077 = vmatprep.mubr.f32.mxu1 %v10739_v23 }
 0x9e2   :  { %v2766_v31 = vpop.f32.mrf.mxu0  ;;  %v2837_v47 = vpop.f32.mrf.mxu1 }
 0x9e3   :  { %v2842_v39 = vadd.f32 %v2766_v31, %v2202_v29  ;;  %v2844_v17 = vadd.f32 %v2837_v47, %v2315_v20  ;;  %v8615_v47 = vld [vmem:[#allocation8 + $0x1c8] sm:$0xff]  ;;  %v8635_v20 = vld [vmem:[#allocation8 + $0x1b0] sm:$0xff] }
 0x9e4   :  { %v2768_v41 = vpop.f32.mrf.mxu0  ;;  %v2839_v24 = vpop.f32.mrf.mxu1 }
 0x9e5   :  { %v6394_v43 = vmul.f32 -1.442695, %v2842_v39  ;;  %v2843_v45 = vadd.f32 %v2768_v41, %v2204_v37  ;;  %v2845_v6 = vadd.f32 %v2839_v24, %v2317_v19  ;;  %v8603_v41 = vld [vmem:[#allocation8 + $0x1e8] sm:$0xff]  ;;  %v8621_v24 = vld [vmem:[#allocation8 + $0x1c0] sm:$0xff] }
 0x9e6   :  { %10748 = vst [vmem:[#allocation25_spill] sm:$0xff] %v8603_v41  ;;  %3184 = vmatprep.subr.mxu0 %v8603_v41  ;;  %v8627_v19 = vld [vmem:[#allocation8 + $0x1a8] sm:$0xff] }
 0x9e7   :  { %6699 = vpow2.f32 %v6394_v43  ;;  %v6395_v51 = vmul.f32 -1.442695, %v2843_v45  ;;  %v6396_v18 = vmul.f32 -1.442695, %v2845_v6  ;;  %v8609_v43 = vld [vmem:[#allocation8 + $0x1e0] sm:$0xff]  ;;  %v8611_v45 = vld [vmem:[#allocation8 + $0x1f0] sm:$0xff] }
 0x9e8   :  { %v8629_v6 = vld [vmem:[#allocation8 + $0x1b8] sm:$0xff] }
 0x9e9   :  { %6701 = vpow2.f32 %v6395_v51  ;;  %v8617_v51 = vld [vmem:[#allocation8 + $0x1d8] sm:$0xff] }
 0x9ea   :  { %6703 = vtanh.f32 %v2844_v17  ;;  %v8639_v17 = vld [vmem:[#allocation8 + $0x188] sm:$0xff] }
 0x9eb   :  { %6705 = vpow2.f32 %v6396_v18  ;;  %v8641_v18 = vld [vmem:[#allocation8 + $0x198] sm:$0xff] }
 0x9f4   :  { %v6700_v4 = vpop.eup %6699 }
 0x9f5   :  { %v2849_v59 = vadd.f32 1.0, %v6700_v4  ;;  %v8645_v4 = vld [vmem:[#allocation8 + $0x180] sm:$0xff] }
 0x9f6   :  { %v6702_v7 = vpop.eup %6701 }
 0x9f7   :  { %6707 = vrcp.f32 %v2849_v59  ;;  %v2855_v46 = vadd.f32 1.0, %v6702_v7  ;;  %v6704_v5 = vpop.eup %6703  ;;  %v8647_v59 = vld [vmem:[#allocation8 + $0x190] sm:$0xff]  ;;  %v8651_v7 = vld [vmem:[#allocation8 + $0x168] sm:$0xff] }
 0x9f8   :  { %v6706_v55 = vpop.eup %6705 }
 0x9f9   :  { %6709 = vrcp.f32 %v2855_v46  ;;  %v2862_v27 = vadd.f32 1.0, %v6706_v55  ;;  %v8653_v46 = vld [vmem:[#allocation8 + $0x178] sm:$0xff]  ;;  %v8659_v55 = vld [vmem:[#allocation8 + $0x170] sm:$0xff] }
 0x9fb   :  { %6711 = vrcp.f32 %v2862_v27  ;;  %v8671_v27 = vld [vmem:[#allocation8 + $0x150] sm:$0xff] }
 0x9fc   :  { %10751 = vst [vmem:[#allocation26_spill] sm:$0xff] %v8671_v27 }
 0xa04   :  { %v6708_v15 = vpop.eup %6707 }
 0xa05   :  { %v2866_v50 = vmul.f32 %v6708_v15, %v6704_v5  ;;  %v8657_v5 = vld [vmem:[#allocation8 + $0x160] sm:$0xff]  ;;  %v8663_v15 = vld [vmem:[#allocation8 + $0x148] sm:$0xff] }
 0xa06   :  { %v6710_v16 = vpop.eup %6709 }
 0xa07   :  { %v2865_v29 = vmul.f32 %v6710_v16, %v8514_v14  ;;  %v8605_v14 = vld [vmem:[#allocation8 + $0x1f8] sm:$0xff]  ;;  %v8669_v16 = vld [vmem:[#allocation8 + $0x140] sm:$0xff] }
 0xa08   :  { %v6712_v35 = vpop.eup %6711  ;;  %10749 = vst [vmem:[#allocation18_spill] sm:$0xff] %v8605_v14  ;;  %3255 = vmatprep.subr.mxu1 %v8605_v14  ;;  %10750 = vst [vmem:[#allocation32_spill] sm:$0xff] %v8669_v16 }
 0xa09   :  { %v8594_v31 = vadd.f32 %v2866_v50, %v2865_v29  ;;  %v8665_v50 = vld [vmem:[#allocation8 + $0x158] sm:$0xff]  ;;  %v8675_v29 = vld [vmem:[#allocation8 + $0x128] sm:$0xff] }
 0xa0a   :  { %10752 = vst [vmem:[#allocation27_spill] sm:$0xff] %v8675_v29 }
 0xa0b   :  { %6713 = vtanh.f32 %v8594_v31 }
 0xa18   :  { %v6714_v37 = vpop.eup %6713 }
 0xa19   :  { %v8597_v39 = vmul.f32 %v6714_v37, %v6712_v35  ;;  %v8677_v35 = vld [vmem:[#allocation8 + $0x138] sm:$0xff]  ;;  %v8681_v37 = vld [vmem:[#allocation8 + $0x120] sm:$0xff] }
 0xa1a   :  { %10753 = vst [vmem:[#allocation19_spill] sm:$0xff] %v8677_v35  ;;  %10754 = vst [vmem:[#allocation33_spill] sm:$0xff] %v8681_v37 }
 0xa1b   :  { %10747 = vst [vmem:[#allocation24_spill] sm:$0xff] %v8597_v39  ;;  %3007 = vmatmul.mubr.f32.vlgmr.msra.gmra.mxu0 %v8597_v39  ;;  %3078 = vmatmul.mubr.f32.vlgmr.msra.gmra.mxu1 %v8597_v39  ;;  %v8683_v39 = vld [vmem:[#allocation8 + $0x130] sm:$0xff] }
 0xa1c   :  { %3248 = vmatprep.mubr.f32.mxu0 %v10739_v23  ;;  %3319 = vmatprep.mubr.f32.mxu1 %v10739_v23  ;;  %v8689_v23 = vld [vmem:[#allocation8 + $0x118] sm:$0xff] }
 0xa1d   :  { %3185 = vmatpush1.msra.mxu0 %v8609_v43  ;;  %3256 = vmatpush1.msra.mxu1 %v8611_v45 }
 0xa1e   :  { %3186 = vmatprep.subr.mxu0 %v8615_v47  ;;  %3257 = vmatprep.subr.mxu1 %v8617_v51 }
 0xa1f   :  { %3187 = vmatpush1.msra.mxu0 %v8621_v24  ;;  %3258 = vmatpush1.msra.mxu1 %v8623_v60 }
 0xa20   :  { %3188 = vmatprep.subr.mxu0 %v8627_v19  ;;  %3259 = vmatprep.subr.mxu1 %v8629_v6 }
 0xa21   :  { %3189 = vmatpush1.msra.mxu0 %v8633_v57  ;;  %3260 = vmatpush1.msra.mxu1 %v8635_v20 }
 0xa22   :  { %3190 = vmatprep.subr.mxu0 %v8639_v17  ;;  %3261 = vmatprep.subr.mxu1 %v8641_v18 }
 0xa23   :  { %3191 = vmatpush1.msra.mxu0 %v8645_v4  ;;  %3262 = vmatpush1.msra.mxu1 %v8647_v59 }
 0xa24   :  { %3192 = vmatprep.subr.mxu0 %v8651_v7  ;;  %3263 = vmatprep.subr.mxu1 %v8653_v46 }
 0xa25   :  { %3193 = vmatpush1.msra.mxu0 %v8657_v5  ;;  %3264 = vmatpush1.msra.mxu1 %v8659_v55 }
 0xa26   :  { %3194 = vmatprep.subr.mxu0 %v8663_v15  ;;  %3265 = vmatprep.subr.mxu1 %v8665_v50 }
 0xa27   :  { %3195 = vmatpush1.msra.mxu0 %v8669_v16  ;;  %3266 = vmatpush1.msra.mxu1 %v8671_v27  ;;  %v8691_v27 = vld [vmem:[#allocation8 + $0x100] sm:$0xff]  ;;  %v8693_v16 = vld [vmem:[#allocation8 + $0x110] sm:$0xff] }
 0xa28   :  { %3196 = vmatprep.subr.mxu0 %v8675_v29  ;;  %3267 = vmatprep.subr.mxu1 %v8677_v35  ;;  %v8697_v35 = vld [vmem:[#allocation8 + $0xe8] sm:$0xff]  ;;  %v8699_v29 = vld [vmem:[#allocation8 + $0xe0] sm:$0xff] }
 0xa29   :  { %3197 = vmatpush1.msra.mxu0 %v8681_v37  ;;  %3268 = vmatpush1.msra.mxu1 %v8683_v39  ;;  %v8703_v37 = vld [vmem:[#allocation8 + $0xc8] sm:$0xff] }
 0xa2a   :  { %3198 = vmatprep.subr.mxu0 %v8685_v52  ;;  %3269 = vmatprep.subr.mxu1 %v8689_v23 }
 0xa2b   :  { %3199 = vmatpush1.msra.mxu0 %v8691_v27  ;;  %3270 = vmatpush1.msra.mxu1 %v8693_v16 }
 0xa2c   :  { %3200 = vmatprep.subr.mxu0 %v8697_v35  ;;  %3271 = vmatprep.subr.mxu1 %v8250_v49  ;;  %v10755_v49 = vld [vmem:[#allocation38_spill] sm:$0xff] }
 0xa2d   :  { %3201 = vmatpush1.msra.mxu0 %v8699_v29  ;;  %3272 = vmatpush1.msra.mxu1 %v8256_v53  ;;  %v2208_v53 = vadd.f32 %v10755_v49, %v8484_v56 }
 0xa2e   :  { %3202 = vmatprep.subr.mxu0 %v8703_v37  ;;  %3273 = vmatprep.subr.mxu1 %v8262_v28 }
 0xa2f   :  { %3203 = vmatpush1.msra.mxu0 %v8265_v32  ;;  %3274 = vmatpush1.msra.mxu1 %v8268_v36  ;;  %v10756_v32 = vld [vmem:[#allocation40_spill] sm:$0xff] }
 0xa30   :  { %3204 = vmatprep.subr.mxu0 %v8271_v40  ;;  %3275 = vmatprep.subr.mxu1 %v8274_v42  ;;  %v2210_v36 = vadd.f32 %v10756_v32, %v10742_v33 }
 0xa31   :  { %3205 = vmatpush1.msra.mxu0 %v8277_v54  ;;  %3276 = vmatpush1.msra.mxu1 %v8280_v0 }
 0xa32   :  { %3206 = vmatprep.subr.mxu0 %v8283_v3  ;;  %3277 = vmatprep.subr.mxu1 %v10721_v8 }
 0xa33   :  { %3207 = vmatpush1.msra.mxu0 %v10722_v13  ;;  %3278 = vmatpush1.msra.mxu1 %v10723_v2  ;;  %v10757_v2 = vld [vmem:[#allocation41_spill] sm:$0xff] }
 0xa34   :  { %3208 = vmatprep.subr.mxu0 %v10724_v58  ;;  %3279 = vmatprep.subr.mxu1 %v10725_v11  ;;  %v2323_v58 = vadd.f32 %v10757_v2, %v10744_v10  ;;  %v8794_v2 = vld [vmem:[#allocation8 + $0xd8] sm:$0xff] }
 0xa35   :  { %3209 = vmatpush1.msra.mxu0 %v10726_v48  ;;  %3280 = vmatpush1.msra.mxu1 %v10727_v61  ;;  %v10758_v48 = vld [vmem:[#allocation39_spill] sm:$0xff] }
 0xa36   :  { %3210 = vmatprep.subr.mxu0 %v10728_v62  ;;  %3281 = vmatprep.subr.mxu1 %v10729_v63  ;;  %v2321_v61 = vadd.f32 %v10758_v48, %v8511_v12  ;;  %v8801_v48 = vld [vmem:[#allocation8 + $0xa8] sm:$0xff] }
 0xa37   :  { %3211 = vmatpush1.msra.mxu0 %v10730_v1  ;;  %3282 = vmatpush1.msra.mxu1 %v10731_v9 }
 0xa38   :  { %3212 = vmatprep.subr.mxu0 %v10732_v30  ;;  %3283 = vmatprep.subr.mxu1 %v10733_v34 }
 0xa39   :  { %3213 = vmatpush1.msra.mxu0 %v10734_v38  ;;  %3284 = vmatpush1.msra.mxu1 %v10735_v26 }
 0xa3a   :  { %3214 = vmatprep.subr.mxu0 %v10736_v44  ;;  %3285 = vmatprep.subr.mxu1 %v10737_v21 }
 0xa3b   :  { %3215 = vmatpush1.msra.mxu0 %v10738_v22  ;;  %3286 = vmatpush1.msra.mxu1 %v10740_v25 }
 0xa3c   :  { %3426 = vmatprep.subr.mxu0 %v8603_v41  ;;  %3497 = vmatprep.subr.mxu1 %v8605_v14 }
 0xadb   :  { %v3008_v28 = vpop.f32.mrf.mxu0  ;;  %v3079_v3 = vpop.f32.mrf.mxu1 }
 0xadc   :  { %v3084_v40 = vadd.f32 %v3008_v28, %v2208_v53  ;;  %v3086_v62 = vadd.f32 %v3079_v3, %v2321_v61  ;;  %v10765_v3 = vmov 0.0   ;;  %v8805_v61 = vld [vmem:[#allocation8 + $0xb8] sm:$0xff] }
 0xadd   :  { %v3010_v42 = vpop.f32.mrf.mxu0  ;;  %v3081_v13 = vpop.f32.mrf.mxu1 }
 0xade   :  { %v6397_v54 = vmul.f32 -1.442695, %v3084_v40  ;;  %v3085_v0 = vadd.f32 %v3010_v42, %v2210_v36  ;;  %v3087_v11 = vadd.f32 %v3081_v13, %v2323_v58  ;;  %v10761_v40 = vld [vmem:[#allocation26_spill] sm:$0xff]  ;;  %v10762_v42 = vld [vmem:[#allocation27_spill] sm:$0xff]  ;;  %v8792_v13 = vld [vmem:[#allocation8 + $0xf0] sm:$0xff] }
 0xadf   :  { %v8797_v58 = vld [vmem:[#allocation8 + $0xc0] sm:$0xff] }
 0xae0   :  { %6715 = vpow2.f32 %v6397_v54  ;;  %v6398_v8 = vmul.f32 -1.442695, %v3085_v0  ;;  %v6399_v63 = vmul.f32 -1.442695, %v3087_v11  ;;  %v10763_v54 = vld [vmem:[#allocation19_spill] sm:$0xff]  ;;  %v10764_v0 = vld [vmem:[#allocation33_spill] sm:$0xff] }
 0xae1   :  { %v8799_v11 = vld [vmem:[#allocation8 + $0xd0] sm:$0xff] }
 0xae2   :  { %6717 = vpow2.f32 %v6398_v8  ;;  %v8790_v8 = vld [vmem:[#allocation8 + $0xf8] sm:$0xff] }
 0xae3   :  { %6719 = vtanh.f32 %v3086_v62  ;;  %v8807_v62 = vld [vmem:[#allocation8 + $0xa0] sm:$0xff] }
 0xae4   :  { %6721 = vpow2.f32 %v6399_v63  ;;  %v8811_v63 = vld [vmem:[#allocation8 + $0xb0] sm:$0xff] }
 0xae5   :  { %10766 = vst [vmem:[#allocation15_spill] sm:$0xff] %v8811_v63 }
 0xaed   :  { %v6716_v1 = vpop.eup %6715 }
 0xaee   :  { %v3091_v9 = vadd.f32 1.0, %v6716_v1  ;;  %v8813_v1 = vld [vmem:[#allocation8 + $0x88] sm:$0xff] }
 0xaef   :  { %v6718_v30 = vpop.eup %6717  ;;  %10767 = vst [vmem:[#allocation20_spill] sm:$0xff] %v8813_v1 }
 0xaf0   :  { %6723 = vrcp.f32 %v3091_v9  ;;  %v3097_v34 = vadd.f32 1.0, %v6718_v30  ;;  %v6720_v38 = vpop.eup %6719  ;;  %v8815_v9 = vld [vmem:[#allocation8 + $0x80] sm:$0xff]  ;;  %v8819_v30 = vld [vmem:[#allocation8 + $0x98] sm:$0xff] }
 0xaf1   :  { %v6722_v26 = vpop.eup %6721  ;;  %10768 = vst [vmem:[#allocation16_spill] sm:$0xff] %v8815_v9  ;;  %10769 = vst [vmem:[#allocation29_spill] sm:$0xff] %v8819_v30 }
 0xaf2   :  { %6725 = vrcp.f32 %v3097_v34  ;;  %v3104_v25 = vadd.f32 1.0, %v6722_v26  ;;  %v8821_v34 = vld [vmem:[#allocation8 + $0x68] sm:$0xff]  ;;  %v8827_v26 = vld [vmem:[#allocation8 + $0x60] sm:$0xff] }
 0xaf3   :  { %10770 = vst [vmem:[#allocation35_spill] sm:$0xff] %v8821_v34  ;;  %10772 = vst [vmem:[#allocation23_spill] sm:$0xff] %v8827_v26 }
 0xaf4   :  { %6727 = vrcp.f32 %v3104_v25  ;;  %v8839_v25 = vld [vmem:[#allocation8 + $0x40] sm:$0xff] }
 0xaf5   :  { %10776 = vst [vmem:[#allocation36_spill] sm:$0xff] %v8839_v25 }
 0xafd   :  { %v6724_v44 = vpop.eup %6723 }
 0xafe   :  { %v3108_v21 = vmul.f32 %v6724_v44, %v6720_v38  ;;  %v8825_v38 = vld [vmem:[#allocation8 + $0x90] sm:$0xff]  ;;  %v8831_v44 = vld [vmem:[#allocation8 + $0x78] sm:$0xff] }
 0xaff   :  { %v6726_v22 = vpop.eup %6725  ;;  %10771 = vst [vmem:[#allocation30_spill] sm:$0xff] %v8825_v38  ;;  %10773 = vst [vmem:[#allocation22_spill] sm:$0xff] %v8831_v44 }
 0xb00   :  { %v3107_v49 = vmul.f32 %v6726_v22, %v8594_v31  ;;  %v10760_v31 = vld [vmem:[#allocation32_spill] sm:$0xff]  ;;  %v8837_v22 = vld [vmem:[#allocation8 + $0x70] sm:$0xff] }
 0xb01   :  { %v6728_v28 = vpop.eup %6727  ;;  %10775 = vst [vmem:[#allocation21_spill] sm:$0xff] %v8837_v22 }
 0xb02   :  { %v8748_v53 = vadd.f32 %v3108_v21, %v3107_v49  ;;  %v8833_v21 = vld [vmem:[#allocation8 + $0x48] sm:$0xff]  ;;  %v8843_v49 = vld [vmem:[#allocation8 + $0x58] sm:$0xff] }
 0xb03   :  { %10774 = vst [vmem:[#allocation34_spill] sm:$0xff] %v8833_v21  ;;  %10777 = vst [vmem:[#allocation61_spill] sm:$0xff] %v8843_v49 }
 0xb04   :  { %6729 = vtanh.f32 %v8748_v53 }
 0xb11   :  { %v6730_v32 = vpop.eup %6729 }
 0xb12   :  { %v8751_v36 = vmul.f32 %v6730_v32, %v6728_v28  ;;  %v8845_v28 = vld [vmem:[#allocation8 + $0x28] sm:$0xff]  ;;  %v8849_v32 = vld [vmem:[#allocation8 + $0x50] sm:$0xff] }
 0xb13   :  { %10778 = vst [vmem:[#allocation31_spill] sm:$0xff] %v8845_v28  ;;  %10779 = vst [vmem:[#allocation65_spill] sm:$0xff] %v8849_v32 }
 0xb14   :  { %10759 = vst [vmem:[#allocation28_spill] sm:$0xff] %v8751_v36  ;;  %3249 = vmatmul.mubr.f32.vlgmr.msra.gmra.mxu0 %v8751_v36  ;;  %3320 = vmatmul.mubr.f32.vlgmr.msra.gmra.mxu1 %v8751_v36  ;;  %v8851_v36 = vld [vmem:[#allocation8 + $0x20] sm:$0xff] }
 0xb15   :  { %3427 = vmatpush1.msra.mxu0 %v8609_v43  ;;  %3498 = vmatpush1.msra.mxu1 %v8611_v45  ;;  %10780 = vst [vmem:[#allocation37_spill] sm:$0xff] %v8851_v36 }
 0xb16   :  { %3428 = vmatprep.subr.mxu0 %v8615_v47  ;;  %3499 = vmatprep.subr.mxu1 %v8617_v51 }
 0xb17   :  { %3429 = vmatpush1.msra.mxu0 %v8621_v24  ;;  %3500 = vmatpush1.msra.mxu1 %v8623_v60 }
 0xb18   :  { %3430 = vmatprep.subr.mxu0 %v8627_v19  ;;  %3501 = vmatprep.subr.mxu1 %v8629_v6 }
 0xb19   :  { %3431 = vmatpush1.msra.mxu0 %v8633_v57  ;;  %3502 = vmatpush1.msra.mxu1 %v8635_v20 }
 0xb1a   :  { %3432 = vmatprep.subr.mxu0 %v8639_v17  ;;  %3503 = vmatprep.subr.mxu1 %v8641_v18 }
 0xb1b   :  { %3433 = vmatpush1.msra.mxu0 %v8645_v4  ;;  %3504 = vmatpush1.msra.mxu1 %v8647_v59 }
 0xb1c   :  { %3434 = vmatprep.subr.mxu0 %v8651_v7  ;;  %3505 = vmatprep.subr.mxu1 %v8653_v46 }
 0xb1d   :  { %3435 = vmatpush1.msra.mxu0 %v8657_v5  ;;  %3506 = vmatpush1.msra.mxu1 %v8659_v55 }
 0xb1e   :  { %3436 = vmatprep.subr.mxu0 %v8663_v15  ;;  %3507 = vmatprep.subr.mxu1 %v8665_v50 }
 0xb1f   :  { %3437 = vmatpush1.msra.mxu0 %v10760_v31  ;;  %3508 = vmatpush1.msra.mxu1 %v10761_v40 }
 0xb20   :  { %3438 = vmatprep.subr.mxu0 %v10762_v42  ;;  %3509 = vmatprep.subr.mxu1 %v10763_v54 }
 0xb21   :  { %3439 = vmatpush1.msra.mxu0 %v10764_v0  ;;  %3510 = vmatpush1.msra.mxu1 %v8683_v39 }
 0xb22   :  { %3440 = vmatprep.subr.mxu0 %v8685_v52  ;;  %3511 = vmatprep.subr.mxu1 %v8689_v23 }
 0xb23   :  { %3441 = vmatpush1.msra.mxu0 %v8691_v27  ;;  %3512 = vmatpush1.msra.mxu1 %v8693_v16 }
 0xb24   :  { %3442 = vmatprep.subr.mxu0 %v8697_v35  ;;  %3490 = vmatprep.mubr.f32.mxu0 %v10765_v3 }
 0xb25   :  { %3443 = vmatpush1.msra.mxu0 %v8699_v29  ;;  %3561 = vmatprep.mubr.f32.mxu1 %v10765_v3  ;;  %v8855_v3 = vld [vmem:[#allocation8 + $0x38] sm:$0xff] }
 0xb26   :  { %3444 = vmatprep.subr.mxu0 %v8703_v37  ;;  %3513 = vmatprep.subr.mxu1 %v8790_v8  ;;  %10781 = vst [vmem:[#allocation17_spill] sm:$0xff] %v8855_v3 }
 0xb27   :  { %3514 = vmatpush1.msra.mxu1 %v8792_v13  ;;  %3445 = vmatpush1.msra.mxu0 %v8797_v58 }
 0xb28   :  { %3515 = vmatprep.subr.mxu1 %v8794_v2  ;;  %3446 = vmatprep.subr.mxu0 %v8801_v48 }
 0xb29   :  { %3516 = vmatpush1.msra.mxu1 %v8799_v11  ;;  %3447 = vmatpush1.msra.mxu0 %v8807_v62 }
 0xb2a   :  { %3517 = vmatprep.subr.mxu1 %v8805_v61  ;;  %3448 = vmatprep.subr.mxu0 %v8813_v1 }
 0xb2b   :  { %3518 = vmatpush1.msra.mxu1 %v8811_v63  ;;  %3449 = vmatpush1.msra.mxu0 %v8815_v9 }
 0xb2c   :  { %3519 = vmatprep.subr.mxu1 %v8819_v30  ;;  %3450 = vmatprep.subr.mxu0 %v8821_v34  ;;  %v8857_v34 = vld [vmem:[#allocation8 + $0x8] sm:$0xff]  ;;  %v10790_v30 = vld [vmem:[#allocation43_spill] sm:$0xff] }
 0xb2d   :  { %3520 = vmatpush1.msra.mxu1 %v8825_v38  ;;  %3451 = vmatpush1.msra.mxu0 %v8827_v26  ;;  %10782 = vst [vmem:[#allocation38_spill] sm:$0xff] %v8857_v34  ;;  %v8861_v26 = vld [vmem:[#allocation8 + $0x30] sm:$0xff] }
 0xb2e   :  { %3521 = vmatprep.subr.mxu1 %v8831_v44  ;;  %3452 = vmatprep.subr.mxu0 %v8833_v21  ;;  %10783 = vst [vmem:[#allocation40_spill] sm:$0xff] %v8861_v26  ;;  %v8863_v44 = vld [vmem:[#allocation8] sm:$0xff]  ;;  %v8867_v21 = vld [vmem:[#allocation8 + $0x18] sm:$0xff] }
 0xb2f   :  { %3522 = vmatpush1.msra.mxu1 %v8837_v22  ;;  %3453 = vmatpush1.msra.mxu0 %v8839_v25  ;;  %10784 = vst [vmem:[#allocation41_spill] sm:$0xff] %v8863_v44  ;;  %10785 = vst [vmem:[#allocation39_spill] sm:$0xff] %v8867_v21  ;;  %v8871_v25 = vld [vmem:[#allocation8 + $0x10] sm:$0xff] }
 0xb30   :  { %3523 = vmatprep.subr.mxu1 %v8843_v49  ;;  %3454 = vmatprep.subr.mxu0 %v8845_v28  ;;  %10786 = vst [vmem:[#allocation32_spill] sm:$0xff] %v8871_v25 }
 0xb31   :  { %3524 = vmatpush1.msra.mxu1 %v8849_v32  ;;  %3455 = vmatpush1.msra.mxu0 %v8851_v36  ;;  %v10787_v36 = vld [vmem:[#allocation42_spill] sm:$0xff] }
 0xb32   :  { %3525 = vmatprep.subr.mxu1 %v8855_v3  ;;  %3456 = vmatprep.subr.mxu0 %v8857_v34  ;;  %v2214_v28 = vadd.f32 %v10787_v36, %v8484_v56  ;;  %v10788_v34 = vld [vmem:[#allocation44_spill] sm:$0xff]  ;;  %v2327_v36 = vadd.f32 %v10790_v30, %v8511_v12  ;;  %v10794_v30 = vld [vmem:[#allocation29_spill] sm:$0xff] }
 0xb33   :  { %3526 = vmatpush1.msra.mxu1 %v8861_v26  ;;  %3457 = vmatpush1.msra.mxu0 %v8863_v44  ;;  %v2216_v32 = vadd.f32 %v10788_v34, %v10742_v33 }
 0xb34   :  { %3527 = vmatprep.subr.mxu1 %v8867_v21  ;;  %3668 = vmatprep.subr.mxu0 %v8603_v41 }
 0xb35   :  { %3528 = vmatpush1.msra.mxu1 %v8871_v25  ;;  %v10789_v25 = vld [vmem:[#allocation45_spill] sm:$0xff] }
 0xb36   :  { %3739 = vmatprep.subr.mxu1 %v8605_v14  ;;  %v2329_v9 = vadd.f32 %v10789_v25, %v10744_v10 }
 0xbd4   :  { %v3250_v3 = vpop.f32.mrf.mxu0  ;;  %v3321_v44 = vpop.f32.mrf.mxu1 }
 0xbd5   :  { %v3326_v49 = vadd.f32 %v3250_v3, %v2214_v28  ;;  %v3328_v56 = vadd.f32 %v3321_v44, %v2327_v36  ;;  %v10795_v44 = vld [vmem:[#allocation16_spill] sm:$0xff]  ;;  %v10797_v36 = vld [vmem:[#allocation35_spill] sm:$0xff] }
 0xbd6   :  { %v3252_v22 = vpop.f32.mrf.mxu0  ;;  %v3323_v41 = vpop.f32.mrf.mxu1 }
 0xbd7   :  { %v6400_v26 = vmul.f32 -1.442695, %v3326_v49  ;;  %v3327_v38 = vadd.f32 %v3252_v22, %v2216_v32  ;;  %v3329_v14 = vadd.f32 %v3323_v41, %v2329_v9  ;;  %v10796_v32 = vld [vmem:[#allocation30_spill] sm:$0xff] }
 0xbd9   :  { %6731 = vpow2.f32 %v6400_v26  ;;  %v6401_v21 = vmul.f32 -1.442695, %v3327_v38  ;;  %v6402_v1 = vmul.f32 -1.442695, %v3329_v14 }
 0xbdb   :  { %6733 = vpow2.f32 %v6401_v21 }
 0xbdc   :  { %6735 = vtanh.f32 %v3328_v56 }
 0xbdd   :  { %6737 = vpow2.f32 %v6402_v1  ;;  %v10793_v1 = vld [vmem:[#allocation20_spill] sm:$0xff] }
 0xbe6   :  { %v6732_v63 = vpop.eup %6731 }
 0xbe7   :  { %v3333_v34 = vadd.f32 1.0, %v6732_v63 }
 0xbe8   :  { %v6734_v3 = vpop.eup %6733 }
 0xbe9   :  { %6739 = vrcp.f32 %v3333_v34  ;;  %v3339_v26 = vadd.f32 1.0, %v6734_v3  ;;  %v6736_v38 = vpop.eup %6735  ;;  %v10798_v34 = vld [vmem:[#allocation22_spill] sm:$0xff]  ;;  %v10799_v3 = vld [vmem:[#allocation23_spill] sm:$0xff] }
 0xbea   :  { %v6738_v21 = vpop.eup %6737 }
 0xbeb   :  { %6741 = vrcp.f32 %v3339_v26  ;;  %v3346_v25 = vadd.f32 1.0, %v6738_v21  ;;  %v10800_v26 = vld [vmem:[#allocation21_spill] sm:$0xff] }
 0xbec   :  { %v10802_v21 = vld [vmem:[#allocation61_spill] sm:$0xff] }
 0xbed   :  { %6743 = vrcp.f32 %v3346_v25  ;;  %v10806_v25 = vld [vmem:[#allocation17_spill] sm:$0xff] }
 0xbf6   :  { %v6740_v22 = vpop.eup %6739 }
 0xbf7   :  { %v3350_v49 = vmul.f32 %v6740_v22, %v6736_v38  ;;  %v10801_v38 = vld [vmem:[#allocation34_spill] sm:$0xff]  ;;  %v10803_v22 = vld [vmem:[#allocation36_spill] sm:$0xff] }
 0xbf8   :  { %v6742_v28 = vpop.eup %6741 }
 0xbf9   :  { %v3349_v41 = vmul.f32 %v6742_v28, %v8748_v53  ;;  %v10792_v53 = vld [vmem:[#allocation15_spill] sm:$0xff] }
 0xbfa   :  { %v6744_v14 = vpop.eup %6743  ;;  %v10805_v28 = vld [vmem:[#allocation31_spill] sm:$0xff] }
 0xbfb   :  { %v8888_v9 = vadd.f32 %v3350_v49, %v3349_v41  ;;  %v10804_v49 = vld [vmem:[#allocation65_spill] sm:$0xff] }
 0xbfc   :  { %v10807_v41 = vld [vmem:[#allocation37_spill] sm:$0xff] }
 0xbfd   :  { %6745 = vtanh.f32 %v8888_v9 }
 0xc0a   :  { %v6746_v56 = vpop.eup %6745 }
 0xc0b   :  { %v8891_v63 = vmul.f32 %v6746_v56, %v6744_v14  ;;  %v10808_v14 = vld [vmem:[#allocation40_spill] sm:$0xff]  ;;  %v10809_v56 = vld [vmem:[#allocation38_spill] sm:$0xff] }
 0xc0d   :  { %10791 = vst [vmem:[#allocation26_spill] sm:$0xff] %v8891_v63  ;;  %3491 = vmatmul.mubr.f32.vlgmr.msra.gmra.mxu0 %v8891_v63  ;;  %3562 = vmatmul.mubr.f32.vlgmr.msra.gmra.mxu1 %v8891_v63  ;;  %v10810_v63 = vld [vmem:[#allocation39_spill] sm:$0xff] }
 0xc0e   :  { %3669 = vmatpush1.msra.mxu0 %v8609_v43  ;;  %3740 = vmatpush1.msra.mxu1 %v8611_v45 }
 0xc0f   :  { %3670 = vmatprep.subr.mxu0 %v8615_v47  ;;  %3741 = vmatprep.subr.mxu1 %v8617_v51 }
 0xc10   :  { %3671 = vmatpush1.msra.mxu0 %v8621_v24  ;;  %3742 = vmatpush1.msra.mxu1 %v8623_v60 }
 0xc11   :  { %3672 = vmatprep.subr.mxu0 %v8627_v19  ;;  %3743 = vmatprep.subr.mxu1 %v8629_v6 }
 0xc12   :  { %3673 = vmatpush1.msra.mxu0 %v8633_v57  ;;  %3744 = vmatpush1.msra.mxu1 %v8635_v20 }
 0xc13   :  { %3674 = vmatprep.subr.mxu0 %v8639_v17  ;;  %3745 = vmatprep.subr.mxu1 %v8641_v18 }
 0xc14   :  { %3675 = vmatpush1.msra.mxu0 %v8645_v4  ;;  %3746 = vmatpush1.msra.mxu1 %v8647_v59 }
 0xc15   :  { %3676 = vmatprep.subr.mxu0 %v8651_v7  ;;  %3747 = vmatprep.subr.mxu1 %v8653_v46 }
 0xc16   :  { %3677 = vmatpush1.msra.mxu0 %v8657_v5  ;;  %3748 = vmatpush1.msra.mxu1 %v8659_v55 }
 0xc17   :  { %3678 = vmatprep.subr.mxu0 %v8663_v15  ;;  %3749 = vmatprep.subr.mxu1 %v8665_v50 }
 0xc18   :  { %3679 = vmatpush1.msra.mxu0 %v10760_v31  ;;  %3750 = vmatpush1.msra.mxu1 %v10761_v40 }
 0xc19   :  { %3680 = vmatprep.subr.mxu0 %v10762_v42  ;;  %3751 = vmatprep.subr.mxu1 %v10763_v54 }
 0xc1a   :  { %3681 = vmatpush1.msra.mxu0 %v10764_v0  ;;  %3752 = vmatpush1.msra.mxu1 %v8683_v39 }
 0xc1b   :  { %3682 = vmatprep.subr.mxu0 %v8685_v52  ;;  %3753 = vmatprep.subr.mxu1 %v8689_v23 }
 0xc1c   :  { %3683 = vmatpush1.msra.mxu0 %v8691_v27  ;;  %3754 = vmatpush1.msra.mxu1 %v8693_v16 }
 0xc1d   :  { %3684 = vmatprep.subr.mxu0 %v8697_v35  ;;  %3755 = vmatprep.subr.mxu1 %v8790_v8 }
 0xc1e   :  { %3685 = vmatpush1.msra.mxu0 %v8699_v29  ;;  %3756 = vmatpush1.msra.mxu1 %v8792_v13 }
 0xc1f   :  { %3686 = vmatprep.subr.mxu0 %v8703_v37  ;;  %3757 = vmatprep.subr.mxu1 %v8794_v2 }
 0xc20   :  { %3687 = vmatpush1.msra.mxu0 %v8797_v58  ;;  %3758 = vmatpush1.msra.mxu1 %v8799_v11 }
 0xc21   :  { %3688 = vmatprep.subr.mxu0 %v8801_v48  ;;  %3759 = vmatprep.subr.mxu1 %v8805_v61 }
 0xc22   :  { %3689 = vmatpush1.msra.mxu0 %v8807_v62  ;;  %3760 = vmatpush1.msra.mxu1 %v10792_v53 }
 0xc23   :  { %3690 = vmatprep.subr.mxu0 %v10793_v1  ;;  %3761 = vmatprep.subr.mxu1 %v10794_v30  ;;  %v10820_v30 = vld [vmem:[#allocation47_spill] sm:$0xff] }
 0xc24   :  { %3691 = vmatpush1.msra.mxu0 %v10795_v44  ;;  %3762 = vmatpush1.msra.mxu1 %v10796_v32 }
 0xc25   :  { %3692 = vmatprep.subr.mxu0 %v10797_v36  ;;  %3763 = vmatprep.subr.mxu1 %v10798_v34 }
 0xc26   :  { %3693 = vmatpush1.msra.mxu0 %v10799_v3  ;;  %3764 = vmatpush1.msra.mxu1 %v10800_v26  ;;  %v10811_v26 = vld [vmem:[#allocation41_spill] sm:$0xff] }
 0xc27   :  { %3694 = vmatprep.subr.mxu0 %v10801_v38  ;;  %3765 = vmatprep.subr.mxu1 %v10802_v21  ;;  %v10812_v38 = vmov 0.0   ;;  %v10813_v21 = vld [vmem:[#allocation32_spill] sm:$0xff] }
 0xc28   :  { %3695 = vmatpush1.msra.mxu0 %v10803_v22  ;;  %3766 = vmatpush1.msra.mxu1 %v10804_v49  ;;  %v10814_v49 = vld [vmem:[#allocation25_spill] sm:$0xff] }
 0xc29   :  { %3696 = vmatprep.subr.mxu0 %v10805_v28  ;;  %3767 = vmatprep.subr.mxu1 %v10806_v25  ;;  %v10815_v28 = vld [vmem:[#allocation18_spill] sm:$0xff] }
 0xc2a   :  { %3697 = vmatpush1.msra.mxu0 %v10807_v41  ;;  %3768 = vmatpush1.msra.mxu1 %v10808_v14  ;;  %v10816_v25 = vld [vmem:[#allocation58_spill] sm:$0xff] }
 0xc2b   :  { %3698 = vmatprep.subr.mxu0 %v10809_v56  ;;  %3769 = vmatprep.subr.mxu1 %v10810_v63  ;;  %v10817_v41 = vld [vmem:[#allocation46_spill] sm:$0xff]  ;;  %v10818_v56 = vld [vmem:[#allocation48_spill] sm:$0xff] }
 0xc2c   :  { %3699 = vmatpush1.msra.mxu0 %v10811_v26  ;;  %3732 = vmatprep.mubr.f32.mxu0 %v10812_v38  ;;  %v2220_v22 = vadd.f32 %v10817_v41, %v10816_v25  ;;  %v2222_v3 = vadd.f32 %v10818_v56, %v10742_v33  ;;  %v2333_v41 = vadd.f32 %v10820_v30, %v8511_v12 }
 0xc2d   :  { %3770 = vmatpush1.msra.mxu1 %v10813_v21  ;;  %3803 = vmatprep.mubr.f32.mxu1 %v10812_v38 }
 0xc2e   :  { %3910 = vmatprep.subr.mxu0 %v10814_v49  ;;  %3981 = vmatprep.subr.mxu1 %v10815_v28  ;;  %v10819_v49 = vld [vmem:[#allocation49_spill] sm:$0xff] }
 0xc2f   :  { %v2335_v44 = vadd.f32 %v10819_v49, %v10744_v10 }
 0xccd   :  { %v3492_v14 = vpop.f32.mrf.mxu0  ;;  %v3563_v32 = vpop.f32.mrf.mxu1 }
 0xcce   :  { %v3568_v63 = vadd.f32 %v3492_v14, %v2220_v22  ;;  %v3570_v25 = vadd.f32 %v3563_v32, %v2333_v41  ;;  %v10847_v41 = vld [vmem:[#allocation51_spill] sm:$0xff] }
 0xccf   :  { %v3494_v34 = vpop.f32.mrf.mxu0  ;;  %v3565_v38 = vpop.f32.mrf.mxu1 }
 0xcd0   :  { %v6403_v26 = vmul.f32 -1.442695, %v3568_v63  ;;  %v3569_v36 = vadd.f32 %v3494_v34, %v2222_v3  ;;  %v3571_v28 = vadd.f32 %v3565_v38, %v2335_v44 }
 0xcd2   :  { %6747 = vpow2.f32 %v6403_v26  ;;  %v6404_v21 = vmul.f32 -1.442695, %v3569_v36  ;;  %v6405_v1 = vmul.f32 -1.442695, %v3571_v28 }
 0xcd4   :  { %6749 = vpow2.f32 %v6404_v21 }
 0xcd5   :  { %6751 = vtanh.f32 %v3570_v25  ;;  %v10846_v25 = vld [vmem:[#allocation54_spill] sm:$0xff] }
 0xcd6   :  { %6753 = vpow2.f32 %v6405_v1  ;;  %v2341_v49 = vadd.f32 %v10846_v25, %v10744_v10  ;;  %v4146_v25 = vld [vmem:[#allocation8 + $0x1d0] sm:$0xff] }
 0xcdf   :  { %v6748_v53 = vpop.eup %6747 }
 0xce0   :  { %v3575_v56 = vadd.f32 1.0, %v6748_v53 }
 0xce1   :  { %v6750_v22 = vpop.eup %6749 }
 0xce2   :  { %6755 = vrcp.f32 %v3575_v56  ;;  %v3581_v63 = vadd.f32 1.0, %v6750_v22  ;;  %v6752_v36 = vpop.eup %6751  ;;  %v2339_v56 = vadd.f32 %v10847_v41, %v8511_v12  ;;  %v4140_v41 = vld [vmem:[#allocation8 + $0x1a0] sm:$0xff] }
 0xce3   :  { %v6754_v34 = vpop.eup %6753 }
 0xce4   :  { %6757 = vrcp.f32 %v3581_v63  ;;  %v3588_v14 = vadd.f32 1.0, %v6754_v34 }
 0xce6   :  { %6759 = vrcp.f32 %v3588_v14 }
 0xcef   :  { %v6756_v3 = vpop.eup %6755 }
 0xcf0   :  { %v3592_v26 = vmul.f32 %v6756_v3, %v6752_v36 }
 0xcf1   :  { %v6758_v21 = vpop.eup %6757 }
 0xcf2   :  { %v3591_v44 = vmul.f32 %v6758_v21, %v8888_v9 }
 0xcf3   :  { %v6760_v53 = vpop.eup %6759 }
 0xcf4   :  { %v8970_v38 = vadd.f32 %v3592_v26, %v3591_v44 }
 0xcf6   :  { %6761 = vtanh.f32 %v8970_v38 }
 0xd03   :  { %v6762_v30 = vpop.eup %6761 }
 0xd04   :  { %v8973_v32 = vmul.f32 %v6762_v30, %v6760_v53 }
 0xd06   :  { %3733 = vmatmul.mubr.f32.vlgmr.msra.gmra.mxu0 %v8973_v32  ;;  %3804 = vmatmul.mubr.f32.vlgmr.msra.gmra.mxu1 %v8973_v32 }
 0xd07   :  { %3911 = vmatpush1.msra.mxu0 %v8609_v43  ;;  %3982 = vmatpush1.msra.mxu1 %v8611_v45  ;;  %v10824_v43 = vld [vmem:[#allocation16_spill] sm:$0xff]  ;;  %v10825_v45 = vld [vmem:[#allocation30_spill] sm:$0xff] }
 0xd08   :  { %3912 = vmatprep.subr.mxu0 %v8615_v47  ;;  %3983 = vmatprep.subr.mxu1 %v8617_v51  ;;  %v10826_v47 = vld [vmem:[#allocation35_spill] sm:$0xff]  ;;  %v10827_v51 = vld [vmem:[#allocation22_spill] sm:$0xff] }
 0xd09   :  { %3913 = vmatpush1.msra.mxu0 %v8621_v24  ;;  %3984 = vmatpush1.msra.mxu1 %v8623_v60  ;;  %v10828_v24 = vld [vmem:[#allocation23_spill] sm:$0xff]  ;;  %v10829_v60 = vld [vmem:[#allocation21_spill] sm:$0xff] }
 0xd0a   :  { %3914 = vmatprep.subr.mxu0 %v8627_v19  ;;  %3985 = vmatprep.subr.mxu1 %v8629_v6  ;;  %v10830_v19 = vld [vmem:[#allocation34_spill] sm:$0xff]  ;;  %v10831_v6 = vld [vmem:[#allocation61_spill] sm:$0xff] }
 0xd0b   :  { %3915 = vmatpush1.msra.mxu0 %v8633_v57  ;;  %3986 = vmatpush1.msra.mxu1 %v8635_v20  ;;  %v10832_v57 = vld [vmem:[#allocation36_spill] sm:$0xff]  ;;  %v10833_v20 = vld [vmem:[#allocation65_spill] sm:$0xff] }
 0xd0c   :  { %3916 = vmatprep.subr.mxu0 %v8639_v17  ;;  %3987 = vmatprep.subr.mxu1 %v8641_v18  ;;  %v10834_v17 = vld [vmem:[#allocation31_spill] sm:$0xff]  ;;  %v10835_v18 = vld [vmem:[#allocation17_spill] sm:$0xff] }
 0xd0d   :  { %3917 = vmatpush1.msra.mxu0 %v8645_v4  ;;  %3988 = vmatpush1.msra.mxu1 %v8647_v59  ;;  %v10836_v4 = vld [vmem:[#allocation37_spill] sm:$0xff]  ;;  %v10837_v59 = vld [vmem:[#allocation40_spill] sm:$0xff] }
 0xd0e   :  { %3918 = vmatprep.subr.mxu0 %v8651_v7  ;;  %3989 = vmatprep.subr.mxu1 %v8653_v46  ;;  %v10838_v7 = vld [vmem:[#allocation38_spill] sm:$0xff]  ;;  %v10839_v46 = vld [vmem:[#allocation39_spill] sm:$0xff] }
 0xd0f   :  { %3919 = vmatpush1.msra.mxu0 %v8657_v5  ;;  %3990 = vmatpush1.msra.mxu1 %v8659_v55  ;;  %v10840_v5 = vld [vmem:[#allocation41_spill] sm:$0xff]  ;;  %v10841_v55 = vmov 0.0  }
 0xd10   :  { %3920 = vmatprep.subr.mxu0 %v8663_v15  ;;  %3991 = vmatprep.subr.mxu1 %v8665_v50  ;;  %v10842_v15 = vld [vmem:[#allocation32_spill] sm:$0xff]  ;;  %v10843_v50 = vld [vmem:[#allocation58_spill] sm:$0xff] }
 0xd11   :  { %3921 = vmatpush1.msra.mxu0 %v10760_v31  ;;  %3992 = vmatpush1.msra.mxu1 %v10761_v40 }
 0xd12   :  { %3922 = vmatprep.subr.mxu0 %v10762_v42  ;;  %3993 = vmatprep.subr.mxu1 %v10763_v54 }
 0xd13   :  { %3923 = vmatpush1.msra.mxu0 %v10764_v0  ;;  %3994 = vmatpush1.msra.mxu1 %v8683_v39  ;;  %v10823_v39 = vld [vmem:[#allocation29_spill] sm:$0xff] }
 0xd14   :  { %3924 = vmatprep.subr.mxu0 %v8685_v52  ;;  %3995 = vmatprep.subr.mxu1 %v8689_v23  ;;  %v10821_v52 = vld [vmem:[#allocation15_spill] sm:$0xff]  ;;  %v10822_v23 = vld [vmem:[#allocation20_spill] sm:$0xff] }
 0xd15   :  { %3925 = vmatpush1.msra.mxu0 %v8691_v27  ;;  %3996 = vmatpush1.msra.mxu1 %v8693_v16  ;;  %v10844_v16 = vld [vmem:[#allocation50_spill] sm:$0xff] }
 0xd16   :  { %3926 = vmatprep.subr.mxu0 %v8697_v35  ;;  %3997 = vmatprep.subr.mxu1 %v8790_v8  ;;  %v2226_v27 = vadd.f32 %v10844_v16, %v10843_v50  ;;  %v10845_v35 = vld [vmem:[#allocation52_spill] sm:$0xff] }
 0xd17   :  { %3927 = vmatpush1.msra.mxu0 %v8699_v29  ;;  %3998 = vmatpush1.msra.mxu1 %v8792_v13 }
 0xd18   :  { %3928 = vmatprep.subr.mxu0 %v8703_v37  ;;  %3999 = vmatprep.subr.mxu1 %v8794_v2  ;;  %v2228_v37 = vadd.f32 %v10845_v35, %v10742_v33 }
 0xd19   :  { %3929 = vmatpush1.msra.mxu0 %v8797_v58  ;;  %4000 = vmatpush1.msra.mxu1 %v8799_v11 }
 0xd1a   :  { %3930 = vmatprep.subr.mxu0 %v8801_v48  ;;  %4001 = vmatprep.subr.mxu1 %v8805_v61 }
 0xd1b   :  { %3931 = vmatpush1.msra.mxu0 %v8807_v62  ;;  %4002 = vmatpush1.msra.mxu1 %v10821_v52 }
 0xd1c   :  { %3932 = vmatprep.subr.mxu0 %v10822_v23  ;;  %4003 = vmatprep.subr.mxu1 %v10823_v39 }
 0xd1d   :  { %3933 = vmatpush1.msra.mxu0 %v10824_v43  ;;  %4004 = vmatpush1.msra.mxu1 %v10825_v45 }
 0xd1e   :  { %3934 = vmatprep.subr.mxu0 %v10826_v47  ;;  %4005 = vmatprep.subr.mxu1 %v10827_v51 }
 0xd1f   :  { %3935 = vmatpush1.msra.mxu0 %v10828_v24  ;;  %4006 = vmatpush1.msra.mxu1 %v10829_v60 }
 0xd20   :  { %3936 = vmatprep.subr.mxu0 %v10830_v19  ;;  %4007 = vmatprep.subr.mxu1 %v10831_v6 }
 0xd21   :  { %3937 = vmatpush1.msra.mxu0 %v10832_v57  ;;  %4008 = vmatpush1.msra.mxu1 %v10833_v20 }
 0xd22   :  { %3938 = vmatprep.subr.mxu0 %v10834_v17  ;;  %4009 = vmatprep.subr.mxu1 %v10835_v18 }
 0xd23   :  { %3939 = vmatpush1.msra.mxu0 %v10836_v4  ;;  %4010 = vmatpush1.msra.mxu1 %v10837_v59 }
 0xd24   :  { %3940 = vmatprep.subr.mxu0 %v10838_v7  ;;  %4011 = vmatprep.subr.mxu1 %v10839_v46 }
 0xd25   :  { %3941 = vmatpush1.msra.mxu0 %v10840_v5  ;;  %3974 = vmatprep.mubr.f32.mxu0 %v10841_v55 }
 0xd26   :  { %4012 = vmatpush1.msra.mxu1 %v10842_v15  ;;  %4045 = vmatprep.mubr.f32.mxu1 %v10841_v55 }
 0xdc6   :  { %v3734_v29 = vpop.f32.mrf.mxu0  ;;  %v3805_v0 = vpop.f32.mrf.mxu1 }
 0xdc7   :  { %v3810_v31 = vadd.f32 %v3734_v29, %v2226_v27  ;;  %v3812_v22 = vadd.f32 %v3805_v0, %v2339_v56  ;;  %v4145_v0 = vld [vmem:[#allocation8 + $0x1c8] sm:$0xff]  ;;  %v4142_v56 = vld [vmem:[#allocation8 + $0x1b0] sm:$0xff] }
 0xdc8   :  { %v3736_v40 = vpop.f32.mrf.mxu0  ;;  %v3807_v1 = vpop.f32.mrf.mxu1 }
 0xdc9   :  { %v6406_v42 = vmul.f32 -1.442695, %v3810_v31  ;;  %v3811_v54 = vadd.f32 %v3736_v40, %v2228_v37  ;;  %v3813_v28 = vadd.f32 %v3807_v1, %v2341_v49  ;;  %v4149_v40 = vld [vmem:[#allocation8 + $0x1e8] sm:$0xff]  ;;  %v4144_v1 = vld [vmem:[#allocation8 + $0x1c0] sm:$0xff] }
 0xdca   :  { %4152 = vmatprep.subr.mxu0 %v4149_v40  ;;  %v4141_v49 = vld [vmem:[#allocation8 + $0x1a8] sm:$0xff]  ;;  %v4126_v40 = vld [vmem:[#allocation8 + $0x130] sm:$0xff] }
 0xdcb   :  { %6763 = vpow2.f32 %v6406_v42  ;;  %v6407_v9 = vmul.f32 -1.442695, %v3811_v54  ;;  %v6408_v63 = vmul.f32 -1.442695, %v3813_v28  ;;  %v4151_v42 = vld [vmem:[#allocation8 + $0x1f8] sm:$0xff]  ;;  %v4150_v54 = vld [vmem:[#allocation8 + $0x1f0] sm:$0xff] }
 0xdcc   :  { %4223 = vmatprep.subr.mxu1 %v4151_v42  ;;  %v4143_v28 = vld [vmem:[#allocation8 + $0x1b8] sm:$0xff]  ;;  %v4121_v42 = vld [vmem:[#allocation8 + $0x108] sm:$0xff] }
 0xdcd   :  { %6765 = vpow2.f32 %v6407_v9  ;;  %v4147_v9 = vld [vmem:[#allocation8 + $0x1d8] sm:$0xff] }
 0xdce   :  { %6767 = vtanh.f32 %v3812_v22  ;;  %v4137_v22 = vld [vmem:[#allocation8 + $0x188] sm:$0xff] }
 0xdcf   :  { %6769 = vpow2.f32 %v6408_v63  ;;  %v4139_v63 = vld [vmem:[#allocation8 + $0x198] sm:$0xff] }
 0xdd8   :  { %v6764_v36 = vpop.eup %6763 }
 0xdd9   :  { %v3817_v34 = vadd.f32 1.0, %v6764_v36  ;;  %v4136_v36 = vld [vmem:[#allocation8 + $0x180] sm:$0xff] }
 0xdda   :  { %v6766_v3 = vpop.eup %6765 }
 0xddb   :  { %6771 = vrcp.f32 %v3817_v34  ;;  %v3823_v26 = vadd.f32 1.0, %v6766_v3  ;;  %v6768_v21 = vpop.eup %6767  ;;  %v4138_v34 = vld [vmem:[#allocation8 + $0x190] sm:$0xff]  ;;  %v4133_v3 = vld [vmem:[#allocation8 + $0x168] sm:$0xff] }
 0xddc   :  { %v6770_v14 = vpop.eup %6769 }
 0xddd   :  { %6773 = vrcp.f32 %v3823_v26  ;;  %v3830_v16 = vadd.f32 1.0, %v6770_v14  ;;  %v4135_v26 = vld [vmem:[#allocation8 + $0x178] sm:$0xff]  ;;  %v4134_v14 = vld [vmem:[#allocation8 + $0x170] sm:$0xff] }
 0xddf   :  { %6775 = vrcp.f32 %v3830_v16  ;;  %v4130_v16 = vld [vmem:[#allocation8 + $0x150] sm:$0xff] }
 0xde8   :  { %v6772_v44 = vpop.eup %6771 }
 0xde9   :  { %v3834_v53 = vmul.f32 %v6772_v44, %v6768_v21  ;;  %v4132_v21 = vld [vmem:[#allocation8 + $0x160] sm:$0xff]  ;;  %v4129_v44 = vld [vmem:[#allocation8 + $0x148] sm:$0xff] }
 0xdea   :  { %v6774_v30 = vpop.eup %6773 }
 0xdeb   :  { %v3833_v27 = vmul.f32 %v6774_v30, %v8970_v38  ;;  %v4148_v38 = vld [vmem:[#allocation8 + $0x1e0] sm:$0xff] }
 0xdec   :  { %v6776_v35 = vpop.eup %6775  ;;  %v4128_v30 = vld [vmem:[#allocation8 + $0x140] sm:$0xff] }
 0xded   :  { %v9050_v29 = vadd.f32 %v3834_v53, %v3833_v27  ;;  %v4131_v53 = vld [vmem:[#allocation8 + $0x158] sm:$0xff]  ;;  %v4125_v27 = vld [vmem:[#allocation8 + $0x128] sm:$0xff] }
 0xdef   :  { %6777 = vtanh.f32 %v9050_v29 }
 0xdfc   :  { %v6778_v37 = vpop.eup %6777 }
 0xdfd   :  { %v9053_v31 = vmul.f32 %v6778_v37, %v6776_v35  ;;  %v4127_v35 = vld [vmem:[#allocation8 + $0x138] sm:$0xff]  ;;  %v4124_v37 = vld [vmem:[#allocation8 + $0x120] sm:$0xff] }
 0xdff   :  { %3975 = vmatmul.mubr.f32.vlgmr.msra.gmra.mxu0 %v9053_v31  ;;  %4046 = vmatmul.mubr.f32.vlgmr.msra.gmra.mxu1 %v9053_v31 }
 0xe00   :  { %4216 = vmatprep.mubr.f32.mxu0 %v10841_v55  ;;  %4287 = vmatprep.mubr.f32.mxu1 %v10841_v55 }
 0xe01   :  { %4153 = vmatpush1.msra.mxu0 %v4148_v38  ;;  %4224 = vmatpush1.msra.mxu1 %v4150_v54  ;;  %v4123_v38 = vld [vmem:[#allocation8 + $0x118] sm:$0xff]  ;;  %v4120_v54 = vld [vmem:[#allocation8 + $0x100] sm:$0xff] }
 0xe02   :  { %4154 = vmatprep.subr.mxu0 %v4145_v0  ;;  %4225 = vmatprep.subr.mxu1 %v4147_v9  ;;  %v4122_v0 = vld [vmem:[#allocation8 + $0x110] sm:$0xff]  ;;  %v4117_v9 = vld [vmem:[#allocation8 + $0xe8] sm:$0xff] }
 0xe03   :  { %4155 = vmatpush1.msra.mxu0 %v4144_v1  ;;  %4226 = vmatpush1.msra.mxu1 %v4146_v25  ;;  %v4116_v1 = vld [vmem:[#allocation8 + $0xe0] sm:$0xff]  ;;  %v4113_v25 = vld [vmem:[#allocation8 + $0xc8] sm:$0xff] }
 0xe04   :  { %4156 = vmatprep.subr.mxu0 %v4141_v49  ;;  %4227 = vmatprep.subr.mxu1 %v4143_v28 }
 0xe05   :  { %4157 = vmatpush1.msra.mxu0 %v4140_v41  ;;  %4228 = vmatpush1.msra.mxu1 %v4142_v56 }
 0xe06   :  { %4158 = vmatprep.subr.mxu0 %v4137_v22  ;;  %4229 = vmatprep.subr.mxu1 %v4139_v63 }
 0xe07   :  { %4159 = vmatpush1.msra.mxu0 %v4136_v36  ;;  %4230 = vmatpush1.msra.mxu1 %v4138_v34  ;;  %v4391_v34 = vld [vmem:[#allocation9 + $0x1e0] sm:$0xff] }
 0xe08   :  { %4160 = vmatprep.subr.mxu0 %v4133_v3  ;;  %4231 = vmatprep.subr.mxu1 %v4135_v26  ;;  %v4393_v3 = vld [vmem:[#allocation9 + $0x1f0] sm:$0xff]  ;;  %v4388_v26 = vld [vmem:[#allocation9 + $0x1c8] sm:$0xff] }
 0xe09   :  { %4161 = vmatpush1.msra.mxu0 %v4132_v21  ;;  %4232 = vmatpush1.msra.mxu1 %v4134_v14  ;;  %v4390_v21 = vld [vmem:[#allocation9 + $0x1d8] sm:$0xff]  ;;  %v4387_v14 = vld [vmem:[#allocation9 + $0x1c0] sm:$0xff] }
 0xe0a   :  { %4162 = vmatprep.subr.mxu0 %v4129_v44  ;;  %4233 = vmatprep.subr.mxu1 %v4131_v53  ;;  %v4389_v44 = vld [vmem:[#allocation9 + $0x1d0] sm:$0xff]  ;;  %v4386_v53 = vld [vmem:[#allocation9 + $0x1b8] sm:$0xff] }
 0xe0b   :  { %4163 = vmatpush1.msra.mxu0 %v4128_v30  ;;  %4234 = vmatpush1.msra.mxu1 %v4130_v16  ;;  %v4383_v30 = vld [vmem:[#allocation9 + $0x1a0] sm:$0xff]  ;;  %v4385_v16 = vld [vmem:[#allocation9 + $0x1b0] sm:$0xff] }
 0xe0c   :  { %4164 = vmatprep.subr.mxu0 %v4125_v27  ;;  %4235 = vmatprep.subr.mxu1 %v4127_v35  ;;  %v4380_v27 = vld [vmem:[#allocation9 + $0x188] sm:$0xff]  ;;  %v4382_v35 = vld [vmem:[#allocation9 + $0x198] sm:$0xff] }
 0xe0d   :  { %4165 = vmatpush1.msra.mxu0 %v4124_v37  ;;  %4236 = vmatpush1.msra.mxu1 %v4126_v40  ;;  %v4379_v37 = vld [vmem:[#allocation9 + $0x180] sm:$0xff]  ;;  %v4381_v40 = vld [vmem:[#allocation9 + $0x190] sm:$0xff] }
 0xe0e   :  { %4166 = vmatprep.subr.mxu0 %v4121_v42  ;;  %4237 = vmatprep.subr.mxu1 %v4123_v38  ;;  %v4376_v42 = vld [vmem:[#allocation9 + $0x168] sm:$0xff]  ;;  %v4378_v38 = vld [vmem:[#allocation9 + $0x178] sm:$0xff] }
 0xe0f   :  { %4167 = vmatpush1.msra.mxu0 %v4120_v54  ;;  %4238 = vmatpush1.msra.mxu1 %v4122_v0  ;;  %v4375_v54 = vld [vmem:[#allocation9 + $0x160] sm:$0xff]  ;;  %v4377_v0 = vld [vmem:[#allocation9 + $0x170] sm:$0xff] }
 0xe10   :  { %4168 = vmatprep.subr.mxu0 %v4117_v9  ;;  %4239 = vmatprep.subr.mxu1 %v8790_v8  ;;  %v4392_v8 = vld [vmem:[#allocation9 + $0x1e8] sm:$0xff] }
 0xe11   :  { %4169 = vmatpush1.msra.mxu0 %v4116_v1  ;;  %4240 = vmatpush1.msra.mxu1 %v8792_v13  ;;  %v4394_v13 = vld [vmem:[#allocation9 + $0x1f8] sm:$0xff]  ;;  %v4372_v9 = vld [vmem:[#allocation9 + $0x148] sm:$0xff] }
 0xe12   :  { %4170 = vmatprep.subr.mxu0 %v4113_v25  ;;  %4241 = vmatprep.subr.mxu1 %v8794_v2  ;;  %v10848_v2 = vld [vmem:[#allocation55_spill] sm:$0xff]  ;;  %v4374_v1 = vld [vmem:[#allocation9 + $0x158] sm:$0xff] }
 0xe13   :  { %4171 = vmatpush1.msra.mxu0 %v8797_v58  ;;  %4242 = vmatpush1.msra.mxu1 %v8799_v11  ;;  %v2232_v58 = vadd.f32 %v10848_v2, %v10843_v50  ;;  %v4371_v25 = vld [vmem:[#allocation9 + $0x140] sm:$0xff]  ;;  %v4370_v2 = vld [vmem:[#allocation9 + $0x138] sm:$0xff] }
 0xe14   :  { %4172 = vmatprep.subr.mxu0 %v8801_v48  ;;  %4243 = vmatprep.subr.mxu1 %v8805_v61  ;;  %v10849_v48 = vld [vmem:[#allocation57_spill] sm:$0xff] }
 0xe15   :  { %4173 = vmatpush1.msra.mxu0 %v8807_v62  ;;  %4244 = vmatpush1.msra.mxu1 %v10821_v52  ;;  %v2234_v61 = vadd.f32 %v10849_v48, %v10742_v33  ;;  %v4364_v48 = vld [vmem:[#allocation9 + $0x108] sm:$0xff] }
 0xe16   :  { %4174 = vmatprep.subr.mxu0 %v10822_v23  ;;  %4245 = vmatprep.subr.mxu1 %v10823_v39 }
 0xe17   :  { %4175 = vmatpush1.msra.mxu0 %v10824_v43  ;;  %4246 = vmatpush1.msra.mxu1 %v10825_v45 }
 0xe18   :  { %4176 = vmatprep.subr.mxu0 %v10826_v47  ;;  %4247 = vmatprep.subr.mxu1 %v10827_v51  ;;  %v10850_v51 = vld [vmem:[#allocation59_spill] sm:$0xff] }
 0xe19   :  { %4177 = vmatpush1.msra.mxu0 %v10828_v24  ;;  %4248 = vmatpush1.msra.mxu1 %v10829_v60  ;;  %v2347_v24 = vadd.f32 %v10850_v51, %v10744_v10  ;;  %v4358_v51 = vld [vmem:[#allocation9 + $0xd8] sm:$0xff] }
 0xe1a   :  { %4178 = vmatprep.subr.mxu0 %v10830_v19  ;;  %4249 = vmatprep.subr.mxu1 %v10831_v6  ;;  %v10851_v19 = vld [vmem:[#allocation56_spill] sm:$0xff] }
 0xe1b   :  { %4179 = vmatpush1.msra.mxu0 %v10832_v57  ;;  %4250 = vmatpush1.msra.mxu1 %v10833_v20  ;;  %v2345_v6 = vadd.f32 %v10851_v19, %v8511_v12  ;;  %v4352_v19 = vld [vmem:[#allocation9 + $0xa8] sm:$0xff] }
 0xe1c   :  { %4180 = vmatprep.subr.mxu0 %v10834_v17  ;;  %4251 = vmatprep.subr.mxu1 %v10835_v18 }
 0xe1d   :  { %4181 = vmatpush1.msra.mxu0 %v10836_v4  ;;  %4252 = vmatpush1.msra.mxu1 %v10837_v59 }
 0xe1e   :  { %4182 = vmatprep.subr.mxu0 %v10838_v7  ;;  %4253 = vmatprep.subr.mxu1 %v10839_v46 }
 0xe1f   :  { %4183 = vmatpush1.msra.mxu0 %v10840_v5  ;;  %4254 = vmatpush1.msra.mxu1 %v10842_v15 }
 0xe20   :  { %4417 = vmatprep.subr.mxu0 %v4392_v8  ;;  %4530 = vmatprep.subr.mxu1 %v4394_v13  ;;  %v4373_v8 = vld [vmem:[#allocation9 + $0x150] sm:$0xff]  ;;  %v4368_v13 = vld [vmem:[#allocation9 + $0x128] sm:$0xff] }
 0xebf   :  { %v3976_v11 = vpop.f32.mrf.mxu0  ;;  %v4047_v43 = vpop.f32.mrf.mxu1 }
 0xec0   :  { %v4052_v62 = vadd.f32 %v3976_v11, %v2232_v58  ;;  %v4054_v57 = vadd.f32 %v4047_v43, %v2345_v6  ;;  %v4367_v58 = vld [vmem:[#allocation9 + $0x120] sm:$0xff]  ;;  %v4369_v11 = vld [vmem:[#allocation9 + $0x130] sm:$0xff]  ;;  %v4354_v6 = vld [vmem:[#allocation9 + $0xb8] sm:$0xff] }
 0xec1   :  { %v3978_v52 = vpop.f32.mrf.mxu0  ;;  %v4049_v47 = vpop.f32.mrf.mxu1  ;;  %v4359_v43 = vld [vmem:[#allocation9 + $0xe0] sm:$0xff] }
 0xec2   :  { %v6409_v23 = vmul.f32 -1.442695, %v4052_v62  ;;  %v4053_v39 = vadd.f32 %v3978_v52, %v2234_v61  ;;  %v4055_v60 = vadd.f32 %v4049_v47, %v2347_v24  ;;  %v4366_v61 = vld [vmem:[#allocation9 + $0x118] sm:$0xff]  ;;  %v4363_v62 = vld [vmem:[#allocation9 + $0x100] sm:$0xff]  ;;  %v4365_v52 = vld [vmem:[#allocation9 + $0x110] sm:$0xff] }
 0xec3   :  { %v4356_v47 = vld [vmem:[#allocation9 + $0xc8] sm:$0xff]  ;;  %v4355_v24 = vld [vmem:[#allocation9 + $0xc0] sm:$0xff] }
 0xec4   :  { %6779 = vpow2.f32 %v6409_v23  ;;  %v6410_v45 = vmul.f32 -1.442695, %v4053_v39  ;;  %v6411_v20 = vmul.f32 -1.442695, %v4055_v60  ;;  %v4360_v23 = vld [vmem:[#allocation9 + $0xe8] sm:$0xff]  ;;  %v4362_v39 = vld [vmem:[#allocation9 + $0xf8] sm:$0xff] }
 0xec5   :  { %v4357_v60 = vld [vmem:[#allocation9 + $0xd0] sm:$0xff] }
 0xec6   :  { %6781 = vpow2.f32 %v6410_v45  ;;  %v4361_v45 = vld [vmem:[#allocation9 + $0xf0] sm:$0xff] }
 0xec7   :  { %6783 = vtanh.f32 %v4054_v57  ;;  %v4351_v57 = vld [vmem:[#allocation9 + $0xa0] sm:$0xff] }
 0xec8   :  { %6785 = vpow2.f32 %v6411_v20  ;;  %v4353_v20 = vld [vmem:[#allocation9 + $0xb0] sm:$0xff] }
 0xed1   :  { %v6780_v17 = vpop.eup %6779 }
 0xed2   :  { %v4059_v18 = vadd.f32 1.0, %v6780_v17  ;;  %v4348_v17 = vld [vmem:[#allocation9 + $0x88] sm:$0xff] }
 0xed3   :  { %v6782_v4 = vpop.eup %6781 }
 0xed4   :  { %6787 = vrcp.f32 %v4059_v18  ;;  %v4065_v59 = vadd.f32 1.0, %v6782_v4  ;;  %v6784_v7 = vpop.eup %6783  ;;  %v4350_v18 = vld [vmem:[#allocation9 + $0x98] sm:$0xff]  ;;  %v4347_v4 = vld [vmem:[#allocation9 + $0x80] sm:$0xff] }
 0xed5   :  { %v6786_v46 = vpop.eup %6785 }
 0xed6   :  { %6789 = vrcp.f32 %v4065_v59  ;;  %v4072_v28 = vadd.f32 1.0, %v6786_v46  ;;  %v4349_v59 = vld [vmem:[#allocation9 + $0x90] sm:$0xff]  ;;  %v4346_v46 = vld [vmem:[#allocation9 + $0x78] sm:$0xff] }
 0xed8   :  { %6791 = vrcp.f32 %v4072_v28  ;;  %v4342_v28 = vld [vmem:[#allocation9 + $0x58] sm:$0xff] }
 0xee1   :  { %v6788_v5 = vpop.eup %6787 }
 0xee2   :  { %v4076_v15 = vmul.f32 %v6788_v5, %v6784_v7  ;;  %v4344_v7 = vld [vmem:[#allocation9 + $0x68] sm:$0xff]  ;;  %v4343_v5 = vld [vmem:[#allocation9 + $0x60] sm:$0xff] }
 0xee3   :  { %v6790_v49 = vpop.eup %6789 }
 0xee4   :  { %v4075_v41 = vmul.f32 %v6790_v49, %v9050_v29  ;;  %v4384_v29 = vld [vmem:[#allocation9 + $0x1a8] sm:$0xff] }
 0xee5   :  { %v6792_v22 = vpop.eup %6791  ;;  %v4340_v49 = vld [vmem:[#allocation9 + $0x48] sm:$0xff] }
 0xee6   :  { %v9097_v56 = vadd.f32 %v4076_v15, %v4075_v41  ;;  %v4345_v15 = vld [vmem:[#allocation9 + $0x70] sm:$0xff]  ;;  %v4339_v41 = vld [vmem:[#allocation9 + $0x40] sm:$0xff] }
 0xee8   :  { %6793 = vtanh.f32 %v9097_v56 }
 0xef5   :  { %v6794_v63 = vpop.eup %6793 }
 0xef6   :  { %v9100_v36 = vmul.f32 %v6794_v63, %v6792_v22  ;;  %v4341_v22 = vld [vmem:[#allocation9 + $0x50] sm:$0xff]  ;;  %v4336_v63 = vld [vmem:[#allocation9 + $0x28] sm:$0xff] }
 0xef8   :  { %4217 = vmatmul.mubr.f32.vlgmr.msra.gmra.mxu0 %v9100_v36  ;;  %4288 = vmatmul.mubr.f32.vlgmr.msra.gmra.mxu1 %v9100_v36 }
 0xef9   :  { %4418 = vmatpush1.msra.mxu0 %v4391_v34  ;;  %4531 = vmatpush1.msra.mxu1 %v4393_v3  ;;  %v4338_v34 = vld [vmem:[#allocation9 + $0x38] sm:$0xff]  ;;  %v4335_v3 = vld [vmem:[#allocation9 + $0x20] sm:$0xff] }
 0xefa   :  { %4419 = vmatprep.subr.mxu0 %v4388_v26  ;;  %4532 = vmatprep.subr.mxu1 %v4390_v21  ;;  %v4337_v26 = vld [vmem:[#allocation9 + $0x30] sm:$0xff]  ;;  %v4332_v21 = vld [vmem:[#allocation9 + $0x8] sm:$0xff] }
 0xefb   :  { %4420 = vmatpush1.msra.mxu0 %v4387_v14  ;;  %4533 = vmatpush1.msra.mxu1 %v4389_v44  ;;  %v4334_v14 = vld [vmem:[#allocation9 + $0x18] sm:$0xff]  ;;  %v4331_v44 = vld [vmem:[#allocation9] sm:$0xff] }
 0xefc   :  { %4421 = vmatprep.subr.mxu0 %v4384_v29  ;;  %4534 = vmatprep.subr.mxu1 %v4386_v53  ;;  %v4333_v29 = vld [vmem:[#allocation9 + $0x10] sm:$0xff]  ;;  %v10852_v53 = vld [vmem:[#allocation66_spill] sm:$0xff] }
 0xefd   :  { %4422 = vmatpush1.msra.mxu0 %v4383_v30  ;;  %4535 = vmatpush1.msra.mxu1 %v4385_v16  ;;  %v10853_v30 = vld [vmem:[#allocation24_spill] sm:$0xff] }
 0xefe   :  { %4423 = vmatprep.subr.mxu0 %v4380_v27  ;;  %4536 = vmatprep.subr.mxu1 %v4382_v35  ;;  %v10854_v16 = vld [vmem:[#allocation28_spill] sm:$0xff]  ;;  %v10855_v27 = vld [vmem:[#allocation26_spill] sm:$0xff] }
 0xeff   :  { %4424 = vmatpush1.msra.mxu0 %v4379_v37  ;;  %4537 = vmatpush1.msra.mxu1 %v4381_v40  ;;  %v9136_v35 = vld [vmem:[#allocation11 + $0x1f8] sm:$0xff]  ;;  %v9139_v37 = vld [vmem:[#allocation11 + $0x1e0] sm:$0xff]  ;;  %v9145_v40 = vld [vmem:[#allocation11 + $0x1c8] sm:$0xff] }
 0xf00   :  { %4425 = vmatprep.subr.mxu0 %v4376_v42  ;;  %4538 = vmatprep.subr.mxu1 %v4378_v38  ;;  %10857 = vst [vmem:[#allocation19_spill] sm:$0xff] %v9136_v35  ;;  %v9151_v42 = vld [vmem:[#allocation11 + $0x1c0] sm:$0xff]  ;;  %v9154_v38 = vld [vmem:[#allocation11 + $0x1d0] sm:$0xff] }
 0xf01   :  { %4426 = vmatpush1.msra.mxu0 %v4375_v54  ;;  %4539 = vmatpush1.msra.mxu1 %v4377_v0  ;;  %v9157_v54 = vld [vmem:[#allocation11 + $0x1a8] sm:$0xff]  ;;  %v9160_v0 = vld [vmem:[#allocation11 + $0x1b8] sm:$0xff] }
 0xf02   :  { %4427 = vmatprep.subr.mxu0 %v4372_v9  ;;  %4540 = vmatprep.subr.mxu1 %v4374_v1  ;;  %v9163_v9 = vld [vmem:[#allocation11 + $0x1a0] sm:$0xff]  ;;  %v9166_v1 = vld [vmem:[#allocation11 + $0x1b0] sm:$0xff] }
 0xf03   :  { %4428 = vmatpush1.msra.mxu0 %v4371_v25  ;;  %4541 = vmatpush1.msra.mxu1 %v4373_v8  ;;  %v9169_v25 = vld [vmem:[#allocation11 + $0x188] sm:$0xff]  ;;  %v9172_v8 = vld [vmem:[#allocation11 + $0x198] sm:$0xff] }
 0xf04   :  { %4429 = vmatprep.subr.mxu0 %v4368_v13  ;;  %4542 = vmatprep.subr.mxu1 %v4370_v2  ;;  %v9175_v13 = vld [vmem:[#allocation11 + $0x180] sm:$0xff]  ;;  %v9178_v2 = vld [vmem:[#allocation11 + $0x190] sm:$0xff] }
 0xf05   :  { %4430 = vmatpush1.msra.mxu0 %v4367_v58  ;;  %4543 = vmatpush1.msra.mxu1 %v4369_v11  ;;  %v9181_v58 = vld [vmem:[#allocation11 + $0x168] sm:$0xff]  ;;  %v9184_v11 = vld [vmem:[#allocation11 + $0x178] sm:$0xff] }
 0xf06   :  { %4431 = vmatprep.subr.mxu0 %v4364_v48  ;;  %4544 = vmatprep.subr.mxu1 %v4366_v61  ;;  %v9187_v48 = vld [vmem:[#allocation11 + $0x160] sm:$0xff]  ;;  %v9190_v61 = vld [vmem:[#allocation11 + $0x170] sm:$0xff] }
 0xf07   :  { %4432 = vmatpush1.msra.mxu0 %v4363_v62  ;;  %4545 = vmatpush1.msra.mxu1 %v4365_v52  ;;  %v9193_v62 = vld [vmem:[#allocation11 + $0x148] sm:$0xff]  ;;  %v9196_v52 = vld [vmem:[#allocation11 + $0x158] sm:$0xff] }
 0xf08   :  { %4433 = vmatprep.subr.mxu0 %v4360_v23  ;;  %4546 = vmatprep.subr.mxu1 %v4362_v39  ;;  %v9199_v23 = vld [vmem:[#allocation11 + $0x140] sm:$0xff]  ;;  %v9202_v39 = vld [vmem:[#allocation11 + $0x150] sm:$0xff] }
 0xf09   :  { %4434 = vmatpush1.msra.mxu0 %v4359_v43  ;;  %4547 = vmatpush1.msra.mxu1 %v4361_v45  ;;  %v9205_v43 = vld [vmem:[#allocation11 + $0x128] sm:$0xff]  ;;  %v9208_v45 = vld [vmem:[#allocation11 + $0x138] sm:$0xff] }
 0xf0a   :  { %4435 = vmatprep.subr.mxu0 %v4356_v47  ;;  %4548 = vmatprep.subr.mxu1 %v4358_v51  ;;  %v9211_v47 = vld [vmem:[#allocation11 + $0x120] sm:$0xff]  ;;  %v9214_v51 = vld [vmem:[#allocation11 + $0x130] sm:$0xff] }
 0xf0b   :  { %4436 = vmatpush1.msra.mxu0 %v4355_v24  ;;  %4549 = vmatpush1.msra.mxu1 %v4357_v60  ;;  %v9217_v24 = vld [vmem:[#allocation11 + $0x108] sm:$0xff]  ;;  %v9220_v60 = vld [vmem:[#allocation11 + $0x118] sm:$0xff] }
 0xf0c   :  { %4437 = vmatprep.subr.mxu0 %v4352_v19  ;;  %4550 = vmatprep.subr.mxu1 %v4354_v6  ;;  %v9223_v19 = vld [vmem:[#allocation11 + $0x100] sm:$0xff]  ;;  %v9226_v6 = vld [vmem:[#allocation11 + $0x110] sm:$0xff] }
 0xf0d   :  { %4438 = vmatpush1.msra.mxu0 %v4351_v57  ;;  %4551 = vmatpush1.msra.mxu1 %v4353_v20  ;;  %v9229_v57 = vld [vmem:[#allocation11 + $0xe8] sm:$0xff]  ;;  %v9232_v20 = vld [vmem:[#allocation11 + $0xf8] sm:$0xff] }
 0xf0e   :  { %4439 = vmatprep.subr.mxu0 %v4348_v17  ;;  %4552 = vmatprep.subr.mxu1 %v4350_v18  ;;  %v9235_v17 = vld [vmem:[#allocation11 + $0xe0] sm:$0xff]  ;;  %v9238_v18 = vld [vmem:[#allocation11 + $0xf0] sm:$0xff] }
 0xf0f   :  { %4440 = vmatpush1.msra.mxu0 %v4347_v4  ;;  %4553 = vmatpush1.msra.mxu1 %v4349_v59  ;;  %v9241_v4 = vld [vmem:[#allocation11 + $0xc8] sm:$0xff]  ;;  %v9244_v59 = vld [vmem:[#allocation11 + $0xd8] sm:$0xff] }
 0xf10   :  { %4441 = vmatprep.subr.mxu0 %v4344_v7  ;;  %4554 = vmatprep.subr.mxu1 %v4346_v46  ;;  %v9247_v7 = vld [vmem:[#allocation11 + $0xc0] sm:$0xff]  ;;  %v9250_v46 = vld [vmem:[#allocation11 + $0xd0] sm:$0xff] }
 0xf11   :  { %4442 = vmatpush1.msra.mxu0 %v4343_v5  ;;  %4555 = vmatpush1.msra.mxu1 %v4345_v15  ;;  %v9253_v5 = vld [vmem:[#allocation11 + $0xa8] sm:$0xff]  ;;  %v9256_v15 = vld [vmem:[#allocation11 + $0xb8] sm:$0xff] }
 0xf12   :  { %4443 = vmatprep.subr.mxu0 %v4340_v49  ;;  %4556 = vmatprep.subr.mxu1 %v4342_v28  ;;  %v9259_v49 = vld [vmem:[#allocation11 + $0xa0] sm:$0xff]  ;;  %v9262_v28 = vld [vmem:[#allocation11 + $0xb0] sm:$0xff] }
 0xf13   :  { %4444 = vmatpush1.msra.mxu0 %v4339_v41  ;;  %4557 = vmatpush1.msra.mxu1 %v4341_v22  ;;  %10858 = vst [vmem:[#allocation33_spill] sm:$0xff] %v9259_v49  ;;  %10859 = vst [vmem:[#allocation42_spill] sm:$0xff] %v9262_v28  ;;  %v9265_v41 = vld [vmem:[#allocation11 + $0x88] sm:$0xff]  ;;  %v9268_v22 = vld [vmem:[#allocation11 + $0x98] sm:$0xff] }
 0xf14   :  { %4445 = vmatprep.subr.mxu0 %v4336_v63  ;;  %4558 = vmatprep.subr.mxu1 %v4338_v34  ;;  %10860 = vst [vmem:[#allocation44_spill] sm:$0xff] %v9265_v41  ;;  %10861 = vst [vmem:[#allocation45_spill] sm:$0xff] %v9268_v22  ;;  %v9271_v63 = vld [vmem:[#allocation11 + $0x80] sm:$0xff]  ;;  %v9274_v34 = vld [vmem:[#allocation11 + $0x90] sm:$0xff] }
 0xf15   :  { %4446 = vmatpush1.msra.mxu0 %v4335_v3  ;;  %4559 = vmatpush1.msra.mxu1 %v4337_v26  ;;  %10862 = vst [vmem:[#allocation43_spill] sm:$0xff] %v9271_v63  ;;  %10863 = vst [vmem:[#allocation25_spill] sm:$0xff] %v9274_v34  ;;  %v9277_v3 = vld [vmem:[#allocation11 + $0x68] sm:$0xff]  ;;  %v9280_v26 = vld [vmem:[#allocation11 + $0x78] sm:$0xff] }
 0xf16   :  { %4447 = vmatprep.subr.mxu0 %v4332_v21  ;;  %4560 = vmatprep.subr.mxu1 %v4334_v14  ;;  %10864 = vst [vmem:[#allocation18_spill] sm:$0xff] %v9277_v3  ;;  %10865 = vst [vmem:[#allocation46_spill] sm:$0xff] %v9280_v26  ;;  %v9283_v21 = vld [vmem:[#allocation11 + $0x60] sm:$0xff]  ;;  %v9286_v14 = vld [vmem:[#allocation11 + $0x70] sm:$0xff] }
 0xf17   :  { %4448 = vmatpush1.msra.mxu0 %v4331_v44  ;;  %4481 = vmatprep.mubr.f32.mxu0 %v10841_v55  ;;  %10866 = vst [vmem:[#allocation48_spill] sm:$0xff] %v9283_v21  ;;  %10867 = vst [vmem:[#allocation49_spill] sm:$0xff] %v9286_v14  ;;  %v9289_v44 = vld [vmem:[#allocation11 + $0x48] sm:$0xff] }
 0xf18   :  { %4561 = vmatpush1.msra.mxu1 %v4333_v29  ;;  %4594 = vmatprep.mubr.f32.mxu1 %v10841_v55  ;;  %10868 = vst [vmem:[#allocation47_spill] sm:$0xff] %v9289_v44  ;;  %v9292_v29 = vld [vmem:[#allocation11 + $0x58] sm:$0xff] }
 0xf19   :  { %4482 = vmatmul.mubr.f32.vlgmr.msra.gmra.mxu0 %v10852_v53  ;;  %4595 = vmatmul.mubr.f32.vlgmr.msra.gmra.mxu1 %v10852_v53  ;;  %10869 = vst [vmem:[#allocation15_spill] sm:$0xff] %v9292_v29  ;;  %v9295_v53 = vld [vmem:[#allocation11 + $0x40] sm:$0xff] }
 0xf1a   :  { %4487 = vmatprep.mubr.f32.mxu0 %v10841_v55  ;;  %4600 = vmatprep.mubr.f32.mxu1 %v10841_v55  ;;  %10870 = vst [vmem:[#allocation20_spill] sm:$0xff] %v9295_v53 }
 0xf1b   :  { %4814 = vmatprep.subr.mxu1 %v9136_v35 }
 0xf1d   :  { %4488 = vmatmul.mubr.f32.gmra.mxu0 %v10853_v30  ;;  %4601 = vmatmul.mubr.f32.gmra.mxu1 %v10853_v30  ;;  %v9298_v30 = vld [vmem:[#allocation11 + $0x50] sm:$0xff] }
 0xf1e   :  { %4493 = vmatprep.mubr.f32.mxu0 %v10841_v55  ;;  %4606 = vmatprep.mubr.f32.mxu1 %v10841_v55  ;;  %10871 = vst [vmem:[#allocation29_spill] sm:$0xff] %v9298_v30 }
 0xf21   :  { %4494 = vmatmul.mubr.f32.gmra.mxu0 %v10854_v16  ;;  %4607 = vmatmul.mubr.f32.gmra.mxu1 %v10854_v16  ;;  %v9301_v16 = vld [vmem:[#allocation11 + $0x28] sm:$0xff] }
 0xf22   :  { %4499 = vmatprep.mubr.f32.mxu0 %v10841_v55  ;;  %4612 = vmatprep.mubr.f32.mxu1 %v10841_v55  ;;  %10872 = vst [vmem:[#allocation16_spill] sm:$0xff] %v9301_v16 }
 0xf25   :  { %4500 = vmatmul.mubr.f32.gmra.mxu0 %v10855_v27  ;;  %4613 = vmatmul.mubr.f32.gmra.mxu1 %v10855_v27  ;;  %v9304_v27 = vld [vmem:[#allocation11 + $0x38] sm:$0xff] }
 0xf26   :  { %4505 = vmatprep.mubr.f32.mxu0 %v10841_v55  ;;  %4618 = vmatprep.mubr.f32.mxu1 %v10841_v55  ;;  %10873 = vst [vmem:[#allocation30_spill] sm:$0xff] %v9304_v27 }
 0xf29   :  { %4506 = vmatmul.mubr.f32.gmra.mxu0 %v8973_v32  ;;  %4619 = vmatmul.mubr.f32.gmra.mxu1 %v8973_v32  ;;  %v9134_v32 = vld [vmem:[#allocation11 + $0x1e8] sm:$0xff] }
 0xf2a   :  { %4511 = vmatprep.mubr.f32.mxu0 %v10841_v55  ;;  %4624 = vmatprep.mubr.f32.mxu1 %v10841_v55  ;;  %10856 = vst [vmem:[#allocation27_spill] sm:$0xff] %v9134_v32 }
 0xf2b   :  { %4743 = vmatprep.subr.mxu0 %v9134_v32 }
 0xf2c   :  { %4744 = vmatpush1.msra.mxu0 %v9139_v37 }
 0xf2d   :  { %4512 = vmatmul.mubr.f32.gmra.mxu0 %v9053_v31  ;;  %4625 = vmatmul.mubr.f32.gmra.mxu1 %v9053_v31  ;;  %v9142_v31 = vld [vmem:[#allocation11 + $0x1f0] sm:$0xff] }
 0xf2e   :  { %4517 = vmatprep.mubr.f32.mxu0 %v10841_v55  ;;  %4630 = vmatprep.mubr.f32.mxu1 %v10841_v55 }
 0xf2f   :  { %4815 = vmatpush1.msra.mxu1 %v9142_v31  ;;  %4745 = vmatprep.subr.mxu0 %v9145_v40 }
 0xf30   :  { %4746 = vmatpush1.msra.mxu0 %v9151_v42 }
 0xf31   :  { %4518 = vmatmul.mubr.f32.gmra.mxu0 %v9100_v36  ;;  %4631 = vmatmul.mubr.f32.gmra.mxu1 %v9100_v36  ;;  %v9148_v36 = vld [vmem:[#allocation11 + $0x1d8] sm:$0xff] }
 0xf32   :  { %4523 = vmatprep.mubr.f32.mxu0 %v10841_v55  ;;  %4636 = vmatprep.mubr.f32.mxu1 %v10841_v55 }
 0xf33   :  { %4816 = vmatprep.subr.mxu1 %v9148_v36  ;;  %4747 = vmatprep.subr.mxu0 %v9157_v54 }
 0xf34   :  { %4817 = vmatpush1.msra.mxu1 %v9154_v38  ;;  %4748 = vmatpush1.msra.mxu0 %v9163_v9 }
 0xf35   :  { %4818 = vmatprep.subr.mxu1 %v9160_v0  ;;  %4749 = vmatprep.subr.mxu0 %v9169_v25 }
 0xf36   :  { %4819 = vmatpush1.msra.mxu1 %v9166_v1  ;;  %4750 = vmatpush1.msra.mxu0 %v9175_v13 }
 0xf37   :  { %4820 = vmatprep.subr.mxu1 %v9172_v8  ;;  %4751 = vmatprep.subr.mxu0 %v9181_v58 }
 0xf38   :  { %4821 = vmatpush1.msra.mxu1 %v9178_v2  ;;  %4752 = vmatpush1.msra.mxu0 %v9187_v48 }
 0xf39   :  { %4822 = vmatprep.subr.mxu1 %v9184_v11  ;;  %4753 = vmatprep.subr.mxu0 %v9193_v62 }
 0xf3a   :  { %4823 = vmatpush1.msra.mxu1 %v9190_v61  ;;  %4754 = vmatpush1.msra.mxu0 %v9199_v23 }
 0xf3b   :  { %4824 = vmatprep.subr.mxu1 %v9196_v52  ;;  %4755 = vmatprep.subr.mxu0 %v9205_v43 }
 0xf3c   :  { %4825 = vmatpush1.msra.mxu1 %v9202_v39  ;;  %4756 = vmatpush1.msra.mxu0 %v9211_v47 }
 0xf3d   :  { %4826 = vmatprep.subr.mxu1 %v9208_v45  ;;  %4757 = vmatprep.subr.mxu0 %v9217_v24 }
 0xf3e   :  { %4827 = vmatpush1.msra.mxu1 %v9214_v51  ;;  %4758 = vmatpush1.msra.mxu0 %v9223_v19 }
 0xf3f   :  { %4828 = vmatprep.subr.mxu1 %v9220_v60  ;;  %4759 = vmatprep.subr.mxu0 %v9229_v57 }
 0xf40   :  { %4829 = vmatpush1.msra.mxu1 %v9226_v6  ;;  %4760 = vmatpush1.msra.mxu0 %v9235_v17 }
 0xf41   :  { %4830 = vmatprep.subr.mxu1 %v9232_v20  ;;  %4761 = vmatprep.subr.mxu0 %v9241_v4 }
 0xf42   :  { %4831 = vmatpush1.msra.mxu1 %v9238_v18  ;;  %4762 = vmatpush1.msra.mxu0 %v9247_v7 }
 0xf43   :  { %4832 = vmatprep.subr.mxu1 %v9244_v59  ;;  %4763 = vmatprep.subr.mxu0 %v9253_v5 }
 0xf44   :  { %4833 = vmatpush1.msra.mxu1 %v9250_v46  ;;  %4764 = vmatpush1.msra.mxu0 %v9259_v49 }
 0xf45   :  { %4834 = vmatprep.subr.mxu1 %v9256_v15  ;;  %4765 = vmatprep.subr.mxu0 %v9265_v41  ;;  %v10883_v41 = vld [vmem:[#allocation62_spill] sm:$0xff] }
 0xf46   :  { %4835 = vmatpush1.msra.mxu1 %v9262_v28  ;;  %4766 = vmatpush1.msra.mxu0 %v9271_v63 }
 0xf47   :  { %4836 = vmatprep.subr.mxu1 %v9268_v22  ;;  %4767 = vmatprep.subr.mxu0 %v9277_v3 }
 0xf48   :  { %4837 = vmatpush1.msra.mxu1 %v9274_v34  ;;  %4768 = vmatpush1.msra.mxu0 %v9283_v21  ;;  %v9318_v21 = vld [vmem:[#allocation11 + $0x18] sm:$0xff] }
 0xf49   :  { %4838 = vmatprep.subr.mxu1 %v9280_v26  ;;  %4769 = vmatprep.subr.mxu0 %v9289_v44  ;;  %v9310_v44 = vld [vmem:[#allocation11 + $0x30] sm:$0xff]  ;;  %10878 = vst [vmem:[#allocation34_spill] sm:$0xff] %v9318_v21 }
 0xf4a   :  { %4839 = vmatpush1.msra.mxu1 %v9286_v14  ;;  %4770 = vmatpush1.msra.mxu0 %v9295_v53  ;;  %v9307_v14 = vld [vmem:[#allocation11 + $0x20] sm:$0xff]  ;;  %10875 = vst [vmem:[#allocation22_spill] sm:$0xff] %v9310_v44 }
 0xf4b   :  { %4840 = vmatprep.subr.mxu1 %v9292_v29  ;;  %4771 = vmatprep.subr.mxu0 %v9301_v16  ;;  %10874 = vst [vmem:[#allocation35_spill] sm:$0xff] %v9307_v14  ;;  %v9313_v29 = vld [vmem:[#allocation11 + $0x8] sm:$0xff]  ;;  %v9316_v53 = vld [vmem:[#allocation11] sm:$0xff]  ;;  %v9322_v16 = vld [vmem:[#allocation11 + $0x10] sm:$0xff] }
 0xf4c   :  { %4841 = vmatpush1.msra.mxu1 %v9298_v30  ;;  %4772 = vmatpush1.msra.mxu0 %v9307_v14  ;;  %10876 = vst [vmem:[#allocation23_spill] sm:$0xff] %v9313_v29  ;;  %10877 = vst [vmem:[#allocation21_spill] sm:$0xff] %v9316_v53  ;;  %v10881_v30 = vld [vmem:[#allocation63_spill] sm:$0xff] }
 0xf4d   :  { %4842 = vmatprep.subr.mxu1 %v9304_v27  ;;  %4773 = vmatprep.subr.mxu0 %v9313_v29  ;;  %10879 = vst [vmem:[#allocation61_spill] sm:$0xff] %v9322_v16  ;;  %v2240_v26 = vadd.f32 %v10881_v30, %v10742_v33  ;;  %v10888_v30 = vld [vmem:[#allocation43_spill] sm:$0xff] }
 0xf4e   :  { %4843 = vmatpush1.msra.mxu1 %v9310_v44  ;;  %4774 = vmatpush1.msra.mxu0 %v9316_v53  ;;  %v10880_v44 = vld [vmem:[#allocation60_spill] sm:$0xff] }
 0xf4f   :  { %4844 = vmatprep.subr.mxu1 %v9318_v21  ;;  %4917 = vmatprep.subr.mxu0 %v9134_v32  ;;  %v2238_v14 = vadd.f32 %v10880_v44, %v10843_v50  ;;  %v10882_v32 = vld [vmem:[#allocation64_spill] sm:$0xff]  ;;  %v2351_v50 = vadd.f32 %v10883_v41, %v8511_v12 }
 0xf50   :  { %4845 = vmatpush1.msra.mxu1 %v9322_v16  ;;  %v2353_v22 = vadd.f32 %v10882_v32, %v10744_v10  ;;  %v10886_v41 = vld [vmem:[#allocation44_spill] sm:$0xff] }
 0xf51   :  { %4988 = vmatprep.subr.mxu1 %v9136_v35 }
 0xfb8   :  { %v4218_v27 = vpop.f32.mrf.mxu0  ;;  %v4289_v63 = vpop.f32.mrf.mxu1 }
 0xfb9   :  { %v4294_v29 = vadd.f32 %v4218_v27, %v2238_v14  ;;  %v4296_v44 = vadd.f32 %v4289_v63, %v2351_v50  ;;  %v10887_v63 = vld [vmem:[#allocation45_spill] sm:$0xff]  ;;  %v10890_v27 = vld [vmem:[#allocation18_spill] sm:$0xff] }
 0xfba   :  { %v4220_v3 = vpop.f32.mrf.mxu0  ;;  %v4291_v16 = vpop.f32.mrf.mxu1  ;;  %v10891_v50 = vld [vmem:[#allocation46_spill] sm:$0xff] }
 0xfbb   :  { %v6412_v21 = vmul.f32 -1.442695, %v4294_v29  ;;  %v4295_v34 = vadd.f32 %v4220_v3, %v2240_v26  ;;  %v4297_v35 = vadd.f32 %v4291_v16, %v2353_v22  ;;  %v10889_v16 = vld [vmem:[#allocation25_spill] sm:$0xff] }
 0xfbd   :  { %6795 = vpow2.f32 %v6412_v21  ;;  %v6413_v53 = vmul.f32 -1.442695, %v4295_v34  ;;  %v6414_v28 = vmul.f32 -1.442695, %v4297_v35 }
 0xfbf   :  { %6797 = vpow2.f32 %v6413_v53 }
 0xfc0   :  { %6799 = vtanh.f32 %v4296_v44  ;;  %v10892_v44 = vld [vmem:[#allocation48_spill] sm:$0xff] }
 0xfc1   :  { %6801 = vpow2.f32 %v6414_v28  ;;  %v10885_v28 = vld [vmem:[#allocation42_spill] sm:$0xff] }
 0xfca   :  { %v6796_v49 = vpop.eup %6795 }
 0xfcb   :  { %v4301_v33 = vadd.f32 1.0, %v6796_v49 }
 0xfcc   :  { %v6798_v14 = vpop.eup %6797 }
 0xfcd   :  { %6803 = vrcp.f32 %v4301_v33  ;;  %v4307_v3 = vadd.f32 1.0, %v6798_v14  ;;  %v6800_v34 = vpop.eup %6799  ;;  %v10893_v33 = vld [vmem:[#allocation49_spill] sm:$0xff]  ;;  %v10894_v14 = vld [vmem:[#allocation47_spill] sm:$0xff] }
 0xfce   :  { %v6802_v26 = vpop.eup %6801 }
 0xfcf   :  { %6805 = vrcp.f32 %v4307_v3  ;;  %v4314_v10 = vadd.f32 1.0, %v6802_v26  ;;  %v10895_v3 = vld [vmem:[#allocation15_spill] sm:$0xff]  ;;  %v10897_v26 = vld [vmem:[#allocation29_spill] sm:$0xff] }
 0xfd1   :  { %6807 = vrcp.f32 %v4314_v10  ;;  %v10901_v10 = vld [vmem:[#allocation22_spill] sm:$0xff] }
 0xfda   :  { %v6804_v21 = vpop.eup %6803 }
 0xfdb   :  { %v4318_v29 = vmul.f32 %v6804_v21, %v6800_v34  ;;  %v10896_v34 = vld [vmem:[#allocation20_spill] sm:$0xff] }
 0xfdc   :  { %v6806_v53 = vpop.eup %6805  ;;  %v10898_v21 = vld [vmem:[#allocation16_spill] sm:$0xff] }
 0xfdd   :  { %v4317_v32 = vmul.f32 %v6806_v53, %v9097_v56  ;;  %v10884_v56 = vld [vmem:[#allocation33_spill] sm:$0xff]  ;;  %v10900_v53 = vld [vmem:[#allocation35_spill] sm:$0xff] }
 0xfde   :  { %v6808_v12 = vpop.eup %6807 }
 0xfdf   :  { %v4319_v22 = vadd.f32 %v4318_v29, %v4317_v32  ;;  %v10899_v29 = vld [vmem:[#allocation30_spill] sm:$0xff]  ;;  %v10902_v32 = vld [vmem:[#allocation23_spill] sm:$0xff] }
 0xfe1   :  { %6809 = vtanh.f32 %v4319_v22  ;;  %v10903_v22 = vld [vmem:[#allocation34_spill] sm:$0xff] }
 0xfee   :  { %v6810_v35 = vpop.eup %6809 }
 0xfef   :  { %v4321_v49 = vmul.f32 %v6810_v35, %v6808_v12  ;;  %v10904_v12 = vld [vmem:[#allocation21_spill] sm:$0xff] }
 0xff0   :  { %v10905_v35 = vld [vmem:[#allocation61_spill] sm:$0xff] }
 0xff1   :  { %4524 = vmatmul.mubr.f32.gmra.mxu0 %v4321_v49  ;;  %4637 = vmatmul.mubr.f32.gmra.mxu1 %v4321_v49  ;;  %v10906_v49 = vld [vmem:[#allocation27_spill] sm:$0xff] }
 0xff2   :  { %4807 = vmatprep.mubr.f32.mxu0 %v10841_v55  ;;  %4878 = vmatprep.mubr.f32.mxu1 %v10841_v55 }
 0xff5   :  { %4808 = vmatmul.mubr.f32.vlgmr.msra.gmra.mxu0 %v10841_v55  ;;  %4879 = vmatmul.mubr.f32.vlgmr.msra.gmra.mxu1 %v10841_v55 }
 0xff6   :  { %4918 = vmatpush1.msra.mxu0 %v9139_v37  ;;  %4989 = vmatpush1.msra.mxu1 %v9142_v31 }
 0xff7   :  { %4919 = vmatprep.subr.mxu0 %v9145_v40  ;;  %4990 = vmatprep.subr.mxu1 %v9148_v36 }
 0xff8   :  { %4920 = vmatpush1.msra.mxu0 %v9151_v42  ;;  %4991 = vmatpush1.msra.mxu1 %v9154_v38 }
 0xff9   :  { %4921 = vmatprep.subr.mxu0 %v9157_v54  ;;  %4992 = vmatprep.subr.mxu1 %v9160_v0 }
 0xffa   :  { %4922 = vmatpush1.msra.mxu0 %v9163_v9  ;;  %4993 = vmatpush1.msra.mxu1 %v9166_v1 }
 0xffb   :  { %4923 = vmatprep.subr.mxu0 %v9169_v25  ;;  %4994 = vmatprep.subr.mxu1 %v9172_v8 }
 0xffc   :  { %4924 = vmatpush1.msra.mxu0 %v9175_v13  ;;  %4995 = vmatpush1.msra.mxu1 %v9178_v2 }
 0xffd   :  { %4925 = vmatprep.subr.mxu0 %v9181_v58  ;;  %4996 = vmatprep.subr.mxu1 %v9184_v11 }
 0xffe   :  { %4926 = vmatpush1.msra.mxu0 %v9187_v48  ;;  %4997 = vmatpush1.msra.mxu1 %v9190_v61 }
 0xfff   :  { %4927 = vmatprep.subr.mxu0 %v9193_v62  ;;  %4998 = vmatprep.subr.mxu1 %v9196_v52 }
0x1000   :  { %4928 = vmatpush1.msra.mxu0 %v9199_v23  ;;  %4999 = vmatpush1.msra.mxu1 %v9202_v39 }
0x1001   :  { %4929 = vmatprep.subr.mxu0 %v9205_v43  ;;  %5000 = vmatprep.subr.mxu1 %v9208_v45 }
0x1002   :  { %4930 = vmatpush1.msra.mxu0 %v9211_v47  ;;  %5001 = vmatpush1.msra.mxu1 %v9214_v51 }
0x1003   :  { %4931 = vmatprep.subr.mxu0 %v9217_v24  ;;  %5002 = vmatprep.subr.mxu1 %v9220_v60 }
0x1004   :  { %4932 = vmatpush1.msra.mxu0 %v9223_v19  ;;  %5003 = vmatpush1.msra.mxu1 %v9226_v6 }
0x1005   :  { %4933 = vmatprep.subr.mxu0 %v9229_v57  ;;  %5004 = vmatprep.subr.mxu1 %v9232_v20 }
0x1006   :  { %4934 = vmatpush1.msra.mxu0 %v9235_v17  ;;  %5005 = vmatpush1.msra.mxu1 %v9238_v18 }
0x1007   :  { %4935 = vmatprep.subr.mxu0 %v9241_v4  ;;  %5006 = vmatprep.subr.mxu1 %v9244_v59 }
0x1008   :  { %4936 = vmatpush1.msra.mxu0 %v9247_v7  ;;  %5007 = vmatpush1.msra.mxu1 %v9250_v46 }
0x1009   :  { %4937 = vmatprep.subr.mxu0 %v9253_v5  ;;  %5008 = vmatprep.subr.mxu1 %v9256_v15 }
0x100a   :  { %4938 = vmatpush1.msra.mxu0 %v10884_v56  ;;  %5009 = vmatpush1.msra.mxu1 %v10885_v28 }
0x100b   :  { %4939 = vmatprep.subr.mxu0 %v10886_v41  ;;  %5010 = vmatprep.subr.mxu1 %v10887_v63 }
0x100c   :  { %4940 = vmatpush1.msra.mxu0 %v10888_v30  ;;  %5011 = vmatpush1.msra.mxu1 %v10889_v16 }
0x100d   :  { %4941 = vmatprep.subr.mxu0 %v10890_v27  ;;  %5012 = vmatprep.subr.mxu1 %v10891_v50 }
0x100e   :  { %4942 = vmatpush1.msra.mxu0 %v10892_v44  ;;  %5013 = vmatpush1.msra.mxu1 %v10893_v33 }
0x100f   :  { %4943 = vmatprep.subr.mxu0 %v10894_v14  ;;  %5014 = vmatprep.subr.mxu1 %v10895_v3 }
0x1010   :  { %4944 = vmatpush1.msra.mxu0 %v10896_v34  ;;  %5015 = vmatpush1.msra.mxu1 %v10897_v26 }
0x1011   :  { %4945 = vmatprep.subr.mxu0 %v10898_v21  ;;  %5016 = vmatprep.subr.mxu1 %v10899_v29  ;;  %v10907_v21 = vld [vmem:[#allocation19_spill] sm:$0xff]  ;;  %v4483_v29 = vpop.f32.mrf.mxu0 }
0x1012   :  { %4946 = vmatpush1.msra.mxu0 %v10900_v53  ;;  %5017 = vmatpush1.msra.mxu1 %v10901_v10  ;;  %v4596_v53 = vpop.f32.mrf.mxu1 }
0x1013   :  { %4947 = vmatprep.subr.mxu0 %v10902_v32  ;;  %5018 = vmatprep.subr.mxu1 %v10903_v22  ;;  %v4485_v26 = vpop.f32.mrf.mxu0 }
0x1014   :  { %4948 = vmatpush1.msra.mxu0 %v10904_v12  ;;  %4981 = vmatprep.mubr.f32.mxu0 %v10841_v55  ;;  %v4598_v10 = vpop.f32.mrf.mxu1 }
0x1015   :  { %5019 = vmatpush1.msra.mxu1 %v10905_v35  ;;  %5052 = vmatprep.mubr.f32.mxu1 %v10841_v55  ;;  %v9407_v34 = vpop.f32.mrf.mxu0 }
0x1016   :  { %5091 = vmatprep.subr.mxu0 %v10906_v49  ;;  %5162 = vmatprep.subr.mxu1 %v10907_v21  ;;  %10908 = vst [vmem:[#allocation36_spill] sm:$0xff] %v9407_v34  ;;  %v9409_v32 = vpop.f32.mrf.mxu1 }
0x1017   :  { %10909 = vst [vmem:[#allocation65_spill] sm:$0xff] %v9409_v32  ;;  %v9411_v22 = vpop.f32.mrf.mxu0 }
0x1018   :  { %10910 = vst [vmem:[#allocation31_spill] sm:$0xff] %v9411_v22  ;;  %v9413_v12 = vpop.f32.mrf.mxu1 }
0x1019   :  { %10911 = vst [vmem:[#allocation17_spill] sm:$0xff] %v9413_v12  ;;  %v9415_v3 = vpop.f32.mrf.mxu0 }
0x101a   :  { %10912 = vst [vmem:[#allocation37_spill] sm:$0xff] %v9415_v3  ;;  %v9417_v35 = vpop.f32.mrf.mxu1 }
0x101b   :  { %10913 = vst [vmem:[#allocation40_spill] sm:$0xff] %v9417_v35  ;;  %v9419_v55 = vpop.f32.mrf.mxu0 }
0x101c   :  { %10914 = vst [vmem:[#allocation38_spill] sm:$0xff] %v9419_v55  ;;  %v9421_v49 = vpop.f32.mrf.mxu1 }
0x101d   :  { %10915 = vst [vmem:[#allocation39_spill] sm:$0xff] %v9421_v49  ;;  %v9423_v21 = vpop.f32.mrf.mxu0 }
0x101e   :  { %10916 = vst [vmem:[#allocation41_spill] sm:$0xff] %v9423_v21  ;;  %v9425_v14 = vpop.f32.mrf.mxu1 }
0x101f   :  { %10917 = vst [vmem:[#allocation32_spill] sm:$0xff] %v9425_v14  ;;  %v9427_v33 = vpop.f32.mrf.mxu0 }
0x1020   :  { %10918 = vst [vmem:[#allocation58_spill] sm:$0xff] %v9427_v33  ;;  %v9429_v34 = vpop.f32.mrf.mxu1 }
0x1021   :  { %10919 = vst [vmem:[#allocation50_spill] sm:$0xff] %v9429_v34  ;;  %v9431_v32 = vpop.f32.mrf.mxu0 }
0x1022   :  { %10920 = vst [vmem:[#allocation52_spill] sm:$0xff] %v9431_v32  ;;  %v9433_v22 = vpop.f32.mrf.mxu1 }
0x1023   :  { %10921 = vst [vmem:[#allocation54_spill] sm:$0xff] %v9433_v22  ;;  %v9435_v12 = vpop.f32.mrf.mxu0  ;;  %v4395_v22 = vld [vmem:[%s10238_s7] sm:$0xf] }
0x1024   :  { %10922 = vst [vmem:[#allocation51_spill] sm:$0xff] %v9435_v12  ;;  %v9437_v3 = vpop.f32.mrf.mxu1  ;;  %v10931_v12 = vld [vmem:[#allocation53_spill] sm:$0xff] }
0x1025   :  { %10923 = vst [vmem:[#allocation55_spill] sm:$0xff] %v9437_v3  ;;  %v9439_v35 = vpop.f32.mrf.mxu0  ;;  %v10932_v3 = vsub.s32 0, %v10931_v12 }
0x1026   :  { %10924 = vst [vmem:[#allocation57_spill] sm:$0xff] %v9439_v35  ;;  %v9441_v55 = vpop.f32.mrf.mxu1 }
0x1027   :  { %10925 = vst [vmem:[#allocation59_spill] sm:$0xff] %v9441_v55  ;;  %v9443_v49 = vpop.f32.mrf.mxu0  ;;  %v9458_v34 = vrot.slane %v4395_v22, %v10932_v3 }
0x1028   :  { %10926 = vst [vmem:[#allocation56_spill] sm:$0xff] %v9443_v49  ;;  %v9445_v21 = vpop.f32.mrf.mxu1 }
0x1029   :  { %10927 = vst [vmem:[#allocation66_spill] sm:$0xff] %v9445_v21  ;;  %v9447_v14 = vpop.f32.mrf.mxu0  ;;  %10933 = vst [vmem:[#allocation60_spill] sm:$0xff] %v9458_v34  ;;  %v10936_v21 = vsub.s32 1, %v10931_v12  ;;  %v4484_v44 = vadd.f32 %v4483_v29, %v9458_v34 }
0x102a   :  { %10928 = vst [vmem:[#allocation24_spill] sm:$0xff] %v9447_v14  ;;  %v9449_v33 = vpop.f32.mrf.mxu1 }
0x102b   :  { %10929 = vst [vmem:[#allocation28_spill] sm:$0xff] %v9449_v33  ;;  %v9454_v32 = vpop.f32.mrf.mxu0  ;;  %v9466_v49 = vrot.slane %v4395_v22, %v10936_v21  ;;  %v10940_v21 = vsub.s32 3, %v10931_v12 }
0x102c   :  { %10930 = vst [vmem:[#allocation26_spill] sm:$0xff] %v9454_v32  ;;  %v9460_v35 = vpop.f32.mrf.mxu1 }
0x102d   :  { %10934 = vst [vmem:[#allocation63_spill] sm:$0xff] %v9460_v35  ;;  %v4486_v32 = vadd.f32 %v4485_v26, %v9466_v49  ;;  %v9478_v41 = vrot.slane %v4395_v22, %v10940_v21 }
0x102f   :  { %10941 = vst [vmem:[#allocation67_spill] sm:$0xff] %v9478_v41  ;;  %v4599_v29 = vadd.f32 %v4598_v10, %v9478_v41 }
0x10b1   :  { %v9462_v55 = vpop.f32.mrf.mxu0  ;;  %v9468_v14 = vpop.f32.mrf.mxu1 }
0x10b2   :  { %10935 = vst [vmem:[#allocation64_spill] sm:$0xff] %v9462_v55  ;;  %10937 = vst [vmem:[#allocation62_spill] sm:$0xff] %v9468_v14 }
0x10b3   :  { %v9470_v33 = vpop.f32.mrf.mxu0  ;;  %v9474_v27 = vpop.f32.mrf.mxu1 }
0x10b4   :  { %10938 = vst [vmem:[#allocation33_spill] sm:$0xff] %v9470_v33  ;;  %10939 = vst [vmem:[#allocation53_spill] sm:$0xff] %v9474_v27  ;;  %v10942_v33 = vsub.s32 2, %v10931_v12 }
0x10b5   :  { %v4809_v50 = vpop.f32.mrf.mxu0  ;;  %v4880_v55 = vpop.f32.mrf.mxu1 }
0x10b6   :  { %v4885_v3 = vadd.f32 %v4809_v50, %v4484_v44  ;;  %v9483_v26 = vrot.slane %v4395_v22, %v10942_v33 }
0x10b7   :  { %v4811_v16 = vpop.f32.mrf.mxu0  ;;  %v4882_v14 = vpop.f32.mrf.mxu1 }
0x10b8   :  { %v6415_v35 = vmul.f32 -1.442695, %v4885_v3  ;;  %v4886_v30 = vadd.f32 %v4811_v16, %v4486_v32  ;;  %v4888_v27 = vadd.f32 %v4882_v14, %v4599_v29  ;;  %v4597_v50 = vadd.f32 %v4596_v53, %v9483_v26  ;;  %v10944_v29 = vld [vmem:[#allocation45_spill] sm:$0xff] }
0x10ba   :  { %6811 = vpow2.f32 %v6415_v35  ;;  %v6416_v63 = vmul.f32 -1.442695, %v4886_v30  ;;  %v6417_v44 = vmul.f32 -1.442695, %v4888_v27  ;;  %v4887_v32 = vadd.f32 %v4880_v55, %v4597_v50  ;;  %v10945_v50 = vld [vmem:[#allocation43_spill] sm:$0xff] }
0x10bc   :  { %6813 = vpow2.f32 %v6416_v63 }
0x10bd   :  { %6815 = vpow2.f32 %v6417_v44  ;;  %v10946_v44 = vld [vmem:[#allocation25_spill] sm:$0xff] }
0x10c7   :  { %v6812_v16 = vpop.eup %6811 }
0x10c8   :  { %v4892_v35 = vadd.f32 1.0, %v6812_v16  ;;  %v10947_v16 = vld [vmem:[#allocation18_spill] sm:$0xff] }
0x10c9   :  { %v6814_v30 = vpop.eup %6813 }
0x10ca   :  { %6817 = vrcp.f32 %v4892_v35  ;;  %v4898_v3 = vadd.f32 1.0, %v6814_v30  ;;  %v6816_v63 = vpop.eup %6815  ;;  %v10949_v35 = vld [vmem:[#allocation48_spill] sm:$0xff]  ;;  %v10950_v30 = vld [vmem:[#allocation49_spill] sm:$0xff] }
0x10cb   :  { %6819 = vtanh.f32 %v4887_v32  ;;  %v4905_v12 = vadd.f32 1.0, %v6816_v63  ;;  %v10948_v32 = vld [vmem:[#allocation46_spill] sm:$0xff]  ;;  %v10952_v63 = vld [vmem:[#allocation15_spill] sm:$0xff] }
0x10cc   :  { %6821 = vrcp.f32 %v4898_v3  ;;  %v10951_v3 = vld [vmem:[#allocation47_spill] sm:$0xff] }
0x10cd   :  { %6823 = vrcp.f32 %v4905_v12  ;;  %v10955_v12 = vld [vmem:[#allocation16_spill] sm:$0xff] }
0x10d7   :  { %v6818_v21 = vpop.eup %6817 }
0x10d8   :  { %v6820_v10 = vpop.eup %6819 }
0x10d9   :  { %v6822_v41 = vpop.eup %6821  ;;  %v4909_v22 = vmul.f32 %v6820_v10, %v6818_v21  ;;  %v10953_v21 = vld [vmem:[#allocation20_spill] sm:$0xff]  ;;  %v10954_v10 = vld [vmem:[#allocation29_spill] sm:$0xff] }
0x10da   :  { %v4908_v33 = vmul.f32 0.0, %v6822_v41  ;;  %v6824_v55 = vpop.eup %6823  ;;  %v10943_v41 = vld [vmem:[#allocation44_spill] sm:$0xff] }
0x10dc   :  { %v9486_v14 = vadd.f32 %v4909_v22, %v4908_v33  ;;  %v10956_v33 = vld [vmem:[#allocation30_spill] sm:$0xff]  ;;  %v10957_v22 = vld [vmem:[#allocation35_spill] sm:$0xff] }
0x10de   :  { %6825 = vtanh.f32 %v9486_v14 }
0x10eb   :  { %v6826_v27 = vpop.eup %6825 }
0x10ec   :  { %v4912_v53 = vmul.f32 %v6826_v27, %v6824_v55  ;;  %v10958_v55 = vld [vmem:[#allocation22_spill] sm:$0xff]  ;;  %v10959_v27 = vld [vmem:[#allocation23_spill] sm:$0xff] }
0x10ee   :  { %4982 = vmatmul.mubr.f32.vlgmr.msra.gmra.mxu0 %v4912_v53  ;;  %5053 = vmatmul.mubr.f32.vlgmr.msra.gmra.mxu1 %v4912_v53  ;;  %v10960_v53 = vld [vmem:[#allocation34_spill] sm:$0xff] }
0x10ef   :  { %5092 = vmatpush1.msra.mxu0 %v9139_v37  ;;  %5163 = vmatpush1.msra.mxu1 %v9142_v31 }
0x10f0   :  { %5093 = vmatprep.subr.mxu0 %v9145_v40  ;;  %5164 = vmatprep.subr.mxu1 %v9148_v36 }
0x10f1   :  { %5094 = vmatpush1.msra.mxu0 %v9151_v42  ;;  %5165 = vmatpush1.msra.mxu1 %v9154_v38 }
0x10f2   :  { %5095 = vmatprep.subr.mxu0 %v9157_v54  ;;  %5166 = vmatprep.subr.mxu1 %v9160_v0 }
0x10f3   :  { %5096 = vmatpush1.msra.mxu0 %v9163_v9  ;;  %5167 = vmatpush1.msra.mxu1 %v9166_v1 }
0x10f4   :  { %5097 = vmatprep.subr.mxu0 %v9169_v25  ;;  %5168 = vmatprep.subr.mxu1 %v9172_v8 }
0x10f5   :  { %5098 = vmatpush1.msra.mxu0 %v9175_v13  ;;  %5169 = vmatpush1.msra.mxu1 %v9178_v2 }
0x10f6   :  { %5099 = vmatprep.subr.mxu0 %v9181_v58  ;;  %5170 = vmatprep.subr.mxu1 %v9184_v11 }
0x10f7   :  { %5100 = vmatpush1.msra.mxu0 %v9187_v48  ;;  %5171 = vmatpush1.msra.mxu1 %v9190_v61 }
0x10f8   :  { %5101 = vmatprep.subr.mxu0 %v9193_v62  ;;  %5172 = vmatprep.subr.mxu1 %v9196_v52 }
0x10f9   :  { %5102 = vmatpush1.msra.mxu0 %v9199_v23  ;;  %5173 = vmatpush1.msra.mxu1 %v9202_v39 }
0x10fa   :  { %5103 = vmatprep.subr.mxu0 %v9205_v43  ;;  %5174 = vmatprep.subr.mxu1 %v9208_v45 }
0x10fb   :  { %5104 = vmatpush1.msra.mxu0 %v9211_v47  ;;  %5175 = vmatpush1.msra.mxu1 %v9214_v51 }
0x10fc   :  { %5105 = vmatprep.subr.mxu0 %v9217_v24  ;;  %5176 = vmatprep.subr.mxu1 %v9220_v60 }
0x10fd   :  { %5106 = vmatpush1.msra.mxu0 %v9223_v19  ;;  %5177 = vmatpush1.msra.mxu1 %v9226_v6 }
0x10fe   :  { %5107 = vmatprep.subr.mxu0 %v9229_v57  ;;  %5178 = vmatprep.subr.mxu1 %v9232_v20 }
0x10ff   :  { %5108 = vmatpush1.msra.mxu0 %v9235_v17  ;;  %5179 = vmatpush1.msra.mxu1 %v9238_v18 }
0x1100   :  { %5109 = vmatprep.subr.mxu0 %v9241_v4  ;;  %5180 = vmatprep.subr.mxu1 %v9244_v59 }
0x1101   :  { %5110 = vmatpush1.msra.mxu0 %v9247_v7  ;;  %5181 = vmatpush1.msra.mxu1 %v9250_v46 }
0x1102   :  { %5111 = vmatprep.subr.mxu0 %v9253_v5  ;;  %5182 = vmatprep.subr.mxu1 %v9256_v15 }
0x1103   :  { %5112 = vmatpush1.msra.mxu0 %v10884_v56  ;;  %5183 = vmatpush1.msra.mxu1 %v10885_v28 }
0x1104   :  { %5113 = vmatprep.subr.mxu0 %v10943_v41  ;;  %5184 = vmatprep.subr.mxu1 %v10944_v29  ;;  %v10970_v29 = vld [vmem:[#allocation65_spill] sm:$0xff] }
0x1105   :  { %5114 = vmatpush1.msra.mxu0 %v10945_v50  ;;  %5185 = vmatpush1.msra.mxu1 %v10946_v44  ;;  %v10968_v44 = vld [vmem:[#allocation67_spill] sm:$0xff] }
0x1106   :  { %5115 = vmatprep.subr.mxu0 %v10947_v16  ;;  %5186 = vmatprep.subr.mxu1 %v10948_v32 }
0x1107   :  { %5116 = vmatpush1.msra.mxu0 %v10949_v35  ;;  %5187 = vmatpush1.msra.mxu1 %v10950_v30  ;;  %v10961_v30 = vld [vmem:[#allocation21_spill] sm:$0xff] }
0x1108   :  { %5117 = vmatprep.subr.mxu0 %v10951_v3  ;;  %5188 = vmatprep.subr.mxu1 %v10952_v63  ;;  %v10962_v3 = vmov 0.0   ;;  %v10963_v63 = vld [vmem:[#allocation61_spill] sm:$0xff] }
0x1109   :  { %5118 = vmatpush1.msra.mxu0 %v10953_v21  ;;  %5189 = vmatpush1.msra.mxu1 %v10954_v10  ;;  %v10964_v10 = vld [vmem:[#allocation27_spill] sm:$0xff] }
0x110a   :  { %5119 = vmatprep.subr.mxu0 %v10955_v12  ;;  %5190 = vmatprep.subr.mxu1 %v10956_v33  ;;  %v10965_v12 = vld [vmem:[#allocation19_spill] sm:$0xff] }
0x110b   :  { %5120 = vmatpush1.msra.mxu0 %v10957_v22  ;;  %5191 = vmatpush1.msra.mxu1 %v10958_v55  ;;  %v10966_v22 = vld [vmem:[#allocation36_spill] sm:$0xff] }
0x110c   :  { %5121 = vmatprep.subr.mxu0 %v10959_v27  ;;  %5192 = vmatprep.subr.mxu1 %v10960_v53  ;;  %v4490_v33 = vadd.f32 %v10966_v22, %v9458_v34  ;;  %v10967_v27 = vld [vmem:[#allocation31_spill] sm:$0xff]  ;;  %v4603_v22 = vadd.f32 %v10970_v29, %v9483_v26 }
0x110d   :  { %5122 = vmatpush1.msra.mxu0 %v10961_v30  ;;  %5155 = vmatprep.mubr.f32.mxu0 %v10962_v3  ;;  %v4492_v21 = vadd.f32 %v10967_v27, %v9466_v49 }
0x110e   :  { %5193 = vmatpush1.msra.mxu1 %v10963_v63  ;;  %5226 = vmatprep.mubr.f32.mxu1 %v10962_v3 }
0x110f   :  { %5265 = vmatprep.subr.mxu0 %v10964_v10  ;;  %5336 = vmatprep.subr.mxu1 %v10965_v12  ;;  %v10969_v10 = vld [vmem:[#allocation17_spill] sm:$0xff] }
0x1110   :  { %v4605_v50 = vadd.f32 %v10969_v10, %v10968_v44 }
0x11ae   :  { %v4983_v55 = vpop.f32.mrf.mxu0  ;;  %v5054_v16 = vpop.f32.mrf.mxu1 }
0x11af   :  { %v5059_v53 = vadd.f32 %v4983_v55, %v4490_v33  ;;  %v5061_v34 = vadd.f32 %v5054_v16, %v4603_v22  ;;  %v10988_v16 = vld [vmem:[#allocation23_spill] sm:$0xff]  ;;  %v10991_v22 = vmov 0.0  }
0x11b0   :  { %v4985_v35 = vpop.f32.mrf.mxu0  ;;  %v5056_v3 = vpop.f32.mrf.mxu1 }
0x11b1   :  { %v6418_v30 = vmul.f32 -1.442695, %v5059_v53  ;;  %v5060_v32 = vadd.f32 %v4985_v35, %v4492_v21  ;;  %v5062_v12 = vadd.f32 %v5056_v3, %v4605_v50  ;;  %v10990_v53 = vld [vmem:[#allocation21_spill] sm:$0xff] }
0x11b3   :  { %6827 = vpow2.f32 %v6418_v30  ;;  %v6419_v63 = vmul.f32 -1.442695, %v5060_v32  ;;  %v6420_v41 = vmul.f32 -1.442695, %v5062_v12  ;;  %v10989_v12 = vld [vmem:[#allocation34_spill] sm:$0xff] }
0x11b5   :  { %6829 = vpow2.f32 %v6419_v63 }
0x11b6   :  { %6831 = vtanh.f32 %v5061_v34 }
0x11b7   :  { %6833 = vpow2.f32 %v6420_v41  ;;  %v10987_v41 = vld [vmem:[#allocation22_spill] sm:$0xff] }
0x11c0   :  { %v6828_v28 = vpop.eup %6827 }
0x11c1   :  { %v5066_v27 = vadd.f32 1.0, %v6828_v28 }
0x11c2   :  { %v6830_v33 = vpop.eup %6829 }
0x11c3   :  { %6835 = vrcp.f32 %v5066_v27  ;;  %v5072_v35 = vadd.f32 1.0, %v6830_v33  ;;  %v6832_v32 = vpop.eup %6831  ;;  %v10992_v27 = vld [vmem:[#allocation61_spill] sm:$0xff]  ;;  %v10993_v33 = vld [vmem:[#allocation27_spill] sm:$0xff] }
0x11c4   :  { %v6834_v30 = vpop.eup %6833 }
0x11c5   :  { %6837 = vrcp.f32 %v5072_v35  ;;  %v5079_v10 = vadd.f32 1.0, %v6834_v30  ;;  %v10994_v35 = vld [vmem:[#allocation19_spill] sm:$0xff]  ;;  %v10996_v30 = vld [vmem:[#allocation37_spill] sm:$0xff] }
0x11c7   :  { %6839 = vrcp.f32 %v5079_v10 }
0x11d0   :  { %v6836_v63 = vpop.eup %6835 }
0x11d1   :  { %v5083_v21 = vmul.f32 %v6836_v63, %v6832_v32  ;;  %v10995_v32 = vld [vmem:[#allocation60_spill] sm:$0xff] }
0x11d2   :  { %v6838_v55 = vpop.eup %6837  ;;  %v4496_v63 = vadd.f32 %v10996_v30, %v10995_v32 }
0x11d3   :  { %v5082_v50 = vmul.f32 %v6838_v55, %v9486_v14  ;;  %v10986_v14 = vld [vmem:[#allocation35_spill] sm:$0xff]  ;;  %v10997_v55 = vld [vmem:[#allocation38_spill] sm:$0xff] }
0x11d4   :  { %v6840_v28 = vpop.eup %6839  ;;  %v4498_v10 = vadd.f32 %v10997_v55, %v9466_v49 }
0x11d5   :  { %v9564_v3 = vadd.f32 %v5083_v21, %v5082_v50 }
0x11d7   :  { %6841 = vtanh.f32 %v9564_v3 }
0x11e4   :  { %v6842_v34 = vpop.eup %6841 }
0x11e5   :  { %v5086_v29 = vmul.f32 %v6842_v34, %v6840_v28 }
0x11e7   :  { %5156 = vmatmul.mubr.f32.vlgmr.msra.gmra.mxu0 %v5086_v29  ;;  %5227 = vmatmul.mubr.f32.vlgmr.msra.gmra.mxu1 %v5086_v29 }
0x11e8   :  { %5266 = vmatpush1.msra.mxu0 %v9139_v37  ;;  %5337 = vmatpush1.msra.mxu1 %v9142_v31  ;;  %v10971_v37 = vld [vmem:[#allocation42_spill] sm:$0xff]  ;;  %v10972_v31 = vld [vmem:[#allocation44_spill] sm:$0xff] }
0x11e9   :  { %5267 = vmatprep.subr.mxu0 %v9145_v40  ;;  %5338 = vmatprep.subr.mxu1 %v9148_v36  ;;  %v10973_v40 = vld [vmem:[#allocation45_spill] sm:$0xff]  ;;  %v10974_v36 = vld [vmem:[#allocation43_spill] sm:$0xff] }
0x11ea   :  { %5268 = vmatpush1.msra.mxu0 %v9151_v42  ;;  %5339 = vmatpush1.msra.mxu1 %v9154_v38  ;;  %v10975_v42 = vld [vmem:[#allocation25_spill] sm:$0xff]  ;;  %v10976_v38 = vld [vmem:[#allocation18_spill] sm:$0xff] }
0x11eb   :  { %5269 = vmatprep.subr.mxu0 %v9157_v54  ;;  %5340 = vmatprep.subr.mxu1 %v9160_v0  ;;  %v10977_v54 = vld [vmem:[#allocation46_spill] sm:$0xff]  ;;  %v10978_v0 = vld [vmem:[#allocation48_spill] sm:$0xff] }
0x11ec   :  { %5270 = vmatpush1.msra.mxu0 %v9163_v9  ;;  %5341 = vmatpush1.msra.mxu1 %v9166_v1  ;;  %v10979_v9 = vld [vmem:[#allocation49_spill] sm:$0xff]  ;;  %v10980_v1 = vld [vmem:[#allocation47_spill] sm:$0xff] }
0x11ed   :  { %5271 = vmatprep.subr.mxu0 %v9169_v25  ;;  %5342 = vmatprep.subr.mxu1 %v9172_v8  ;;  %v10981_v25 = vld [vmem:[#allocation15_spill] sm:$0xff]  ;;  %v10982_v8 = vld [vmem:[#allocation20_spill] sm:$0xff] }
0x11ee   :  { %5272 = vmatpush1.msra.mxu0 %v9175_v13  ;;  %5343 = vmatpush1.msra.mxu1 %v9178_v2  ;;  %v10983_v13 = vld [vmem:[#allocation29_spill] sm:$0xff]  ;;  %v10984_v2 = vld [vmem:[#allocation16_spill] sm:$0xff] }
0x11ef   :  { %5273 = vmatprep.subr.mxu0 %v9181_v58  ;;  %5344 = vmatprep.subr.mxu1 %v9184_v11  ;;  %v10985_v58 = vld [vmem:[#allocation30_spill] sm:$0xff] }
0x11f0   :  { %5274 = vmatpush1.msra.mxu0 %v9187_v48  ;;  %5345 = vmatpush1.msra.mxu1 %v9190_v61 }
0x11f1   :  { %5275 = vmatprep.subr.mxu0 %v9193_v62  ;;  %5346 = vmatprep.subr.mxu1 %v9196_v52 }
0x11f2   :  { %5276 = vmatpush1.msra.mxu0 %v9199_v23  ;;  %5347 = vmatpush1.msra.mxu1 %v9202_v39 }
0x11f3   :  { %5277 = vmatprep.subr.mxu0 %v9205_v43  ;;  %5348 = vmatprep.subr.mxu1 %v9208_v45 }
0x11f4   :  { %5278 = vmatpush1.msra.mxu0 %v9211_v47  ;;  %5349 = vmatpush1.msra.mxu1 %v9214_v51 }
0x11f5   :  { %5279 = vmatprep.subr.mxu0 %v9217_v24  ;;  %5350 = vmatprep.subr.mxu1 %v9220_v60 }
0x11f6   :  { %5280 = vmatpush1.msra.mxu0 %v9223_v19  ;;  %5351 = vmatpush1.msra.mxu1 %v9226_v6 }
0x11f7   :  { %5281 = vmatprep.subr.mxu0 %v9229_v57  ;;  %5352 = vmatprep.subr.mxu1 %v9232_v20 }
0x11f8   :  { %5282 = vmatpush1.msra.mxu0 %v9235_v17  ;;  %5353 = vmatpush1.msra.mxu1 %v9238_v18 }
0x11f9   :  { %5283 = vmatprep.subr.mxu0 %v9241_v4  ;;  %5354 = vmatprep.subr.mxu1 %v9244_v59 }
0x11fa   :  { %5284 = vmatpush1.msra.mxu0 %v9247_v7  ;;  %5355 = vmatpush1.msra.mxu1 %v9250_v46 }
0x11fb   :  { %5285 = vmatprep.subr.mxu0 %v9253_v5  ;;  %5356 = vmatprep.subr.mxu1 %v9256_v15 }
0x11fc   :  { %5286 = vmatpush1.msra.mxu0 %v10884_v56  ;;  %5357 = vmatpush1.msra.mxu1 %v10971_v37 }
0x11fd   :  { %5287 = vmatprep.subr.mxu0 %v10972_v31  ;;  %5358 = vmatprep.subr.mxu1 %v10973_v40 }
0x11fe   :  { %5288 = vmatpush1.msra.mxu0 %v10974_v36  ;;  %5359 = vmatpush1.msra.mxu1 %v10975_v42 }
0x11ff   :  { %5289 = vmatprep.subr.mxu0 %v10976_v38  ;;  %5360 = vmatprep.subr.mxu1 %v10977_v54 }
0x1200   :  { %5290 = vmatpush1.msra.mxu0 %v10978_v0  ;;  %5361 = vmatpush1.msra.mxu1 %v10979_v9 }
0x1201   :  { %5291 = vmatprep.subr.mxu0 %v10980_v1  ;;  %5362 = vmatprep.subr.mxu1 %v10981_v25 }
0x1202   :  { %5292 = vmatpush1.msra.mxu0 %v10982_v8  ;;  %5363 = vmatpush1.msra.mxu1 %v10983_v13 }
0x1203   :  { %5293 = vmatprep.subr.mxu0 %v10984_v2  ;;  %5364 = vmatprep.subr.mxu1 %v10985_v58 }
0x1204   :  { %5294 = vmatpush1.msra.mxu0 %v10986_v14  ;;  %5365 = vmatpush1.msra.mxu1 %v10987_v41 }
0x1205   :  { %5295 = vmatprep.subr.mxu0 %v10988_v16  ;;  %5366 = vmatprep.subr.mxu1 %v10989_v12  ;;  %v10999_v16 = vld [vmem:[#allocation40_spill] sm:$0xff] }
0x1206   :  { %5296 = vmatpush1.msra.mxu0 %v10990_v53  ;;  %5329 = vmatprep.mubr.f32.mxu0 %v10991_v22  ;;  %v4609_v30 = vadd.f32 %v10999_v16, %v9483_v26 }
0x1207   :  { %5367 = vmatpush1.msra.mxu1 %v10992_v27  ;;  %5400 = vmatprep.mubr.f32.mxu1 %v10991_v22 }
0x1208   :  { %5439 = vmatprep.subr.mxu0 %v10993_v33  ;;  %5510 = vmatprep.subr.mxu1 %v10994_v35  ;;  %v10998_v33 = vld [vmem:[#allocation39_spill] sm:$0xff] }
0x1209   :  { %v4611_v12 = vadd.f32 %v10998_v33, %v10968_v44  ;;  %v9651_v33 = vld [vmem:[#allocation11 + $0x1c8] sm:$0xff] }
0x12a7   :  { %v5157_v21 = vpop.f32.mrf.mxu0  ;;  %v5228_v53 = vpop.f32.mrf.mxu1 }
0x12a8   :  { %v5233_v50 = vadd.f32 %v5157_v21, %v4496_v63  ;;  %v5235_v32 = vadd.f32 %v5228_v53, %v4609_v30  ;;  %v9660_v30 = vld [vmem:[#allocation11 + $0x1d0] sm:$0xff] }
0x12a9   :  { %v5159_v28 = vpop.f32.mrf.mxu0  ;;  %v5230_v22 = vpop.f32.mrf.mxu1 }
0x12aa   :  { %v6421_v34 = vmul.f32 -1.442695, %v5233_v50  ;;  %v5234_v29 = vadd.f32 %v5159_v28, %v4498_v10  ;;  %v5236_v35 = vadd.f32 %v5230_v22, %v4611_v12 }
0x12ac   :  { %6843 = vpow2.f32 %v6421_v34  ;;  %v6422_v27 = vmul.f32 -1.442695, %v5234_v29  ;;  %v6423_v41 = vmul.f32 -1.442695, %v5236_v35  ;;  %v9657_v35 = vld [vmem:[#allocation11 + $0x1c0] sm:$0xff] }
0x12ae   :  { %6845 = vpow2.f32 %v6422_v27 }
0x12af   :  { %6847 = vtanh.f32 %v5235_v32  ;;  %v9648_v32 = vld [vmem:[#allocation11 + $0x1f0] sm:$0xff] }
0x12b0   :  { %6849 = vpow2.f32 %v6423_v41  ;;  %v9645_v41 = vld [vmem:[#allocation11 + $0x1e0] sm:$0xff] }
0x12b9   :  { %v6844_v14 = vpop.eup %6843 }
0x12ba   :  { %v5240_v55 = vadd.f32 1.0, %v6844_v14 }
0x12bb   :  { %v6846_v63 = vpop.eup %6845 }
0x12bc   :  { %6851 = vrcp.f32 %v5240_v55  ;;  %v5246_v21 = vadd.f32 1.0, %v6846_v63  ;;  %v6848_v10 = vpop.eup %6847  ;;  %v9663_v55 = vld [vmem:[#allocation11 + $0x1a8] sm:$0xff]  ;;  %v9666_v63 = vld [vmem:[#allocation11 + $0x1b8] sm:$0xff] }
0x12bd   :  { %v6850_v27 = vpop.eup %6849 }
0x12be   :  { %6853 = vrcp.f32 %v5246_v21  ;;  %v5253_v29 = vadd.f32 1.0, %v6850_v27  ;;  %v9669_v21 = vld [vmem:[#allocation11 + $0x1a0] sm:$0xff]  ;;  %v9675_v27 = vld [vmem:[#allocation11 + $0x188] sm:$0xff] }
0x12c0   :  { %6855 = vrcp.f32 %v5253_v29  ;;  %v9687_v29 = vld [vmem:[#allocation11 + $0x168] sm:$0xff] }
0x12c9   :  { %v6852_v50 = vpop.eup %6851 }
0x12ca   :  { %v5257_v28 = vmul.f32 %v6852_v50, %v6848_v10  ;;  %v9672_v10 = vld [vmem:[#allocation11 + $0x1b0] sm:$0xff]  ;;  %v9678_v50 = vld [vmem:[#allocation11 + $0x198] sm:$0xff] }
0x12cb   :  { %v6854_v34 = vpop.eup %6853 }
0x12cc   :  { %v5256_v12 = vmul.f32 %v6854_v34, %v9564_v3  ;;  %v9654_v3 = vld [vmem:[#allocation11 + $0x1d8] sm:$0xff]  ;;  %v9684_v34 = vld [vmem:[#allocation11 + $0x190] sm:$0xff] }
0x12cd   :  { %v6856_v14 = vpop.eup %6855 }
0x12ce   :  { %v9642_v22 = vadd.f32 %v5257_v28, %v5256_v12  ;;  %v9681_v28 = vld [vmem:[#allocation11 + $0x180] sm:$0xff] }
0x12d0   :  { %6857 = vtanh.f32 %v9642_v22 }
0x12dd   :  { %v6858_v16 = vpop.eup %6857 }
0x12de   :  { %v5260_v53 = vmul.f32 %v6858_v16, %v6856_v14 }
0x12e0   :  { %5330 = vmatmul.mubr.f32.vlgmr.msra.gmra.mxu0 %v5260_v53  ;;  %5401 = vmatmul.mubr.f32.vlgmr.msra.gmra.mxu1 %v5260_v53  ;;  %v9775_v53 = vld [vmem:[#allocation11 + $0x160] sm:$0xff] }
0x12e1   :  { %5440 = vmatpush1.msra.mxu0 %v9645_v41  ;;  %5511 = vmatpush1.msra.mxu1 %v9648_v32 }
0x12e2   :  { %5441 = vmatprep.subr.mxu0 %v9651_v33  ;;  %5512 = vmatprep.subr.mxu1 %v9654_v3 }
0x12e3   :  { %5442 = vmatpush1.msra.mxu0 %v9657_v35  ;;  %5513 = vmatpush1.msra.mxu1 %v9660_v30 }
0x12e4   :  { %5443 = vmatprep.subr.mxu0 %v9663_v55  ;;  %5514 = vmatprep.subr.mxu1 %v9666_v63 }
0x12e5   :  { %5444 = vmatpush1.msra.mxu0 %v9669_v21  ;;  %5515 = vmatpush1.msra.mxu1 %v9672_v10 }
0x12e6   :  { %5445 = vmatprep.subr.mxu0 %v9675_v27  ;;  %5516 = vmatprep.subr.mxu1 %v9678_v50 }
0x12e7   :  { %5446 = vmatpush1.msra.mxu0 %v9681_v28  ;;  %5517 = vmatpush1.msra.mxu1 %v9684_v34 }
0x12e8   :  { %5447 = vmatprep.subr.mxu0 %v9687_v29  ;;  %5518 = vmatprep.subr.mxu1 %v9184_v11  ;;  %v11000_v11 = vld [vmem:[#allocation35_spill] sm:$0xff] }
0x12e9   :  { %5448 = vmatpush1.msra.mxu0 %v9187_v48  ;;  %5519 = vmatpush1.msra.mxu1 %v9190_v61  ;;  %v11001_v48 = vld [vmem:[#allocation22_spill] sm:$0xff]  ;;  %v11002_v61 = vld [vmem:[#allocation23_spill] sm:$0xff] }
0x12ea   :  { %5449 = vmatprep.subr.mxu0 %v9193_v62  ;;  %5520 = vmatprep.subr.mxu1 %v9196_v52  ;;  %v11003_v62 = vld [vmem:[#allocation34_spill] sm:$0xff]  ;;  %v11004_v52 = vld [vmem:[#allocation21_spill] sm:$0xff] }
0x12eb   :  { %5450 = vmatpush1.msra.mxu0 %v9199_v23  ;;  %5521 = vmatpush1.msra.mxu1 %v9202_v39  ;;  %v11005_v23 = vmov 0.0   ;;  %v11006_v39 = vld [vmem:[#allocation61_spill] sm:$0xff] }
0x12ec   :  { %5451 = vmatprep.subr.mxu0 %v9205_v43  ;;  %5522 = vmatprep.subr.mxu1 %v9208_v45  ;;  %v9739_v43 = vld [vmem:[#allocation11 + $0x1e8] sm:$0xff]  ;;  %v9742_v45 = vld [vmem:[#allocation11 + $0x1f8] sm:$0xff] }
0x12ed   :  { %5452 = vmatpush1.msra.mxu0 %v9211_v47  ;;  %5523 = vmatpush1.msra.mxu1 %v9214_v51  ;;  %11007 = vst [vmem:[#allocation36_spill] sm:$0xff] %v9739_v43  ;;  %11008 = vst [vmem:[#allocation31_spill] sm:$0xff] %v9742_v45  ;;  %v11009_v47 = vld [vmem:[#allocation60_spill] sm:$0xff]  ;;  %v11010_v51 = vld [vmem:[#allocation41_spill] sm:$0xff] }
0x12ee   :  { %5453 = vmatprep.subr.mxu0 %v9217_v24  ;;  %5524 = vmatprep.subr.mxu1 %v9220_v60  ;;  %v4502_v24 = vadd.f32 %v11010_v51, %v11009_v47  ;;  %v9796_v51 = vld [vmem:[#allocation11 + $0x138] sm:$0xff] }
0x12ef   :  { %5454 = vmatpush1.msra.mxu0 %v9223_v19  ;;  %5525 = vmatpush1.msra.mxu1 %v9226_v6  ;;  %v11011_v19 = vld [vmem:[#allocation58_spill] sm:$0xff] }
0x12f0   :  { %5455 = vmatprep.subr.mxu0 %v9229_v57  ;;  %5526 = vmatprep.subr.mxu1 %v9232_v20  ;;  %v4504_v6 = vadd.f32 %v11011_v19, %v9466_v49  ;;  %v9805_v19 = vld [vmem:[#allocation11 + $0x108] sm:$0xff] }
0x12f1   :  { %5456 = vmatpush1.msra.mxu0 %v9235_v17  ;;  %5527 = vmatpush1.msra.mxu1 %v9238_v18 }
0x12f2   :  { %5457 = vmatprep.subr.mxu0 %v9241_v4  ;;  %5528 = vmatprep.subr.mxu1 %v9244_v59 }
0x12f3   :  { %5458 = vmatpush1.msra.mxu0 %v9247_v7  ;;  %5529 = vmatpush1.msra.mxu1 %v9250_v46  ;;  %v11012_v46 = vld [vmem:[#allocation50_spill] sm:$0xff] }
0x12f4   :  { %5459 = vmatprep.subr.mxu0 %v9253_v5  ;;  %5530 = vmatprep.subr.mxu1 %v9256_v15  ;;  %v4617_v5 = vadd.f32 %v11012_v46, %v10968_v44  ;;  %v9832_v46 = vld [vmem:[#allocation11 + $0xd8] sm:$0xff] }
0x12f5   :  { %5460 = vmatpush1.msra.mxu0 %v10884_v56  ;;  %5531 = vmatpush1.msra.mxu1 %v10971_v37  ;;  %v11013_v56 = vld [vmem:[#allocation32_spill] sm:$0xff] }
0x12f6   :  { %5461 = vmatprep.subr.mxu0 %v10972_v31  ;;  %5532 = vmatprep.subr.mxu1 %v10973_v40  ;;  %v4615_v37 = vadd.f32 %v11013_v56, %v9483_v26  ;;  %v9841_v56 = vld [vmem:[#allocation11 + $0xa8] sm:$0xff] }
0x12f7   :  { %5462 = vmatpush1.msra.mxu0 %v10974_v36  ;;  %5533 = vmatpush1.msra.mxu1 %v10975_v42 }
0x12f8   :  { %5463 = vmatprep.subr.mxu0 %v10976_v38  ;;  %5534 = vmatprep.subr.mxu1 %v10977_v54 }
0x12f9   :  { %5464 = vmatpush1.msra.mxu0 %v10978_v0  ;;  %5535 = vmatpush1.msra.mxu1 %v10979_v9 }
0x12fa   :  { %5465 = vmatprep.subr.mxu0 %v10980_v1  ;;  %5536 = vmatprep.subr.mxu1 %v10981_v25 }
0x12fb   :  { %5466 = vmatpush1.msra.mxu0 %v10982_v8  ;;  %5537 = vmatpush1.msra.mxu1 %v10983_v13 }
0x12fc   :  { %5467 = vmatprep.subr.mxu0 %v10984_v2  ;;  %5538 = vmatprep.subr.mxu1 %v10985_v58 }
0x12fd   :  { %5468 = vmatpush1.msra.mxu0 %v11000_v11  ;;  %5539 = vmatpush1.msra.mxu1 %v11001_v48  ;;  %v9778_v11 = vld [vmem:[#allocation11 + $0x170] sm:$0xff]  ;;  %v9781_v48 = vld [vmem:[#allocation11 + $0x148] sm:$0xff] }
0x12fe   :  { %5469 = vmatprep.subr.mxu0 %v11002_v61  ;;  %5540 = vmatprep.subr.mxu1 %v11003_v62  ;;  %v9784_v61 = vld [vmem:[#allocation11 + $0x158] sm:$0xff]  ;;  %v9787_v62 = vld [vmem:[#allocation11 + $0x140] sm:$0xff] }
0x12ff   :  { %5470 = vmatpush1.msra.mxu0 %v11004_v52  ;;  %5503 = vmatprep.mubr.f32.mxu0 %v11005_v23  ;;  %v9790_v52 = vld [vmem:[#allocation11 + $0x150] sm:$0xff] }
0x1300   :  { %5541 = vmatpush1.msra.mxu1 %v11006_v39  ;;  %5574 = vmatprep.mubr.f32.mxu1 %v11005_v23  ;;  %v9793_v39 = vld [vmem:[#allocation11 + $0x128] sm:$0xff] }
0x1301   :  { %5613 = vmatprep.subr.mxu0 %v9739_v43  ;;  %5684 = vmatprep.subr.mxu1 %v9742_v45 }
0x13a0   :  { %v5331_v60 = vpop.f32.mrf.mxu0  ;;  %v5402_v4 = vpop.f32.mrf.mxu1 }
0x13a1   :  { %v5407_v57 = vadd.f32 %v5331_v60, %v4502_v24  ;;  %v5409_v31 = vadd.f32 %v5402_v4, %v4615_v37  ;;  %v9799_v24 = vld [vmem:[#allocation11 + $0x120] sm:$0xff]  ;;  %v9802_v60 = vld [vmem:[#allocation11 + $0x130] sm:$0xff]  ;;  %v9844_v37 = vld [vmem:[#allocation11 + $0xb8] sm:$0xff] }
0x13a2   :  { %v5333_v20 = vpop.f32.mrf.mxu0  ;;  %v5404_v7 = vpop.f32.mrf.mxu1  ;;  %v9823_v4 = vld [vmem:[#allocation11 + $0xe0] sm:$0xff] }
0x13a3   :  { %v6424_v17 = vmul.f32 -1.442695, %v5407_v57  ;;  %v5408_v18 = vadd.f32 %v5333_v20, %v4504_v6  ;;  %v5410_v15 = vadd.f32 %v5404_v7, %v4617_v5  ;;  %v9808_v6 = vld [vmem:[#allocation11 + $0x118] sm:$0xff]  ;;  %v9811_v57 = vld [vmem:[#allocation11 + $0x100] sm:$0xff]  ;;  %v9814_v20 = vld [vmem:[#allocation11 + $0x110] sm:$0xff] }
0x13a4   :  { %v9829_v7 = vld [vmem:[#allocation11 + $0xc8] sm:$0xff]  ;;  %v9835_v5 = vld [vmem:[#allocation11 + $0xc0] sm:$0xff] }
0x13a5   :  { %6859 = vpow2.f32 %v6424_v17  ;;  %v6425_v59 = vmul.f32 -1.442695, %v5408_v18  ;;  %v6426_v40 = vmul.f32 -1.442695, %v5410_v15  ;;  %v9817_v17 = vld [vmem:[#allocation11 + $0xe8] sm:$0xff]  ;;  %v9820_v18 = vld [vmem:[#allocation11 + $0xf8] sm:$0xff] }
0x13a6   :  { %v9838_v15 = vld [vmem:[#allocation11 + $0xd0] sm:$0xff] }
0x13a7   :  { %6861 = vpow2.f32 %v6425_v59  ;;  %v9826_v59 = vld [vmem:[#allocation11 + $0xf0] sm:$0xff] }
0x13a8   :  { %6863 = vtanh.f32 %v5409_v31  ;;  %v9847_v31 = vld [vmem:[#allocation11 + $0xa0] sm:$0xff] }
0x13a9   :  { %6865 = vpow2.f32 %v6426_v40  ;;  %v9850_v40 = vld [vmem:[#allocation11 + $0xb0] sm:$0xff] }
0x13aa   :  { %11014 = vst [vmem:[#allocation67_spill] sm:$0xff] %v9850_v40 }
0x13b2   :  { %v6860_v36 = vpop.eup %6859 }
0x13b3   :  { %v5414_v42 = vadd.f32 1.0, %v6860_v36  ;;  %v9853_v36 = vld [vmem:[#allocation11 + $0x88] sm:$0xff] }
0x13b4   :  { %v6862_v38 = vpop.eup %6861  ;;  %11015 = vst [vmem:[#allocation17_spill] sm:$0xff] %v9853_v36 }
0x13b5   :  { %6867 = vrcp.f32 %v5414_v42  ;;  %v5420_v54 = vadd.f32 1.0, %v6862_v38  ;;  %v6864_v0 = vpop.eup %6863  ;;  %v9856_v42 = vld [vmem:[#allocation11 + $0x98] sm:$0xff]  ;;  %v9859_v38 = vld [vmem:[#allocation11 + $0x80] sm:$0xff] }
0x13b6   :  { %v6866_v9 = vpop.eup %6865  ;;  %11016 = vst [vmem:[#allocation65_spill] sm:$0xff] %v9856_v42  ;;  %11017 = vst [vmem:[#allocation42_spill] sm:$0xff] %v9859_v38 }
0x13b7   :  { %6869 = vrcp.f32 %v5420_v54  ;;  %v5427_v13 = vadd.f32 1.0, %v6866_v9  ;;  %v9862_v54 = vld [vmem:[#allocation11 + $0x90] sm:$0xff]  ;;  %v9868_v9 = vld [vmem:[#allocation11 + $0x78] sm:$0xff] }
0x13b8   :  { %11018 = vst [vmem:[#allocation44_spill] sm:$0xff] %v9862_v54  ;;  %11020 = vst [vmem:[#allocation43_spill] sm:$0xff] %v9868_v9 }
0x13b9   :  { %6871 = vrcp.f32 %v5427_v13  ;;  %v9880_v13 = vld [vmem:[#allocation11 + $0x58] sm:$0xff] }
0x13ba   :  { %11024 = vst [vmem:[#allocation48_spill] sm:$0xff] %v9880_v13 }
0x13c2   :  { %v6868_v1 = vpop.eup %6867 }
0x13c3   :  { %v5431_v25 = vmul.f32 %v6868_v1, %v6864_v0  ;;  %v9865_v0 = vld [vmem:[#allocation11 + $0x68] sm:$0xff]  ;;  %v9871_v1 = vld [vmem:[#allocation11 + $0x60] sm:$0xff] }
0x13c4   :  { %v6870_v8 = vpop.eup %6869  ;;  %11019 = vst [vmem:[#allocation45_spill] sm:$0xff] %v9865_v0  ;;  %11021 = vst [vmem:[#allocation25_spill] sm:$0xff] %v9871_v1 }
0x13c5   :  { %v5430_v2 = vmul.f32 %v6870_v8, %v9642_v22  ;;  %v9772_v22 = vld [vmem:[#allocation11 + $0x178] sm:$0xff]  ;;  %v9877_v8 = vld [vmem:[#allocation11 + $0x48] sm:$0xff] }
0x13c6   :  { %v6872_v12 = vpop.eup %6871  ;;  %11023 = vst [vmem:[#allocation46_spill] sm:$0xff] %v9877_v8 }
0x13c7   :  { %v9754_v58 = vadd.f32 %v5431_v25, %v5430_v2  ;;  %v9874_v25 = vld [vmem:[#allocation11 + $0x70] sm:$0xff]  ;;  %v9883_v2 = vld [vmem:[#allocation11 + $0x40] sm:$0xff] }
0x13c8   :  { %11022 = vst [vmem:[#allocation18_spill] sm:$0xff] %v9874_v25  ;;  %11025 = vst [vmem:[#allocation49_spill] sm:$0xff] %v9883_v2 }
0x13c9   :  { %6873 = vtanh.f32 %v9754_v58 }
0x13d6   :  { %v6874_v14 = vpop.eup %6873 }
0x13d7   :  { %v5434_v16 = vmul.f32 %v6874_v14, %v6872_v12  ;;  %v9886_v12 = vld [vmem:[#allocation11 + $0x50] sm:$0xff]  ;;  %v9889_v14 = vld [vmem:[#allocation11 + $0x28] sm:$0xff] }
0x13d8   :  { %11026 = vst [vmem:[#allocation47_spill] sm:$0xff] %v9886_v12  ;;  %11027 = vst [vmem:[#allocation15_spill] sm:$0xff] %v9889_v14 }
0x13d9   :  { %5504 = vmatmul.mubr.f32.vlgmr.msra.gmra.mxu0 %v5434_v16  ;;  %5575 = vmatmul.mubr.f32.vlgmr.msra.gmra.mxu1 %v5434_v16  ;;  %v9892_v16 = vld [vmem:[#allocation11 + $0x38] sm:$0xff] }
0x13da   :  { %5614 = vmatpush1.msra.mxu0 %v9645_v41  ;;  %5685 = vmatpush1.msra.mxu1 %v9648_v32  ;;  %11028 = vst [vmem:[#allocation20_spill] sm:$0xff] %v9892_v16 }
0x13db   :  { %5615 = vmatprep.subr.mxu0 %v9651_v33  ;;  %5686 = vmatprep.subr.mxu1 %v9654_v3 }
0x13dc   :  { %5616 = vmatpush1.msra.mxu0 %v9657_v35  ;;  %5687 = vmatpush1.msra.mxu1 %v9660_v30 }
0x13dd   :  { %5617 = vmatprep.subr.mxu0 %v9663_v55  ;;  %5688 = vmatprep.subr.mxu1 %v9666_v63 }
0x13de   :  { %5618 = vmatpush1.msra.mxu0 %v9669_v21  ;;  %5689 = vmatpush1.msra.mxu1 %v9672_v10 }
0x13df   :  { %5619 = vmatprep.subr.mxu0 %v9675_v27  ;;  %5690 = vmatprep.subr.mxu1 %v9678_v50 }
0x13e0   :  { %5620 = vmatpush1.msra.mxu0 %v9681_v28  ;;  %5691 = vmatpush1.msra.mxu1 %v9684_v34 }
0x13e1   :  { %5621 = vmatprep.subr.mxu0 %v9687_v29  ;;  %5692 = vmatprep.subr.mxu1 %v9772_v22 }
0x13e2   :  { %5622 = vmatpush1.msra.mxu0 %v9775_v53  ;;  %5693 = vmatpush1.msra.mxu1 %v9778_v11 }
0x13e3   :  { %5623 = vmatprep.subr.mxu0 %v9781_v48  ;;  %5694 = vmatprep.subr.mxu1 %v9784_v61 }
0x13e4   :  { %5624 = vmatpush1.msra.mxu0 %v9787_v62  ;;  %5695 = vmatpush1.msra.mxu1 %v9790_v52 }
0x13e5   :  { %5625 = vmatprep.subr.mxu0 %v9793_v39  ;;  %5696 = vmatprep.subr.mxu1 %v9796_v51 }
0x13e6   :  { %5626 = vmatpush1.msra.mxu0 %v9799_v24  ;;  %5697 = vmatpush1.msra.mxu1 %v9802_v60 }
0x13e7   :  { %5627 = vmatprep.subr.mxu0 %v9805_v19  ;;  %5698 = vmatprep.subr.mxu1 %v9808_v6 }
0x13e8   :  { %5628 = vmatpush1.msra.mxu0 %v9811_v57  ;;  %5699 = vmatpush1.msra.mxu1 %v9814_v20 }
0x13e9   :  { %5629 = vmatprep.subr.mxu0 %v9817_v17  ;;  %5700 = vmatprep.subr.mxu1 %v9820_v18 }
0x13ea   :  { %5630 = vmatpush1.msra.mxu0 %v9823_v4  ;;  %5701 = vmatpush1.msra.mxu1 %v9826_v59 }
0x13eb   :  { %5631 = vmatprep.subr.mxu0 %v9829_v7  ;;  %5702 = vmatprep.subr.mxu1 %v9832_v46 }
0x13ec   :  { %5632 = vmatpush1.msra.mxu0 %v9835_v5  ;;  %5703 = vmatpush1.msra.mxu1 %v9838_v15 }
0x13ed   :  { %5633 = vmatprep.subr.mxu0 %v9841_v56  ;;  %5704 = vmatprep.subr.mxu1 %v9844_v37 }
0x13ee   :  { %5634 = vmatpush1.msra.mxu0 %v9847_v31  ;;  %5705 = vmatpush1.msra.mxu1 %v9850_v40 }
0x13ef   :  { %5635 = vmatprep.subr.mxu0 %v9853_v36  ;;  %5706 = vmatprep.subr.mxu1 %v9856_v42  ;;  %v11038_v42 = vld [vmem:[#allocation54_spill] sm:$0xff] }
0x13f0   :  { %5636 = vmatpush1.msra.mxu0 %v9859_v38  ;;  %5707 = vmatpush1.msra.mxu1 %v9862_v54 }
0x13f1   :  { %5637 = vmatprep.subr.mxu0 %v9865_v0  ;;  %5708 = vmatprep.subr.mxu1 %v9868_v9 }
0x13f2   :  { %5638 = vmatpush1.msra.mxu0 %v9871_v1  ;;  %5709 = vmatpush1.msra.mxu1 %v9874_v25 }
0x13f3   :  { %5639 = vmatprep.subr.mxu0 %v9877_v8  ;;  %5710 = vmatprep.subr.mxu1 %v9880_v13  ;;  %v9895_v8 = vld [vmem:[#allocation11 + $0x20] sm:$0xff]  ;;  %v9898_v13 = vld [vmem:[#allocation11 + $0x30] sm:$0xff] }
0x13f4   :  { %5640 = vmatpush1.msra.mxu0 %v9883_v2  ;;  %5711 = vmatpush1.msra.mxu1 %v9886_v12  ;;  %11029 = vst [vmem:[#allocation29_spill] sm:$0xff] %v9895_v8  ;;  %11030 = vst [vmem:[#allocation16_spill] sm:$0xff] %v9898_v13  ;;  %v9901_v2 = vld [vmem:[#allocation11 + $0x8] sm:$0xff]  ;;  %v9904_v12 = vld [vmem:[#allocation11 + $0x18] sm:$0xff] }
0x13f5   :  { %5641 = vmatprep.subr.mxu0 %v9889_v14  ;;  %5712 = vmatprep.subr.mxu1 %v9892_v16  ;;  %11031 = vst [vmem:[#allocation30_spill] sm:$0xff] %v9901_v2  ;;  %11032 = vst [vmem:[#allocation27_spill] sm:$0xff] %v9904_v12  ;;  %v9907_v14 = vld [vmem:[#allocation11] sm:$0xff]  ;;  %v9911_v16 = vld [vmem:[#allocation11 + $0x10] sm:$0xff] }
0x13f6   :  { %5642 = vmatpush1.msra.mxu0 %v9895_v8  ;;  %5713 = vmatpush1.msra.mxu1 %v9898_v13  ;;  %11033 = vst [vmem:[#allocation19_spill] sm:$0xff] %v9907_v14  ;;  %11034 = vst [vmem:[#allocation37_spill] sm:$0xff] %v9911_v16  ;;  %v11036_v8 = vld [vmem:[#allocation51_spill] sm:$0xff] }
0x13f7   :  { %5643 = vmatprep.subr.mxu0 %v9901_v2  ;;  %5714 = vmatprep.subr.mxu1 %v9904_v12  ;;  %v11035_v2 = vld [vmem:[#allocation52_spill] sm:$0xff]  ;;  %v4510_v25 = vadd.f32 %v11036_v8, %v9466_v49 }
0x13f8   :  { %5644 = vmatpush1.msra.mxu0 %v9907_v14  ;;  %5677 = vmatprep.mubr.f32.mxu0 %v11005_v23  ;;  %v4508_v13 = vadd.f32 %v11035_v2, %v11009_v47  ;;  %v4621_v2 = vadd.f32 %v11038_v42, %v9483_v26  ;;  %v11041_v42 = vld [vmem:[#allocation65_spill] sm:$0xff] }
0x13f9   :  { %5715 = vmatpush1.msra.mxu1 %v9911_v16  ;;  %5748 = vmatprep.mubr.f32.mxu1 %v11005_v23 }
0x13fa   :  { %5787 = vmatprep.subr.mxu0 %v9739_v43  ;;  %5858 = vmatprep.subr.mxu1 %v9742_v45  ;;  %v11037_v43 = vld [vmem:[#allocation55_spill] sm:$0xff] }
0x13fb   :  { %v4623_v38 = vadd.f32 %v11037_v43, %v10968_v44 }
0x1499   :  { %v5505_v12 = vpop.f32.mrf.mxu0  ;;  %v5576_v54 = vpop.f32.mrf.mxu1 }
0x149a   :  { %v5581_v14 = vadd.f32 %v5505_v12, %v4508_v13  ;;  %v5583_v47 = vadd.f32 %v5576_v54, %v4621_v2  ;;  %v11042_v54 = vld [vmem:[#allocation42_spill] sm:$0xff]  ;;  %v11044_v2 = vld [vmem:[#allocation45_spill] sm:$0xff] }
0x149b   :  { %v5507_v1 = vpop.f32.mrf.mxu0  ;;  %v5578_v23 = vpop.f32.mrf.mxu1 }
0x149c   :  { %v6427_v9 = vmul.f32 -1.442695, %v5581_v14  ;;  %v5582_v0 = vadd.f32 %v5507_v1, %v4510_v25  ;;  %v5584_v45 = vadd.f32 %v5578_v23, %v4623_v38 }
0x149e   :  { %6875 = vpow2.f32 %v6427_v9  ;;  %v6428_v16 = vmul.f32 -1.442695, %v5582_v0  ;;  %v6429_v36 = vmul.f32 -1.442695, %v5584_v45 }
0x14a0   :  { %6877 = vpow2.f32 %v6428_v16  ;;  %v11043_v16 = vld [vmem:[#allocation44_spill] sm:$0xff] }
0x14a1   :  { %6879 = vtanh.f32 %v5583_v47 }
0x14a2   :  { %6881 = vpow2.f32 %v6429_v36  ;;  %v11040_v36 = vld [vmem:[#allocation17_spill] sm:$0xff] }
0x14ab   :  { %v6876_v40 = vpop.eup %6875 }
0x14ac   :  { %v5588_v8 = vadd.f32 1.0, %v6876_v40 }
0x14ad   :  { %v6878_v13 = vpop.eup %6877 }
0x14ae   :  { %6883 = vrcp.f32 %v5588_v8  ;;  %v5594_v9 = vadd.f32 1.0, %v6878_v13  ;;  %v6880_v0 = vpop.eup %6879  ;;  %v11045_v8 = vld [vmem:[#allocation43_spill] sm:$0xff]  ;;  %v11046_v13 = vld [vmem:[#allocation25_spill] sm:$0xff] }
0x14af   :  { %v6882_v1 = vpop.eup %6881 }
0x14b0   :  { %6885 = vrcp.f32 %v5594_v9  ;;  %v5601_v43 = vadd.f32 1.0, %v6882_v1  ;;  %v11047_v9 = vld [vmem:[#allocation18_spill] sm:$0xff]  ;;  %v11049_v1 = vld [vmem:[#allocation48_spill] sm:$0xff] }
0x14b2   :  { %6887 = vrcp.f32 %v5601_v43  ;;  %v11053_v43 = vld [vmem:[#allocation20_spill] sm:$0xff] }
0x14bb   :  { %v6884_v25 = vpop.eup %6883 }
0x14bc   :  { %v5605_v12 = vmul.f32 %v6884_v25, %v6880_v0  ;;  %v11048_v0 = vld [vmem:[#allocation46_spill] sm:$0xff]  ;;  %v11050_v25 = vld [vmem:[#allocation49_spill] sm:$0xff] }
0x14bd   :  { %v6886_v14 = vpop.eup %6885 }
0x14be   :  { %v5604_v23 = vmul.f32 %v6886_v14, %v9754_v58  ;;  %v11039_v58 = vld [vmem:[#allocation67_spill] sm:$0xff] }
0x14bf   :  { %v6888_v45 = vpop.eup %6887  ;;  %v11052_v14 = vld [vmem:[#allocation15_spill] sm:$0xff] }
0x14c0   :  { %v9926_v38 = vadd.f32 %v5605_v12, %v5604_v23  ;;  %v11051_v12 = vld [vmem:[#allocation47_spill] sm:$0xff]  ;;  %v11054_v23 = vld [vmem:[#allocation29_spill] sm:$0xff] }
0x14c2   :  { %6889 = vtanh.f32 %v9926_v38 }
0x14cf   :  { %v6890_v47 = vpop.eup %6889 }
0x14d0   :  { %v5608_v40 = vmul.f32 %v6890_v47, %v6888_v45  ;;  %v11055_v45 = vld [vmem:[#allocation16_spill] sm:$0xff]  ;;  %v11056_v47 = vld [vmem:[#allocation30_spill] sm:$0xff] }
0x14d2   :  { %5678 = vmatmul.mubr.f32.vlgmr.msra.gmra.mxu0 %v5608_v40  ;;  %5749 = vmatmul.mubr.f32.vlgmr.msra.gmra.mxu1 %v5608_v40  ;;  %v11057_v40 = vld [vmem:[#allocation27_spill] sm:$0xff] }
0x14d3   :  { %5788 = vmatpush1.msra.mxu0 %v9645_v41  ;;  %5859 = vmatpush1.msra.mxu1 %v9648_v32 }
0x14d4   :  { %5789 = vmatprep.subr.mxu0 %v9651_v33  ;;  %5860 = vmatprep.subr.mxu1 %v9654_v3 }
0x14d5   :  { %5790 = vmatpush1.msra.mxu0 %v9657_v35  ;;  %5861 = vmatpush1.msra.mxu1 %v9660_v30 }
0x14d6   :  { %5791 = vmatprep.subr.mxu0 %v9663_v55  ;;  %5862 = vmatprep.subr.mxu1 %v9666_v63 }
0x14d7   :  { %5792 = vmatpush1.msra.mxu0 %v9669_v21  ;;  %5863 = vmatpush1.msra.mxu1 %v9672_v10 }
0x14d8   :  { %5793 = vmatprep.subr.mxu0 %v9675_v27  ;;  %5864 = vmatprep.subr.mxu1 %v9678_v50 }
0x14d9   :  { %5794 = vmatpush1.msra.mxu0 %v9681_v28  ;;  %5865 = vmatpush1.msra.mxu1 %v9684_v34 }
0x14da   :  { %5795 = vmatprep.subr.mxu0 %v9687_v29  ;;  %5866 = vmatprep.subr.mxu1 %v9772_v22 }
0x14db   :  { %5796 = vmatpush1.msra.mxu0 %v9775_v53  ;;  %5867 = vmatpush1.msra.mxu1 %v9778_v11 }
0x14dc   :  { %5797 = vmatprep.subr.mxu0 %v9781_v48  ;;  %5868 = vmatprep.subr.mxu1 %v9784_v61 }
0x14dd   :  { %5798 = vmatpush1.msra.mxu0 %v9787_v62  ;;  %5869 = vmatpush1.msra.mxu1 %v9790_v52 }
0x14de   :  { %5799 = vmatprep.subr.mxu0 %v9793_v39  ;;  %5870 = vmatprep.subr.mxu1 %v9796_v51 }
0x14df   :  { %5800 = vmatpush1.msra.mxu0 %v9799_v24  ;;  %5871 = vmatpush1.msra.mxu1 %v9802_v60 }
0x14e0   :  { %5801 = vmatprep.subr.mxu0 %v9805_v19  ;;  %5872 = vmatprep.subr.mxu1 %v9808_v6 }
0x14e1   :  { %5802 = vmatpush1.msra.mxu0 %v9811_v57  ;;  %5873 = vmatpush1.msra.mxu1 %v9814_v20 }
0x14e2   :  { %5803 = vmatprep.subr.mxu0 %v9817_v17  ;;  %5874 = vmatprep.subr.mxu1 %v9820_v18 }
0x14e3   :  { %5804 = vmatpush1.msra.mxu0 %v9823_v4  ;;  %5875 = vmatpush1.msra.mxu1 %v9826_v59 }
0x14e4   :  { %5805 = vmatprep.subr.mxu0 %v9829_v7  ;;  %5876 = vmatprep.subr.mxu1 %v9832_v46 }
0x14e5   :  { %5806 = vmatpush1.msra.mxu0 %v9835_v5  ;;  %5877 = vmatpush1.msra.mxu1 %v9838_v15 }
0x14e6   :  { %5807 = vmatprep.subr.mxu0 %v9841_v56  ;;  %5878 = vmatprep.subr.mxu1 %v9844_v37 }
0x14e7   :  { %5808 = vmatpush1.msra.mxu0 %v9847_v31  ;;  %5879 = vmatpush1.msra.mxu1 %v11039_v58 }
0x14e8   :  { %5809 = vmatprep.subr.mxu0 %v11040_v36  ;;  %5880 = vmatprep.subr.mxu1 %v11041_v42  ;;  %v11067_v42 = vld [vmem:[#allocation59_spill] sm:$0xff] }
0x14e9   :  { %5810 = vmatpush1.msra.mxu0 %v11042_v54  ;;  %5881 = vmatpush1.msra.mxu1 %v11043_v16 }
0x14ea   :  { %5811 = vmatprep.subr.mxu0 %v11044_v2  ;;  %5882 = vmatprep.subr.mxu1 %v11045_v8 }
0x14eb   :  { %5812 = vmatpush1.msra.mxu0 %v11046_v13  ;;  %5883 = vmatpush1.msra.mxu1 %v11047_v9  ;;  %v11058_v9 = vld [vmem:[#allocation19_spill] sm:$0xff] }
0x14ec   :  { %5813 = vmatprep.subr.mxu0 %v11048_v0  ;;  %5884 = vmatprep.subr.mxu1 %v11049_v1  ;;  %v11059_v0 = vmov 0.0   ;;  %v11060_v1 = vld [vmem:[#allocation37_spill] sm:$0xff] }
0x14ed   :  { %5814 = vmatpush1.msra.mxu0 %v11050_v25  ;;  %5885 = vmatpush1.msra.mxu1 %v11051_v12  ;;  %v11061_v12 = vld [vmem:[#allocation36_spill] sm:$0xff] }
0x14ee   :  { %5815 = vmatprep.subr.mxu0 %v11052_v14  ;;  %5886 = vmatprep.subr.mxu1 %v11053_v43  ;;  %v11062_v14 = vld [vmem:[#allocation31_spill] sm:$0xff]  ;;  %v11063_v43 = vld [vmem:[#allocation60_spill] sm:$0xff] }
0x14ef   :  { %5816 = vmatpush1.msra.mxu0 %v11054_v23  ;;  %5887 = vmatpush1.msra.mxu1 %v11055_v45  ;;  %v11064_v23 = vld [vmem:[#allocation57_spill] sm:$0xff] }
0x14f0   :  { %5817 = vmatprep.subr.mxu0 %v11056_v47  ;;  %5888 = vmatprep.subr.mxu1 %v11057_v40  ;;  %v4514_v25 = vadd.f32 %v11064_v23, %v11063_v43  ;;  %v11065_v47 = vld [vmem:[#allocation56_spill] sm:$0xff]  ;;  %v4627_v23 = vadd.f32 %v11067_v42, %v9483_v26 }
0x14f1   :  { %5818 = vmatpush1.msra.mxu0 %v11058_v9  ;;  %5851 = vmatprep.mubr.f32.mxu0 %v11059_v0  ;;  %v4516_v13 = vadd.f32 %v11065_v47, %v9466_v49 }
0x14f2   :  { %5889 = vmatpush1.msra.mxu1 %v11060_v1  ;;  %5922 = vmatprep.mubr.f32.mxu1 %v11059_v0 }
0x14f3   :  { %5961 = vmatprep.subr.mxu0 %v11061_v12  ;;  %6032 = vmatprep.subr.mxu1 %v11062_v14  ;;  %v11066_v12 = vld [vmem:[#allocation66_spill] sm:$0xff] }
0x14f4   :  { %v4629_v54 = vadd.f32 %v11066_v12, %v10968_v44 }
0x1592   :  { %v5679_v45 = vpop.f32.mrf.mxu0  ;;  %v5750_v16 = vpop.f32.mrf.mxu1 }
0x1593   :  { %v5755_v40 = vadd.f32 %v5679_v45, %v4514_v25  ;;  %v5757_v43 = vadd.f32 %v5750_v16, %v4627_v23 }
0x1594   :  { %v5681_v8 = vpop.f32.mrf.mxu0  ;;  %v5752_v0 = vpop.f32.mrf.mxu1 }
0x1595   :  { %v6430_v9 = vmul.f32 -1.442695, %v5755_v40  ;;  %v5756_v2 = vadd.f32 %v5681_v8, %v4516_v13  ;;  %v5758_v14 = vadd.f32 %v5752_v0, %v4629_v54 }
0x1597   :  { %6891 = vpow2.f32 %v6430_v9  ;;  %v6431_v1 = vmul.f32 -1.442695, %v5756_v2  ;;  %v6432_v36 = vmul.f32 -1.442695, %v5758_v14 }
0x1599   :  { %6893 = vpow2.f32 %v6431_v1 }
0x159a   :  { %6895 = vtanh.f32 %v5757_v43 }
0x159b   :  { %6897 = vpow2.f32 %v6432_v36 }
0x15a4   :  { %v6892_v58 = vpop.eup %6891 }
0x15a5   :  { %v5762_v47 = vadd.f32 1.0, %v6892_v58 }
0x15a6   :  { %v6894_v25 = vpop.eup %6893 }
0x15a7   :  { %6899 = vrcp.f32 %v5762_v47  ;;  %v5768_v8 = vadd.f32 1.0, %v6894_v25  ;;  %v6896_v2 = vpop.eup %6895 }
0x15a8   :  { %v6898_v13 = vpop.eup %6897 }
0x15a9   :  { %6901 = vrcp.f32 %v5768_v8  ;;  %v5775_v40 = vadd.f32 1.0, %v6898_v13 }
0x15ab   :  { %6903 = vrcp.f32 %v5775_v40 }
0x15b4   :  { %v6900_v9 = vpop.eup %6899 }
0x15b5   :  { %v5779_v1 = vmul.f32 %v6900_v9, %v6896_v2 }
0x15b6   :  { %v6902_v45 = vpop.eup %6901 }
0x15b7   :  { %v5778_v54 = vmul.f32 %v6902_v45, %v9926_v38 }
0x15b8   :  { %v6904_v58 = vpop.eup %6903 }
0x15b9   :  { %v10004_v0 = vadd.f32 %v5779_v1, %v5778_v54 }
0x15bb   :  { %6905 = vtanh.f32 %v10004_v0 }
0x15c8   :  { %v6906_v42 = vpop.eup %6905 }
0x15c9   :  { %v5782_v16 = vmul.f32 %v6906_v42, %v6904_v58  ;;  %v6146_v58 = vld [vmem:[%s10239_s8 + $0x78] sm:$0xff]  ;;  %v6144_v42 = vld [vmem:[%s10239_s8 + $0x68] sm:$0xff] }
0x15cb   :  { %5852 = vmatmul.mubr.f32.vlgmr.msra.gmra.mxu0 %v5782_v16  ;;  %5923 = vmatmul.mubr.f32.vlgmr.msra.gmra.mxu1 %v5782_v16  ;;  %v6143_v16 = vld [vmem:[%s10239_s8 + $0x60] sm:$0xff] }
0x15cc   :  { %5962 = vmatpush1.msra.mxu0 %v9645_v41  ;;  %6033 = vmatpush1.msra.mxu1 %v9648_v32  ;;  %v11068_v41 = vld [vmem:[#allocation67_spill] sm:$0xff]  ;;  %v11069_v32 = vld [vmem:[#allocation17_spill] sm:$0xff] }
0x15cd   :  { %5963 = vmatprep.subr.mxu0 %v9651_v33  ;;  %6034 = vmatprep.subr.mxu1 %v9654_v3  ;;  %v11070_v33 = vld [vmem:[#allocation65_spill] sm:$0xff]  ;;  %v11071_v3 = vld [vmem:[#allocation42_spill] sm:$0xff] }
0x15ce   :  { %5964 = vmatpush1.msra.mxu0 %v9657_v35  ;;  %6035 = vmatpush1.msra.mxu1 %v9660_v30  ;;  %v11072_v35 = vld [vmem:[#allocation44_spill] sm:$0xff]  ;;  %v11073_v30 = vld [vmem:[#allocation45_spill] sm:$0xff] }
0x15cf   :  { %5965 = vmatprep.subr.mxu0 %v9663_v55  ;;  %6036 = vmatprep.subr.mxu1 %v9666_v63  ;;  %v11074_v55 = vld [vmem:[#allocation43_spill] sm:$0xff]  ;;  %v11075_v63 = vld [vmem:[#allocation25_spill] sm:$0xff] }
0x15d0   :  { %5966 = vmatpush1.msra.mxu0 %v9669_v21  ;;  %6037 = vmatpush1.msra.mxu1 %v9672_v10  ;;  %v11076_v21 = vld [vmem:[#allocation18_spill] sm:$0xff] }
0x15d1   :  { %5967 = vmatprep.subr.mxu0 %v9675_v27  ;;  %6038 = vmatprep.subr.mxu1 %v9678_v50  ;;  %v11077_v10 = vld [vmem:[#allocation46_spill] sm:$0xff]  ;;  %v11078_v27 = vld [vmem:[#allocation48_spill] sm:$0xff]  ;;  %v11079_v50 = vld [vmem:[#allocation49_spill] sm:$0xff] }
0x15d2   :  { %5968 = vmatpush1.msra.mxu0 %v9681_v28  ;;  %6039 = vmatpush1.msra.mxu1 %v9684_v34  ;;  %v11080_v28 = vld [vmem:[#allocation47_spill] sm:$0xff] }
0x15d3   :  { %5969 = vmatprep.subr.mxu0 %v9687_v29  ;;  %6040 = vmatprep.subr.mxu1 %v9772_v22  ;;  %v11081_v34 = vld [vmem:[#allocation15_spill] sm:$0xff]  ;;  %v11082_v29 = vld [vmem:[#allocation20_spill] sm:$0xff]  ;;  %v11083_v22 = vld [vmem:[#allocation29_spill] sm:$0xff] }
0x15d4   :  { %5970 = vmatpush1.msra.mxu0 %v9775_v53  ;;  %6041 = vmatpush1.msra.mxu1 %v9778_v11  ;;  %v11084_v53 = vld [vmem:[#allocation16_spill] sm:$0xff]  ;;  %v11085_v11 = vld [vmem:[#allocation30_spill] sm:$0xff] }
0x15d5   :  { %5971 = vmatprep.subr.mxu0 %v9781_v48  ;;  %6042 = vmatprep.subr.mxu1 %v9784_v61  ;;  %v11086_v48 = vld [vmem:[#allocation27_spill] sm:$0xff] }
0x15d6   :  { %5972 = vmatpush1.msra.mxu0 %v9787_v62  ;;  %6043 = vmatpush1.msra.mxu1 %v9790_v52  ;;  %v11087_v61 = vld [vmem:[#allocation19_spill] sm:$0xff]  ;;  %v11088_v62 = vmov 0.0   ;;  %v11089_v52 = vld [vmem:[#allocation37_spill] sm:$0xff] }
0x15d7   :  { %5973 = vmatprep.subr.mxu0 %v9793_v39  ;;  %6044 = vmatprep.subr.mxu1 %v9796_v51  ;;  %v11090_v39 = vld [vmem:[#allocation60_spill] sm:$0xff] }
0x15d8   :  { %5974 = vmatpush1.msra.mxu0 %v9799_v24  ;;  %6045 = vmatpush1.msra.mxu1 %v9802_v60  ;;  %v11091_v51 = vld [vmem:[#allocation24_spill] sm:$0xff] }
0x15d9   :  { %5975 = vmatprep.subr.mxu0 %v9805_v19  ;;  %6046 = vmatprep.subr.mxu1 %v9808_v6  ;;  %v4520_v24 = vadd.f32 %v11091_v51, %v11090_v39  ;;  %v11092_v19 = vld [vmem:[#allocation26_spill] sm:$0xff] }
0x15da   :  { %5976 = vmatpush1.msra.mxu0 %v9811_v57  ;;  %6047 = vmatpush1.msra.mxu1 %v9814_v20  ;;  %v4522_v6 = vadd.f32 %v11092_v19, %v9466_v49 }
0x15db   :  { %5977 = vmatprep.subr.mxu0 %v9817_v17  ;;  %6048 = vmatprep.subr.mxu1 %v9820_v18 }
0x15dc   :  { %5978 = vmatpush1.msra.mxu0 %v9823_v4  ;;  %6049 = vmatpush1.msra.mxu1 %v9826_v59 }
0x15dd   :  { %5979 = vmatprep.subr.mxu0 %v9829_v7  ;;  %6050 = vmatprep.subr.mxu1 %v9832_v46  ;;  %v11093_v46 = vld [vmem:[#allocation63_spill] sm:$0xff] }
0x15de   :  { %5980 = vmatpush1.msra.mxu0 %v9835_v5  ;;  %6051 = vmatpush1.msra.mxu1 %v9838_v15  ;;  %v4635_v5 = vadd.f32 %v11093_v46, %v10968_v44 }
0x15df   :  { %5981 = vmatprep.subr.mxu0 %v9841_v56  ;;  %6052 = vmatprep.subr.mxu1 %v9844_v37  ;;  %v11094_v56 = vld [vmem:[#allocation28_spill] sm:$0xff] }
0x15e0   :  { %5982 = vmatpush1.msra.mxu0 %v9847_v31  ;;  %6053 = vmatpush1.msra.mxu1 %v11068_v41  ;;  %v4633_v37 = vadd.f32 %v11094_v56, %v9483_v26  ;;  %v6142_v41 = vld [vmem:[%s10239_s8 + $0x58] sm:$0xff] }
0x15e1   :  { %5983 = vmatprep.subr.mxu0 %v11069_v32  ;;  %6054 = vmatprep.subr.mxu1 %v11070_v33  ;;  %v6141_v32 = vld [vmem:[%s10239_s8 + $0x50] sm:$0xff]  ;;  %v6140_v33 = vld [vmem:[%s10239_s8 + $0x48] sm:$0xff] }
0x15e2   :  { %5984 = vmatpush1.msra.mxu0 %v11071_v3  ;;  %6055 = vmatpush1.msra.mxu1 %v11072_v35  ;;  %v6139_v3 = vld [vmem:[%s10239_s8 + $0x40] sm:$0xff]  ;;  %v6138_v35 = vld [vmem:[%s10239_s8 + $0x38] sm:$0xff] }
0x15e3   :  { %5985 = vmatprep.subr.mxu0 %v11073_v30  ;;  %6056 = vmatprep.subr.mxu1 %v11074_v55  ;;  %v6137_v30 = vld [vmem:[%s10239_s8 + $0x30] sm:$0xff]  ;;  %v6136_v55 = vld [vmem:[%s10239_s8 + $0x28] sm:$0xff] }
0x15e4   :  { %5986 = vmatpush1.msra.mxu0 %v11075_v63  ;;  %6057 = vmatpush1.msra.mxu1 %v11076_v21  ;;  %v6135_v63 = vld [vmem:[%s10239_s8 + $0x20] sm:$0xff]  ;;  %v6134_v21 = vld [vmem:[%s10239_s8 + $0x18] sm:$0xff] }
0x15e5   :  { %5987 = vmatprep.subr.mxu0 %v11077_v10  ;;  %6058 = vmatprep.subr.mxu1 %v11078_v27  ;;  %v6133_v10 = vld [vmem:[%s10239_s8 + $0x10] sm:$0xff]  ;;  %v6132_v27 = vld [vmem:[%s10239_s8 + $0x8] sm:$0xff] }
0x15e6   :  { %5988 = vmatpush1.msra.mxu0 %v11079_v50  ;;  %6059 = vmatpush1.msra.mxu1 %v11080_v28  ;;  %v6131_v50 = vld [vmem:[%s10239_s8] sm:$0xff]  ;;  %v6246_v28 = vld [vmem:[%s10241_s10 + $0x78] sm:$0xff] }
0x15e7   :  { %5989 = vmatprep.subr.mxu0 %v11081_v34  ;;  %6060 = vmatprep.subr.mxu1 %v11082_v29  ;;  %v6245_v34 = vld [vmem:[%s10241_s10 + $0x70] sm:$0xff]  ;;  %v6244_v29 = vld [vmem:[%s10241_s10 + $0x68] sm:$0xff] }
0x15e8   :  { %5990 = vmatpush1.msra.mxu0 %v11083_v22  ;;  %6061 = vmatpush1.msra.mxu1 %v11084_v53  ;;  %v11095_v22 = vld [vmem:[#allocation64_spill] sm:$0xff] }
0x15e9   :  { %5991 = vmatprep.subr.mxu0 %v11085_v11  ;;  %6062 = vmatprep.subr.mxu1 %v11086_v48  ;;  %v4526_v53 = vadd.f32 %v11095_v22, %v11090_v39  ;;  %v11096_v48 = vld [vmem:[#allocation33_spill] sm:$0xff] }
0x15ea   :  { %5992 = vmatpush1.msra.mxu0 %v11087_v61  ;;  %6025 = vmatprep.mubr.f32.mxu0 %v11088_v62  ;;  %v4528_v61 = vadd.f32 %v11096_v48, %v9466_v49 }
0x15eb   :  { %6063 = vmatpush1.msra.mxu1 %v11089_v52  ;;  %6096 = vmatprep.mubr.f32.mxu1 %v11088_v62 }
0x15ec   :  { %6476 = vmatprep.subr.mxu0 %v11088_v62  ;;  %6511 = vmatprep.subr.mxu1 %v11088_v62 }
0x168b   :  { %v5853_v60 = vpop.f32.mrf.mxu0  ;;  %v5924_v4 = vpop.f32.mrf.mxu1 }
0x168c   :  { %v5929_v57 = vadd.f32 %v5853_v60, %v4520_v24  ;;  %v5931_v31 = vadd.f32 %v5924_v4, %v4633_v37  ;;  %v11098_v4 = vld [vmem:[#allocation62_spill] sm:$0xff] }
0x168d   :  { %v5855_v20 = vpop.f32.mrf.mxu0  ;;  %v5926_v7 = vpop.f32.mrf.mxu1  ;;  %v4639_v39 = vadd.f32 %v11098_v4, %v9483_v26 }
0x168e   :  { %v6433_v17 = vmul.f32 -1.442695, %v5929_v57  ;;  %v5930_v18 = vadd.f32 %v5855_v20, %v4522_v6  ;;  %v5932_v15 = vadd.f32 %v5926_v7, %v4635_v5  ;;  %v11097_v20 = vld [vmem:[#allocation53_spill] sm:$0xff] }
0x1690   :  { %6907 = vpow2.f32 %v6433_v17  ;;  %v6434_v59 = vmul.f32 -1.442695, %v5930_v18  ;;  %v6435_v38 = vmul.f32 -1.442695, %v5932_v15  ;;  %v4641_v17 = vadd.f32 %v11097_v20, %v10968_v44 }
0x1692   :  { %6909 = vpow2.f32 %v6434_v59 }
0x1693   :  { %6911 = vtanh.f32 %v5931_v31 }
0x1694   :  { %6913 = vpow2.f32 %v6435_v38 }
0x169d   :  { %v6908_v36 = vpop.eup %6907 }
0x169e   :  { %v5936_v43 = vadd.f32 1.0, %v6908_v36 }
0x169f   :  { %v6910_v12 = vpop.eup %6909 }
0x16a0   :  { %6915 = vrcp.f32 %v5936_v43  ;;  %v5942_v14 = vadd.f32 1.0, %v6910_v12  ;;  %v6912_v23 = vpop.eup %6911 }
0x16a1   :  { %v6914_v47 = vpop.eup %6913 }
0x16a2   :  { %6917 = vrcp.f32 %v5942_v14  ;;  %v5949_v13 = vadd.f32 1.0, %v6914_v47  ;;  %v6243_v47 = vld [vmem:[%s10241_s10 + $0x60] sm:$0xff] }
0x16a4   :  { %6919 = vrcp.f32 %v5949_v13  ;;  %v6239_v13 = vld [vmem:[%s10241_s10 + $0x40] sm:$0xff] }
0x16ad   :  { %v6916_v25 = vpop.eup %6915 }
0x16ae   :  { %v5953_v8 = vmul.f32 %v6916_v25, %v6912_v23  ;;  %v6242_v25 = vld [vmem:[%s10241_s10 + $0x58] sm:$0xff] }
0x16af   :  { %v6918_v2 = vpop.eup %6917 }
0x16b0   :  { %v5952_v9 = vmul.f32 %v6918_v2, %v10004_v0  ;;  %v6145_v0 = vld [vmem:[%s10239_s8 + $0x70] sm:$0xff]  ;;  %v6240_v2 = vld [vmem:[%s10241_s10 + $0x48] sm:$0xff] }
0x16b1   :  { %v6920_v45 = vpop.eup %6919 }
0x16b2   :  { %v10082_v1 = vadd.f32 %v5953_v8, %v5952_v9  ;;  %v6241_v8 = vld [vmem:[%s10241_s10 + $0x50] sm:$0xff]  ;;  %v6238_v9 = vld [vmem:[%s10241_s10 + $0x38] sm:$0xff] }
0x16b4   :  { %6921 = vtanh.f32 %v10082_v1 }
0x16c1   :  { %v6922_v40 = vpop.eup %6921 }
0x16c2   :  { %v5956_v54 = vmul.f32 %v6922_v40, %v6920_v45  ;;  %v6236_v45 = vld [vmem:[%s10241_s10 + $0x28] sm:$0xff]  ;;  %v6235_v40 = vld [vmem:[%s10241_s10 + $0x20] sm:$0xff] }
0x16c4   :  { %6026 = vmatmul.mubr.f32.vlgmr.msra.gmra.mxu0 %v5956_v54  ;;  %6097 = vmatmul.mubr.f32.vlgmr.msra.gmra.mxu1 %v5956_v54  ;;  %v6234_v54 = vld [vmem:[%s10241_s10 + $0x18] sm:$0xff] }
0x16c5   :  { %6477 = vmatpush3.msra.mxu0 %v6146_v58  ;;  %6508 = vmatprep.mubr.msk.f32.mxu0 %vm7119_vm0, %v11088_v62  ;;  %v6233_v58 = vld [vmem:[%s10241_s10 + $0x10] sm:$0xff] }
0x16c6   :  { %6478 = vmatprep.subr.mxu0 %v11088_v62  ;;  %6543 = vmatprep.mubr.msk.f32.mxu1 %vm7119_vm0, %v11088_v62 }
0x16c7   :  { %6479 = vmatpush3.msra.mxu0 %v6145_v0  ;;  %6512 = vmatpush3.msra.mxu1 %v6246_v28  ;;  %v6232_v0 = vld [vmem:[%s10241_s10 + $0x8] sm:$0xff] }
0x16c8   :  { %6480 = vmatprep.subr.mxu0 %v11088_v62  ;;  %6513 = vmatprep.subr.mxu1 %v11088_v62 }
0x16c9   :  { %6481 = vmatpush3.msra.mxu0 %v6144_v42  ;;  %6514 = vmatpush3.msra.mxu1 %v6245_v34  ;;  %v6231_v42 = vld [vmem:[%s10241_s10] sm:$0xff] }
0x16ca   :  { %6482 = vmatprep.subr.mxu0 %v11088_v62  ;;  %6515 = vmatprep.subr.mxu1 %v11088_v62 }
0x16cb   :  { %6483 = vmatpush3.msra.mxu0 %v6143_v16  ;;  %6516 = vmatpush3.msra.mxu1 %v6244_v29  ;;  %v6439_v16 = vld [vmem:[%s10240_s9] ss:$0 sm:$0xff] }
0x16cc   :  { %6484 = vmatprep.subr.mxu0 %v11088_v62  ;;  %6517 = vmatprep.subr.mxu1 %v11088_v62 }
0x16cd   :  { %6485 = vmatpush3.msra.mxu0 %v6142_v41  ;;  %6518 = vmatpush3.msra.mxu1 %v6243_v47 }
0x16ce   :  { %6486 = vmatprep.subr.mxu0 %v11088_v62  ;;  %6519 = vmatprep.subr.mxu1 %v11088_v62 }
0x16cf   :  { %6487 = vmatpush3.msra.mxu0 %v6141_v32  ;;  %6520 = vmatpush3.msra.mxu1 %v6242_v25 }
0x16d0   :  { %6488 = vmatprep.subr.mxu0 %v11088_v62  ;;  %6521 = vmatprep.subr.mxu1 %v11088_v62 }
0x16d1   :  { %6489 = vmatpush3.msra.mxu0 %v6140_v33  ;;  %6522 = vmatpush3.msra.mxu1 %v6241_v8 }
0x16d2   :  { %6490 = vmatprep.subr.mxu0 %v11088_v62  ;;  %6523 = vmatprep.subr.mxu1 %v11088_v62 }
0x16d3   :  { %6491 = vmatpush3.msra.mxu0 %v6139_v3  ;;  %6524 = vmatpush3.msra.mxu1 %v6240_v2 }
0x16d4   :  { %6492 = vmatprep.subr.mxu0 %v11088_v62  ;;  %6525 = vmatprep.subr.mxu1 %v11088_v62 }
0x16d5   :  { %6493 = vmatpush3.msra.mxu0 %v6138_v35  ;;  %6526 = vmatpush3.msra.mxu1 %v6239_v13 }
0x16d6   :  { %6494 = vmatprep.subr.mxu0 %v11088_v62  ;;  %6527 = vmatprep.subr.mxu1 %v11088_v62 }
0x16d7   :  { %6495 = vmatpush3.msra.mxu0 %v6137_v30  ;;  %6528 = vmatpush3.msra.mxu1 %v6238_v9 }
0x16d8   :  { %6496 = vmatprep.subr.mxu0 %v11088_v62  ;;  %6529 = vmatprep.subr.mxu1 %v11088_v62 }
0x16d9   :  { %6497 = vmatpush3.msra.mxu0 %v6136_v55 }
0x16da   :  { %6498 = vmatprep.subr.mxu0 %v11088_v62 }
0x16db   :  { %6499 = vmatpush3.msra.mxu0 %v6135_v63 }
0x16dc   :  { %6500 = vmatprep.subr.mxu0 %v11088_v62 }
0x16dd   :  { %6501 = vmatpush3.msra.mxu0 %v6134_v21 }
0x16de   :  { %6502 = vmatprep.subr.mxu0 %v11088_v62 }
0x16df   :  { %6503 = vmatpush3.msra.mxu0 %v6133_v10 }
0x16e0   :  { %6504 = vmatprep.subr.mxu0 %v11088_v62 }
0x16e1   :  { %6505 = vmatpush3.msra.mxu0 %v6132_v27 }
0x16e2   :  { %6506 = vmatprep.subr.mxu0 %v11088_v62 }
0x16e3   :  { %6507 = vmatpush3.msra.mxu0 %v6131_v50 }
0x1784   :  { %v6027_v11 = vpop.f32.mrf.mxu0  ;;  %v6098_v19 = vpop.f32.mrf.mxu1 }
0x1785   :  { %v6103_v52 = vadd.f32 %v6027_v11, %v4526_v53  ;;  %v6105_v59 = vadd.f32 %v6098_v19, %v4639_v39 }
0x1786   :  { %v6029_v51 = vpop.f32.mrf.mxu0  ;;  %v6100_v57 = vpop.f32.mrf.mxu1 }
0x1787   :  { %v6436_v24 = vmul.f32 -1.442695, %v6103_v52  ;;  %v6104_v60 = vadd.f32 %v6029_v51, %v4528_v61  ;;  %v6106_v18 = vadd.f32 %v6100_v57, %v4641_v17 }
0x1789   :  { %6923 = vpow2.f32 %v6436_v24  ;;  %v6437_v6 = vmul.f32 -1.442695, %v6104_v60  ;;  %v6438_v7 = vmul.f32 -1.442695, %v6106_v18 }
0x178b   :  { %6925 = vpow2.f32 %v6437_v6 }
0x178c   :  { %6927 = vtanh.f32 %v6105_v59 }
0x178d   :  { %6929 = vpow2.f32 %v6438_v7 }
0x1796   :  { %v6924_v46 = vpop.eup %6923 }
0x1797   :  { %v6110_v49 = vadd.f32 1.0, %v6924_v46 }
0x1798   :  { %v6926_v5 = vpop.eup %6925 }
0x1799   :  { %6931 = vrcp.f32 %v6110_v49  ;;  %v6116_v15 = vadd.f32 1.0, %v6926_v5  ;;  %v6928_v56 = vpop.eup %6927 }
0x179a   :  { %v6930_v37 = vpop.eup %6929 }
0x179b   :  { %6933 = vrcp.f32 %v6116_v15  ;;  %v6123_v44 = vadd.f32 1.0, %v6930_v37 }
0x179d   :  { %6935 = vrcp.f32 %v6123_v44 }
0x17a6   :  { %v6932_v31 = vpop.eup %6931 }
0x17a7   :  { %v6127_v38 = vmul.f32 %v6932_v31, %v6928_v56 }
0x17a8   :  { %v6934_v36 = vpop.eup %6933 }
0x17a9   :  { %v6126_v43 = vmul.f32 %v6934_v36, %v10082_v1  ;;  %v6237_v1 = vld [vmem:[%s10241_s10 + $0x30] sm:$0xff] }
0x17aa   :  { %v6936_v26 = vpop.eup %6935  ;;  %6530 = vmatpush3.msra.mxu1 %v6237_v1 }
0x17ab   :  { %v6128_v12 = vadd.f32 %v6127_v38, %v6126_v43  ;;  %6531 = vmatprep.subr.mxu1 %v11088_v62 }
0x17ac   :  { %6532 = vmatpush3.msra.mxu1 %v6236_v45 }
0x17ad   :  { %6937 = vtanh.f32 %v6128_v12  ;;  %6533 = vmatprep.subr.mxu1 %v11088_v62 }
0x17ae   :  { %6534 = vmatpush3.msra.mxu1 %v6235_v40 }
0x17af   :  { %6535 = vmatprep.subr.mxu1 %v11088_v62 }
0x17b0   :  { %6536 = vmatpush3.msra.mxu1 %v6234_v54 }
0x17b1   :  { %6537 = vmatprep.subr.mxu1 %v11088_v62 }
0x17b2   :  { %6538 = vmatpush3.msra.mxu1 %v6233_v58 }
0x17b3   :  { %6539 = vmatprep.subr.mxu1 %v11088_v62 }
0x17b4   :  { %6540 = vmatpush3.msra.mxu1 %v6232_v0 }
0x17b5   :  { %6541 = vmatprep.subr.mxu1 %v11088_v62  ;;  %v6441_v62 = vld [vmem:[%s10242_s11] ss:$0 sm:$0xff] }
0x17b6   :  { %6542 = vmatpush3.msra.mxu1 %v6231_v42 }
0x17ba   :  { %v6938_v14 = vpop.eup %6937 }
0x17bb   :  { %v6130_v23 = vmul.f32 %v6938_v14, %v6936_v26 }
0x17bd   :  { %6509 = vmatmul.mubr.f32.vlgmr.msra.gmra.mxu0 %v6130_v23 }
0x187d   :  { %v6220_v41 = vpop.f32.mrf.mxu0 }
0x187e   :  { %v6221_v32 = vadd.f32 %v6439_v16, %v6220_v41 }
0x187f   :  { %v6510_v33 = vpop.f32.mrf.mxu0 }
0x1880   :  { %v6225_v3 = vmul.f32 1.442695, %v6221_v32  ;;  %vm6224_vm1 = vcmp.gt.f32.partialorder %v6221_v32, 0.0 }
0x1882   :  { %6939 = vpow2.f32 %v6225_v3 }
0x188f   :  { %v6940_v35 = vpop.eup %6939 }
0x1890   :  { %v6440_v30 = vadd.f32 -1.0, %v6940_v35 }
0x1892   :  { %v6228_v55 = vmul.f32 1.6732632, %v6440_v30 }
0x1894   :  { %v6229_v63 = vsel %vm6224_vm1, %v6221_v32, %v6228_v55 }
0x1895   :  { %v6230_v21 = vmul.f32 1.050701, %v6229_v63 }
0x1897   :  { %6544 = vmatmul.mubr.f32.vlgmr.msra.gmra.mxu1 %v6230_v21 }
0x1957   :  { %v6320_v10 = vpop.f32.mrf.mxu1 }
0x1958   :  { %v6321_v27 = vadd.f32 %v6441_v62, %v6320_v10 }
0x1959   :  { %v6545_v50 = vpop.f32.mrf.mxu1 }
0x195a   :  { %6324 = vst [vmem:[%s10243_s12] sm:$0xff] %v6321_v27 }
0x195b   :  { %6329 = vsyncpa [#allocation5], 1 }
0x195c   :  { %6330 = vsyncpa [#allocation7], 1 }
0x195d   :  { %6331 = vsyncpa [#allocation10], 1 }

</bundles_post_ra>
